<compile_context>
chip_gen: v6e
topology: v6e:2x2x1
jax: 0.10.0
libtpu: 0.0.40
codegen_flags: <defaults>
</compile_context>

<pallas_src>
import functools

import jax
import jax.numpy as jnp
from jax.experimental import pallas as pl
from jax.experimental.pallas import tpu as pltpu


# ------------------------------ fused kernel --------------------------------

def _bottleneck_fused_kernel(x_ref, w1_ref, b1_ref, w2_ref, b2_ref, w3_ref,
                             b3_ref, mask_ref, o_ref, a1_ref, a2_ref,
                             *, wp, lead, relu12):
    """Fused (1x1 conv pad=1 [+ReLU], 3x3 conv pad=1 [+ReLU], 3x3 conv pad=1).

    x_ref   : (1, S, C0)  canvas-flat input (S = Hp*Wp), x at canvas (r+2, c+2)
    w1_ref  : (C0, C1)    1x1 conv weight as a matrix
    w2_ref  : (3, 3, C1, C2), w3_ref: (3, 3, C2, C3)   HWIO weights
    b*_ref  : (1, C*)
    mask_ref: (S, 1)      {0,1} mask of canvas rows that hold valid conv output
    o_ref   : (1, S, C3)  canvas-flat output (cropped by the wrapper)
    a1_ref  : (S_ext, C1) VMEM scratch: stage-1 canvas with leading/trailing zeros
    a2_ref  : (S_ext, C2) VMEM scratch: stage-2 canvas with leading/trailing zeros
    """
    s = o_ref.shape[1]             # Hp * Wp canvas rows
    shift = lead - (wp + 1)        # tap-read base adjustment for the aligned lead pad
    f32 = jnp.float32
    mask = mask_ref[...]           # (S, 1)

    def conv3x3(src_ref, w_ref, b_ref):
        cout = w_ref.shape[3]
        # Bias folded into the accumulator init (one less pass over the output).
        acc = jnp.broadcast_to(b_ref[...].astype(f32), (s, cout))
        for kh in range(3):        # unrolled at trace time: 9 2D MXU matmuls
            for kw in range(3):
                base = shift + kh * wp + kw
                acc = acc + jnp.dot(src_ref[base:base + s, :], w_ref[kh, kw],
                                    preferred_element_type=f32)
        return acc

    # ---- stage 1: 1x1 conv, padding=1 (+ ReLU) ----
    t1 = jnp.dot(x_ref[0], w1_ref[...], preferred_element_type=f32)
    t1 = t1 + b1_ref[...].astype(f32)
    if relu12:
        t1 = jnp.maximum(t1, 0.0)
    a1_ref[...] = jnp.zeros_like(a1_ref)                       # zero halo rows
    a1_ref[lead:lead + s, :] = (t1 * mask).astype(a1_ref.dtype)

    # ---- stage 2: 3x3 conv, padding=1 (+ ReLU) ----
    t2 = conv3x3(a1_ref, w2_ref, b2_ref)
    if relu12:
        t2 = jnp.maximum(t2, 0.0)
    a2_ref[...] = jnp.zeros_like(a2_ref)
    a2_ref[lead:lead + s, :] = (t2 * mask).astype(a2_ref.dtype)

    # ---- stage 3: 3x3 conv, padding=1 (no ReLU) ----
    t3 = conv3x3(a2_ref, w3_ref, b3_ref)
    o_ref[0] = t3.astype(o_ref.dtype)


def bottleneck_block_pallas(x_nhwc, w1, b1, w2, b2, w3, b3, *, relu12):
    """One fused bottleneck block.  x_nhwc: (N, H, W, C0) -> (N, H+2, W+2, C3)."""
    n, h, w_, c0 = x_nhwc.shape
    kh1, kw1, c0w, c1 = w1.shape
    assert (kh1, kw1) == (1, 1) and c0w == c0
    c2 = w2.shape[3]
    c3 = w3.shape[3]

    ho, wo = h + 2, w_ + 2              # spatial size after every conv in the block
    hp, wp = ho + 2, wo + 2             # canvas: output + 1-px halo for the 3x3 convs
    s = hp * wp
    lead = ((wp + 1 + 7) // 8) * 8      # 8-aligned leading zero rows in the scratch
    s_ext = lead + s + wp + 1           # + trailing rows covering the largest tap shift

    # Canvas-flat input: x placed at canvas (r+2, c+2); zeros elsewhere.
    xc = jnp.pad(x_nhwc, ((0, 0), (2, 2), (2, 2), (0, 0))).reshape(n, s, c0)
    # {0,1} mask of canvas rows holding valid conv outputs (keeps the halo zero).
    yy = jnp.arange(hp)[:, None]
    zz = jnp.arange(wp)[None, :]
    mask = ((yy >= 1) & (yy <= ho) & (zz >= 1) & (zz <= wo))
    mask = mask.astype(x_nhwc.dtype).reshape(s, 1)

    kern = functools.partial(_bottleneck_fused_kernel,
                             wp=wp, lead=lead, relu12=relu12)
    out_flat = pl.pallas_call(
        kern,
        out_shape=jax.ShapeDtypeStruct((n, s, c3), x_nhwc.dtype),
        grid=(n,),
        in_specs=[
            pl.BlockSpec((1, s, c0), lambda i: (i, 0, 0)),
            pl.BlockSpec((c0, c1), lambda i: (0, 0)),
            pl.BlockSpec((1, c1), lambda i: (0, 0)),
            pl.BlockSpec((3, 3, c1, c2), lambda i: (0, 0, 0, 0)),
            pl.BlockSpec((1, c2), lambda i: (0, 0)),
            pl.BlockSpec((3, 3, c2, c3), lambda i: (0, 0, 0, 0)),
            pl.BlockSpec((1, c3), lambda i: (0, 0)),
            pl.BlockSpec((s, 1), lambda i: (0, 0)),
        ],
        out_specs=pl.BlockSpec((1, s, c3), lambda i: (i, 0, 0)),
        scratch_shapes=[
            pltpu.VMEM((s_ext, c1), jnp.float32),
            pltpu.VMEM((s_ext, c2), jnp.float32),
        ],
        compiler_params=pltpu.CompilerParams(
            dimension_semantics=("parallel",)),
    )(xc, w1.reshape(c0, c1), b1.reshape(1, c1),
      w2, b2.reshape(1, c2), w3, b3.reshape(1, c3), mask)

    # Un-flatten the canvas and crop to the (ho, wo) valid region (free in XLA).
    return out_flat.reshape(n, hp, wp, c3)[:, 1:ho + 1, 1:wo + 1, :]


# ----------------------------- parameters ----------------------------------

def _init_conv(key, kh, kw, cin, cout):
    # Deterministic init mimicking torch Conv2d default (uniform +/- 1/sqrt(fan_in)).
    wk, bk = jax.random.split(key)
    bound = 1.0 / float(cin * kh * kw) ** 0.5
    w = jax.random.uniform(wk, (kh, kw, cin, cout), jnp.float32, -bound, bound)
    b = jax.random.uniform(bk, (cout,), jnp.float32, -bound, bound)
    return w, b


def init_bottleneck_params(key, in_ch, out_ch, times):
    mid = in_ch // 2
    n_remaining = max(times - 1, 0)
    keys = jax.random.split(key, 3 + 3 * n_remaining)
    params = {
        "layers": [
            _init_conv(keys[0], 1, 1, in_ch, mid),     # Conv2d(in, in//2, k=1, pad=1)
            _init_conv(keys[1], 3, 3, mid, mid),       # Conv2d(in//2, in//2, k=3, pad=1)
            _init_conv(keys[2], 3, 3, mid, out_ch),    # Conv2d(in//2, out, k=3, pad=1)
        ],
        "remaining": [],
    }
    for t in range(n_remaining):
        k0, k1, k2 = keys[3 + 3 * t:6 + 3 * t]
        params["remaining"].append([
            _init_conv(k0, 1, 1, out_ch, out_ch // 2),
            _init_conv(k1, 3, 3, out_ch // 2, in_ch // 2),
            _init_conv(k2, 3, 3, out_ch // 2, out_ch),
        ])
    return params


# ------------------------------ forward -------------------------------------

def bottleneck_forward(x_nchw, params):
    # NCHW (PyTorch) -> NHWC for the TPU kernel -> back to NCHW.
    x = jnp.transpose(x_nchw, (0, 2, 3, 1))
    (w1, b1), (w2, b2), (w3, b3) = params["layers"]
    x = bottleneck_block_pallas(x, w1, b1, w2, b2, w3, b3, relu12=True)

    # TODO(synk): the PyTorch `remaining_layers` path cannot actually run for
    # times > 1 (the 1x1/pad=1 conv grows H,W by 2 so `block(x) + x_clone`
    # shape-mismatches, and channels only line up when in_ch == out_ch); it is
    # translated faithfully below but only exercised when times == 1 (empty loop).
    for (wa, ba), (wb, bb), (wc, bc) in params["remaining"]:
        x_clone = x
        y = bottleneck_block_pallas(x, wa, ba, wb, bb, wc, bc, relu12=False)
        x = jnp.maximum(y + x_clone, 0.0)   # block(x) + x.clone(); ReLU(inplace)

    return jnp.transpose(x, (0, 3, 1, 2))


# ------------------------- pure-JAX reference -------------------------------

def _conv_ref(x, w, b, padding):
    y = jax.lax.conv_general_dilated(
        x, w, window_strides=(1, 1),
        padding=((padding, padding), (padding, padding)),
        dimension_numbers=("NHWC", "HWIO", "NHWC"))
    return y + b[None, None, None, :]


def bottleneck_reference(x_nchw, params):
    x = jnp.transpose(x_nchw, (0, 2, 3, 1))
    (w1, b1), (w2, b2), (w3, b3) = params["layers"]
    x = jax.nn.relu(_conv_ref(x, w1, b1, 1))
    x = jax.nn.relu(_conv_ref(x, w2, b2, 1))
    x = _conv_ref(x, w3, b3, 1)
    for (wa, ba), (wb, bb), (wc, bc) in params["remaining"]:
        y = _conv_ref(_conv_ref(_conv_ref(x, wa, ba, 1), wb, bb, 1), wc, bc, 1)
        x = jax.nn.relu(y + x)
    return jnp.transpose(x, (0, 3, 1, 2))


if __name__ == "__main__":
    key = jax.random.PRNGKey(0)
    kx, kp = jax.random.split(key)

    N, IN_CH, H, W = 2, 4, 16, 16
    OUT_CH = 8
    TIMES = 1   # PyTorch forward is only runnable for times == 1 (see TODO above)

    x_nchw = jax.random.normal(kx, (N, IN_CH, H, W), dtype=jnp.float32)
    params = init_bottleneck_params(kp, IN_CH, OUT_CH, TIMES)

    fwd = jax.jit(bottleneck_forward)
    y = jax.block_until_ready(fwd(x_nchw, params))

    # Each 1x1/pad=1 conv grows spatial dims by 2 -> output is (N, OUT_CH, H+2, W+2).
    assert y.shape == (N, OUT_CH, H + 2, W + 2), y.shape

    y_ref = bottleneck_reference(x_nchw, params)
    assert jnp.allclose(y, y_ref, atol=1e-4, rtol=1e-4), "mismatch vs XLA conv reference"

    print("KERNEL_OK")
</pallas_src>

<mosaic_0001>
module attributes {stable_mosaic.version = 11 : i64} {
  func.func @_bottleneck_fused_kernel(%arg0: i32, %arg1: memref<1x400x4xf32, #tpu.memory_space<vmem>>, %arg2: memref<4x2xf32, #tpu.memory_space<vmem>>, %arg3: memref<1x2xf32, #tpu.memory_space<vmem>>, %arg4: memref<3x3x2x2xf32, #tpu.memory_space<vmem>>, %arg5: memref<1x2xf32, #tpu.memory_space<vmem>>, %arg6: memref<3x3x2x8xf32, #tpu.memory_space<vmem>>, %arg7: memref<1x8xf32, #tpu.memory_space<vmem>>, %arg8: memref<400x1xf32, #tpu.memory_space<vmem>>, %arg9: memref<1x400x8xf32, #tpu.memory_space<vmem>>, %arg10: memref<445x2xf32, #tpu.memory_space<vmem>>, %arg11: memref<445x2xf32, #tpu.memory_space<vmem>>) attributes {dimension_semantics = [#tpu.dimension_semantics<parallel>], iteration_bounds = array<i64: 2>, scalar_prefetch = 0 : i64, scratch_operands = 2 : i64, tpu.core_type = #tpu.core_type<tc>, window_params = [{transform_indices = @transform_0, window_bounds = array<i64: 1, 400, 4>}, {pipeline_mode = #tpu.pipeline_mode<synchronous>, transform_indices = @transform_1, window_bounds = array<i64: 4, 2>}, {pipeline_mode = #tpu.pipeline_mode<synchronous>, transform_indices = @transform_2, window_bounds = array<i64: 1, 2>}, {pipeline_mode = #tpu.pipeline_mode<synchronous>, transform_indices = @transform_3, window_bounds = array<i64: 3, 3, 2, 2>}, {pipeline_mode = #tpu.pipeline_mode<synchronous>, transform_indices = @transform_4, window_bounds = array<i64: 1, 2>}, {pipeline_mode = #tpu.pipeline_mode<synchronous>, transform_indices = @transform_5, window_bounds = array<i64: 3, 3, 2, 8>}, {pipeline_mode = #tpu.pipeline_mode<synchronous>, transform_indices = @transform_6, window_bounds = array<i64: 1, 8>}, {pipeline_mode = #tpu.pipeline_mode<synchronous>, transform_indices = @transform_7, window_bounds = array<i64: 400, 1>}, {transform_indices = @transform_8, window_bounds = array<i64: 1, 400, 8>}]} {
    %c0 = arith.constant 0 : index
    %c0_0 = arith.constant 0 : index
    %0 = vector.load %arg8[%c0, %c0_0] : memref<400x1xf32, #tpu.memory_space<vmem>>, vector<400x1xf32>
    %c0_1 = arith.constant 0 : index
    %c0_2 = arith.constant 0 : index
    %c0_3 = arith.constant 0 : index
    %1 = vector.load %arg1[%c0_1, %c0_2, %c0_3] : memref<1x400x4xf32, #tpu.memory_space<vmem>>, vector<1x400x4xf32>
    %2 = vector.shape_cast %1 : vector<1x400x4xf32> to vector<400x4xf32>
    %c0_4 = arith.constant 0 : index
    %c0_5 = arith.constant 0 : index
    %3 = vector.load %arg2[%c0_4, %c0_5] : memref<4x2xf32, #tpu.memory_space<vmem>>, vector<4x2xf32>
    %cst = arith.constant dense<0.000000e+00> : vector<400x2xf32>
    %4 = tpu.matmul %2, %3, %cst {dimension_numbers = #tpu.dot_dimension_numbers<[1], [0], [0], [1], [0, 0, 1, 1], [], []>} : vector<400x4xf32>, vector<4x2xf32>, vector<400x2xf32> -> vector<400x2xf32>
    %c0_6 = arith.constant 0 : index
    %c0_7 = arith.constant 0 : index
    %5 = vector.load %arg3[%c0_6, %c0_7] : memref<1x2xf32, #tpu.memory_space<vmem>>, vector<1x2xf32>
    %6 = vector.broadcast %5 : vector<1x2xf32> to vector<400x2xf32>
    %7 = arith.addf %4, %6 : vector<400x2xf32>
    %cst_8 = arith.constant 0.000000e+00 : f32
    %8 = vector.broadcast %cst_8 : f32 to vector<400x2xf32>
    %9 = arith.maximumf %7, %8 : vector<400x2xf32>
    %cst_9 = arith.constant 0.000000e+00 : f32
    %10 = vector.broadcast %cst_9 : f32 to vector<445x2xf32>
    %c0_10 = arith.constant 0 : index
    %c0_11 = arith.constant 0 : index
    %11 = vector.load %arg10[%c0_10, %c0_11] : memref<445x2xf32, #tpu.memory_space<vmem>>, vector<445x2xf32>
    tpu.vector_store %arg10[%c0_10, %c0_11], %10 {strides = array<i32>} : memref<445x2xf32, #tpu.memory_space<vmem>>, vector<445x2xf32>,
    %12 = vector.broadcast %0 : vector<400x1xf32> to vector<400x2xf32>
    %13 = arith.mulf %9, %12 : vector<400x2xf32>
    %c24 = arith.constant 24 : index
    %c0_12 = arith.constant 0 : index
    %14 = vector.load %arg10[%c24, %c0_12] : memref<445x2xf32, #tpu.memory_space<vmem>>, vector<400x2xf32>
    tpu.vector_store %arg10[%c24, %c0_12], %13 {strides = array<i32>} : memref<445x2xf32, #tpu.memory_space<vmem>>, vector<400x2xf32>,
    %c0_13 = arith.constant 0 : index
    %c0_14 = arith.constant 0 : index
    %15 = vector.load %arg5[%c0_13, %c0_14] : memref<1x2xf32, #tpu.memory_space<vmem>>, vector<1x2xf32>
    %16 = vector.shape_cast %15 : vector<1x2xf32> to vector<1x2xf32>
    %17 = vector.broadcast %16 : vector<1x2xf32> to vector<400x2xf32>
    %c3 = arith.constant 3 : index
    %c0_15 = arith.constant 0 : index
    %18 = vector.load %arg10[%c3, %c0_15] : memref<445x2xf32, #tpu.memory_space<vmem>>, vector<400x2xf32>
    %c0_16 = arith.constant 0 : index
    %c0_17 = arith.constant 0 : index
    %c0_18 = arith.constant 0 : index
    %c0_19 = arith.constant 0 : index
    %19 = vector.load %arg4[%c0_16, %c0_17, %c0_18, %c0_19] : memref<3x3x2x2xf32, #tpu.memory_space<vmem>>, vector<1x1x2x2xf32>
    %20 = vector.shape_cast %19 : vector<1x1x2x2xf32> to vector<2x2xf32>
    %cst_20 = arith.constant dense<0.000000e+00> : vector<400x2xf32>
    %21 = tpu.matmul %18, %20, %cst_20 {dimension_numbers = #tpu.dot_dimension_numbers<[1], [0], [0], [1], [0, 0, 1, 1], [], []>} : vector<400x2xf32>, vector<2x2xf32>, vector<400x2xf32> -> vector<400x2xf32>
    %22 = arith.addf %17, %21 : vector<400x2xf32>
    %c4 = arith.constant 4 : index
    %c0_21 = arith.constant 0 : index
    %23 = vector.load %arg10[%c4, %c0_21] : memref<445x2xf32, #tpu.memory_space<vmem>>, vector<400x2xf32>
    %c0_22 = arith.constant 0 : index
    %c1 = arith.constant 1 : index
    %c0_23 = arith.constant 0 : index
    %c0_24 = arith.constant 0 : index
    %24 = vector.load %arg4[%c0_22, %c1, %c0_23, %c0_24] : memref<3x3x2x2xf32, #tpu.memory_space<vmem>>, vector<1x1x2x2xf32>
    %25 = vector.shape_cast %24 : vector<1x1x2x2xf32> to vector<2x2xf32>
    %cst_25 = arith.constant dense<0.000000e+00> : vector<400x2xf32>
    %26 = tpu.matmul %23, %25, %cst_25 {dimension_numbers = #tpu.dot_dimension_numbers<[1], [0], [0], [1], [0, 0, 1, 1], [], []>} : vector<400x2xf32>, vector<2x2xf32>, vector<400x2xf32> -> vector<400x2xf32>
    %27 = arith.addf %22, %26 : vector<400x2xf32>
    %c5 = arith.constant 5 : index
    %c0_26 = arith.constant 0 : index
    %28 = vector.load %arg10[%c5, %c0_26] : memref<445x2xf32, #tpu.memory_space<vmem>>, vector<400x2xf32>
    %c0_27 = arith.constant 0 : index
    %c2 = arith.constant 2 : index
    %c0_28 = arith.constant 0 : index
    %c0_29 = arith.constant 0 : index
    %29 = vector.load %arg4[%c0_27, %c2, %c0_28, %c0_29] : memref<3x3x2x2xf32, #tpu.memory_space<vmem>>, vector<1x1x2x2xf32>
    %30 = vector.shape_cast %29 : vector<1x1x2x2xf32> to vector<2x2xf32>
    %cst_30 = arith.constant dense<0.000000e+00> : vector<400x2xf32>
    %31 = tpu.matmul %28, %30, %cst_30 {dimension_numbers = #tpu.dot_dimension_numbers<[1], [0], [0], [1], [0, 0, 1, 1], [], []>} : vector<400x2xf32>, vector<2x2xf32>, vector<400x2xf32> -> vector<400x2xf32>
    %32 = arith.addf %27, %31 : vector<400x2xf32>
    %c23 = arith.constant 23 : index
    %c0_31 = arith.constant 0 : index
    %33 = vector.load %arg10[%c23, %c0_31] : memref<445x2xf32, #tpu.memory_space<vmem>>, vector<400x2xf32>
    %c1_32 = arith.constant 1 : index
    %c0_33 = arith.constant 0 : index
    %c0_34 = arith.constant 0 : index
    %c0_35 = arith.constant 0 : index
    %34 = vector.load %arg4[%c1_32, %c0_33, %c0_34, %c0_35] : memref<3x3x2x2xf32, #tpu.memory_space<vmem>>, vector<1x1x2x2xf32>
    %35 = vector.shape_cast %34 : vector<1x1x2x2xf32> to vector<2x2xf32>
    %cst_36 = arith.constant dense<0.000000e+00> : vector<400x2xf32>
    %36 = tpu.matmul %33, %35, %cst_36 {dimension_numbers = #tpu.dot_dimension_numbers<[1], [0], [0], [1], [0, 0, 1, 1], [], []>} : vector<400x2xf32>, vector<2x2xf32>, vector<400x2xf32> -> vector<400x2xf32>
    %37 = arith.addf %32, %36 : vector<400x2xf32>
    %c24_37 = arith.constant 24 : index
    %c0_38 = arith.constant 0 : index
    %38 = vector.load %arg10[%c24_37, %c0_38] : memref<445x2xf32, #tpu.memory_space<vmem>>, vector<400x2xf32>
    %c1_39 = arith.constant 1 : index
    %c1_40 = arith.constant 1 : index
    %c0_41 = arith.constant 0 : index
    %c0_42 = arith.constant 0 : index
    %39 = vector.load %arg4[%c1_39, %c1_40, %c0_41, %c0_42] : memref<3x3x2x2xf32, #tpu.memory_space<vmem>>, vector<1x1x2x2xf32>
    %40 = vector.shape_cast %39 : vector<1x1x2x2xf32> to vector<2x2xf32>
    %cst_43 = arith.constant dense<0.000000e+00> : vector<400x2xf32>
    %41 = tpu.matmul %38, %40, %cst_43 {dimension_numbers = #tpu.dot_dimension_numbers<[1], [0], [0], [1], [0, 0, 1, 1], [], []>} : vector<400x2xf32>, vector<2x2xf32>, vector<400x2xf32> -> vector<400x2xf32>
    %42 = arith.addf %37, %41 : vector<400x2xf32>
    %c25 = arith.constant 25 : index
    %c0_44 = arith.constant 0 : index
    %43 = vector.load %arg10[%c25, %c0_44] : memref<445x2xf32, #tpu.memory_space<vmem>>, vector<400x2xf32>
    %c1_45 = arith.constant 1 : index
    %c2_46 = arith.constant 2 : index
    %c0_47 = arith.constant 0 : index
    %c0_48 = arith.constant 0 : index
    %44 = vector.load %arg4[%c1_45, %c2_46, %c0_47, %c0_48] : memref<3x3x2x2xf32, #tpu.memory_space<vmem>>, vector<1x1x2x2xf32>
    %45 = vector.shape_cast %44 : vector<1x1x2x2xf32> to vector<2x2xf32>
    %cst_49 = arith.constant dense<0.000000e+00> : vector<400x2xf32>
    %46 = tpu.matmul %43, %45, %cst_49 {dimension_numbers = #tpu.dot_dimension_numbers<[1], [0], [0], [1], [0, 0, 1, 1], [], []>} : vector<400x2xf32>, vector<2x2xf32>, vector<400x2xf32> -> vector<400x2xf32>
    %47 = arith.addf %42, %46 : vector<400x2xf32>
    %c43 = arith.constant 43 : index
    %c0_50 = arith.constant 0 : index
    %48 = vector.load %arg10[%c43, %c0_50] : memref<445x2xf32, #tpu.memory_space<vmem>>, vector<400x2xf32>
    %c2_51 = arith.constant 2 : index
    %c0_52 = arith.constant 0 : index
    %c0_53 = arith.constant 0 : index
    %c0_54 = arith.constant 0 : index
    %49 = vector.load %arg4[%c2_51, %c0_52, %c0_53, %c0_54] : memref<3x3x2x2xf32, #tpu.memory_space<vmem>>, vector<1x1x2x2xf32>
    %50 = vector.shape_cast %49 : vector<1x1x2x2xf32> to vector<2x2xf32>
    %cst_55 = arith.constant dense<0.000000e+00> : vector<400x2xf32>
    %51 = tpu.matmul %48, %50, %cst_55 {dimension_numbers = #tpu.dot_dimension_numbers<[1], [0], [0], [1], [0, 0, 1, 1], [], []>} : vector<400x2xf32>, vector<2x2xf32>, vector<400x2xf32> -> vector<400x2xf32>
    %52 = arith.addf %47, %51 : vector<400x2xf32>
    %c44 = arith.constant 44 : index
    %c0_56 = arith.constant 0 : index
    %53 = vector.load %arg10[%c44, %c0_56] : memref<445x2xf32, #tpu.memory_space<vmem>>, vector<400x2xf32>
    %c2_57 = arith.constant 2 : index
    %c1_58 = arith.constant 1 : index
    %c0_59 = arith.constant 0 : index
    %c0_60 = arith.constant 0 : index
    %54 = vector.load %arg4[%c2_57, %c1_58, %c0_59, %c0_60] : memref<3x3x2x2xf32, #tpu.memory_space<vmem>>, vector<1x1x2x2xf32>
    %55 = vector.shape_cast %54 : vector<1x1x2x2xf32> to vector<2x2xf32>
    %cst_61 = arith.constant dense<0.000000e+00> : vector<400x2xf32>
    %56 = tpu.matmul %53, %55, %cst_61 {dimension_numbers = #tpu.dot_dimension_numbers<[1], [0], [0], [1], [0, 0, 1, 1], [], []>} : vector<400x2xf32>, vector<2x2xf32>, vector<400x2xf32> -> vector<400x2xf32>
    %57 = arith.addf %52, %56 : vector<400x2xf32>
    %c45 = arith.constant 45 : index
    %c0_62 = arith.constant 0 : index
    %58 = vector.load %arg10[%c45, %c0_62] : memref<445x2xf32, #tpu.memory_space<vmem>>, vector<400x2xf32>
    %c2_63 = arith.constant 2 : index
    %c2_64 = arith.constant 2 : index
    %c0_65 = arith.constant 0 : index
    %c0_66 = arith.constant 0 : index
    %59 = vector.load %arg4[%c2_63, %c2_64, %c0_65, %c0_66] : memref<3x3x2x2xf32, #tpu.memory_space<vmem>>, vector<1x1x2x2xf32>
    %60 = vector.shape_cast %59 : vector<1x1x2x2xf32> to vector<2x2xf32>
    %cst_67 = arith.constant dense<0.000000e+00> : vector<400x2xf32>
    %61 = tpu.matmul %58, %60, %cst_67 {dimension_numbers = #tpu.dot_dimension_numbers<[1], [0], [0], [1], [0, 0, 1, 1], [], []>} : vector<400x2xf32>, vector<2x2xf32>, vector<400x2xf32> -> vector<400x2xf32>
    %62 = arith.addf %57, %61 : vector<400x2xf32>
    %cst_68 = arith.constant 0.000000e+00 : f32
    %63 = vector.broadcast %cst_68 : f32 to vector<400x2xf32>
    %64 = arith.maximumf %62, %63 : vector<400x2xf32>
    %cst_69 = arith.constant 0.000000e+00 : f32
    %65 = vector.broadcast %cst_69 : f32 to vector<445x2xf32>
    %c0_70 = arith.constant 0 : index
    %c0_71 = arith.constant 0 : index
    %66 = vector.load %arg11[%c0_70, %c0_71] : memref<445x2xf32, #tpu.memory_space<vmem>>, vector<445x2xf32>
    tpu.vector_store %arg11[%c0_70, %c0_71], %65 {strides = array<i32>} : memref<445x2xf32, #tpu.memory_space<vmem>>, vector<445x2xf32>,
    %67 = vector.broadcast %0 : vector<400x1xf32> to vector<400x2xf32>
    %68 = arith.mulf %64, %67 : vector<400x2xf32>
    %c24_72 = arith.constant 24 : index
    %c0_73 = arith.constant 0 : index
    %69 = vector.load %arg11[%c24_72, %c0_73] : memref<445x2xf32, #tpu.memory_space<vmem>>, vector<400x2xf32>
    tpu.vector_store %arg11[%c24_72, %c0_73], %68 {strides = array<i32>} : memref<445x2xf32, #tpu.memory_space<vmem>>, vector<400x2xf32>,
    %c0_74 = arith.constant 0 : index
    %c0_75 = arith.constant 0 : index
    %70 = vector.load %arg7[%c0_74, %c0_75] : memref<1x8xf32, #tpu.memory_space<vmem>>, vector<1x8xf32>
    %71 = vector.shape_cast %70 : vector<1x8xf32> to vector<1x8xf32>
    %72 = vector.broadcast %71 : vector<1x8xf32> to vector<400x8xf32>
    %c3_76 = arith.constant 3 : index
    %c0_77 = arith.constant 0 : index
    %73 = vector.load %arg11[%c3_76, %c0_77] : memref<445x2xf32, #tpu.memory_space<vmem>>, vector<400x2xf32>
    %c0_78 = arith.constant 0 : index
    %c0_79 = arith.constant 0 : index
    %c0_80 = arith.constant 0 : index
    %c0_81 = arith.constant 0 : index
    %74 = vector.load %arg6[%c0_78, %c0_79, %c0_80, %c0_81] : memref<3x3x2x8xf32, #tpu.memory_space<vmem>>, vector<1x1x2x8xf32>
    %75 = vector.shape_cast %74 : vector<1x1x2x8xf32> to vector<2x8xf32>
    %cst_82 = arith.constant dense<0.000000e+00> : vector<400x8xf32>
    %76 = tpu.matmul %73, %75, %cst_82 {dimension_numbers = #tpu.dot_dimension_numbers<[1], [0], [0], [1], [0, 0, 1, 1], [], []>} : vector<400x2xf32>, vector<2x8xf32>, vector<400x8xf32> -> vector<400x8xf32>
    %77 = arith.addf %72, %76 : vector<400x8xf32>
    %c4_83 = arith.constant 4 : index
    %c0_84 = arith.constant 0 : index
    %78 = vector.load %arg11[%c4_83, %c0_84] : memref<445x2xf32, #tpu.memory_space<vmem>>, vector<400x2xf32>
    %c0_85 = arith.constant 0 : index
    %c1_86 = arith.constant 1 : index
    %c0_87 = arith.constant 0 : index
    %c0_88 = arith.constant 0 : index
    %79 = vector.load %arg6[%c0_85, %c1_86, %c0_87, %c0_88] : memref<3x3x2x8xf32, #tpu.memory_space<vmem>>, vector<1x1x2x8xf32>
    %80 = vector.shape_cast %79 : vector<1x1x2x8xf32> to vector<2x8xf32>
    %cst_89 = arith.constant dense<0.000000e+00> : vector<400x8xf32>
    %81 = tpu.matmul %78, %80, %cst_89 {dimension_numbers = #tpu.dot_dimension_numbers<[1], [0], [0], [1], [0, 0, 1, 1], [], []>} : vector<400x2xf32>, vector<2x8xf32>, vector<400x8xf32> -> vector<400x8xf32>
    %82 = arith.addf %77, %81 : vector<400x8xf32>
    %c5_90 = arith.constant 5 : index
    %c0_91 = arith.constant 0 : index
    %83 = vector.load %arg11[%c5_90, %c0_91] : memref<445x2xf32, #tpu.memory_space<vmem>>, vector<400x2xf32>
    %c0_92 = arith.constant 0 : index
    %c2_93 = arith.constant 2 : index
    %c0_94 = arith.constant 0 : index
    %c0_95 = arith.constant 0 : index
    %84 = vector.load %arg6[%c0_92, %c2_93, %c0_94, %c0_95] : memref<3x3x2x8xf32, #tpu.memory_space<vmem>>, vector<1x1x2x8xf32>
    %85 = vector.shape_cast %84 : vector<1x1x2x8xf32> to vector<2x8xf32>
    %cst_96 = arith.constant dense<0.000000e+00> : vector<400x8xf32>
    %86 = tpu.matmul %83, %85, %cst_96 {dimension_numbers = #tpu.dot_dimension_numbers<[1], [0], [0], [1], [0, 0, 1, 1], [], []>} : vector<400x2xf32>, vector<2x8xf32>, vector<400x8xf32> -> vector<400x8xf32>
    %87 = arith.addf %82, %86 : vector<400x8xf32>
    %c23_97 = arith.constant 23 : index
    %c0_98 = arith.constant 0 : index
    %88 = vector.load %arg11[%c23_97, %c0_98] : memref<445x2xf32, #tpu.memory_space<vmem>>, vector<400x2xf32>
    %c1_99 = arith.constant 1 : index
    %c0_100 = arith.constant 0 : index
    %c0_101 = arith.constant 0 : index
    %c0_102 = arith.constant 0 : index
    %89 = vector.load %arg6[%c1_99, %c0_100, %c0_101, %c0_102] : memref<3x3x2x8xf32, #tpu.memory_space<vmem>>, vector<1x1x2x8xf32>
    %90 = vector.shape_cast %89 : vector<1x1x2x8xf32> to vector<2x8xf32>
    %cst_103 = arith.constant dense<0.000000e+00> : vector<400x8xf32>
    %91 = tpu.matmul %88, %90, %cst_103 {dimension_numbers = #tpu.dot_dimension_numbers<[1], [0], [0], [1], [0, 0, 1, 1], [], []>} : vector<400x2xf32>, vector<2x8xf32>, vector<400x8xf32> -> vector<400x8xf32>
    %92 = arith.addf %87, %91 : vector<400x8xf32>
    %c24_104 = arith.constant 24 : index
    %c0_105 = arith.constant 0 : index
    %93 = vector.load %arg11[%c24_104, %c0_105] : memref<445x2xf32, #tpu.memory_space<vmem>>, vector<400x2xf32>
    %c1_106 = arith.constant 1 : index
    %c1_107 = arith.constant 1 : index
    %c0_108 = arith.constant 0 : index
    %c0_109 = arith.constant 0 : index
    %94 = vector.load %arg6[%c1_106, %c1_107, %c0_108, %c0_109] : memref<3x3x2x8xf32, #tpu.memory_space<vmem>>, vector<1x1x2x8xf32>
    %95 = vector.shape_cast %94 : vector<1x1x2x8xf32> to vector<2x8xf32>
    %cst_110 = arith.constant dense<0.000000e+00> : vector<400x8xf32>
    %96 = tpu.matmul %93, %95, %cst_110 {dimension_numbers = #tpu.dot_dimension_numbers<[1], [0], [0], [1], [0, 0, 1, 1], [], []>} : vector<400x2xf32>, vector<2x8xf32>, vector<400x8xf32> -> vector<400x8xf32>
    %97 = arith.addf %92, %96 : vector<400x8xf32>
    %c25_111 = arith.constant 25 : index
    %c0_112 = arith.constant 0 : index
    %98 = vector.load %arg11[%c25_111, %c0_112] : memref<445x2xf32, #tpu.memory_space<vmem>>, vector<400x2xf32>
    %c1_113 = arith.constant 1 : index
    %c2_114 = arith.constant 2 : index
    %c0_115 = arith.constant 0 : index
    %c0_116 = arith.constant 0 : index
    %99 = vector.load %arg6[%c1_113, %c2_114, %c0_115, %c0_116] : memref<3x3x2x8xf32, #tpu.memory_space<vmem>>, vector<1x1x2x8xf32>
    %100 = vector.shape_cast %99 : vector<1x1x2x8xf32> to vector<2x8xf32>
    %cst_117 = arith.constant dense<0.000000e+00> : vector<400x8xf32>
    %101 = tpu.matmul %98, %100, %cst_117 {dimension_numbers = #tpu.dot_dimension_numbers<[1], [0], [0], [1], [0, 0, 1, 1], [], []>} : vector<400x2xf32>, vector<2x8xf32>, vector<400x8xf32> -> vector<400x8xf32>
    %102 = arith.addf %97, %101 : vector<400x8xf32>
    %c43_118 = arith.constant 43 : index
    %c0_119 = arith.constant 0 : index
    %103 = vector.load %arg11[%c43_118, %c0_119] : memref<445x2xf32, #tpu.memory_space<vmem>>, vector<400x2xf32>
    %c2_120 = arith.constant 2 : index
    %c0_121 = arith.constant 0 : index
    %c0_122 = arith.constant 0 : index
    %c0_123 = arith.constant 0 : index
    %104 = vector.load %arg6[%c2_120, %c0_121, %c0_122, %c0_123] : memref<3x3x2x8xf32, #tpu.memory_space<vmem>>, vector<1x1x2x8xf32>
    %105 = vector.shape_cast %104 : vector<1x1x2x8xf32> to vector<2x8xf32>
    %cst_124 = arith.constant dense<0.000000e+00> : vector<400x8xf32>
    %106 = tpu.matmul %103, %105, %cst_124 {dimension_numbers = #tpu.dot_dimension_numbers<[1], [0], [0], [1], [0, 0, 1, 1], [], []>} : vector<400x2xf32>, vector<2x8xf32>, vector<400x8xf32> -> vector<400x8xf32>
    %107 = arith.addf %102, %106 : vector<400x8xf32>
    %c44_125 = arith.constant 44 : index
    %c0_126 = arith.constant 0 : index
    %108 = vector.load %arg11[%c44_125, %c0_126] : memref<445x2xf32, #tpu.memory_space<vmem>>, vector<400x2xf32>
    %c2_127 = arith.constant 2 : index
    %c1_128 = arith.constant 1 : index
    %c0_129 = arith.constant 0 : index
    %c0_130 = arith.constant 0 : index
    %109 = vector.load %arg6[%c2_127, %c1_128, %c0_129, %c0_130] : memref<3x3x2x8xf32, #tpu.memory_space<vmem>>, vector<1x1x2x8xf32>
    %110 = vector.shape_cast %109 : vector<1x1x2x8xf32> to vector<2x8xf32>
    %cst_131 = arith.constant dense<0.000000e+00> : vector<400x8xf32>
    %111 = tpu.matmul %108, %110, %cst_131 {dimension_numbers = #tpu.dot_dimension_numbers<[1], [0], [0], [1], [0, 0, 1, 1], [], []>} : vector<400x2xf32>, vector<2x8xf32>, vector<400x8xf32> -> vector<400x8xf32>
    %112 = arith.addf %107, %111 : vector<400x8xf32>
    %c45_132 = arith.constant 45 : index
    %c0_133 = arith.constant 0 : index
    %113 = vector.load %arg11[%c45_132, %c0_133] : memref<445x2xf32, #tpu.memory_space<vmem>>, vector<400x2xf32>
    %c2_134 = arith.constant 2 : index
    %c2_135 = arith.constant 2 : index
    %c0_136 = arith.constant 0 : index
    %c0_137 = arith.constant 0 : index
    %114 = vector.load %arg6[%c2_134, %c2_135, %c0_136, %c0_137] : memref<3x3x2x8xf32, #tpu.memory_space<vmem>>, vector<1x1x2x8xf32>
    %115 = vector.shape_cast %114 : vector<1x1x2x8xf32> to vector<2x8xf32>
    %cst_138 = arith.constant dense<0.000000e+00> : vector<400x8xf32>
    %116 = tpu.matmul %113, %115, %cst_138 {dimension_numbers = #tpu.dot_dimension_numbers<[1], [0], [0], [1], [0, 0, 1, 1], [], []>} : vector<400x2xf32>, vector<2x8xf32>, vector<400x8xf32> -> vector<400x8xf32>
    %117 = arith.addf %112, %116 : vector<400x8xf32>
    %c0_139 = arith.constant 0 : index
    %c0_140 = arith.constant 0 : index
    %c0_141 = arith.constant 0 : index
    %118 = vector.load %arg9[%c0_139, %c0_140, %c0_141] : memref<1x400x8xf32, #tpu.memory_space<vmem>>, vector<1x400x8xf32>
    %119 = vector.shape_cast %118 : vector<1x400x8xf32> to vector<400x8xf32>
    %120 = vector.shape_cast %117 : vector<400x8xf32> to vector<1x400x8xf32>
    tpu.vector_store %arg9[%c0_139, %c0_140, %c0_141], %120 {strides = array<i32>} : memref<1x400x8xf32, #tpu.memory_space<vmem>>, vector<1x400x8xf32>,
    return
  }
  func.func @transform_0(%arg0: i32) -> (i32, i32, i32) {
    %c0_i32 = arith.constant 0 : i32
    %c0_i32_0 = arith.constant 0 : i32
    %c0_i32_1 = arith.constant 0 : i32
    return %arg0, %c0_i32, %c0_i32_0 : i32, i32, i32
  }
  func.func @transform_1(%arg0: i32) -> (i32, i32) {
    %c0_i32 = arith.constant 0 : i32
    %c0_i32_0 = arith.constant 0 : i32
    %c0_i32_1 = arith.constant 0 : i32
    return %c0_i32, %c0_i32_0 : i32, i32
  }
  func.func @transform_2(%arg0: i32) -> (i32, i32) {
    %c0_i32 = arith.constant 0 : i32
    %c0_i32_0 = arith.constant 0 : i32
    %c0_i32_1 = arith.constant 0 : i32
    return %c0_i32, %c0_i32_0 : i32, i32
  }
  func.func @transform_3(%arg0: i32) -> (i32, i32, i32, i32) {
    %c0_i32 = arith.constant 0 : i32
    %c0_i32_0 = arith.constant 0 : i32
    %c0_i32_1 = arith.constant 0 : i32
    %c0_i32_2 = arith.constant 0 : i32
    %c0_i32_3 = arith.constant 0 : i32
    return %c0_i32, %c0_i32_0, %c0_i32_1, %c0_i32_2 : i32, i32, i32, i32
  }
  func.func @transform_4(%arg0: i32) -> (i32, i32) {
    %c0_i32 = arith.constant 0 : i32
    %c0_i32_0 = arith.constant 0 : i32
    %c0_i32_1 = arith.constant 0 : i32
    return %c0_i32, %c0_i32_0 : i32, i32
  }
  func.func @transform_5(%arg0: i32) -> (i32, i32, i32, i32) {
    %c0_i32 = arith.constant 0 : i32
    %c0_i32_0 = arith.constant 0 : i32
    %c0_i32_1 = arith.constant 0 : i32
    %c0_i32_2 = arith.constant 0 : i32
    %c0_i32_3 = arith.constant 0 : i32
    return %c0_i32, %c0_i32_0, %c0_i32_1, %c0_i32_2 : i32, i32, i32, i32
  }
  func.func @transform_6(%arg0: i32) -> (i32, i32) {
    %c0_i32 = arith.constant 0 : i32
    %c0_i32_0 = arith.constant 0 : i32
    %c0_i32_1 = arith.constant 0 : i32
    return %c0_i32, %c0_i32_0 : i32, i32
  }
  func.func @transform_7(%arg0: i32) -> (i32, i32) {
    %c0_i32 = arith.constant 0 : i32
    %c0_i32_0 = arith.constant 0 : i32
    %c0_i32_1 = arith.constant 0 : i32
    return %c0_i32, %c0_i32_0 : i32, i32
  }
  func.func @transform_8(%arg0: i32) -> (i32, i32, i32) {
    %c0_i32 = arith.constant 0 : i32
    %c0_i32_0 = arith.constant 0 : i32
    %c0_i32_1 = arith.constant 0 : i32
    return %arg0, %c0_i32, %c0_i32_0 : i32, i32, i32
  }
}

</mosaic_0001>

<bundles_post_ra>
// kernel: bottleneck_forward.1
= control target key start
LH: loop header
LB: loop body
LE: loop exit
PB: predicated region body
PF: predicated region fallthrough
CT: control target
= control target key end

     0   :  { %s15429_s27 = smov 0   ;;  %s19084_s0 = inlined_call_operand.vmem [shape: f32[2,400,4], index: 0, kind: input, shape index: {}]   ;;  %s19085_s1 = inlined_call_operand.vmem [shape: f32[4,2], index: 1, kind: input, shape index: {}]   ;;  %s19086_s2 = inlined_call_operand.vmem [shape: f32[1,2], index: 2, kind: input, shape index: {}]   ;;  %s19087_s3 = inlined_call_operand.vmem [shape: f32[3,3,2,2], index: 3, kind: input, shape index: {}]   ;;  %s19088_s4 = inlined_call_operand.vmem [shape: f32[1,2], index: 4, kind: input, shape index: {}]   ;;  %s19089_s5 = inlined_call_operand.vmem [shape: f32[3,3,2,8], index: 5, kind: input, shape index: {}]   ;;  %s19090_s6 = inlined_call_operand.vmem [shape: f32[1,8], index: 6, kind: input, shape index: {}]   ;;  %s19091_s7 = inlined_call_operand.vmem [shape: f32[400,1], index: 7, kind: input, shape index: {}]   ;;  %s19092_s8 = inlined_call_operand.vmem [shape: f32[2,400,8], index: 8, kind: output, shape index: {}]  }
   0x1 LB: > { %s11927_s28 = sadd.s32 4294967295, %s15380_s27   ;;  %p11931_p0 = scmp.ge.s32.totalorder %s15380_s27, 1  ;;  %s15380_s27 = sphi %s15429_s27, %s18_s27  }
   0x2   : > { %p262_p1 = scmp.lt.s32.totalorder %s15380_s27, 3 }
   0x4   : > { %p263_p2 = pnand %p11931_p0, %p262_p1 }
   0x6   : > { %266 = sbr.rel (%p263_p2) target bundleno = 1527 (0x5f7), region = 52 }
   0xb   : > { %v308_v0 = vld [vmem:[%s19091_s7 + $0x10] sm:$0xff]  ;;  %v306_v1 = vld [vmem:[%s19091_s7] sm:$0xff]  ;;  %vm565_vm0 = vcmask 1043456   ;;  %p296_p3 = scmp.lt.s32.totalorder %s11927_s28, 1  ;;  %v15382_v2 = vmov 0   ;;  %v309_v4 = vld [vmem:[%s19091_s7 + $0x18] sm:$0xff] }
   0xc   : > { %15370 = vset.pattern.permute.xlu1 %v15382_v2  ;;  %15369 = vset.pattern.permute.xlu0 %v15382_v2  ;;  %v406_v3 = vld [vmem:[%s19085_s1] sm:$0xf]  ;;  %v307_v5 = vld [vmem:[%s19091_s7 + $0x8] sm:$0xff]  ;;  %vm414_vm1 = vcmask 31744   ;;  %v313_v16 = vld [vmem:[%s19091_s7 + $0x38] sm:$0xff]  ;;  %vm1550_vm2 = vcmask 1041408  }
   0xd   : > { %1004 = vperm.xlu1 %15370, %v308_v0   ;;  %994 = vperm.xlu0 %15369, %v306_v1   ;;  %s19473_s28 = smov (!%p296_p3, %s11927_s28), 1  ;;  %v311_v6 = vld [vmem:[%s19091_s7 + $0x28] sm:$0xff]  ;;  %v310_v7 = vld [vmem:[%s19091_s7 + $0x20] sm:$0xff]  ;;  %v312_v17 = vld [vmem:[%s19091_s7 + $0x30] sm:$0xff]  ;;  %vm934_vm3 = vcmask 15360   ;;  %vm990_vm4 = vcmask 12288  }
   0xe   : > { %13893 = vmatprep.subr.msk.mxu0 %vm565_vm0, %v406_v3  ;;  %15356 = vmatprep.subr.msk.mxu1 %vm565_vm0, %v406_v3  ;;  %s15358_s17 = smul.u32 400, %s19473_s28  ;;  %v315_v22 = vld [vmem:[%s19091_s7 + $0x48] sm:$0xff]  ;;  %v314_v23 = vld [vmem:[%s19091_s7 + $0x40] sm:$0xff]  ;;  %v317_v28 = vld [vmem:[%s19091_s7 + $0x58] sm:$0xff]  ;;  %vm11821_vm5 = vcmask 64512  }
   0xf   : > { %13894 = vmatpush3.msk.msra.mxu0 %vm565_vm0, %v406_v3  ;;  %15357 = vmatpush3.msk.msra.mxu1 %vm565_vm0, %v406_v3  ;;  %v316_v29 = vld [vmem:[%s19091_s7 + $0x50] sm:$0xff]  ;;  %v319_v34 = vld [vmem:[%s19091_s7 + $0x68] sm:$0xff]  ;;  %v318_v35 = vld [vmem:[%s19091_s7 + $0x60] sm:$0xff] }
  0x10   : > { %s15460_s20 = scalar_lea.vmem %s19084_s0, %s15358_s17  ;;  %v321_v40 = vld [vmem:[%s19091_s7 + $0x78] sm:$0xff]  ;;  %v320_v41 = vld [vmem:[%s19091_s7 + $0x70] sm:$0xff]  ;;  %v323_v46 = vld [vmem:[%s19091_s7 + $0x88] sm:$0xff]  ;;  %s18873_s12 = scalar_lea.vmem %s19092_s8, %s15358_s17 }
  0x11   : > { %1009 = vperm.xlu1 %15370, %v309_v4   ;;  %999 = vperm.xlu0 %15369, %v307_v5   ;;  %v356_v8 = vld [vmem:[%s15460_s20] sm:$0xff]  ;;  %v382_v9 = vld [vmem:[%s15460_s20 + $0xd0] sm:$0xff]  ;;  %v357_v10 = vld [vmem:[%s15460_s20 + $0x8] sm:$0xff] }
  0x12   : > { %13895 = vmatprep.mubr.msk.f32.mxu0 %vm414_vm1, %v356_v8  ;;  %13934 = vmatprep.mubr.msk.f32.mxu1 %vm414_vm1, %v382_v9  ;;  %v383_v11 = vld [vmem:[%s15460_s20 + $0xd8] sm:$0xff]  ;;  %v358_v12 = vld [vmem:[%s15460_s20 + $0x10] sm:$0xff]  ;;  %v384_v13 = vld [vmem:[%s15460_s20 + $0xe0] sm:$0xff] }
  0x13   : > { %13896 = vmatmul.mubr.msk.f32.vlgmr.msra.gmra.mxu0 %vm414_vm1, %v357_v10  ;;  %13935 = vmatmul.mubr.msk.f32.vlgmr.msra.gmra.mxu1 %vm414_vm1, %v383_v11  ;;  %v359_v14 = vld [vmem:[%s15460_s20 + $0x18] sm:$0xff]  ;;  %v385_v15 = vld [vmem:[%s15460_s20 + $0xe8] sm:$0xff]  ;;  %v360_v18 = vld [vmem:[%s15460_s20 + $0x20] sm:$0xff] }
  0x14   : > { %13898 = vmatprep.mubr.msk.f32.mxu0 %vm414_vm1, %v358_v12  ;;  %13937 = vmatprep.mubr.msk.f32.mxu1 %vm414_vm1, %v384_v13  ;;  %v386_v19 = vld [vmem:[%s15460_s20 + $0xf0] sm:$0xff]  ;;  %v361_v20 = vld [vmem:[%s15460_s20 + $0x28] sm:$0xff]  ;;  %v387_v21 = vld [vmem:[%s15460_s20 + $0xf8] sm:$0xff] }
  0x15   : > { %1019 = vperm.xlu1 %15370, %v311_v6   ;;  %1014 = vperm.xlu0 %15369, %v310_v7   ;;  %v362_v24 = vld [vmem:[%s15460_s20 + $0x30] sm:$0xff]  ;;  %v388_v25 = vld [vmem:[%s15460_s20 + $0x100] sm:$0xff]  ;;  %v363_v26 = vld [vmem:[%s15460_s20 + $0x38] sm:$0xff] }
  0x16   : > { %v389_v27 = vld [vmem:[%s15460_s20 + $0x108] sm:$0xff]  ;;  %v364_v30 = vld [vmem:[%s15460_s20 + $0x40] sm:$0xff]  ;;  %v390_v31 = vld [vmem:[%s15460_s20 + $0x110] sm:$0xff] }
  0x17   : > { %13899 = vmatmul.mubr.msk.f32.gmra.mxu0 %vm414_vm1, %v359_v14  ;;  %13938 = vmatmul.mubr.msk.f32.gmra.mxu1 %vm414_vm1, %v385_v15  ;;  %v365_v32 = vld [vmem:[%s15460_s20 + $0x48] sm:$0xff]  ;;  %v391_v33 = vld [vmem:[%s15460_s20 + $0x118] sm:$0xff]  ;;  %v366_v36 = vld [vmem:[%s15460_s20 + $0x50] sm:$0xff] }
  0x18   : > { %13901 = vmatprep.mubr.msk.f32.mxu0 %vm414_vm1, %v360_v18  ;;  %13940 = vmatprep.mubr.msk.f32.mxu1 %vm414_vm1, %v386_v19  ;;  %v392_v37 = vld [vmem:[%s15460_s20 + $0x120] sm:$0xff]  ;;  %v367_v38 = vld [vmem:[%s15460_s20 + $0x58] sm:$0xff]  ;;  %v393_v39 = vld [vmem:[%s15460_s20 + $0x128] sm:$0xff] }
  0x19   : > { %1029 = vperm.xlu1 %15370, %v313_v16   ;;  %1024 = vperm.xlu0 %15369, %v312_v17   ;;  %v368_v42 = vld [vmem:[%s15460_s20 + $0x60] sm:$0xff]  ;;  %v394_v43 = vld [vmem:[%s15460_s20 + $0x130] sm:$0xff]  ;;  %v369_v44 = vld [vmem:[%s15460_s20 + $0x68] sm:$0xff] }
  0x1a   : > { %v395_v45 = vld [vmem:[%s15460_s20 + $0x138] sm:$0xff]  ;;  %v322_v47 = vld [vmem:[%s19091_s7 + $0x80] sm:$0xff]  ;;  %v370_v48 = vld [vmem:[%s15460_s20 + $0x70] sm:$0xff] }
  0x1b   : > { %13902 = vmatmul.mubr.msk.f32.gmra.mxu0 %vm414_vm1, %v361_v20  ;;  %13941 = vmatmul.mubr.msk.f32.gmra.mxu1 %vm414_vm1, %v387_v21  ;;  %v396_v49 = vld [vmem:[%s15460_s20 + $0x140] sm:$0xff]  ;;  %v371_v50 = vld [vmem:[%s15460_s20 + $0x78] sm:$0xff]  ;;  %v397_v51 = vld [vmem:[%s15460_s20 + $0x148] sm:$0xff] }
  0x1c   : > { %13904 = vmatprep.mubr.msk.f32.mxu0 %vm414_vm1, %v362_v24  ;;  %13943 = vmatprep.mubr.msk.f32.mxu1 %vm414_vm1, %v388_v25  ;;  %v325_v52 = vld [vmem:[%s19091_s7 + $0x98] sm:$0xff]  ;;  %v324_v53 = vld [vmem:[%s19091_s7 + $0x90] sm:$0xff]  ;;  %v372_v54 = vld [vmem:[%s15460_s20 + $0x80] sm:$0xff] }
  0x1d   : > { %1039 = vperm.xlu1 %15370, %v315_v22   ;;  %1034 = vperm.xlu0 %15369, %v314_v23   ;;  %v398_v55 = vld [vmem:[%s15460_s20 + $0x150] sm:$0xff]  ;;  %v1399_v56 = vld [vmem:[%s19087_s3] sm:$0x3]  ;;  %v373_v57 = vld [vmem:[%s15460_s20 + $0x88] sm:$0xff] }
  0x1e   : > { %v399_v58 = vld [vmem:[%s15460_s20 + $0x158] sm:$0xff]  ;;  %v327_v59 = vld [vmem:[%s19091_s7 + $0xa8] sm:$0xff]  ;;  %v326_v60 = vld [vmem:[%s19091_s7 + $0xa0] sm:$0xff]  ;;  %13970 = vmatprep.subr.msk.mxu1 %vm1550_vm2, %v1399_v56 }
  0x1f   : > { %13905 = vmatmul.mubr.msk.f32.gmra.mxu0 %vm414_vm1, %v363_v26  ;;  %13944 = vmatmul.mubr.msk.f32.gmra.mxu1 %vm414_vm1, %v389_v27  ;;  %v374_v61 = vld [vmem:[%s15460_s20 + $0x90] sm:$0xff]  ;;  %v400_v62 = vld [vmem:[%s15460_s20 + $0x160] sm:$0xff]  ;;  %v375_v63 = vld [vmem:[%s15460_s20 + $0x98] sm:$0xff] }
  0x20   : > { %13907 = vmatprep.mubr.msk.f32.mxu0 %vm414_vm1, %v364_v30  ;;  %13946 = vmatprep.mubr.msk.f32.mxu1 %vm414_vm1, %v390_v31  ;;  %v401_v0 = vld [vmem:[%s15460_s20 + $0x168] sm:$0xff]  ;;  %v329_v1 = vld [vmem:[%s19091_s7 + $0xb8] sm:$0xff]  ;;  %v328_v2 = vld [vmem:[%s19091_s7 + $0xb0] sm:$0xff] }
  0x21   : > { %1049 = vperm.xlu1 %15370, %v317_v28   ;;  %1044 = vperm.xlu0 %15369, %v316_v29   ;;  %v376_v3 = vld [vmem:[%s15460_s20 + $0xa0] sm:$0xff]  ;;  %v402_v4 = vld [vmem:[%s15460_s20 + $0x170] sm:$0xff]  ;;  %v377_v5 = vld [vmem:[%s15460_s20 + $0xa8] sm:$0xff]  ;;  %v19093_v29 = vmov 0.0  }
  0x22   : > { %13971 = vmatpush3.msk.msra.mxu1 %vm1550_vm2, %v1399_v56  ;;  %v403_v6 = vld [vmem:[%s15460_s20 + $0x178] sm:$0xff]  ;;  %v331_v7 = vld [vmem:[%s19091_s7 + $0xc8] sm:$0xff]  ;;  %v330_v8 = vld [vmem:[%s19091_s7 + $0xc0] sm:$0xff]  ;;  %939 = vst.msk [vmem:[#allocation2 + $0x20] sm:$0xff] %vm934_vm3, %v19093_v29 }
  0x23   : > { %13908 = vmatmul.mubr.msk.f32.gmra.mxu0 %vm414_vm1, %v365_v32  ;;  %13947 = vmatmul.mubr.msk.f32.gmra.mxu1 %vm414_vm1, %v391_v33  ;;  %v378_v9 = vld [vmem:[%s15460_s20 + $0xb0] sm:$0xff]  ;;  %v404_v10 = vld [vmem:[%s15460_s20 + $0x180] sm:$0xff]  ;;  %v379_v11 = vld [vmem:[%s15460_s20 + $0xb8] sm:$0xff]  ;;  %935 = vst.msk [vmem:[#allocation2] sm:$0xff] %vm934_vm3, %v19093_v29 }
  0x24   : > { %13910 = vmatprep.mubr.msk.f32.mxu0 %vm414_vm1, %v366_v36  ;;  %13949 = vmatprep.mubr.msk.f32.mxu1 %vm414_vm1, %v392_v37  ;;  %v405_v12 = vld [vmem:[%s15460_s20 + $0x188] sm:$0xff]  ;;  %v333_v13 = vld [vmem:[%s19091_s7 + $0xd8] sm:$0xff]  ;;  %v332_v14 = vld [vmem:[%s19091_s7 + $0xd0] sm:$0xff]  ;;  %936 = vst.msk [vmem:[#allocation2 + $0x8] sm:$0xff] %vm934_vm3, %v19093_v29 }
  0x25   : > { %1059 = vperm.xlu1 %15370, %v319_v34   ;;  %1054 = vperm.xlu0 %15369, %v318_v35   ;;  %v380_v15 = vld [vmem:[%s15460_s20 + $0xc0] sm:$0xff]  ;;  %v381_v16 = vld [vmem:[%s15460_s20 + $0xc8] sm:$0xff]  ;;  %v337_v19 = vld [vmem:[%s19091_s7 + $0xf8] sm:$0xff]  ;;  %937 = vst.msk [vmem:[#allocation2 + $0x10] sm:$0xff] %vm934_vm3, %v19093_v29 }
  0x26   : > { %v335_v17 = vld [vmem:[%s19091_s7 + $0xe8] sm:$0xff]  ;;  %v334_v18 = vld [vmem:[%s19091_s7 + $0xe0] sm:$0xff]  ;;  %v336_v20 = vld [vmem:[%s19091_s7 + $0xf0] sm:$0xff]  ;;  %938 = vst.msk [vmem:[#allocation2 + $0x18] sm:$0xff] %vm934_vm3, %v19093_v29 }
  0x27   : > { %13911 = vmatmul.mubr.msk.f32.gmra.mxu0 %vm414_vm1, %v367_v38  ;;  %13950 = vmatmul.mubr.msk.f32.gmra.mxu1 %vm414_vm1, %v393_v39  ;;  %v339_v21 = vld [vmem:[%s19091_s7 + $0x108] sm:$0xff]  ;;  %v338_v22 = vld [vmem:[%s19091_s7 + $0x100] sm:$0xff]  ;;  %v341_v23 = vld [vmem:[%s19091_s7 + $0x118] sm:$0xff]  ;;  %940 = vst.msk [vmem:[#allocation2 + $0x28] sm:$0xff] %vm934_vm3, %v19093_v29 }
  0x28   : > { %13913 = vmatprep.mubr.msk.f32.mxu0 %vm414_vm1, %v368_v42  ;;  %13952 = vmatprep.mubr.msk.f32.mxu1 %vm414_vm1, %v394_v43  ;;  %v340_v24 = vld [vmem:[%s19091_s7 + $0x110] sm:$0xff]  ;;  %v343_v25 = vld [vmem:[%s19091_s7 + $0x128] sm:$0xff]  ;;  %v342_v26 = vld [vmem:[%s19091_s7 + $0x120] sm:$0xff]  ;;  %941 = vst.msk [vmem:[#allocation2 + $0x30] sm:$0xff] %vm934_vm3, %v19093_v29 }
  0x29   : > { %1069 = vperm.xlu1 %15370, %v321_v40   ;;  %1064 = vperm.xlu0 %15369, %v320_v41   ;;  %v15672_v27 = vld [vmem:[%s19091_s7 + $0x138] sm:$0xff]  ;;  %v15677_v28 = vld [vmem:[%s19091_s7 + $0x130] sm:$0xff]  ;;  %942 = vst.msk [vmem:[#allocation2 + $0x38] sm:$0xff] %vm934_vm3, %v19093_v29  ;;  %943 = vst.msk [vmem:[#allocation2 + $0x40] sm:$0xff] %vm934_vm3, %v19093_v29 }
  0x2a   : > { %944 = vst.msk [vmem:[#allocation2 + $0x48] sm:$0xff] %vm934_vm3, %v19093_v29  ;;  %945 = vst.msk [vmem:[#allocation2 + $0x50] sm:$0xff] %vm934_vm3, %v19093_v29  ;;  %v347_v30 = vld [vmem:[%s19091_s7 + $0x148] sm:$0xff]  ;;  %v346_v31 = vld [vmem:[%s19091_s7 + $0x140] sm:$0xff] }
  0x2b   : > { %13914 = vmatmul.mubr.msk.f32.gmra.mxu0 %vm414_vm1, %v369_v44  ;;  %13953 = vmatmul.mubr.msk.f32.gmra.mxu1 %vm414_vm1, %v395_v45  ;;  %946 = vst.msk [vmem:[#allocation2 + $0x58] sm:$0xff] %vm934_vm3, %v19093_v29  ;;  %947 = vst.msk [vmem:[#allocation2 + $0x60] sm:$0xff] %vm934_vm3, %v19093_v29  ;;  %v349_v32 = vld [vmem:[%s19091_s7 + $0x158] sm:$0xff]  ;;  %v348_v33 = vld [vmem:[%s19091_s7 + $0x150] sm:$0xff] }
  0x2c   : > { %13916 = vmatprep.mubr.msk.f32.mxu0 %vm414_vm1, %v370_v48  ;;  %13955 = vmatprep.mubr.msk.f32.mxu1 %vm414_vm1, %v396_v49  ;;  %948 = vst.msk [vmem:[#allocation2 + $0x68] sm:$0xff] %vm934_vm3, %v19093_v29  ;;  %949 = vst.msk [vmem:[#allocation2 + $0x70] sm:$0xff] %vm934_vm3, %v19093_v29  ;;  %v1349_v34 = vld [vmem:[#allocation2 + $0x3] sm:$0xff]  ;;  %v1350_v36 = vld [vmem:[#allocation2 + $0xb] sm:$0xff] }
  0x2d   : > { %1079 = vperm.xlu1 %15370, %v323_v46   ;;  %1074 = vperm.xlu0 %15369, %v322_v47   ;;  %950 = vst.msk [vmem:[#allocation2 + $0x78] sm:$0xff] %vm934_vm3, %v19093_v29  ;;  %951 = vst.msk [vmem:[#allocation2 + $0x80] sm:$0xff] %vm934_vm3, %v19093_v29  ;;  %v12038_v35 = vld [vmem:[%s19087_s3 + $0x2] sm:$0x3]  ;;  %v351_v37 = vld [vmem:[%s19091_s7 + $0x168] sm:$0xff] }
  0x2e   : > { %952 = vst.msk [vmem:[#allocation2 + $0x88] sm:$0xff] %vm934_vm3, %v19093_v29  ;;  %953 = vst.msk [vmem:[#allocation2 + $0x90] sm:$0xff] %vm934_vm3, %v19093_v29  ;;  %v350_v38 = vld [vmem:[%s19091_s7 + $0x160] sm:$0xff]  ;;  %14047 = vmatprep.subr.msk.mxu0 %vm1550_vm2, %v12038_v35  ;;  %v1920_v40 = vld [vmem:[#allocation2 + $0xc] sm:$0xff] }
  0x2f   : > { %13917 = vmatmul.mubr.msk.f32.gmra.mxu0 %vm414_vm1, %v371_v50  ;;  %13956 = vmatmul.mubr.msk.f32.gmra.mxu1 %vm414_vm1, %v397_v51  ;;  %954 = vst.msk [vmem:[#allocation2 + $0x98] sm:$0xff] %vm934_vm3, %v19093_v29  ;;  %955 = vst.msk [vmem:[#allocation2 + $0xa0] sm:$0xff] %vm934_vm3, %v19093_v29  ;;  %v1919_v39 = vld [vmem:[#allocation2 + $0x4] sm:$0xff]  ;;  %v353_v41 = vld [vmem:[%s19091_s7 + $0x178] sm:$0xff] }
  0x30   : > { %13919 = vmatprep.mubr.msk.f32.mxu0 %vm414_vm1, %v372_v54  ;;  %13958 = vmatprep.mubr.msk.f32.mxu1 %vm414_vm1, %v398_v55  ;;  %956 = vst.msk [vmem:[#allocation2 + $0xa8] sm:$0xff] %vm934_vm3, %v19093_v29  ;;  %957 = vst.msk [vmem:[#allocation2 + $0xb0] sm:$0xff] %vm934_vm3, %v19093_v29  ;;  %v352_v42 = vld [vmem:[%s19091_s7 + $0x170] sm:$0xff]  ;;  %v12090_v43 = vld [vmem:[%s19087_s3 + $0x4] sm:$0x3] }
  0x31   : > { %1089 = vperm.xlu1 %15370, %v325_v52   ;;  %1084 = vperm.xlu0 %15369, %v324_v53   ;;  %958 = vst.msk [vmem:[#allocation2 + $0xb8] sm:$0xff] %vm934_vm3, %v19093_v29  ;;  %959 = vst.msk [vmem:[#allocation2 + $0xc0] sm:$0xff] %vm934_vm3, %v19093_v29  ;;  %v355_v44 = vld [vmem:[%s19091_s7 + $0x188] sm:$0xff]  ;;  %v354_v45 = vld [vmem:[%s19091_s7 + $0x180] sm:$0xff] }
  0x32   : > { %960 = vst.msk [vmem:[#allocation2 + $0xc8] sm:$0xff] %vm934_vm3, %v19093_v29  ;;  %961 = vst.msk [vmem:[#allocation2 + $0xd0] sm:$0xff] %vm934_vm3, %v19093_v29  ;;  %14048 = vmatpush3.msk.msra.mxu0 %vm1550_vm2, %v12038_v35  ;;  %14124 = vmatprep.subr.msk.mxu1 %vm1550_vm2, %v12090_v43 }
  0x33   : > { %13920 = vmatmul.mubr.msk.f32.gmra.mxu0 %vm414_vm1, %v373_v57  ;;  %13959 = vmatmul.mubr.msk.f32.gmra.mxu1 %vm414_vm1, %v399_v58  ;;  %962 = vst.msk [vmem:[#allocation2 + $0xd8] sm:$0xff] %vm934_vm3, %v19093_v29  ;;  %963 = vst.msk [vmem:[#allocation2 + $0xe0] sm:$0xff] %vm934_vm3, %v19093_v29 }
  0x34   : > { %13922 = vmatprep.mubr.msk.f32.mxu0 %vm414_vm1, %v374_v61  ;;  %13961 = vmatprep.mubr.msk.f32.mxu1 %vm414_vm1, %v400_v62  ;;  %964 = vst.msk [vmem:[#allocation2 + $0xe8] sm:$0xff] %vm934_vm3, %v19093_v29  ;;  %965 = vst.msk [vmem:[#allocation2 + $0xf0] sm:$0xff] %vm934_vm3, %v19093_v29 }
  0x35   : > { %1099 = vperm.xlu1 %15370, %v327_v59   ;;  %1094 = vperm.xlu0 %15369, %v326_v60   ;;  %966 = vst.msk [vmem:[#allocation2 + $0xf8] sm:$0xff] %vm934_vm3, %v19093_v29  ;;  %967 = vst.msk [vmem:[#allocation2 + $0x100] sm:$0xff] %vm934_vm3, %v19093_v29 }
  0x36   : > { %968 = vst.msk [vmem:[#allocation2 + $0x108] sm:$0xff] %vm934_vm3, %v19093_v29  ;;  %969 = vst.msk [vmem:[#allocation2 + $0x110] sm:$0xff] %vm934_vm3, %v19093_v29 }
  0x37   : > { %13923 = vmatmul.mubr.msk.f32.gmra.mxu0 %vm414_vm1, %v375_v63  ;;  %13962 = vmatmul.mubr.msk.f32.gmra.mxu1 %vm414_vm1, %v401_v0  ;;  %970 = vst.msk [vmem:[#allocation2 + $0x118] sm:$0xff] %vm934_vm3, %v19093_v29  ;;  %971 = vst.msk [vmem:[#allocation2 + $0x120] sm:$0xff] %vm934_vm3, %v19093_v29 }
  0x38   : > { %13925 = vmatprep.mubr.msk.f32.mxu0 %vm414_vm1, %v376_v3  ;;  %13964 = vmatprep.mubr.msk.f32.mxu1 %vm414_vm1, %v402_v4  ;;  %972 = vst.msk [vmem:[#allocation2 + $0x128] sm:$0xff] %vm934_vm3, %v19093_v29  ;;  %973 = vst.msk [vmem:[#allocation2 + $0x130] sm:$0xff] %vm934_vm3, %v19093_v29 }
  0x39   : > { %1109 = vperm.xlu1 %15370, %v329_v1   ;;  %1104 = vperm.xlu0 %15369, %v328_v2   ;;  %974 = vst.msk [vmem:[#allocation2 + $0x138] sm:$0xff] %vm934_vm3, %v19093_v29  ;;  %975 = vst.msk [vmem:[#allocation2 + $0x140] sm:$0xff] %vm934_vm3, %v19093_v29 }
  0x3a   : > { %976 = vst.msk [vmem:[#allocation2 + $0x148] sm:$0xff] %vm934_vm3, %v19093_v29  ;;  %977 = vst.msk [vmem:[#allocation2 + $0x150] sm:$0xff] %vm934_vm3, %v19093_v29 }
  0x3b   : > { %13926 = vmatmul.mubr.msk.f32.gmra.mxu0 %vm414_vm1, %v377_v5  ;;  %13965 = vmatmul.mubr.msk.f32.gmra.mxu1 %vm414_vm1, %v403_v6  ;;  %978 = vst.msk [vmem:[#allocation2 + $0x158] sm:$0xff] %vm934_vm3, %v19093_v29  ;;  %979 = vst.msk [vmem:[#allocation2 + $0x160] sm:$0xff] %vm934_vm3, %v19093_v29 }
  0x3c   : > { %13928 = vmatprep.mubr.msk.f32.mxu0 %vm414_vm1, %v378_v9  ;;  %13967 = vmatprep.mubr.msk.f32.mxu1 %vm414_vm1, %v404_v10  ;;  %980 = vst.msk [vmem:[#allocation2 + $0x168] sm:$0xff] %vm934_vm3, %v19093_v29  ;;  %981 = vst.msk [vmem:[#allocation2 + $0x170] sm:$0xff] %vm934_vm3, %v19093_v29  ;;  %v12142_v9 = vld [vmem:[%s19087_s3 + $0x6] sm:$0x3] }
  0x3d   : > { %1119 = vperm.xlu1 %15370, %v331_v7   ;;  %1114 = vperm.xlu0 %15369, %v330_v8   ;;  %982 = vst.msk [vmem:[#allocation2 + $0x178] sm:$0xff] %vm934_vm3, %v19093_v29  ;;  %983 = vst.msk [vmem:[#allocation2 + $0x180] sm:$0xff] %vm934_vm3, %v19093_v29 }
  0x3e   : > { %984 = vst.msk [vmem:[#allocation2 + $0x188] sm:$0xff] %vm934_vm3, %v19093_v29  ;;  %985 = vst.msk [vmem:[#allocation2 + $0x190] sm:$0xff] %vm934_vm3, %v19093_v29  ;;  %14201 = vmatprep.subr.msk.mxu0 %vm1550_vm2, %v12142_v9 }
  0x3f   : > { %13929 = vmatmul.mubr.msk.f32.gmra.mxu0 %vm414_vm1, %v379_v11  ;;  %13968 = vmatmul.mubr.msk.f32.gmra.mxu1 %vm414_vm1, %v405_v12  ;;  %986 = vst.msk [vmem:[#allocation2 + $0x198] sm:$0xff] %vm934_vm3, %v19093_v29  ;;  %987 = vst.msk [vmem:[#allocation2 + $0x1a0] sm:$0xff] %vm934_vm3, %v19093_v29  ;;  %v16008_v11 = vld [vmem:[%s19087_s3 + $0x8] sm:$0x3] }
  0x40   : > { %13931 = vmatprep.mubr.msk.f32.mxu0 %vm414_vm1, %v380_v15  ;;  %988 = vst.msk [vmem:[#allocation2 + $0x1a8] sm:$0xff] %vm934_vm3, %v19093_v29  ;;  %989 = vst.msk [vmem:[#allocation2 + $0x1b0] sm:$0xff] %vm934_vm3, %v19093_v29  ;;  %13972 = vmatprep.mubr.msk.f32.mxu1 %vm934_vm3, %v1349_v34 }
  0x41   : > { %1129 = vperm.xlu1 %15370, %v333_v13   ;;  %1124 = vperm.xlu0 %15369, %v332_v14   ;;  %6529 = vst.msk [vmem:[#allocation3] sm:$0xff] %vm934_vm3, %v19093_v29  ;;  %6530 = vst.msk [vmem:[#allocation3 + $0x8] sm:$0xff] %vm934_vm3, %v19093_v29 }
  0x42   : > { %6531 = vst.msk [vmem:[#allocation3 + $0x10] sm:$0xff] %vm934_vm3, %v19093_v29  ;;  %6532 = vst.msk [vmem:[#allocation3 + $0x18] sm:$0xff] %vm934_vm3, %v19093_v29 }
  0x43   : > { %13932 = vmatmul.mubr.msk.f32.gmra.mxu0 %vm414_vm1, %v381_v16  ;;  %6533 = vst.msk [vmem:[#allocation3 + $0x20] sm:$0xff] %vm934_vm3, %v19093_v29  ;;  %6534 = vst.msk [vmem:[#allocation3 + $0x28] sm:$0xff] %vm934_vm3, %v19093_v29  ;;  %13973 = vmatmul.mubr.msk.f32.vlgmr.msra.gmra.mxu1 %vm934_vm3, %v1350_v36  ;;  %v16024_v16 = vld [vmem:[%s19086_s2] ss:$0 sm:$0xff] }
  0x44   : > { %6535 = vst.msk [vmem:[#allocation3 + $0x30] sm:$0xff] %vm934_vm3, %v19093_v29  ;;  %6536 = vst.msk [vmem:[#allocation3 + $0x38] sm:$0xff] %vm934_vm3, %v19093_v29  ;;  %14049 = vmatprep.mubr.msk.f32.mxu0 %vm934_vm3, %v1919_v39  ;;  %14125 = vmatpush3.msk.msra.mxu1 %vm1550_vm2, %v12090_v43 }
  0x45   : > { %1139 = vperm.xlu1 %15370, %v335_v17   ;;  %1134 = vperm.xlu0 %15369, %v334_v18   ;;  %6537 = vst.msk [vmem:[#allocation3 + $0x40] sm:$0xff] %vm934_vm3, %v19093_v29  ;;  %6538 = vst.msk [vmem:[#allocation3 + $0x48] sm:$0xff] %vm934_vm3, %v19093_v29 }
  0x46   : > { %6539 = vst.msk [vmem:[#allocation3 + $0x50] sm:$0xff] %vm934_vm3, %v19093_v29  ;;  %6540 = vst.msk [vmem:[#allocation3 + $0x58] sm:$0xff] %vm934_vm3, %v19093_v29  ;;  %14278 = vmatprep.subr.msk.mxu1 %vm1550_vm2, %v16008_v11 }
  0x47   : > { %6541 = vst.msk [vmem:[#allocation3 + $0x60] sm:$0xff] %vm934_vm3, %v19093_v29  ;;  %6542 = vst.msk [vmem:[#allocation3 + $0x68] sm:$0xff] %vm934_vm3, %v19093_v29  ;;  %14050 = vmatmul.mubr.msk.f32.vlgmr.msra.gmra.mxu0 %vm934_vm3, %v1920_v40 }
  0x48   : > { %6543 = vst.msk [vmem:[#allocation3 + $0x70] sm:$0xff] %vm934_vm3, %v19093_v29  ;;  %6544 = vst.msk [vmem:[#allocation3 + $0x78] sm:$0xff] %vm934_vm3, %v19093_v29  ;;  %14202 = vmatpush3.msk.msra.mxu0 %vm1550_vm2, %v12142_v9 }
  0x49   : > { %1149 = vperm.xlu1 %15370, %v337_v19   ;;  %1144 = vperm.xlu0 %15369, %v336_v20   ;;  %6545 = vst.msk [vmem:[#allocation3 + $0x80] sm:$0xff] %vm934_vm3, %v19093_v29  ;;  %6546 = vst.msk [vmem:[#allocation3 + $0x88] sm:$0xff] %vm934_vm3, %v19093_v29 }
  0x4a   : > { %6547 = vst.msk [vmem:[#allocation3 + $0x90] sm:$0xff] %vm934_vm3, %v19093_v29  ;;  %6548 = vst.msk [vmem:[#allocation3 + $0x98] sm:$0xff] %vm934_vm3, %v19093_v29 }
  0x4b   : > { %6549 = vst.msk [vmem:[#allocation3 + $0xa0] sm:$0xff] %vm934_vm3, %v19093_v29  ;;  %6550 = vst.msk [vmem:[#allocation3 + $0xa8] sm:$0xff] %vm934_vm3, %v19093_v29 }
  0x4c   : > { %6551 = vst.msk [vmem:[#allocation3 + $0xb0] sm:$0xff] %vm934_vm3, %v19093_v29  ;;  %6552 = vst.msk [vmem:[#allocation3 + $0xb8] sm:$0xff] %vm934_vm3, %v19093_v29 }
  0x4d   : > { %1159 = vperm.xlu1 %15370, %v339_v21   ;;  %1154 = vperm.xlu0 %15369, %v338_v22   ;;  %6553 = vst.msk [vmem:[#allocation3 + $0xc0] sm:$0xff] %vm934_vm3, %v19093_v29  ;;  %6554 = vst.msk [vmem:[#allocation3 + $0xc8] sm:$0xff] %vm934_vm3, %v19093_v29 }
  0x4e   : > { %6555 = vst.msk [vmem:[#allocation3 + $0xd0] sm:$0xff] %vm934_vm3, %v19093_v29  ;;  %6556 = vst.msk [vmem:[#allocation3 + $0xd8] sm:$0xff] %vm934_vm3, %v19093_v29 }
  0x4f   : > { %6557 = vst.msk [vmem:[#allocation3 + $0xe0] sm:$0xff] %vm934_vm3, %v19093_v29  ;;  %6558 = vst.msk [vmem:[#allocation3 + $0xe8] sm:$0xff] %vm934_vm3, %v19093_v29 }
  0x50   : > { %6559 = vst.msk [vmem:[#allocation3 + $0xf0] sm:$0xff] %vm934_vm3, %v19093_v29  ;;  %6560 = vst.msk [vmem:[#allocation3 + $0xf8] sm:$0xff] %vm934_vm3, %v19093_v29 }
  0x51   : > { %1169 = vperm.xlu1 %15370, %v341_v23   ;;  %1164 = vperm.xlu0 %15369, %v340_v24   ;;  %6561 = vst.msk [vmem:[#allocation3 + $0x100] sm:$0xff] %vm934_vm3, %v19093_v29  ;;  %6562 = vst.msk [vmem:[#allocation3 + $0x108] sm:$0xff] %vm934_vm3, %v19093_v29 }
  0x52   : > { %6563 = vst.msk [vmem:[#allocation3 + $0x110] sm:$0xff] %vm934_vm3, %v19093_v29  ;;  %6564 = vst.msk [vmem:[#allocation3 + $0x118] sm:$0xff] %vm934_vm3, %v19093_v29 }
  0x53   : > { %6565 = vst.msk [vmem:[#allocation3 + $0x120] sm:$0xff] %vm934_vm3, %v19093_v29  ;;  %6566 = vst.msk [vmem:[#allocation3 + $0x128] sm:$0xff] %vm934_vm3, %v19093_v29 }
  0x54   : > { %6567 = vst.msk [vmem:[#allocation3 + $0x130] sm:$0xff] %vm934_vm3, %v19093_v29  ;;  %6568 = vst.msk [vmem:[#allocation3 + $0x138] sm:$0xff] %vm934_vm3, %v19093_v29 }
  0x55   : > { %1179 = vperm.xlu1 %15370, %v343_v25   ;;  %1174 = vperm.xlu0 %15369, %v342_v26   ;;  %6569 = vst.msk [vmem:[#allocation3 + $0x140] sm:$0xff] %vm934_vm3, %v19093_v29  ;;  %6570 = vst.msk [vmem:[#allocation3 + $0x148] sm:$0xff] %vm934_vm3, %v19093_v29 }
  0x56   : > { %6571 = vst.msk [vmem:[#allocation3 + $0x150] sm:$0xff] %vm934_vm3, %v19093_v29  ;;  %6572 = vst.msk [vmem:[#allocation3 + $0x158] sm:$0xff] %vm934_vm3, %v19093_v29 }
  0x57   : > { %6573 = vst.msk [vmem:[#allocation3 + $0x160] sm:$0xff] %vm934_vm3, %v19093_v29  ;;  %6574 = vst.msk [vmem:[#allocation3 + $0x168] sm:$0xff] %vm934_vm3, %v19093_v29 }
  0x58   : > { %6575 = vst.msk [vmem:[#allocation3 + $0x170] sm:$0xff] %vm934_vm3, %v19093_v29  ;;  %6576 = vst.msk [vmem:[#allocation3 + $0x178] sm:$0xff] %vm934_vm3, %v19093_v29 }
  0x59   : > { %6577 = vst.msk [vmem:[#allocation3 + $0x180] sm:$0xff] %vm934_vm3, %v19093_v29  ;;  %6578 = vst.msk [vmem:[#allocation3 + $0x188] sm:$0xff] %vm934_vm3, %v19093_v29  ;;  %1189 = vperm.xlu1 %15370, %v15672_v27   ;;  %1184 = vperm.xlu0 %15369, %v15677_v28  }
  0x5a   : > { %6579 = vst.msk [vmem:[#allocation3 + $0x190] sm:$0xff] %vm934_vm3, %v19093_v29  ;;  %6580 = vst.msk [vmem:[#allocation3 + $0x198] sm:$0xff] %vm934_vm3, %v19093_v29 }
  0x5b   : > { %6581 = vst.msk [vmem:[#allocation3 + $0x1a0] sm:$0xff] %vm934_vm3, %v19093_v29  ;;  %6582 = vst.msk [vmem:[#allocation3 + $0x1a8] sm:$0xff] %vm934_vm3, %v19093_v29 }
  0x5c   : > { %6583 = vst.msk [vmem:[#allocation3 + $0x1b0] sm:$0xff] %vm934_vm3, %v19093_v29 }
  0x5d   : > { %1199 = vperm.xlu1 %15370, %v347_v30   ;;  %1194 = vperm.xlu0 %15369, %v346_v31  }
  0x61   : > { %1209 = vperm.xlu1 %15370, %v349_v32   ;;  %1204 = vperm.xlu0 %15369, %v348_v33  }
  0x65   : > { %1219 = vperm.xlu1 %15370, %v351_v37   ;;  %1214 = vperm.xlu0 %15369, %v350_v38  }
  0x69   : > { %1229 = vperm.xlu1 %15370, %v353_v41   ;;  %1224 = vperm.xlu0 %15369, %v352_v42  }
  0x6d   : > { %1239 = vperm.xlu1 %15370, %v355_v44   ;;  %1234 = vperm.xlu0 %15369, %v354_v45  }
  0x88   : > { %v15945_v46 = vpop.permute.xlu1 %1004  ;;  %v15947_v47 = vpop.permute.xlu0 %994 }
  0x89   : > { %19145 = vst [vmem:[#allocation4_spill] sm:$0xff] %v15945_v46  ;;  %19146 = vst [vmem:[#allocation5_spill] sm:$0xff] %v15947_v47 }
  0x8c   : > { %v15949_v48 = vpop.permute.xlu1 %1009  ;;  %v15951_v49 = vpop.permute.xlu0 %999 }
  0x8d   : > { %19147 = vst [vmem:[#allocation6_spill] sm:$0xff] %v15949_v48  ;;  %19148 = vst [vmem:[#allocation7_spill] sm:$0xff] %v15951_v49 }
  0x90   : > { %v15953_v50 = vpop.permute.xlu1 %1019  ;;  %v15955_v51 = vpop.permute.xlu0 %1014 }
  0x91   : > { %19149 = vst [vmem:[#allocation8_spill] sm:$0xff] %v15953_v50  ;;  %19150 = vst [vmem:[#allocation9_spill] sm:$0xff] %v15955_v51 }
  0x94   : > { %v15957_v52 = vpop.permute.xlu1 %1029  ;;  %v15959_v53 = vpop.permute.xlu0 %1024 }
  0x95   : > { %19151 = vst [vmem:[#allocation10_spill] sm:$0xff] %v15957_v52  ;;  %19152 = vst [vmem:[#allocation11_spill] sm:$0xff] %v15959_v53 }
  0x98   : > { %v15961_v54 = vpop.permute.xlu1 %1039  ;;  %v15963_v55 = vpop.permute.xlu0 %1034 }
  0x99   : > { %19153 = vst [vmem:[#allocation12_spill] sm:$0xff] %v15961_v54  ;;  %19154 = vst [vmem:[#allocation13_spill] sm:$0xff] %v15963_v55 }
  0x9c   : > { %v15965_v56 = vpop.permute.xlu1 %1049  ;;  %v15967_v57 = vpop.permute.xlu0 %1044 }
  0x9d   : > { %19155 = vst [vmem:[#allocation14_spill] sm:$0xff] %v15965_v56  ;;  %19156 = vst [vmem:[#allocation15_spill] sm:$0xff] %v15967_v57 }
  0xa0   : > { %v15969_v58 = vpop.permute.xlu1 %1059  ;;  %v15971_v59 = vpop.permute.xlu0 %1054 }
  0xa1   : > { %19157 = vst [vmem:[#allocation16_spill] sm:$0xff] %v15969_v58  ;;  %19158 = vst [vmem:[#allocation17_spill] sm:$0xff] %v15971_v59 }
  0xa4   : > { %v15973_v60 = vpop.permute.xlu1 %1069  ;;  %v15975_v61 = vpop.permute.xlu0 %1064 }
  0xa5   : > { %19159 = vst [vmem:[#allocation18_spill] sm:$0xff] %v15973_v60  ;;  %19160 = vst [vmem:[#allocation19_spill] sm:$0xff] %v15975_v61 }
  0xa8   : > { %v15977_v62 = vpop.permute.xlu1 %1079  ;;  %v15979_v63 = vpop.permute.xlu0 %1074 }
  0xa9   : > { %19161 = vst [vmem:[#allocation20_spill] sm:$0xff] %v15977_v62  ;;  %19162 = vst [vmem:[#allocation21_spill] sm:$0xff] %v15979_v63 }
  0xac   : > { %v15981_v0 = vpop.permute.xlu1 %1089  ;;  %v15983_v1 = vpop.permute.xlu0 %1084 }
  0xad   : > { %19163 = vst [vmem:[#allocation22_spill] sm:$0xff] %v15981_v0  ;;  %19164 = vst [vmem:[#allocation23_spill] sm:$0xff] %v15983_v1 }
  0xb0   : > { %v15985_v2 = vpop.permute.xlu1 %1099  ;;  %v15987_v3 = vpop.permute.xlu0 %1094 }
  0xb1   : > { %19165 = vst [vmem:[#allocation24_spill] sm:$0xff] %v15985_v2  ;;  %19166 = vst [vmem:[#allocation25_spill] sm:$0xff] %v15987_v3 }
  0xb4   : > { %v15989_v4 = vpop.permute.xlu1 %1109  ;;  %v15991_v5 = vpop.permute.xlu0 %1104 }
  0xb5   : > { %19167 = vst [vmem:[#allocation26_spill] sm:$0xff] %v15989_v4  ;;  %19168 = vst [vmem:[#allocation27_spill] sm:$0xff] %v15991_v5 }
  0xb8   : > { %v15993_v6 = vpop.permute.xlu1 %1119  ;;  %v15995_v7 = vpop.permute.xlu0 %1114 }
  0xb9   : > { %19169 = vst [vmem:[#allocation28_spill] sm:$0xff] %v15993_v6  ;;  %19170 = vst [vmem:[#allocation29_spill] sm:$0xff] %v15995_v7 }
  0xbc   : > { %v15997_v8 = vpop.permute.xlu1 %1129  ;;  %v16002_v10 = vpop.permute.xlu0 %1124 }
  0xbd   : > { %19171 = vst [vmem:[#allocation30_spill] sm:$0xff] %v15997_v8  ;;  %19172 = vst [vmem:[#allocation31_spill] sm:$0xff] %v16002_v10 }
  0xc0   : > { %v16013_v12 = vpop.permute.xlu1 %1139  ;;  %v16015_v13 = vpop.permute.xlu0 %1134 }
  0xc1   : > { %19173 = vst [vmem:[#allocation32_spill] sm:$0xff] %v16013_v12  ;;  %19174 = vst [vmem:[#allocation33_spill] sm:$0xff] %v16015_v13 }
  0xc4   : > { %v16017_v14 = vpop.permute.xlu1 %1149  ;;  %v16019_v15 = vpop.permute.xlu0 %1144 }
  0xc5   : > { %19175 = vst [vmem:[#allocation34_spill] sm:$0xff] %v16017_v14  ;;  %19176 = vst [vmem:[#allocation35_spill] sm:$0xff] %v16019_v15 }
  0xc8   : > { %v16026_v17 = vpop.permute.xlu1 %1159  ;;  %v16030_v24 = vpop.permute.xlu0 %1154 }
  0xc9   : > { %19177 = vst [vmem:[#allocation36_spill] sm:$0xff] %v16026_v17  ;;  %19178 = vst [vmem:[#allocation37_spill] sm:$0xff] %v16030_v24 }
  0xcc   : > { %v16034_v32 = vpop.permute.xlu1 %1169 }
  0xcd   : > { %19179 = vst [vmem:[#allocation38_spill] sm:$0xff] %v16034_v32 }
  0xd3   : > { %v13897_v18 = vpop.f32.mrf.mxu0  ;;  %v13936_v19 = vpop.f32.mrf.mxu1 }
  0xd4   : > { %v641_v20 = vadd.f32 %v13897_v18, %v16024_v16  ;;  %v771_v21 = vadd.f32 %v13936_v19, %v16024_v16 }
  0xd5   : > { %v635_v22 = vpop.f32.mrf.mxu0  ;;  %v765_v23 = vpop.f32.mrf.mxu1 }
  0xd6   : > { %v885_v25 = vmax.f32 %v641_v20, 0.0  ;;  %v911_v26 = vmax.f32 %v771_v21, 0.0  ;;  %v636_v27 = vadd.f32 %v16024_v16, %v635_v22  ;;  %v766_v28 = vadd.f32 %v16024_v16, %v765_v23  ;;  %v16046_v20 = vpop.permute.xlu0 %1164 }
  0xd7   : > { %v13900_v30 = vpop.f32.mrf.mxu0  ;;  %v13939_v31 = vpop.f32.mrf.mxu1  ;;  %19180 = vst [vmem:[#allocation39_spill] sm:$0xff] %v16046_v20 }
  0xd8   : > { %v1243_v33 = vmul.f32 %v15951_v49, %v885_v25  ;;  %v1269_v34 = vmul.f32 %v15997_v8, %v911_v26  ;;  %v884_v35 = vmax.f32 %v636_v27, 0.0  ;;  %v910_v36 = vmax.f32 %v766_v28, 0.0 }
  0xd9   : > { %v651_v37 = vadd.f32 %v13900_v30, %v16024_v16  ;;  %v781_v38 = vadd.f32 %v13939_v31, %v16024_v16  ;;  %v645_v39 = vpop.f32.mrf.mxu0  ;;  %v775_v40 = vpop.f32.mrf.mxu1 }
  0xda   : > { %1293 = vst.msk [vmem:[#allocation2 + $0x20] sm:$0xff] %vm934_vm3, %v1243_v33  ;;  %1319 = vst.msk [vmem:[#allocation2 + $0xf0] sm:$0xff] %vm934_vm3, %v1269_v34  ;;  %v1242_v41 = vmul.f32 %v15947_v47, %v884_v35  ;;  %v1268_v42 = vmul.f32 %v16002_v10, %v910_v36  ;;  %v646_v43 = vadd.f32 %v16024_v16, %v645_v39  ;;  %v16054_v31 = vpop.permute.xlu1 %1179 }
  0xdb   : > { %v776_v44 = vadd.f32 %v16024_v16, %v775_v40  ;;  %v887_v45 = vmax.f32 %v651_v37, 0.0  ;;  %v913_v9 = vmax.f32 %v781_v38, 0.0  ;;  %v13903_v18 = vpop.f32.mrf.mxu0  ;;  %v13942_v19 = vpop.f32.mrf.mxu1  ;;  %19181 = vst [vmem:[#allocation40_spill] sm:$0xff] %v16054_v31 }
  0xdc   : > { %1292 = vst.msk [vmem:[#allocation2 + $0x18] sm:$0xff] %vm934_vm3, %v1242_v41  ;;  %1318 = vst.msk [vmem:[#allocation2 + $0xe8] sm:$0xff] %vm934_vm3, %v1268_v42  ;;  %v886_v21 = vmax.f32 %v646_v43, 0.0  ;;  %v661_v23 = vadd.f32 %v13903_v18, %v16024_v16  ;;  %v791_v25 = vadd.f32 %v13942_v19, %v16024_v16 }
  0xdd   : > { %v912_v22 = vmax.f32 %v776_v44, 0.0  ;;  %v1245_v26 = vmul.f32 %v15949_v48, %v887_v45  ;;  %v1271_v27 = vmul.f32 %v16013_v12, %v913_v9  ;;  %v655_v28 = vpop.f32.mrf.mxu0  ;;  %v785_v30 = vpop.f32.mrf.mxu1 }
  0xde   : > { %v1244_v33 = vmul.f32 %v15945_v46, %v886_v21  ;;  %v889_v35 = vmax.f32 %v661_v23, 0.0  ;;  %v915_v36 = vmax.f32 %v791_v25, 0.0  ;;  %v656_v37 = vadd.f32 %v16024_v16, %v655_v28  ;;  %v16068_v21 = vpop.permute.xlu0 %1174 }
  0xdf   : > { %v1270_v34 = vmul.f32 %v16015_v13, %v912_v22  ;;  %1295 = vst.msk [vmem:[#allocation2 + $0x30] sm:$0xff] %vm934_vm3, %v1245_v26  ;;  %1321 = vst.msk [vmem:[#allocation2 + $0x100] sm:$0xff] %vm934_vm3, %v1271_v27  ;;  %v786_v38 = vadd.f32 %v16024_v16, %v785_v30  ;;  %v13906_v39 = vpop.f32.mrf.mxu0  ;;  %v13945_v40 = vpop.f32.mrf.mxu1 }
  0xe0   : > { %1294 = vst.msk [vmem:[#allocation2 + $0x28] sm:$0xff] %vm934_vm3, %v1244_v33  ;;  %v1247_v41 = vmul.f32 %v15953_v50, %v889_v35  ;;  %v1273_v42 = vmul.f32 %v16017_v14, %v915_v36  ;;  %v671_v43 = vadd.f32 %v13906_v39, %v16024_v16  ;;  %v801_v44 = vadd.f32 %v13945_v40, %v16024_v16 }
  0xe1   : > { %1320 = vst.msk [vmem:[#allocation2 + $0xf8] sm:$0xff] %vm934_vm3, %v1270_v34  ;;  %v888_v45 = vmax.f32 %v656_v37, 0.0  ;;  %v914_v9 = vmax.f32 %v786_v38, 0.0  ;;  %v665_v18 = vpop.f32.mrf.mxu0  ;;  %v795_v19 = vpop.f32.mrf.mxu1  ;;  %19182 = vst [vmem:[#allocation41_spill] sm:$0xff] %v16068_v21 }
  0xe2   : > { %1297 = vst.msk [vmem:[#allocation2 + $0x40] sm:$0xff] %vm934_vm3, %v1247_v41  ;;  %1323 = vst.msk [vmem:[#allocation2 + $0x110] sm:$0xff] %vm934_vm3, %v1273_v42  ;;  %v891_v22 = vmax.f32 %v671_v43, 0.0  ;;  %v917_v23 = vmax.f32 %v801_v44, 0.0  ;;  %v666_v25 = vadd.f32 %v16024_v16, %v665_v18  ;;  %v796_v26 = vadd.f32 %v16024_v16, %v795_v19  ;;  %v16076_v37 = vpop.permute.xlu1 %1189 }
  0xe3   : > { %v1246_v27 = vmul.f32 %v15955_v51, %v888_v45  ;;  %v1272_v28 = vmul.f32 %v16019_v15, %v914_v9  ;;  %v13909_v30 = vpop.f32.mrf.mxu0  ;;  %v13948_v33 = vpop.f32.mrf.mxu1  ;;  %v1351_v34 = vld [vmem:[#allocation2 + $0x13] sm:$0xff]  ;;  %v1352_v36 = vld [vmem:[#allocation2 + $0x1b] sm:$0xff]  ;;  %19183 = vst [vmem:[#allocation42_spill] sm:$0xff] %v16076_v37 }
  0xe4   : > { %v1921_v35 = vld [vmem:[#allocation2 + $0x14] sm:$0xff]  ;;  %v1249_v38 = vmul.f32 %v15957_v52, %v891_v22  ;;  %v1275_v39 = vmul.f32 %v16026_v17, %v917_v23  ;;  %v890_v40 = vmax.f32 %v666_v25, 0.0  ;;  %v916_v41 = vmax.f32 %v796_v26, 0.0  ;;  %13975 = vmatprep.mubr.msk.f32.mxu1 %vm934_vm3, %v1351_v34  ;;  %v1922_v42 = vld [vmem:[#allocation2 + $0x1c] sm:$0xff] }
  0xe5   : > { %14052 = vmatprep.mubr.msk.f32.mxu0 %vm934_vm3, %v1921_v35  ;;  %1296 = vst.msk [vmem:[#allocation2 + $0x38] sm:$0xff] %vm934_vm3, %v1246_v27  ;;  %1322 = vst.msk [vmem:[#allocation2 + $0x108] sm:$0xff] %vm934_vm3, %v1272_v28  ;;  %v681_v43 = vadd.f32 %v13909_v30, %v16024_v16  ;;  %v811_v44 = vadd.f32 %v13948_v33, %v16024_v16  ;;  %v675_v45 = vpop.f32.mrf.mxu0  ;;  %v805_v9 = vpop.f32.mrf.mxu1  ;;  %13976 = vmatmul.mubr.msk.f32.gmra.mxu1 %vm934_vm3, %v1352_v36 }
  0xe6   : > { %14053 = vmatmul.mubr.msk.f32.gmra.mxu0 %vm934_vm3, %v1922_v42  ;;  %1299 = vst.msk [vmem:[#allocation2 + $0x50] sm:$0xff] %vm934_vm3, %v1249_v38  ;;  %1325 = vst.msk [vmem:[#allocation2 + $0x120] sm:$0xff] %vm934_vm3, %v1275_v39  ;;  %v1248_v18 = vmul.f32 %v15959_v53, %v890_v40  ;;  %v1274_v19 = vmul.f32 %v16030_v24, %v916_v41  ;;  %v676_v22 = vadd.f32 %v16024_v16, %v675_v45  ;;  %v16094_v35 = vpop.permute.xlu0 %1184 }
  0xe7   : > { %v806_v23 = vadd.f32 %v16024_v16, %v805_v9  ;;  %v893_v25 = vmax.f32 %v681_v43, 0.0  ;;  %v919_v26 = vmax.f32 %v811_v44, 0.0  ;;  %v13912_v27 = vpop.f32.mrf.mxu0  ;;  %v13951_v28 = vpop.f32.mrf.mxu1  ;;  %v1353_v30 = vld [vmem:[#allocation2 + $0x23] sm:$0xff]  ;;  %v1354_v34 = vld [vmem:[#allocation2 + $0x2b] sm:$0xff]  ;;  %19184 = vst [vmem:[#allocation43_spill] sm:$0xff] %v16094_v35 }
  0xe8   : > { %v1923_v33 = vld [vmem:[#allocation2 + $0x24] sm:$0xff]  ;;  %1298 = vst.msk [vmem:[#allocation2 + $0x48] sm:$0xff] %vm934_vm3, %v1248_v18  ;;  %1324 = vst.msk [vmem:[#allocation2 + $0x118] sm:$0xff] %vm934_vm3, %v1274_v19  ;;  %v892_v36 = vmax.f32 %v676_v22, 0.0  ;;  %v691_v39 = vadd.f32 %v13912_v27, %v16024_v16  ;;  %v821_v40 = vadd.f32 %v13951_v28, %v16024_v16  ;;  %13978 = vmatprep.mubr.msk.f32.mxu1 %vm934_vm3, %v1353_v30  ;;  %v1924_v41 = vld [vmem:[#allocation2 + $0x2c] sm:$0xff]  ;;  %v16106_v9 = vpop.permute.xlu1 %1199 }
  0xe9   : > { %v918_v38 = vmax.f32 %v806_v23, 0.0  ;;  %14055 = vmatprep.mubr.msk.f32.mxu0 %vm934_vm3, %v1923_v33  ;;  %v1251_v42 = vmul.f32 %v15961_v54, %v893_v25  ;;  %v1277_v43 = vmul.f32 %v16034_v32, %v919_v26  ;;  %v685_v44 = vpop.f32.mrf.mxu0  ;;  %v815_v45 = vpop.f32.mrf.mxu1  ;;  %13979 = vmatmul.mubr.msk.f32.gmra.mxu1 %vm934_vm3, %v1354_v34  ;;  %19185 = vst [vmem:[#allocation44_spill] sm:$0xff] %v16106_v9 }
  0xea   : > { %14056 = vmatmul.mubr.msk.f32.gmra.mxu0 %vm934_vm3, %v1924_v41  ;;  %v1250_v18 = vmul.f32 %v15963_v55, %v892_v36  ;;  %v895_v22 = vmax.f32 %v691_v39, 0.0  ;;  %v921_v23 = vmax.f32 %v821_v40, 0.0  ;;  %v686_v25 = vadd.f32 %v16024_v16, %v685_v44 }
  0xeb   : > { %v1276_v19 = vmul.f32 %v16046_v20, %v918_v38  ;;  %1301 = vst.msk [vmem:[#allocation2 + $0x60] sm:$0xff] %vm934_vm3, %v1251_v42  ;;  %1327 = vst.msk [vmem:[#allocation2 + $0x130] sm:$0xff] %vm934_vm3, %v1277_v43  ;;  %v816_v26 = vadd.f32 %v16024_v16, %v815_v45  ;;  %v13915_v27 = vpop.f32.mrf.mxu0  ;;  %v13954_v28 = vpop.f32.mrf.mxu1  ;;  %v19195_v55 = vmov 0.0  }
  0xec   : > { %1300 = vst.msk [vmem:[#allocation2 + $0x58] sm:$0xff] %vm934_vm3, %v1250_v18  ;;  %v1253_v30 = vmul.f32 %v15965_v56, %v895_v22  ;;  %v1279_v33 = vmul.f32 %v16054_v31, %v921_v23  ;;  %v701_v34 = vadd.f32 %v13915_v27, %v16024_v16  ;;  %v831_v36 = vadd.f32 %v13954_v28, %v16024_v16  ;;  %v1355_v38 = vld [vmem:[#allocation2 + $0x33] sm:$0xff]  ;;  %v1356_v40 = vld [vmem:[#allocation2 + $0x3b] sm:$0xff]  ;;  %v16122_v18 = vpop.permute.xlu0 %1194 }
  0xed   : > { %1326 = vst.msk [vmem:[#allocation2 + $0x128] sm:$0xff] %vm934_vm3, %v1276_v19  ;;  %v1925_v39 = vld [vmem:[#allocation2 + $0x34] sm:$0xff]  ;;  %v894_v41 = vmax.f32 %v686_v25, 0.0  ;;  %v920_v42 = vmax.f32 %v816_v26, 0.0  ;;  %13981 = vmatprep.mubr.msk.f32.mxu1 %vm934_vm3, %v1355_v38  ;;  %v695_v43 = vpop.f32.mrf.mxu0  ;;  %v825_v44 = vpop.f32.mrf.mxu1  ;;  %v1926_v45 = vld [vmem:[#allocation2 + $0x3c] sm:$0xff]  ;;  %19186 = vst [vmem:[#allocation45_spill] sm:$0xff] %v16122_v18 }
  0xee   : > { %14058 = vmatprep.mubr.msk.f32.mxu0 %vm934_vm3, %v1925_v39  ;;  %1303 = vst.msk [vmem:[#allocation2 + $0x70] sm:$0xff] %vm934_vm3, %v1253_v30  ;;  %1329 = vst.msk [vmem:[#allocation2 + $0x140] sm:$0xff] %vm934_vm3, %v1279_v33  ;;  %v897_v19 = vmax.f32 %v701_v34, 0.0  ;;  %v923_v22 = vmax.f32 %v831_v36, 0.0  ;;  %v696_v23 = vadd.f32 %v16024_v16, %v695_v43  ;;  %v826_v25 = vadd.f32 %v16024_v16, %v825_v44  ;;  %v16132_v33 = vpop.permute.xlu1 %1209 }
  0xef   : > { %13982 = vmatmul.mubr.msk.f32.gmra.mxu1 %vm934_vm3, %v1356_v40  ;;  %14059 = vmatmul.mubr.msk.f32.gmra.mxu0 %vm934_vm3, %v1926_v45  ;;  %v1252_v26 = vmul.f32 %v15967_v57, %v894_v41  ;;  %v1278_v27 = vmul.f32 %v16068_v21, %v920_v42  ;;  %v13918_v28 = vpop.f32.mrf.mxu0  ;;  %v13957_v38 = vpop.f32.mrf.mxu1  ;;  %v1357_v39 = vld [vmem:[#allocation2 + $0x43] sm:$0xff]  ;;  %v1358_v29 = vld [vmem:[#allocation2 + $0x4b] sm:$0xff]  ;;  %19187 = vst [vmem:[#allocation46_spill] sm:$0xff] %v16132_v33  ;;  %991 = vst.msk [vmem:[#allocation2 + $0x1b8] sm:$0x1f] %vm990_vm4, %v19195_v55 }
  0xf0   : > { %v1927_v30 = vld [vmem:[#allocation2 + $0x44] sm:$0xff]  ;;  %v1255_v34 = vmul.f32 %v15969_v58, %v897_v19  ;;  %v1281_v36 = vmul.f32 %v16076_v37, %v923_v22  ;;  %v896_v43 = vmax.f32 %v696_v23, 0.0  ;;  %v922_v44 = vmax.f32 %v826_v25, 0.0  ;;  %13984 = vmatprep.mubr.msk.f32.mxu1 %vm934_vm3, %v1357_v39  ;;  %v1928_v40 = vld [vmem:[#allocation2 + $0x4c] sm:$0xff]  ;;  %6584 = vst.msk [vmem:[#allocation3 + $0x1b8] sm:$0x1f] %vm990_vm4, %v19195_v55 }
  0xf1   : > { %14061 = vmatprep.mubr.msk.f32.mxu0 %vm934_vm3, %v1927_v30  ;;  %1302 = vst.msk [vmem:[#allocation2 + $0x68] sm:$0xff] %vm934_vm3, %v1252_v26  ;;  %1328 = vst.msk [vmem:[#allocation2 + $0x138] sm:$0xff] %vm934_vm3, %v1278_v27  ;;  %v711_v41 = vadd.f32 %v13918_v28, %v16024_v16  ;;  %v841_v42 = vadd.f32 %v13957_v38, %v16024_v16  ;;  %v705_v45 = vpop.f32.mrf.mxu0  ;;  %v835_v21 = vpop.f32.mrf.mxu1 }
  0xf2   : > { %1305 = vst.msk [vmem:[#allocation2 + $0x80] sm:$0xff] %vm934_vm3, %v1255_v34  ;;  %1331 = vst.msk [vmem:[#allocation2 + $0x150] sm:$0xff] %vm934_vm3, %v1281_v36  ;;  %v1254_v19 = vmul.f32 %v15971_v59, %v896_v43  ;;  %v1280_v22 = vmul.f32 %v16094_v35, %v922_v44  ;;  %v706_v23 = vadd.f32 %v16024_v16, %v705_v45  ;;  %v16150_v36 = vpop.permute.xlu0 %1204  ;;  %v3664_v58 = vld [vmem:[#allocation2 + $0x130] sm:$0xff] }
  0xf3   : > { %v836_v25 = vadd.f32 %v16024_v16, %v835_v21  ;;  %13985 = vmatmul.mubr.msk.f32.gmra.mxu1 %vm934_vm3, %v1358_v29  ;;  %v899_v26 = vmax.f32 %v711_v41, 0.0  ;;  %v925_v27 = vmax.f32 %v841_v42, 0.0  ;;  %14062 = vmatmul.mubr.msk.f32.gmra.mxu0 %vm934_vm3, %v1928_v40  ;;  %v13921_v28 = vpop.f32.mrf.mxu0  ;;  %v13960_v38 = vpop.f32.mrf.mxu1  ;;  %v1359_v39 = vld [vmem:[#allocation2 + $0x53] sm:$0xff]  ;;  %v1360_v34 = vld [vmem:[#allocation2 + $0x5b] sm:$0xff]  ;;  %19188 = vst [vmem:[#allocation47_spill] sm:$0xff] %v16150_v36 }
  0xf4   : > { %v1929_v30 = vld [vmem:[#allocation2 + $0x54] sm:$0xff]  ;;  %1304 = vst.msk [vmem:[#allocation2 + $0x78] sm:$0xff] %vm934_vm3, %v1254_v19  ;;  %1330 = vst.msk [vmem:[#allocation2 + $0x148] sm:$0xff] %vm934_vm3, %v1280_v22  ;;  %v898_v43 = vmax.f32 %v706_v23, 0.0  ;;  %v721_v21 = vadd.f32 %v13921_v28, %v16024_v16  ;;  %v851_v29 = vadd.f32 %v13960_v38, %v16024_v16  ;;  %13987 = vmatprep.mubr.msk.f32.mxu1 %vm934_vm3, %v1359_v39  ;;  %v1930_v40 = vld [vmem:[#allocation2 + $0x5c] sm:$0xff]  ;;  %v16160_v19 = vpop.permute.xlu1 %1219 }
  0xf5   : > { %v924_v44 = vmax.f32 %v836_v25, 0.0  ;;  %14064 = vmatprep.mubr.msk.f32.mxu0 %vm934_vm3, %v1929_v30  ;;  %v1257_v41 = vmul.f32 %v15973_v60, %v899_v26  ;;  %v1283_v42 = vmul.f32 %v16106_v9, %v925_v27  ;;  %v715_v45 = vpop.f32.mrf.mxu0  ;;  %v845_v35 = vpop.f32.mrf.mxu1  ;;  %19189 = vst [vmem:[#allocation48_spill] sm:$0xff] %v16160_v19  ;;  %v3638_v9 = vld [vmem:[#allocation2 + $0x60] sm:$0xff]  ;;  %v3640_v31 = vld [vmem:[#allocation2 + $0x70] sm:$0xff] }
  0xf6   : > { %v1256_v22 = vmul.f32 %v15975_v61, %v898_v43  ;;  %v901_v25 = vmax.f32 %v721_v21, 0.0  ;;  %v927_v28 = vmax.f32 %v851_v29, 0.0  ;;  %v716_v26 = vadd.f32 %v16024_v16, %v715_v45  ;;  %v3662_v60 = vld [vmem:[#allocation2 + $0x120] sm:$0xff] }
  0xf7   : > { %v1282_v23 = vmul.f32 %v16122_v18, %v924_v44  ;;  %13988 = vmatmul.mubr.msk.f32.gmra.mxu1 %vm934_vm3, %v1360_v34  ;;  %1307 = vst.msk [vmem:[#allocation2 + $0x90] sm:$0xff] %vm934_vm3, %v1257_v41  ;;  %1333 = vst.msk [vmem:[#allocation2 + $0x160] sm:$0xff] %vm934_vm3, %v1283_v42  ;;  %v846_v27 = vadd.f32 %v16024_v16, %v845_v35  ;;  %14065 = vmatmul.mubr.msk.f32.gmra.mxu0 %vm934_vm3, %v1930_v40  ;;  %v13924_v38 = vpop.f32.mrf.mxu0  ;;  %v13963_v39 = vpop.f32.mrf.mxu1  ;;  %v3666_v56 = vld [vmem:[#allocation2 + $0x140] sm:$0xff] }
  0xf8   : > { %1306 = vst.msk [vmem:[#allocation2 + $0x88] sm:$0xff] %vm934_vm3, %v1256_v22  ;;  %v1259_v30 = vmul.f32 %v15977_v62, %v901_v25  ;;  %v1285_v34 = vmul.f32 %v16132_v33, %v927_v28  ;;  %v731_v43 = vadd.f32 %v13924_v38, %v16024_v16  ;;  %v861_v44 = vadd.f32 %v13963_v39, %v16024_v16  ;;  %v1361_v21 = vld [vmem:[#allocation2 + $0x63] sm:$0xff]  ;;  %v1362_v41 = vld [vmem:[#allocation2 + $0x6b] sm:$0xff] }
  0xf9   : > { %1332 = vst.msk [vmem:[#allocation2 + $0x158] sm:$0xff] %vm934_vm3, %v1282_v23  ;;  %v1931_v29 = vld [vmem:[#allocation2 + $0x64] sm:$0xff]  ;;  %v900_v35 = vmax.f32 %v716_v26, 0.0  ;;  %v926_v42 = vmax.f32 %v846_v27, 0.0  ;;  %13990 = vmatprep.mubr.msk.f32.mxu1 %vm934_vm3, %v1361_v21  ;;  %v725_v40 = vpop.f32.mrf.mxu0  ;;  %v855_v45 = vpop.f32.mrf.mxu1  ;;  %v1932_v22 = vld [vmem:[#allocation2 + $0x6c] sm:$0xff] }
  0xfa   : > { %14067 = vmatprep.mubr.msk.f32.mxu0 %vm934_vm3, %v1931_v29  ;;  %v16178_v23 = vpop.permute.xlu0 %1214  ;;  %1309 = vst.msk [vmem:[#allocation2 + $0xa0] sm:$0xff] %vm934_vm3, %v1259_v30  ;;  %1335 = vst.msk [vmem:[#allocation2 + $0x170] sm:$0xff] %vm934_vm3, %v1285_v34  ;;  %v903_v25 = vmax.f32 %v731_v43, 0.0  ;;  %v929_v28 = vmax.f32 %v861_v44, 0.0  ;;  %v726_v38 = vadd.f32 %v16024_v16, %v725_v40  ;;  %v856_v26 = vadd.f32 %v16024_v16, %v855_v45  ;;  %v16188_v34 = vpop.permute.xlu1 %1229  ;;  %v3642_v32 = vld [vmem:[#allocation2 + $0x80] sm:$0xff]  ;;  %v3660_v62 = vld [vmem:[#allocation2 + $0x110] sm:$0xff] }
  0xfb   : > { %19190 = vst [vmem:[#allocation49_spill] sm:$0xff] %v16178_v23  ;;  %13991 = vmatmul.mubr.msk.f32.gmra.mxu1 %vm934_vm3, %v1362_v41  ;;  %v1258_v27 = vmul.f32 %v15979_v63, %v900_v35  ;;  %v1284_v39 = vmul.f32 %v16150_v36, %v926_v42  ;;  %14068 = vmatmul.mubr.msk.f32.gmra.mxu0 %vm934_vm3, %v1932_v22  ;;  %v13927_v21 = vpop.f32.mrf.mxu0  ;;  %v13966_v29 = vpop.f32.mrf.mxu1  ;;  %v1363_v33 = vld [vmem:[#allocation2 + $0x73] sm:$0xff]  ;;  %v1364_v18 = vld [vmem:[#allocation2 + $0x7b] sm:$0xff]  ;;  %19191 = vst [vmem:[#allocation50_spill] sm:$0xff] %v16188_v34 }
  0xfc   : > { %v1933_v30 = vld [vmem:[#allocation2 + $0x74] sm:$0xff]  ;;  %v1261_v43 = vmul.f32 %v15981_v0, %v903_v25  ;;  %v1287_v44 = vmul.f32 %v16160_v19, %v929_v28  ;;  %v902_v40 = vmax.f32 %v726_v38, 0.0  ;;  %v928_v45 = vmax.f32 %v856_v26, 0.0  ;;  %13993 = vmatprep.mubr.msk.f32.mxu1 %vm934_vm3, %v1363_v33  ;;  %v1934_v41 = vld [vmem:[#allocation2 + $0x7c] sm:$0xff] }
  0xfd   : > { %14070 = vmatprep.mubr.msk.f32.mxu0 %vm934_vm3, %v1933_v30  ;;  %1308 = vst.msk [vmem:[#allocation2 + $0x98] sm:$0xff] %vm934_vm3, %v1258_v27  ;;  %1334 = vst.msk [vmem:[#allocation2 + $0x168] sm:$0xff] %vm934_vm3, %v1284_v39  ;;  %v741_v35 = vadd.f32 %v13927_v21, %v16024_v16  ;;  %v871_v42 = vadd.f32 %v13966_v29, %v16024_v16  ;;  %v735_v22 = vpop.f32.mrf.mxu0  ;;  %v865_v36 = vpop.f32.mrf.mxu1  ;;  %v3668_v53 = vld [vmem:[#allocation2 + $0x150] sm:$0xff] }
  0xfe   : > { %1311 = vst.msk [vmem:[#allocation2 + $0xb0] sm:$0xff] %vm934_vm3, %v1261_v43  ;;  %1337 = vst.msk [vmem:[#allocation2 + $0x180] sm:$0xff] %vm934_vm3, %v1287_v44  ;;  %v1260_v25 = vmul.f32 %v15983_v1, %v902_v40  ;;  %v1286_v33 = vmul.f32 %v16178_v23, %v928_v45  ;;  %v736_v28 = vadd.f32 %v16024_v16, %v735_v22  ;;  %v16206_v44 = vpop.permute.xlu0 %1224  ;;  %v3644_v17 = vld [vmem:[#allocation2 + $0x90] sm:$0xff]  ;;  %v3670_v52 = vld [vmem:[#allocation2 + $0x160] sm:$0xff] }
  0xff   : > { %v866_v38 = vadd.f32 %v16024_v16, %v865_v36  ;;  %13994 = vmatmul.mubr.msk.f32.gmra.mxu1 %vm934_vm3, %v1364_v18  ;;  %v905_v26 = vmax.f32 %v741_v35, 0.0  ;;  %v931_v27 = vmax.f32 %v871_v42, 0.0  ;;  %14071 = vmatmul.mubr.msk.f32.gmra.mxu0 %vm934_vm3, %v1934_v41  ;;  %v13930_v39 = vpop.f32.mrf.mxu0  ;;  %v13969_v21 = vpop.f32.mrf.mxu1  ;;  %v1365_v29 = vld [vmem:[#allocation2 + $0x83] sm:$0xff]  ;;  %v1366_v43 = vld [vmem:[#allocation2 + $0x8b] sm:$0xff]  ;;  %19192 = vst [vmem:[#allocation51_spill] sm:$0xff] %v16206_v44 }
 0x100   : > { %v1935_v30 = vld [vmem:[#allocation2 + $0x84] sm:$0xff]  ;;  %1310 = vst.msk [vmem:[#allocation2 + $0xa8] sm:$0xff] %vm934_vm3, %v1260_v25  ;;  %1336 = vst.msk [vmem:[#allocation2 + $0x178] sm:$0xff] %vm934_vm3, %v1286_v33  ;;  %v904_v40 = vmax.f32 %v736_v28, 0.0  ;;  %v751_v36 = vadd.f32 %v13930_v39, %v16024_v16  ;;  %v881_v18 = vadd.f32 %v13969_v21, %v16024_v16  ;;  %13996 = vmatprep.mubr.msk.f32.mxu1 %vm934_vm3, %v1365_v29  ;;  %v1936_v41 = vld [vmem:[#allocation2 + $0x8c] sm:$0xff]  ;;  %v16219_v39 = vpop.permute.xlu1 %1239 }
 0x101   : > { %v930_v45 = vmax.f32 %v866_v38, 0.0  ;;  %14073 = vmatprep.mubr.msk.f32.mxu0 %vm934_vm3, %v1935_v30  ;;  %v1263_v35 = vmul.f32 %v15985_v2, %v905_v26  ;;  %v1289_v42 = vmul.f32 %v16188_v34, %v931_v27  ;;  %v745_v22 = vpop.f32.mrf.mxu0  ;;  %v875_v23 = vpop.f32.mrf.mxu1  ;;  %19193 = vst [vmem:[#allocation52_spill] sm:$0xff] %v16219_v39  ;;  %v3636_v34 = vld [vmem:[#allocation2 + $0x50] sm:$0xff]  ;;  %v3646_v14 = vld [vmem:[#allocation2 + $0xa0] sm:$0xff] }
 0x102   : > { %v1262_v25 = vmul.f32 %v15987_v3, %v904_v40  ;;  %v907_v28 = vmax.f32 %v751_v36, 0.0  ;;  %v933_v38 = vmax.f32 %v881_v18, 0.0  ;;  %v746_v26 = vadd.f32 %v16024_v16, %v745_v22  ;;  %v3656_v2 = vld [vmem:[#allocation2 + $0xf0] sm:$0xff] }
 0x103   : > { %v1288_v33 = vmul.f32 %v16206_v44, %v930_v45  ;;  %13997 = vmatmul.mubr.msk.f32.gmra.mxu1 %vm934_vm3, %v1366_v43  ;;  %1313 = vst.msk [vmem:[#allocation2 + $0xc0] sm:$0xff] %vm934_vm3, %v1263_v35  ;;  %1339 = vst.msk [vmem:[#allocation2 + $0x190] sm:$0xff] %vm934_vm3, %v1289_v42  ;;  %v876_v27 = vadd.f32 %v16024_v16, %v875_v23  ;;  %14074 = vmatmul.mubr.msk.f32.gmra.mxu0 %vm934_vm3, %v1936_v41  ;;  %v13933_v21 = vpop.f32.mrf.mxu0  ;;  %v16233_v42 = vpop.permute.xlu0 %1234  ;;  %v3635_v44 = vld [vmem:[#allocation2 + $0x48] sm:$0xff]  ;;  %v3672_v50 = vld [vmem:[#allocation2 + $0x170] sm:$0xff] }
 0x104   : > { %1312 = vst.msk [vmem:[#allocation2 + $0xb8] sm:$0xff] %vm934_vm3, %v1262_v25  ;;  %v1265_v29 = vmul.f32 %v15989_v4, %v907_v28  ;;  %v1291_v30 = vmul.f32 %v16219_v39, %v933_v38  ;;  %v761_v43 = vadd.f32 %v13933_v21, %v16024_v16  ;;  %v1367_v40 = vld [vmem:[#allocation2 + $0x93] sm:$0xff]  ;;  %v1368_v36 = vld [vmem:[#allocation2 + $0x9b] sm:$0xff]  ;;  %v906_v18 = vmax.f32 %v746_v26, 0.0  ;;  %19194 = vst [vmem:[#allocation53_spill] sm:$0xff] %v16233_v42 }
 0x105   : > { %1338 = vst.msk [vmem:[#allocation2 + $0x188] sm:$0xff] %vm934_vm3, %v1288_v33  ;;  %v1937_v45 = vld [vmem:[#allocation2 + $0x94] sm:$0xff]  ;;  %v932_v35 = vmax.f32 %v876_v27, 0.0  ;;  %13999 = vmatprep.mubr.msk.f32.mxu1 %vm934_vm3, %v1367_v40  ;;  %v755_v23 = vpop.f32.mrf.mxu0  ;;  %v1938_v41 = vld [vmem:[#allocation2 + $0x9c] sm:$0xff] }
 0x106   : > { %14076 = vmatprep.mubr.msk.f32.mxu0 %vm934_vm3, %v1937_v45  ;;  %1315 = vst.msk [vmem:[#allocation2 + $0xd0] sm:$0xff] %vm934_vm3, %v1265_v29  ;;  %1341 = vst.msk [vmem:[#allocation2 + $0x1a0] sm:$0xff] %vm934_vm3, %v1291_v30  ;;  %v909_v22 = vmax.f32 %v761_v43, 0.0  ;;  %v756_v25 = vadd.f32 %v16024_v16, %v755_v23  ;;  %v1264_v33 = vmul.f32 %v15991_v5, %v906_v18  ;;  %v3648_v12 = vld [vmem:[#allocation2 + $0xb0] sm:$0xff]  ;;  %v3674_v48 = vld [vmem:[#allocation2 + $0x180] sm:$0xff] }
 0x107   : > { %14000 = vmatmul.mubr.msk.f32.gmra.mxu1 %vm934_vm3, %v1368_v36  ;;  %v1290_v28 = vmul.f32 %v16233_v42, %v932_v35  ;;  %14077 = vmatmul.mubr.msk.f32.gmra.mxu0 %vm934_vm3, %v1938_v41  ;;  %v1369_v38 = vld [vmem:[#allocation2 + $0xa3] sm:$0xff]  ;;  %v1370_v27 = vld [vmem:[#allocation2 + $0xab] sm:$0xff] }
 0x108   : > { %v1939_v26 = vld [vmem:[#allocation2 + $0xa4] sm:$0xff]  ;;  %v1267_v21 = vmul.f32 %v15993_v6, %v909_v22  ;;  %v908_v40 = vmax.f32 %v756_v25, 0.0  ;;  %14002 = vmatprep.mubr.msk.f32.mxu1 %vm934_vm3, %v1369_v38  ;;  %v1940_v29 = vld [vmem:[#allocation2 + $0xac] sm:$0xff]  ;;  %1314 = vst.msk [vmem:[#allocation2 + $0xc8] sm:$0xff] %vm934_vm3, %v1264_v33 }
 0x109   : > { %14079 = vmatprep.mubr.msk.f32.mxu0 %vm934_vm3, %v1939_v26  ;;  %1340 = vst.msk [vmem:[#allocation2 + $0x198] sm:$0xff] %vm934_vm3, %v1290_v28 }
 0x10a   : > { %1317 = vst.msk [vmem:[#allocation2 + $0xe0] sm:$0xff] %vm934_vm3, %v1267_v21  ;;  %v1266_v16 = vmul.f32 %v15995_v7, %v908_v40  ;;  %v1948_v21 = vld [vmem:[#allocation2 + $0xec] sm:$0xff]  ;;  %v3650_v8 = vld [vmem:[#allocation2 + $0xc0] sm:$0xff] }
 0x10b   : > { %14003 = vmatmul.mubr.msk.f32.gmra.mxu1 %vm934_vm3, %v1370_v27  ;;  %14080 = vmatmul.mubr.msk.f32.gmra.mxu0 %vm934_vm3, %v1940_v29  ;;  %v1371_v30 = vld [vmem:[#allocation2 + $0xb3] sm:$0xff]  ;;  %v1372_v45 = vld [vmem:[#allocation2 + $0xbb] sm:$0xff]  ;;  %v1378_v27 = vld [vmem:[#allocation2 + $0xeb] sm:$0xff] }
 0x10c   : > { %v1941_v43 = vld [vmem:[#allocation2 + $0xb4] sm:$0xff]  ;;  %1316 = vst.msk [vmem:[#allocation2 + $0xd8] sm:$0xff] %vm934_vm3, %v1266_v16  ;;  %14005 = vmatprep.mubr.msk.f32.mxu1 %vm934_vm3, %v1371_v30  ;;  %v1942_v36 = vld [vmem:[#allocation2 + $0xbc] sm:$0xff] }
 0x10d   : > { %14082 = vmatprep.mubr.msk.f32.mxu0 %vm934_vm3, %v1941_v43  ;;  %v1379_v40 = vld [vmem:[#allocation2 + $0xf3] sm:$0xff]  ;;  %v1380_v16 = vld [vmem:[#allocation2 + $0xfb] sm:$0xff]  ;;  %v1381_v43 = vld [vmem:[#allocation2 + $0x103] sm:$0xff] }
 0x10e   : > { %v1949_v29 = vld [vmem:[#allocation2 + $0xf4] sm:$0xff]  ;;  %v1950_v30 = vld [vmem:[#allocation2 + $0xfc] sm:$0xff] }
 0x10f   : > { %14006 = vmatmul.mubr.msk.f32.gmra.mxu1 %vm934_vm3, %v1372_v45  ;;  %14083 = vmatmul.mubr.msk.f32.gmra.mxu0 %vm934_vm3, %v1942_v36  ;;  %v1373_v18 = vld [vmem:[#allocation2 + $0xc3] sm:$0xff]  ;;  %v1374_v23 = vld [vmem:[#allocation2 + $0xcb] sm:$0xff] }
 0x110   : > { %v1943_v35 = vld [vmem:[#allocation2 + $0xc4] sm:$0xff]  ;;  %14008 = vmatprep.mubr.msk.f32.mxu1 %vm934_vm3, %v1373_v18  ;;  %v1944_v41 = vld [vmem:[#allocation2 + $0xcc] sm:$0xff]  ;;  %v16277_v18 = vld [vmem:[%s19088_s4] ss:$0 sm:$0xff] }
 0x111   : > { %14085 = vmatprep.mubr.msk.f32.mxu0 %vm934_vm3, %v1943_v35  ;;  %v1377_v38 = vld [vmem:[#allocation2 + $0xe3] sm:$0xff]  ;;  %v1382_v36 = vld [vmem:[#allocation2 + $0x10b] sm:$0xff]  ;;  %v13974_v35 = vpop.f32.mrf.mxu1 }
 0x112   : > { %v1947_v26 = vld [vmem:[#allocation2 + $0xe4] sm:$0xff]  ;;  %v3652_v6 = vld [vmem:[#allocation2 + $0xd0] sm:$0xff] }
 0x113   : > { %14009 = vmatmul.mubr.msk.f32.gmra.mxu1 %vm934_vm3, %v1374_v23  ;;  %14086 = vmatmul.mubr.msk.f32.gmra.mxu0 %vm934_vm3, %v1944_v41  ;;  %v1375_v22 = vld [vmem:[#allocation2 + $0xd3] sm:$0xff]  ;;  %v1376_v33 = vld [vmem:[#allocation2 + $0xdb] sm:$0xff]  ;;  %v1951_v45 = vld [vmem:[#allocation2 + $0x104] sm:$0xff] }
 0x114   : > { %v1945_v25 = vld [vmem:[#allocation2 + $0xd4] sm:$0xff]  ;;  %14011 = vmatprep.mubr.msk.f32.mxu1 %vm934_vm3, %v1375_v22  ;;  %v1946_v28 = vld [vmem:[#allocation2 + $0xdc] sm:$0xff]  ;;  %v1952_v23 = vld [vmem:[#allocation2 + $0x10c] sm:$0xff]  ;;  %v1870_v22 = vadd.f32 %v13974_v35, %v16277_v18 }
 0x115   : > { %14088 = vmatprep.mubr.msk.f32.mxu0 %vm934_vm3, %v1945_v25  ;;  %v1383_v41 = vld [vmem:[#allocation2 + $0x113] sm:$0xff]  ;;  %v1389_v35 = vld [vmem:[#allocation2 + $0x143] sm:$0xff] }
 0x116   : > { %v1953_v25 = vld [vmem:[#allocation2 + $0x114] sm:$0xff]  ;;  %v3654_v4 = vld [vmem:[#allocation2 + $0xe0] sm:$0xff] }
 0x117   : > { %14012 = vmatmul.mubr.msk.f32.gmra.mxu1 %vm934_vm3, %v1376_v33  ;;  %14089 = vmatmul.mubr.msk.f32.gmra.mxu0 %vm934_vm3, %v1946_v28  ;;  %v14051_v33 = vpop.f32.mrf.mxu0  ;;  %v1384_v28 = vld [vmem:[#allocation2 + $0x11b] sm:$0xff] }
 0x118   : > { %14014 = vmatprep.mubr.msk.f32.mxu1 %vm934_vm3, %v1377_v38  ;;  %14091 = vmatprep.mubr.msk.f32.mxu0 %vm934_vm3, %v1947_v26  ;;  %v16284_v38 = vadd.f32 %v14051_v33, %v1870_v22  ;;  %v1954_v26 = vld [vmem:[#allocation2 + $0x11c] sm:$0xff]  ;;  %v1960_v22 = vld [vmem:[#allocation2 + $0x14c] sm:$0xff]  ;;  %v1961_v33 = vld [vmem:[#allocation2 + $0x154] sm:$0xff] }
 0x11b   : > { %14015 = vmatmul.mubr.msk.f32.gmra.mxu1 %vm934_vm3, %v1378_v27  ;;  %14092 = vmatmul.mubr.msk.f32.gmra.mxu0 %vm934_vm3, %v1948_v21  ;;  %v1385_v27 = vld [vmem:[#allocation2 + $0x123] sm:$0xff] }
 0x11c   : > { %14017 = vmatprep.mubr.msk.f32.mxu1 %vm934_vm3, %v1379_v40  ;;  %14094 = vmatprep.mubr.msk.f32.mxu0 %vm934_vm3, %v1949_v29  ;;  %v1955_v21 = vld [vmem:[#allocation2 + $0x124] sm:$0xff] }
 0x11d   : > { %v16293_v40 = vld [vmem:[%s19087_s3 + $0xa] sm:$0x3] }
 0x11e   : > { %v1386_v29 = vld [vmem:[#allocation2 + $0x12b] sm:$0xff]  ;;  %14355 = vmatprep.subr.msk.mxu0 %vm1550_vm2, %v16293_v40 }
 0x11f   : > { %14018 = vmatmul.mubr.msk.f32.gmra.mxu1 %vm934_vm3, %v1380_v16  ;;  %14095 = vmatmul.mubr.msk.f32.gmra.mxu0 %vm934_vm3, %v1950_v30  ;;  %v1956_v16 = vld [vmem:[#allocation2 + $0x12c] sm:$0xff] }
 0x120   : > { %14020 = vmatprep.mubr.msk.f32.mxu1 %vm934_vm3, %v1381_v43  ;;  %14097 = vmatprep.mubr.msk.f32.mxu0 %vm934_vm3, %v1951_v45  ;;  %v1387_v30 = vld [vmem:[#allocation2 + $0x133] sm:$0xff]  ;;  %v1388_v45 = vld [vmem:[#allocation2 + $0x13b] sm:$0xff] }
 0x121   : > { %v1957_v43 = vld [vmem:[#allocation2 + $0x134] sm:$0xff] }
 0x123   : > { %14021 = vmatmul.mubr.msk.f32.gmra.mxu1 %vm934_vm3, %v1382_v36  ;;  %14098 = vmatmul.mubr.msk.f32.gmra.mxu0 %vm934_vm3, %v1952_v23  ;;  %v1958_v36 = vld [vmem:[#allocation2 + $0x13c] sm:$0xff]  ;;  %v1959_v23 = vld [vmem:[#allocation2 + $0x144] sm:$0xff] }
 0x124   : > { %14023 = vmatprep.mubr.msk.f32.mxu1 %vm934_vm3, %v1383_v41  ;;  %14100 = vmatprep.mubr.msk.f32.mxu0 %vm934_vm3, %v1953_v25  ;;  %v1390_v41 = vld [vmem:[#allocation2 + $0x14b] sm:$0xff]  ;;  %v1391_v25 = vld [vmem:[#allocation2 + $0x153] sm:$0xff] }
 0x127   : > { %14024 = vmatmul.mubr.msk.f32.gmra.mxu1 %vm934_vm3, %v1384_v28  ;;  %14101 = vmatmul.mubr.msk.f32.gmra.mxu0 %vm934_vm3, %v1954_v26  ;;  %v1392_v28 = vld [vmem:[#allocation2 + $0x15b] sm:$0xff] }
 0x128   : > { %14026 = vmatprep.mubr.msk.f32.mxu1 %vm934_vm3, %v1385_v27  ;;  %14103 = vmatprep.mubr.msk.f32.mxu0 %vm934_vm3, %v1955_v21  ;;  %v1962_v26 = vld [vmem:[#allocation2 + $0x15c] sm:$0xff]  ;;  %v1963_v21 = vld [vmem:[#allocation2 + $0x164] sm:$0xff] }
 0x129   : > { %v1393_v27 = vld [vmem:[#allocation2 + $0x163] sm:$0xff] }
 0x12b   : > { %14027 = vmatmul.mubr.msk.f32.gmra.mxu1 %vm934_vm3, %v1386_v29  ;;  %14104 = vmatmul.mubr.msk.f32.gmra.mxu0 %vm934_vm3, %v1956_v16  ;;  %v1394_v29 = vld [vmem:[#allocation2 + $0x16b] sm:$0xff] }
 0x12c   : > { %14029 = vmatprep.mubr.msk.f32.mxu1 %vm934_vm3, %v1387_v30  ;;  %14106 = vmatprep.mubr.msk.f32.mxu0 %vm934_vm3, %v1957_v43  ;;  %v1964_v16 = vld [vmem:[#allocation2 + $0x16c] sm:$0xff]  ;;  %v1965_v43 = vld [vmem:[#allocation2 + $0x174] sm:$0xff] }
 0x12d   : > { %v1395_v30 = vld [vmem:[#allocation2 + $0x173] sm:$0xff] }
 0x12f   : > { %14030 = vmatmul.mubr.msk.f32.gmra.mxu1 %vm934_vm3, %v1388_v45  ;;  %14107 = vmatmul.mubr.msk.f32.gmra.mxu0 %vm934_vm3, %v1958_v36  ;;  %v1396_v45 = vld [vmem:[#allocation2 + $0x17b] sm:$0xff] }
 0x130   : > { %14032 = vmatprep.mubr.msk.f32.mxu1 %vm934_vm3, %v1389_v35  ;;  %14109 = vmatprep.mubr.msk.f32.mxu0 %vm934_vm3, %v1959_v23  ;;  %v1966_v36 = vld [vmem:[#allocation2 + $0x17c] sm:$0xff]  ;;  %v1967_v23 = vld [vmem:[#allocation2 + $0x184] sm:$0xff] }
 0x131   : > { %v1397_v35 = vld [vmem:[#allocation2 + $0x183] sm:$0xff] }
 0x133   : > { %14033 = vmatmul.mubr.msk.f32.gmra.mxu1 %vm934_vm3, %v1390_v41  ;;  %14110 = vmatmul.mubr.msk.f32.gmra.mxu0 %vm934_vm3, %v1960_v22  ;;  %v2489_v41 = vld [vmem:[#allocation2 + $0x5] sm:$0xff] }
 0x134   : > { %14035 = vmatprep.mubr.msk.f32.mxu1 %vm934_vm3, %v1391_v25  ;;  %14112 = vmatprep.mubr.msk.f32.mxu0 %vm934_vm3, %v1961_v33  ;;  %v1398_v22 = vld [vmem:[#allocation2 + $0x18b] sm:$0xff]  ;;  %v3059_v33 = vld [vmem:[#allocation2 + $0x17] sm:$0xff] }
 0x135   : > { %v1968_v25 = vld [vmem:[#allocation2 + $0x18c] sm:$0xff] }
 0x137   : > { %14036 = vmatmul.mubr.msk.f32.gmra.mxu1 %vm934_vm3, %v1392_v28  ;;  %14113 = vmatmul.mubr.msk.f32.gmra.mxu0 %vm934_vm3, %v1962_v26  ;;  %v2490_v28 = vld [vmem:[#allocation2 + $0xd] sm:$0xff]  ;;  %v3060_v26 = vld [vmem:[#allocation2 + $0x1f] sm:$0xff] }
 0x138   : > { %14038 = vmatprep.mubr.msk.f32.mxu1 %vm934_vm3, %v1393_v27  ;;  %14115 = vmatprep.mubr.msk.f32.mxu0 %vm934_vm3, %v1963_v21  ;;  %v16329_v27 = vld [vmem:[%s19087_s3 + $0xc] sm:$0x3]  ;;  %v2491_v21 = vld [vmem:[#allocation2 + $0x15] sm:$0xff] }
 0x13b   : > { %14039 = vmatmul.mubr.msk.f32.gmra.mxu1 %vm934_vm3, %v1394_v29  ;;  %14116 = vmatmul.mubr.msk.f32.gmra.mxu0 %vm934_vm3, %v1964_v16  ;;  %v3061_v29 = vld [vmem:[#allocation2 + $0x27] sm:$0xff]  ;;  %v2492_v16 = vld [vmem:[#allocation2 + $0x1d] sm:$0xff] }
 0x13c   : > { %14041 = vmatprep.mubr.msk.f32.mxu1 %vm934_vm3, %v1395_v30  ;;  %14118 = vmatprep.mubr.msk.f32.mxu0 %vm934_vm3, %v1965_v43  ;;  %v3062_v30 = vld [vmem:[#allocation2 + $0x2f] sm:$0xff]  ;;  %v2493_v43 = vld [vmem:[#allocation2 + $0x25] sm:$0xff] }
 0x13f   : > { %14042 = vmatmul.mubr.msk.f32.gmra.mxu1 %vm934_vm3, %v1396_v45  ;;  %14119 = vmatmul.mubr.msk.f32.gmra.mxu0 %vm934_vm3, %v1966_v36  ;;  %v2494_v45 = vld [vmem:[#allocation2 + $0x2d] sm:$0xff]  ;;  %v3064_v36 = vld [vmem:[#allocation2 + $0x3f] sm:$0xff] }
 0x140   : > { %14044 = vmatprep.mubr.msk.f32.mxu1 %vm934_vm3, %v1397_v35  ;;  %14121 = vmatprep.mubr.msk.f32.mxu0 %vm934_vm3, %v1967_v23  ;;  %v2495_v35 = vld [vmem:[#allocation2 + $0x35] sm:$0xff]  ;;  %v2496_v23 = vld [vmem:[#allocation2 + $0x3d] sm:$0xff] }
 0x143   : > { %14045 = vmatmul.mubr.msk.f32.gmra.mxu1 %vm934_vm3, %v1398_v22  ;;  %14122 = vmatmul.mubr.msk.f32.gmra.mxu0 %vm934_vm3, %v1968_v25  ;;  %v2497_v22 = vld [vmem:[#allocation2 + $0x45] sm:$0xff]  ;;  %v3067_v25 = vld [vmem:[#allocation2 + $0x57] sm:$0xff] }
 0x144   : > { %14126 = vmatprep.mubr.msk.f32.mxu1 %vm934_vm3, %v2489_v41  ;;  %14203 = vmatprep.mubr.msk.f32.mxu0 %vm934_vm3, %v3059_v33  ;;  %v3066_v41 = vld [vmem:[#allocation2 + $0x4f] sm:$0xff] }
 0x145   : > { %v2498_v33 = vld [vmem:[#allocation2 + $0x4d] sm:$0xff] }
 0x147   : > { %14127 = vmatmul.mubr.msk.f32.vlgmr.msra.gmra.mxu1 %vm934_vm3, %v2490_v28  ;;  %14204 = vmatmul.mubr.msk.f32.vlgmr.msra.gmra.mxu0 %vm934_vm3, %v3060_v26  ;;  %v3068_v28 = vld [vmem:[#allocation2 + $0x5f] sm:$0xff]  ;;  %v2499_v26 = vld [vmem:[#allocation2 + $0x55] sm:$0xff] }
 0x148   : > { %14279 = vmatpush3.msk.msra.mxu1 %vm1550_vm2, %v16008_v11  ;;  %14129 = vmatprep.mubr.msk.f32.mxu1 %vm934_vm3, %v2491_v21  ;;  %v3063_v11 = vld [vmem:[#allocation2 + $0x37] sm:$0xff]  ;;  %v3069_v21 = vld [vmem:[#allocation2 + $0x67] sm:$0xff] }
 0x149   : > { %14206 = vmatprep.mubr.msk.f32.mxu0 %vm934_vm3, %v3061_v29  ;;  %14356 = vmatpush3.msk.msra.mxu0 %vm1550_vm2, %v16293_v40  ;;  %v3065_v40 = vld [vmem:[#allocation2 + $0x47] sm:$0xff]  ;;  %v2500_v29 = vld [vmem:[#allocation2 + $0x5d] sm:$0xff] }
 0x14a   : > { %14432 = vmatprep.subr.msk.mxu1 %vm1550_vm2, %v16329_v27 }
 0x14b   : > { %14130 = vmatmul.mubr.msk.f32.gmra.mxu1 %vm934_vm3, %v2492_v16  ;;  %14207 = vmatmul.mubr.msk.f32.gmra.mxu0 %vm934_vm3, %v3062_v30  ;;  %v3070_v16 = vld [vmem:[#allocation2 + $0x6f] sm:$0xff]  ;;  %v2501_v30 = vld [vmem:[#allocation2 + $0x65] sm:$0xff] }
 0x14c   : > { %14132 = vmatprep.mubr.msk.f32.mxu1 %vm934_vm3, %v2493_v43  ;;  %14209 = vmatprep.mubr.msk.f32.mxu0 %vm934_vm3, %v3063_v11  ;;  %v3071_v43 = vld [vmem:[#allocation2 + $0x77] sm:$0xff]  ;;  %v2502_v11 = vld [vmem:[#allocation2 + $0x6d] sm:$0xff] }
 0x14f   : > { %14133 = vmatmul.mubr.msk.f32.gmra.mxu1 %vm934_vm3, %v2494_v45  ;;  %14210 = vmatmul.mubr.msk.f32.gmra.mxu0 %vm934_vm3, %v3064_v36  ;;  %v3072_v45 = vld [vmem:[#allocation2 + $0x7f] sm:$0xff]  ;;  %v2503_v36 = vld [vmem:[#allocation2 + $0x75] sm:$0xff] }
 0x150   : > { %14135 = vmatprep.mubr.msk.f32.mxu1 %vm934_vm3, %v2495_v35  ;;  %14212 = vmatprep.mubr.msk.f32.mxu0 %vm934_vm3, %v3065_v40  ;;  %v3073_v35 = vld [vmem:[#allocation2 + $0x87] sm:$0xff]  ;;  %v2504_v40 = vld [vmem:[#allocation2 + $0x7d] sm:$0xff] }
 0x153   : > { %14136 = vmatmul.mubr.msk.f32.gmra.mxu1 %vm934_vm3, %v2496_v23  ;;  %14213 = vmatmul.mubr.msk.f32.gmra.mxu0 %vm934_vm3, %v3066_v41  ;;  %v3074_v23 = vld [vmem:[#allocation2 + $0x8f] sm:$0xff]  ;;  %v2505_v41 = vld [vmem:[#allocation2 + $0x85] sm:$0xff] }
 0x154   : > { %14138 = vmatprep.mubr.msk.f32.mxu1 %vm934_vm3, %v2497_v22  ;;  %14215 = vmatprep.mubr.msk.f32.mxu0 %vm934_vm3, %v3067_v25  ;;  %v3075_v22 = vld [vmem:[#allocation2 + $0x97] sm:$0xff]  ;;  %v2506_v25 = vld [vmem:[#allocation2 + $0x8d] sm:$0xff] }
 0x157   : > { %14139 = vmatmul.mubr.msk.f32.gmra.mxu1 %vm934_vm3, %v2498_v33  ;;  %14216 = vmatmul.mubr.msk.f32.gmra.mxu0 %vm934_vm3, %v3068_v28  ;;  %v3076_v33 = vld [vmem:[#allocation2 + $0x9f] sm:$0xff]  ;;  %v2507_v28 = vld [vmem:[#allocation2 + $0x95] sm:$0xff] }
 0x158   : > { %14141 = vmatprep.mubr.msk.f32.mxu1 %vm934_vm3, %v2499_v26  ;;  %14218 = vmatprep.mubr.msk.f32.mxu0 %vm934_vm3, %v3069_v21  ;;  %v3077_v26 = vld [vmem:[#allocation2 + $0xa7] sm:$0xff]  ;;  %v2508_v21 = vld [vmem:[#allocation2 + $0x9d] sm:$0xff] }
 0x15b   : > { %14142 = vmatmul.mubr.msk.f32.gmra.mxu1 %vm934_vm3, %v2500_v29  ;;  %14219 = vmatmul.mubr.msk.f32.gmra.mxu0 %vm934_vm3, %v3070_v16  ;;  %v3078_v29 = vld [vmem:[#allocation2 + $0xaf] sm:$0xff]  ;;  %v2509_v16 = vld [vmem:[#allocation2 + $0xa5] sm:$0xff] }
 0x15c   : > { %14144 = vmatprep.mubr.msk.f32.mxu1 %vm934_vm3, %v2501_v30  ;;  %14221 = vmatprep.mubr.msk.f32.mxu0 %vm934_vm3, %v3071_v43  ;;  %v3079_v30 = vld [vmem:[#allocation2 + $0xb7] sm:$0xff]  ;;  %v2510_v43 = vld [vmem:[#allocation2 + $0xad] sm:$0xff] }
 0x15f   : > { %14145 = vmatmul.mubr.msk.f32.gmra.mxu1 %vm934_vm3, %v2502_v11  ;;  %14222 = vmatmul.mubr.msk.f32.gmra.mxu0 %vm934_vm3, %v3072_v45  ;;  %v3080_v11 = vld [vmem:[#allocation2 + $0xbf] sm:$0xff]  ;;  %v2511_v45 = vld [vmem:[#allocation2 + $0xb5] sm:$0xff] }
 0x160   : > { %14147 = vmatprep.mubr.msk.f32.mxu1 %vm934_vm3, %v2503_v36  ;;  %14224 = vmatprep.mubr.msk.f32.mxu0 %vm934_vm3, %v3073_v35  ;;  %v3081_v36 = vld [vmem:[#allocation2 + $0xc7] sm:$0xff]  ;;  %v2512_v35 = vld [vmem:[#allocation2 + $0xbd] sm:$0xff] }
 0x163   : > { %14148 = vmatmul.mubr.msk.f32.gmra.mxu1 %vm934_vm3, %v2504_v40  ;;  %14225 = vmatmul.mubr.msk.f32.gmra.mxu0 %vm934_vm3, %v3074_v23  ;;  %v3082_v40 = vld [vmem:[#allocation2 + $0xcf] sm:$0xff]  ;;  %v2513_v23 = vld [vmem:[#allocation2 + $0xc5] sm:$0xff] }
 0x164   : > { %14150 = vmatprep.mubr.msk.f32.mxu1 %vm934_vm3, %v2505_v41  ;;  %14227 = vmatprep.mubr.msk.f32.mxu0 %vm934_vm3, %v3075_v22  ;;  %v3083_v41 = vld [vmem:[#allocation2 + $0xd7] sm:$0xff]  ;;  %v2514_v22 = vld [vmem:[#allocation2 + $0xcd] sm:$0xff] }
 0x167   : > { %14151 = vmatmul.mubr.msk.f32.gmra.mxu1 %vm934_vm3, %v2506_v25  ;;  %14228 = vmatmul.mubr.msk.f32.gmra.mxu0 %vm934_vm3, %v3076_v33  ;;  %v3084_v25 = vld [vmem:[#allocation2 + $0xdf] sm:$0xff]  ;;  %v2515_v33 = vld [vmem:[#allocation2 + $0xd5] sm:$0xff] }
 0x168   : > { %14153 = vmatprep.mubr.msk.f32.mxu1 %vm934_vm3, %v2507_v28  ;;  %14230 = vmatprep.mubr.msk.f32.mxu0 %vm934_vm3, %v3077_v26  ;;  %v3085_v28 = vld [vmem:[#allocation2 + $0xe7] sm:$0xff]  ;;  %v2516_v26 = vld [vmem:[#allocation2 + $0xdd] sm:$0xff] }
 0x16b   : > { %14154 = vmatmul.mubr.msk.f32.gmra.mxu1 %vm934_vm3, %v2508_v21  ;;  %14231 = vmatmul.mubr.msk.f32.gmra.mxu0 %vm934_vm3, %v3078_v29  ;;  %v3086_v21 = vld [vmem:[#allocation2 + $0xef] sm:$0xff]  ;;  %v2517_v29 = vld [vmem:[#allocation2 + $0xe5] sm:$0xff] }
 0x16c   : > { %14156 = vmatprep.mubr.msk.f32.mxu1 %vm934_vm3, %v2509_v16  ;;  %14233 = vmatprep.mubr.msk.f32.mxu0 %vm934_vm3, %v3079_v30  ;;  %v3087_v16 = vld [vmem:[#allocation2 + $0xf7] sm:$0xff]  ;;  %v2518_v30 = vld [vmem:[#allocation2 + $0xed] sm:$0xff] }
 0x16f   : > { %14157 = vmatmul.mubr.msk.f32.gmra.mxu1 %vm934_vm3, %v2510_v43  ;;  %14234 = vmatmul.mubr.msk.f32.gmra.mxu0 %vm934_vm3, %v3080_v11  ;;  %v3088_v43 = vld [vmem:[#allocation2 + $0xff] sm:$0xff]  ;;  %v2519_v11 = vld [vmem:[#allocation2 + $0xf5] sm:$0xff] }
 0x170   : > { %14159 = vmatprep.mubr.msk.f32.mxu1 %vm934_vm3, %v2511_v45  ;;  %14236 = vmatprep.mubr.msk.f32.mxu0 %vm934_vm3, %v3081_v36  ;;  %v3089_v45 = vld [vmem:[#allocation2 + $0x107] sm:$0xff]  ;;  %v2520_v36 = vld [vmem:[#allocation2 + $0xfd] sm:$0xff] }
 0x173   : > { %14160 = vmatmul.mubr.msk.f32.gmra.mxu1 %vm934_vm3, %v2512_v35  ;;  %14237 = vmatmul.mubr.msk.f32.gmra.mxu0 %vm934_vm3, %v3082_v40  ;;  %v3090_v35 = vld [vmem:[#allocation2 + $0x10f] sm:$0xff]  ;;  %v2521_v40 = vld [vmem:[#allocation2 + $0x105] sm:$0xff] }
 0x174   : > { %14162 = vmatprep.mubr.msk.f32.mxu1 %vm934_vm3, %v2513_v23  ;;  %14239 = vmatprep.mubr.msk.f32.mxu0 %vm934_vm3, %v3083_v41  ;;  %v3091_v23 = vld [vmem:[#allocation2 + $0x117] sm:$0xff]  ;;  %v2522_v41 = vld [vmem:[#allocation2 + $0x10d] sm:$0xff] }
 0x177   : > { %14163 = vmatmul.mubr.msk.f32.gmra.mxu1 %vm934_vm3, %v2514_v22  ;;  %14240 = vmatmul.mubr.msk.f32.gmra.mxu0 %vm934_vm3, %v3084_v25  ;;  %v3092_v22 = vld [vmem:[#allocation2 + $0x11f] sm:$0xff]  ;;  %v2523_v25 = vld [vmem:[#allocation2 + $0x115] sm:$0xff] }
 0x178   : > { %14165 = vmatprep.mubr.msk.f32.mxu1 %vm934_vm3, %v2515_v33  ;;  %14242 = vmatprep.mubr.msk.f32.mxu0 %vm934_vm3, %v3085_v28  ;;  %v3093_v33 = vld [vmem:[#allocation2 + $0x127] sm:$0xff]  ;;  %v2524_v28 = vld [vmem:[#allocation2 + $0x11d] sm:$0xff] }
 0x17b   : > { %14166 = vmatmul.mubr.msk.f32.gmra.mxu1 %vm934_vm3, %v2516_v26  ;;  %14243 = vmatmul.mubr.msk.f32.gmra.mxu0 %vm934_vm3, %v3086_v21  ;;  %v3094_v26 = vld [vmem:[#allocation2 + $0x12f] sm:$0xff]  ;;  %v2525_v21 = vld [vmem:[#allocation2 + $0x125] sm:$0xff] }
 0x17c   : > { %14168 = vmatprep.mubr.msk.f32.mxu1 %vm934_vm3, %v2517_v29  ;;  %14245 = vmatprep.mubr.msk.f32.mxu0 %vm934_vm3, %v3087_v16  ;;  %v3095_v29 = vld [vmem:[#allocation2 + $0x137] sm:$0xff]  ;;  %v2526_v16 = vld [vmem:[#allocation2 + $0x12d] sm:$0xff] }
 0x17f   : > { %14169 = vmatmul.mubr.msk.f32.gmra.mxu1 %vm934_vm3, %v2518_v30  ;;  %14246 = vmatmul.mubr.msk.f32.gmra.mxu0 %vm934_vm3, %v3088_v43  ;;  %v16411_v30 = vld [vmem:[%s19087_s3 + $0xe] sm:$0x3]  ;;  %v3096_v43 = vld [vmem:[#allocation2 + $0x13f] sm:$0xff] }
 0x180   : > { %14171 = vmatprep.mubr.msk.f32.mxu1 %vm934_vm3, %v2519_v11  ;;  %14248 = vmatprep.mubr.msk.f32.mxu0 %vm934_vm3, %v3089_v45  ;;  %v2527_v11 = vld [vmem:[#allocation2 + $0x135] sm:$0xff]  ;;  %v3097_v45 = vld [vmem:[#allocation2 + $0x147] sm:$0xff] }
 0x181   : > { %14509 = vmatprep.subr.msk.mxu0 %vm1550_vm2, %v16411_v30 }
 0x183   : > { %14172 = vmatmul.mubr.msk.f32.gmra.mxu1 %vm934_vm3, %v2520_v36  ;;  %14249 = vmatmul.mubr.msk.f32.gmra.mxu0 %vm934_vm3, %v3090_v35  ;;  %v2528_v36 = vld [vmem:[#allocation2 + $0x13d] sm:$0xff]  ;;  %v3098_v35 = vld [vmem:[#allocation2 + $0x14f] sm:$0xff] }
 0x184   : > { %14174 = vmatprep.mubr.msk.f32.mxu1 %vm934_vm3, %v2521_v40  ;;  %14251 = vmatprep.mubr.msk.f32.mxu0 %vm934_vm3, %v3091_v23  ;;  %v2529_v40 = vld [vmem:[#allocation2 + $0x145] sm:$0xff]  ;;  %v3099_v23 = vld [vmem:[#allocation2 + $0x157] sm:$0xff] }
 0x187   : > { %14175 = vmatmul.mubr.msk.f32.gmra.mxu1 %vm934_vm3, %v2522_v41  ;;  %14252 = vmatmul.mubr.msk.f32.gmra.mxu0 %vm934_vm3, %v3092_v22  ;;  %v2530_v41 = vld [vmem:[#allocation2 + $0x14d] sm:$0xff]  ;;  %v3100_v22 = vld [vmem:[#allocation2 + $0x15f] sm:$0xff] }
 0x188   : > { %14177 = vmatprep.mubr.msk.f32.mxu1 %vm934_vm3, %v2523_v25  ;;  %14254 = vmatprep.mubr.msk.f32.mxu0 %vm934_vm3, %v3093_v33  ;;  %v2531_v25 = vld [vmem:[#allocation2 + $0x155] sm:$0xff]  ;;  %v3101_v33 = vld [vmem:[#allocation2 + $0x167] sm:$0xff] }
 0x18b   : > { %14178 = vmatmul.mubr.msk.f32.gmra.mxu1 %vm934_vm3, %v2524_v28  ;;  %14255 = vmatmul.mubr.msk.f32.gmra.mxu0 %vm934_vm3, %v3094_v26  ;;  %v2532_v28 = vld [vmem:[#allocation2 + $0x15d] sm:$0xff]  ;;  %v3102_v26 = vld [vmem:[#allocation2 + $0x16f] sm:$0xff] }
 0x18c   : > { %14180 = vmatprep.mubr.msk.f32.mxu1 %vm934_vm3, %v2525_v21  ;;  %14257 = vmatprep.mubr.msk.f32.mxu0 %vm934_vm3, %v3095_v29  ;;  %v2533_v21 = vld [vmem:[#allocation2 + $0x165] sm:$0xff]  ;;  %v3103_v29 = vld [vmem:[#allocation2 + $0x177] sm:$0xff] }
 0x18f   : > { %14181 = vmatmul.mubr.msk.f32.gmra.mxu1 %vm934_vm3, %v2526_v16  ;;  %14258 = vmatmul.mubr.msk.f32.gmra.mxu0 %vm934_vm3, %v3096_v43  ;;  %v2534_v16 = vld [vmem:[#allocation2 + $0x16d] sm:$0xff]  ;;  %v3104_v43 = vld [vmem:[#allocation2 + $0x17f] sm:$0xff] }
 0x190   : > { %14183 = vmatprep.mubr.msk.f32.mxu1 %vm934_vm3, %v2527_v11  ;;  %14260 = vmatprep.mubr.msk.f32.mxu0 %vm934_vm3, %v3097_v45  ;;  %v2535_v11 = vld [vmem:[#allocation2 + $0x175] sm:$0xff]  ;;  %v3105_v45 = vld [vmem:[#allocation2 + $0x187] sm:$0xff] }
 0x193   : > { %14184 = vmatmul.mubr.msk.f32.gmra.mxu1 %vm934_vm3, %v2528_v36  ;;  %14261 = vmatmul.mubr.msk.f32.gmra.mxu0 %vm934_vm3, %v3098_v35  ;;  %v2536_v36 = vld [vmem:[#allocation2 + $0x17d] sm:$0xff]  ;;  %v16435_v35 = vpop.f32.mrf.mxu0 }
 0x194   : > { %14186 = vmatprep.mubr.msk.f32.mxu1 %vm934_vm3, %v2529_v40  ;;  %14263 = vmatprep.mubr.msk.f32.mxu0 %vm934_vm3, %v3099_v23  ;;  %v3106_v40 = vld [vmem:[#allocation2 + $0x18f] sm:$0xff]  ;;  %v2537_v23 = vld [vmem:[#allocation2 + $0x185] sm:$0xff] }
 0x197   : > { %14187 = vmatmul.mubr.msk.f32.gmra.mxu1 %vm934_vm3, %v2530_v41  ;;  %14264 = vmatmul.mubr.msk.f32.gmra.mxu0 %vm934_vm3, %v3100_v22  ;;  %v16438_v41 = vpop.f32.mrf.mxu1  ;;  %v3107_v22 = vld [vmem:[#allocation2 + $0x197] sm:$0xff] }
 0x198   : > { %14189 = vmatprep.mubr.msk.f32.mxu1 %vm934_vm3, %v2531_v25  ;;  %14266 = vmatprep.mubr.msk.f32.mxu0 %vm934_vm3, %v3101_v33 }
 0x19b   : > { %14190 = vmatmul.mubr.msk.f32.gmra.mxu1 %vm934_vm3, %v2532_v28  ;;  %14267 = vmatmul.mubr.msk.f32.gmra.mxu0 %vm934_vm3, %v3102_v26  ;;  %v2538_v28 = vld [vmem:[#allocation2 + $0x18d] sm:$0xff] }
 0x19c   : > { %14192 = vmatprep.mubr.msk.f32.mxu1 %vm934_vm3, %v2533_v21  ;;  %14269 = vmatprep.mubr.msk.f32.mxu0 %vm934_vm3, %v3103_v29  ;;  %v3108_v21 = vld [vmem:[#allocation2 + $0x19f] sm:$0xff] }
 0x19d   : > { %v3629_v29 = vld [vmem:[#allocation2 + $0x18] sm:$0xff] }
 0x19f   : > { %14193 = vmatmul.mubr.msk.f32.gmra.mxu1 %vm934_vm3, %v2534_v16  ;;  %14270 = vmatmul.mubr.msk.f32.gmra.mxu0 %vm934_vm3, %v3104_v43  ;;  %v4199_v16 = vld [vmem:[#allocation2 + $0x19] sm:$0xff] }
 0x1a0   : > { %14195 = vmatprep.mubr.msk.f32.mxu1 %vm934_vm3, %v2535_v11  ;;  %14272 = vmatprep.mubr.msk.f32.mxu0 %vm934_vm3, %v3105_v45 }
 0x1a3   : > { %14196 = vmatmul.mubr.msk.f32.gmra.mxu1 %vm934_vm3, %v2536_v36  ;;  %14273 = vmatmul.mubr.msk.f32.gmra.mxu0 %vm934_vm3, %v3106_v40 }
 0x1a4   : > { %14198 = vmatprep.mubr.msk.f32.mxu1 %vm934_vm3, %v2537_v23  ;;  %14275 = vmatprep.mubr.msk.f32.mxu0 %vm934_vm3, %v3107_v22  ;;  %v3630_v22 = vld [vmem:[#allocation2 + $0x20] sm:$0xff] }
 0x1a5   : > { %v13977_v25 = vpop.f32.mrf.mxu1 }
 0x1a6   : > { %v14054_v33 = vpop.f32.mrf.mxu0  ;;  %v1872_v26 = vadd.f32 %v13977_v25, %v16277_v18 }
 0x1a7   : > { %14199 = vmatmul.mubr.msk.f32.gmra.mxu1 %vm934_vm3, %v2538_v28  ;;  %14276 = vmatmul.mubr.msk.f32.gmra.mxu0 %vm934_vm3, %v3108_v21  ;;  %v1630_v43 = vpop.f32.mrf.mxu1  ;;  %v4200_v21 = vld [vmem:[#allocation2 + $0x21] sm:$0xff] }
 0x1a8   : > { %14280 = vmatprep.mubr.msk.f32.mxu1 %vm934_vm3, %v3629_v29  ;;  %v2200_v11 = vpop.f32.mrf.mxu0  ;;  %v16447_v45 = vadd.f32 %v14054_v33, %v1872_v26  ;;  %14357 = vmatprep.mubr.msk.f32.mxu0 %vm934_vm3, %v4199_v16  ;;  %v1871_v36 = vadd.f32 %v16277_v18, %v1630_v43  ;;  %v16458_v29 = vld [vmem:[%s19087_s3 + $0x10] sm:$0x3]  ;;  %v3631_v33 = vld [vmem:[#allocation2 + $0x28] sm:$0xff] }
 0x1a9   : > { %v13980_v40 = vpop.f32.mrf.mxu1  ;;  %v4201_v26 = vld [vmem:[#allocation2 + $0x29] sm:$0xff] }
 0x1aa   : > { %v14057_v23 = vpop.f32.mrf.mxu0  ;;  %v16451_v25 = vadd.f32 %v2200_v11, %v1871_v36  ;;  %v1874_v28 = vadd.f32 %v13980_v40, %v16277_v18  ;;  %v3632_v40 = vld [vmem:[#allocation2 + $0x30] sm:$0xff] }
 0x1ab   : > { %14281 = vmatmul.mubr.msk.f32.vlgmr.msra.gmra.mxu1 %vm934_vm3, %v3630_v22  ;;  %14358 = vmatmul.mubr.msk.f32.vlgmr.msra.gmra.mxu0 %vm934_vm3, %v4200_v21  ;;  %v1640_v16 = vpop.f32.mrf.mxu1 }
 0x1ac   : > { %14433 = vmatpush3.msk.msra.mxu1 %vm1550_vm2, %v16329_v27  ;;  %v2210_v43 = vpop.f32.mrf.mxu0  ;;  %v16463_v11 = vadd.f32 %v14057_v23, %v1874_v28  ;;  %14283 = vmatprep.mubr.msk.f32.mxu1 %vm934_vm3, %v3631_v33  ;;  %v1873_v36 = vadd.f32 %v16277_v18, %v1640_v16  ;;  %v4202_v23 = vld [vmem:[#allocation2 + $0x31] sm:$0xff] }
 0x1ad   : > { %14360 = vmatprep.mubr.msk.f32.mxu0 %vm934_vm3, %v4201_v26  ;;  %14510 = vmatpush3.msk.msra.mxu0 %vm1550_vm2, %v16411_v30  ;;  %v3633_v28 = vld [vmem:[#allocation2 + $0x38] sm:$0xff] }
 0x1ae   : > { %14586 = vmatprep.subr.msk.mxu1 %vm1550_vm2, %v16458_v29  ;;  %v16472_v27 = vadd.f32 %v2210_v43, %v1873_v36  ;;  %v4203_v26 = vld [vmem:[#allocation2 + $0x39] sm:$0xff] }
 0x1af   : > { %v13983_v22 = vpop.f32.mrf.mxu1  ;;  %v14060_v21 = vpop.f32.mrf.mxu0  ;;  %14284 = vmatmul.mubr.msk.f32.gmra.mxu1 %vm934_vm3, %v3632_v40  ;;  %14361 = vmatmul.mubr.msk.f32.gmra.mxu0 %vm934_vm3, %v4202_v23  ;;  %v3634_v36 = vld [vmem:[#allocation2 + $0x40] sm:$0xff] }
 0x1b0   : > { %v1876_v33 = vadd.f32 %v13983_v22, %v16277_v18  ;;  %14286 = vmatprep.mubr.msk.f32.mxu1 %vm934_vm3, %v3633_v28  ;;  %14363 = vmatprep.mubr.msk.f32.mxu0 %vm934_vm3, %v4203_v26  ;;  %v4204_v40 = vld [vmem:[#allocation2 + $0x41] sm:$0xff]  ;;  %v4205_v26 = vld [vmem:[#allocation2 + $0x49] sm:$0xff] }
 0x1b1   : > { %v1650_v30 = vpop.f32.mrf.mxu1  ;;  %v2220_v16 = vpop.f32.mrf.mxu0 }
 0x1b2   : > { %v16479_v42 = vadd.f32 %v14060_v21, %v1876_v33  ;;  %v1875_v43 = vadd.f32 %v16277_v18, %v1650_v30 }
 0x1b3   : > { %v13986_v39 = vpop.f32.mrf.mxu1  ;;  %14287 = vmatmul.mubr.msk.f32.gmra.mxu1 %vm934_vm3, %v3634_v36  ;;  %v14063_v28 = vpop.f32.mrf.mxu0  ;;  %14364 = vmatmul.mubr.msk.f32.gmra.mxu0 %vm934_vm3, %v4204_v40 }
 0x1b4   : > { %v16483_v22 = vadd.f32 %v2220_v16, %v1875_v43  ;;  %v1878_v23 = vadd.f32 %v13986_v39, %v16277_v18  ;;  %14289 = vmatprep.mubr.msk.f32.mxu1 %vm934_vm3, %v3635_v44  ;;  %14366 = vmatprep.mubr.msk.f32.mxu0 %vm934_vm3, %v4205_v26  ;;  %v4206_v16 = vld [vmem:[#allocation2 + $0x51] sm:$0xff] }
 0x1b5   : > { %v1660_v21 = vpop.f32.mrf.mxu1  ;;  %v2230_v36 = vpop.f32.mrf.mxu0  ;;  %v3637_v39 = vld [vmem:[#allocation2 + $0x58] sm:$0xff] }
 0x1b6   : > { %v16489_v33 = vadd.f32 %v14063_v28, %v1878_v23  ;;  %v1877_v30 = vadd.f32 %v16277_v18, %v1660_v21  ;;  %v4207_v23 = vld [vmem:[#allocation2 + $0x59] sm:$0xff] }
 0x1b7   : > { %v13989_v19 = vpop.f32.mrf.mxu1  ;;  %14290 = vmatmul.mubr.msk.f32.gmra.mxu1 %vm934_vm3, %v3636_v34  ;;  %v14066_v44 = vpop.f32.mrf.mxu0  ;;  %14367 = vmatmul.mubr.msk.f32.gmra.mxu0 %vm934_vm3, %v4206_v16 }
 0x1b8   : > { %v16493_v43 = vadd.f32 %v2230_v36, %v1877_v30  ;;  %v1880_v40 = vadd.f32 %v13989_v19, %v16277_v18  ;;  %14292 = vmatprep.mubr.msk.f32.mxu1 %vm934_vm3, %v3637_v39  ;;  %14369 = vmatprep.mubr.msk.f32.mxu0 %vm934_vm3, %v4207_v23  ;;  %v4208_v30 = vld [vmem:[#allocation2 + $0x61] sm:$0xff] }
 0x1b9   : > { %v1670_v28 = vpop.f32.mrf.mxu1  ;;  %v2240_v34 = vpop.f32.mrf.mxu0  ;;  %v3639_v19 = vld [vmem:[#allocation2 + $0x68] sm:$0xff] }
 0x1ba   : > { %v16499_v26 = vadd.f32 %v14066_v44, %v1880_v40  ;;  %v1879_v21 = vadd.f32 %v16277_v18, %v1670_v28  ;;  %v4209_v40 = vld [vmem:[#allocation2 + $0x69] sm:$0xff] }
 0x1bb   : > { %v13992_v37 = vpop.f32.mrf.mxu1  ;;  %14293 = vmatmul.mubr.msk.f32.gmra.mxu1 %vm934_vm3, %v3638_v9  ;;  %v14069_v39 = vpop.f32.mrf.mxu0  ;;  %14370 = vmatmul.mubr.msk.f32.gmra.mxu0 %vm934_vm3, %v4208_v30 }
 0x1bc   : > { %v16503_v36 = vadd.f32 %v2240_v34, %v1879_v21  ;;  %v1882_v16 = vadd.f32 %v13992_v37, %v16277_v18  ;;  %14295 = vmatprep.mubr.msk.f32.mxu1 %vm934_vm3, %v3639_v19  ;;  %14372 = vmatprep.mubr.msk.f32.mxu0 %vm934_vm3, %v4209_v40  ;;  %v4210_v21 = vld [vmem:[#allocation2 + $0x71] sm:$0xff] }
 0x1bd   : > { %v1680_v44 = vpop.f32.mrf.mxu1  ;;  %v2250_v9 = vpop.f32.mrf.mxu0  ;;  %v3641_v37 = vld [vmem:[#allocation2 + $0x78] sm:$0xff] }
 0x1be   : > { %v16509_v23 = vadd.f32 %v14069_v39, %v1882_v16  ;;  %v1881_v28 = vadd.f32 %v16277_v18, %v1680_v44  ;;  %v4211_v16 = vld [vmem:[#allocation2 + $0x79] sm:$0xff] }
 0x1bf   : > { %v13995_v20 = vpop.f32.mrf.mxu1  ;;  %14296 = vmatmul.mubr.msk.f32.gmra.mxu1 %vm934_vm3, %v3640_v31  ;;  %v14072_v19 = vpop.f32.mrf.mxu0  ;;  %14373 = vmatmul.mubr.msk.f32.gmra.mxu0 %vm934_vm3, %v4210_v21 }
 0x1c0   : > { %v16513_v34 = vadd.f32 %v2250_v9, %v1881_v28  ;;  %v1884_v30 = vadd.f32 %v13995_v20, %v16277_v18  ;;  %14298 = vmatprep.mubr.msk.f32.mxu1 %vm934_vm3, %v3641_v37  ;;  %14375 = vmatprep.mubr.msk.f32.mxu0 %vm934_vm3, %v4211_v16  ;;  %v4212_v28 = vld [vmem:[#allocation2 + $0x81] sm:$0xff] }
 0x1c1   : > { %v1690_v39 = vpop.f32.mrf.mxu1  ;;  %v2260_v31 = vpop.f32.mrf.mxu0  ;;  %v3643_v20 = vld [vmem:[#allocation2 + $0x88] sm:$0xff] }
 0x1c2   : > { %v16519_v40 = vadd.f32 %v14072_v19, %v1884_v30  ;;  %v1883_v44 = vadd.f32 %v16277_v18, %v1690_v39  ;;  %v4213_v30 = vld [vmem:[#allocation2 + $0x89] sm:$0xff] }
 0x1c3   : > { %v13998_v24 = vpop.f32.mrf.mxu1  ;;  %14299 = vmatmul.mubr.msk.f32.gmra.mxu1 %vm934_vm3, %v3642_v32  ;;  %v14075_v37 = vpop.f32.mrf.mxu0  ;;  %14376 = vmatmul.mubr.msk.f32.gmra.mxu0 %vm934_vm3, %v4212_v28 }
 0x1c4   : > { %v16523_v9 = vadd.f32 %v2260_v31, %v1883_v44  ;;  %v1886_v21 = vadd.f32 %v13998_v24, %v16277_v18  ;;  %14301 = vmatprep.mubr.msk.f32.mxu1 %vm934_vm3, %v3643_v20  ;;  %14378 = vmatprep.mubr.msk.f32.mxu0 %vm934_vm3, %v4213_v30  ;;  %v4214_v44 = vld [vmem:[#allocation2 + $0x91] sm:$0xff] }
 0x1c5   : > { %v1700_v19 = vpop.f32.mrf.mxu1  ;;  %v2270_v32 = vpop.f32.mrf.mxu0  ;;  %v3645_v24 = vld [vmem:[#allocation2 + $0x98] sm:$0xff] }
 0x1c6   : > { %v16529_v16 = vadd.f32 %v14075_v37, %v1886_v21  ;;  %v1885_v39 = vadd.f32 %v16277_v18, %v1700_v19  ;;  %v4215_v21 = vld [vmem:[#allocation2 + $0x99] sm:$0xff] }
 0x1c7   : > { %v14001_v15 = vpop.f32.mrf.mxu1  ;;  %14302 = vmatmul.mubr.msk.f32.gmra.mxu1 %vm934_vm3, %v3644_v17  ;;  %v14078_v20 = vpop.f32.mrf.mxu0  ;;  %14379 = vmatmul.mubr.msk.f32.gmra.mxu0 %vm934_vm3, %v4214_v44 }
 0x1c8   : > { %v16533_v31 = vadd.f32 %v2270_v32, %v1885_v39  ;;  %v1888_v28 = vadd.f32 %v14001_v15, %v16277_v18  ;;  %14304 = vmatprep.mubr.msk.f32.mxu1 %vm934_vm3, %v3645_v24  ;;  %14381 = vmatprep.mubr.msk.f32.mxu0 %vm934_vm3, %v4215_v21  ;;  %v4216_v39 = vld [vmem:[#allocation2 + $0xa1] sm:$0xff] }
 0x1c9   : > { %v1710_v37 = vpop.f32.mrf.mxu1  ;;  %v2280_v17 = vpop.f32.mrf.mxu0  ;;  %v3647_v15 = vld [vmem:[#allocation2 + $0xa8] sm:$0xff] }
 0x1ca   : > { %v16539_v30 = vadd.f32 %v14078_v20, %v1888_v28  ;;  %v1887_v19 = vadd.f32 %v16277_v18, %v1710_v37  ;;  %v4217_v28 = vld [vmem:[#allocation2 + $0xa9] sm:$0xff] }
 0x1cb   : > { %v14004_v13 = vpop.f32.mrf.mxu1  ;;  %14305 = vmatmul.mubr.msk.f32.gmra.mxu1 %vm934_vm3, %v3646_v14  ;;  %v14081_v24 = vpop.f32.mrf.mxu0  ;;  %14382 = vmatmul.mubr.msk.f32.gmra.mxu0 %vm934_vm3, %v4216_v39 }
 0x1cc   : > { %v16543_v32 = vadd.f32 %v2280_v17, %v1887_v19  ;;  %v1890_v44 = vadd.f32 %v14004_v13, %v16277_v18  ;;  %14307 = vmatprep.mubr.msk.f32.mxu1 %vm934_vm3, %v3647_v15  ;;  %14384 = vmatprep.mubr.msk.f32.mxu0 %vm934_vm3, %v4217_v28  ;;  %v4218_v19 = vld [vmem:[#allocation2 + $0xb1] sm:$0xff] }
 0x1cd   : > { %v1720_v20 = vpop.f32.mrf.mxu1  ;;  %v2290_v14 = vpop.f32.mrf.mxu0  ;;  %v3649_v13 = vld [vmem:[#allocation2 + $0xb8] sm:$0xff] }
 0x1ce   : > { %v16549_v21 = vadd.f32 %v14081_v24, %v1890_v44  ;;  %v1889_v37 = vadd.f32 %v16277_v18, %v1720_v20  ;;  %v4219_v44 = vld [vmem:[#allocation2 + $0xb9] sm:$0xff] }
 0x1cf   : > { %v14007_v10 = vpop.f32.mrf.mxu1  ;;  %14308 = vmatmul.mubr.msk.f32.gmra.mxu1 %vm934_vm3, %v3648_v12  ;;  %v14084_v15 = vpop.f32.mrf.mxu0  ;;  %14385 = vmatmul.mubr.msk.f32.gmra.mxu0 %vm934_vm3, %v4218_v19 }
 0x1d0   : > { %v16553_v17 = vadd.f32 %v2290_v14, %v1889_v37  ;;  %v1892_v39 = vadd.f32 %v14007_v10, %v16277_v18  ;;  %14310 = vmatprep.mubr.msk.f32.mxu1 %vm934_vm3, %v3649_v13  ;;  %14387 = vmatprep.mubr.msk.f32.mxu0 %vm934_vm3, %v4219_v44  ;;  %v4220_v37 = vld [vmem:[#allocation2 + $0xc1] sm:$0xff] }
 0x1d1   : > { %v1730_v24 = vpop.f32.mrf.mxu1  ;;  %v2300_v12 = vpop.f32.mrf.mxu0  ;;  %v3651_v10 = vld [vmem:[#allocation2 + $0xc8] sm:$0xff] }
 0x1d2   : > { %v16559_v28 = vadd.f32 %v14084_v15, %v1892_v39  ;;  %v1891_v20 = vadd.f32 %v16277_v18, %v1730_v24  ;;  %v4221_v39 = vld [vmem:[#allocation2 + $0xc9] sm:$0xff] }
 0x1d3   : > { %v14010_v7 = vpop.f32.mrf.mxu1  ;;  %14311 = vmatmul.mubr.msk.f32.gmra.mxu1 %vm934_vm3, %v3650_v8  ;;  %v14087_v13 = vpop.f32.mrf.mxu0  ;;  %14388 = vmatmul.mubr.msk.f32.gmra.mxu0 %vm934_vm3, %v4220_v37 }
 0x1d4   : > { %v16563_v14 = vadd.f32 %v2300_v12, %v1891_v20  ;;  %v1894_v19 = vadd.f32 %v14010_v7, %v16277_v18  ;;  %14313 = vmatprep.mubr.msk.f32.mxu1 %vm934_vm3, %v3651_v10  ;;  %14390 = vmatprep.mubr.msk.f32.mxu0 %vm934_vm3, %v4221_v39  ;;  %v4222_v20 = vld [vmem:[#allocation2 + $0xd1] sm:$0xff] }
 0x1d5   : > { %v1740_v15 = vpop.f32.mrf.mxu1  ;;  %v2310_v8 = vpop.f32.mrf.mxu0  ;;  %v3653_v7 = vld [vmem:[#allocation2 + $0xd8] sm:$0xff] }
 0x1d6   : > { %v16569_v44 = vadd.f32 %v14087_v13, %v1894_v19  ;;  %v1893_v24 = vadd.f32 %v16277_v18, %v1740_v15  ;;  %v4223_v19 = vld [vmem:[#allocation2 + $0xd9] sm:$0xff] }
 0x1d7   : > { %v14013_v5 = vpop.f32.mrf.mxu1  ;;  %14314 = vmatmul.mubr.msk.f32.gmra.mxu1 %vm934_vm3, %v3652_v6  ;;  %v14090_v10 = vpop.f32.mrf.mxu0  ;;  %14391 = vmatmul.mubr.msk.f32.gmra.mxu0 %vm934_vm3, %v4222_v20 }
 0x1d8   : > { %v16573_v12 = vadd.f32 %v2310_v8, %v1893_v24  ;;  %v1896_v37 = vadd.f32 %v14013_v5, %v16277_v18  ;;  %14316 = vmatprep.mubr.msk.f32.mxu1 %vm934_vm3, %v3653_v7  ;;  %14393 = vmatprep.mubr.msk.f32.mxu0 %vm934_vm3, %v4223_v19  ;;  %v4224_v24 = vld [vmem:[#allocation2 + $0xe1] sm:$0xff] }
 0x1d9   : > { %v1750_v13 = vpop.f32.mrf.mxu1  ;;  %v2320_v6 = vpop.f32.mrf.mxu0  ;;  %v3655_v5 = vld [vmem:[#allocation2 + $0xe8] sm:$0xff] }
 0x1da   : > { %v16579_v39 = vadd.f32 %v14090_v10, %v1896_v37  ;;  %v1895_v15 = vadd.f32 %v16277_v18, %v1750_v13  ;;  %v4225_v37 = vld [vmem:[#allocation2 + $0xe9] sm:$0xff] }
 0x1db   : > { %v14016_v3 = vpop.f32.mrf.mxu1  ;;  %14317 = vmatmul.mubr.msk.f32.gmra.mxu1 %vm934_vm3, %v3654_v4  ;;  %v14093_v7 = vpop.f32.mrf.mxu0  ;;  %14394 = vmatmul.mubr.msk.f32.gmra.mxu0 %vm934_vm3, %v4224_v24 }
 0x1dc   : > { %v16583_v8 = vadd.f32 %v2320_v6, %v1895_v15  ;;  %v1898_v20 = vadd.f32 %v14016_v3, %v16277_v18  ;;  %14319 = vmatprep.mubr.msk.f32.mxu1 %vm934_vm3, %v3655_v5  ;;  %14396 = vmatprep.mubr.msk.f32.mxu0 %vm934_vm3, %v4225_v37  ;;  %v4226_v15 = vld [vmem:[#allocation2 + $0xf1] sm:$0xff] }
 0x1dd   : > { %v1760_v10 = vpop.f32.mrf.mxu1  ;;  %v2330_v4 = vpop.f32.mrf.mxu0  ;;  %v3657_v3 = vld [vmem:[#allocation2 + $0xf8] sm:$0xff] }
 0x1de   : > { %v16589_v19 = vadd.f32 %v14093_v7, %v1898_v20  ;;  %v1897_v13 = vadd.f32 %v16277_v18, %v1760_v10  ;;  %v4227_v20 = vld [vmem:[#allocation2 + $0xf9] sm:$0xff] }
 0x1df   : > { %v14019_v1 = vpop.f32.mrf.mxu1  ;;  %14320 = vmatmul.mubr.msk.f32.gmra.mxu1 %vm934_vm3, %v3656_v2  ;;  %v14096_v5 = vpop.f32.mrf.mxu0  ;;  %14397 = vmatmul.mubr.msk.f32.gmra.mxu0 %vm934_vm3, %v4226_v15  ;;  %v16604_v2 = vld [vmem:[%s19088_s4] ss:$0 sm:$0xff]  ;;  %v3659_v15 = vld [vmem:[#allocation2 + $0x108] sm:$0xff] }
 0x1e0   : > { %v16593_v6 = vadd.f32 %v2330_v4, %v1897_v13  ;;  %v1900_v24 = vadd.f32 %v14019_v1, %v16277_v18  ;;  %14322 = vmatprep.mubr.msk.f32.mxu1 %vm934_vm3, %v3657_v3  ;;  %14399 = vmatprep.mubr.msk.f32.mxu0 %vm934_vm3, %v4227_v20  ;;  %v3658_v1 = vld [vmem:[#allocation2 + $0x100] sm:$0xff] }
 0x1e1   : > { %v1770_v7 = vpop.f32.mrf.mxu1  ;;  %v2340_v13 = vpop.f32.mrf.mxu0  ;;  %v4228_v4 = vld [vmem:[#allocation2 + $0x101] sm:$0xff] }
 0x1e2   : > { %v16599_v37 = vadd.f32 %v14096_v5, %v1900_v24  ;;  %v1899_v10 = vadd.f32 %v16604_v2, %v1770_v7  ;;  %v4229_v5 = vld [vmem:[#allocation2 + $0x109] sm:$0xff] }
 0x1e3   : > { %v14022_v18 = vpop.f32.mrf.mxu1  ;;  %14323 = vmatmul.mubr.msk.f32.gmra.mxu1 %vm934_vm3, %v3658_v1  ;;  %v14099_v24 = vpop.f32.mrf.mxu0  ;;  %14400 = vmatmul.mubr.msk.f32.gmra.mxu0 %vm934_vm3, %v4228_v4 }
 0x1e4   : > { %v16608_v3 = vadd.f32 %v2340_v13, %v1899_v10  ;;  %v1902_v20 = vadd.f32 %v16604_v2, %v14022_v18  ;;  %14325 = vmatprep.mubr.msk.f32.mxu1 %vm934_vm3, %v3659_v15  ;;  %14402 = vmatprep.mubr.msk.f32.mxu0 %vm934_vm3, %v4229_v5  ;;  %v4230_v10 = vld [vmem:[#allocation2 + $0x111] sm:$0xff] }
 0x1e5   : > { %v1780_v7 = vpop.f32.mrf.mxu1  ;;  %v2350_v1 = vpop.f32.mrf.mxu0  ;;  %v3661_v13 = vld [vmem:[#allocation2 + $0x118] sm:$0xff] }
 0x1e6   : > { %v16614_v0 = vadd.f32 %v14099_v24, %v1902_v20  ;;  %v1901_v63 = vadd.f32 %v16604_v2, %v1780_v7  ;;  %v4231_v20 = vld [vmem:[#allocation2 + $0x119] sm:$0xff] }
 0x1e7   : > { %v14025_v61 = vpop.f32.mrf.mxu1  ;;  %14326 = vmatmul.mubr.msk.f32.gmra.mxu1 %vm934_vm3, %v3660_v62  ;;  %v14102_v15 = vpop.f32.mrf.mxu0  ;;  %14403 = vmatmul.mubr.msk.f32.gmra.mxu0 %vm934_vm3, %v4230_v10 }
 0x1e8   : > { %v16618_v18 = vadd.f32 %v2350_v1, %v1901_v63  ;;  %v1904_v4 = vadd.f32 %v16604_v2, %v14025_v61  ;;  %14328 = vmatprep.mubr.msk.f32.mxu1 %vm934_vm3, %v3661_v13  ;;  %14405 = vmatprep.mubr.msk.f32.mxu0 %vm934_vm3, %v4231_v20  ;;  %v4232_v63 = vld [vmem:[#allocation2 + $0x121] sm:$0xff] }
 0x1e9   : > { %v1790_v24 = vpop.f32.mrf.mxu1  ;;  %v2360_v62 = vpop.f32.mrf.mxu0  ;;  %v3663_v61 = vld [vmem:[#allocation2 + $0x128] sm:$0xff] }
 0x1ea   : > { %v16624_v5 = vadd.f32 %v14102_v15, %v1904_v4  ;;  %v1903_v7 = vadd.f32 %v16604_v2, %v1790_v24  ;;  %v4233_v4 = vld [vmem:[#allocation2 + $0x129] sm:$0xff] }
 0x1eb   : > { %v14028_v59 = vpop.f32.mrf.mxu1  ;;  %14329 = vmatmul.mubr.msk.f32.gmra.mxu1 %vm934_vm3, %v3662_v60  ;;  %v14105_v13 = vpop.f32.mrf.mxu0  ;;  %14406 = vmatmul.mubr.msk.f32.gmra.mxu0 %vm934_vm3, %v4232_v63 }
 0x1ec   : > { %v16628_v1 = vadd.f32 %v2360_v62, %v1903_v7  ;;  %v1906_v10 = vadd.f32 %v16604_v2, %v14028_v59  ;;  %14331 = vmatprep.mubr.msk.f32.mxu1 %vm934_vm3, %v3663_v61  ;;  %14408 = vmatprep.mubr.msk.f32.mxu0 %vm934_vm3, %v4233_v4  ;;  %v4234_v7 = vld [vmem:[#allocation2 + $0x131] sm:$0xff] }
 0x1ed   : > { %v1800_v15 = vpop.f32.mrf.mxu1  ;;  %v2370_v60 = vpop.f32.mrf.mxu0  ;;  %v3665_v59 = vld [vmem:[#allocation2 + $0x138] sm:$0xff] }
 0x1ee   : > { %v16634_v20 = vadd.f32 %v14105_v13, %v1906_v10  ;;  %v1905_v24 = vadd.f32 %v16604_v2, %v1800_v15  ;;  %v4235_v10 = vld [vmem:[#allocation2 + $0x139] sm:$0xff] }
 0x1ef   : > { %v14031_v57 = vpop.f32.mrf.mxu1  ;;  %14332 = vmatmul.mubr.msk.f32.gmra.mxu1 %vm934_vm3, %v3664_v58  ;;  %v14108_v61 = vpop.f32.mrf.mxu0  ;;  %14409 = vmatmul.mubr.msk.f32.gmra.mxu0 %vm934_vm3, %v4234_v7 }
 0x1f0   : > { %v16638_v62 = vadd.f32 %v2370_v60, %v1905_v24  ;;  %v1908_v63 = vadd.f32 %v16604_v2, %v14031_v57  ;;  %14334 = vmatprep.mubr.msk.f32.mxu1 %vm934_vm3, %v3665_v59  ;;  %14411 = vmatprep.mubr.msk.f32.mxu0 %vm934_vm3, %v4235_v10  ;;  %v4236_v57 = vld [vmem:[#allocation2 + $0x141] sm:$0xff] }
 0x1f1   : > { %v1810_v13 = vpop.f32.mrf.mxu1  ;;  %v2380_v58 = vpop.f32.mrf.mxu0  ;;  %v3667_v60 = vld [vmem:[#allocation2 + $0x148] sm:$0xff] }
 0x1f2   : > { %v16644_v4 = vadd.f32 %v14108_v61, %v1908_v63  ;;  %v1907_v15 = vadd.f32 %v16604_v2, %v1810_v13  ;;  %v4237_v61 = vld [vmem:[#allocation2 + $0x149] sm:$0xff] }
 0x1f3   : > { %v14034_v24 = vpop.f32.mrf.mxu1  ;;  %14335 = vmatmul.mubr.msk.f32.gmra.mxu1 %vm934_vm3, %v3666_v56  ;;  %v14111_v63 = vpop.f32.mrf.mxu0  ;;  %14412 = vmatmul.mubr.msk.f32.gmra.mxu0 %vm934_vm3, %v4236_v57 }
 0x1f4   : > { %v16650_v7 = vadd.f32 %v2380_v58, %v1907_v15  ;;  %v1910_v59 = vadd.f32 %v16604_v2, %v14034_v24  ;;  %14337 = vmatprep.mubr.msk.f32.mxu1 %vm934_vm3, %v3667_v60  ;;  %14414 = vmatprep.mubr.msk.f32.mxu0 %vm934_vm3, %v4237_v61  ;;  %v4238_v15 = vld [vmem:[#allocation2 + $0x151] sm:$0xff] }
 0x1f5   : > { %v1820_v10 = vpop.f32.mrf.mxu1  ;;  %v2390_v54 = vpop.f32.mrf.mxu0  ;;  %v3669_v58 = vld [vmem:[#allocation2 + $0x158] sm:$0xff] }
 0x1f6   : > { %v16656_v56 = vadd.f32 %v14111_v63, %v1910_v59  ;;  %v1909_v13 = vadd.f32 %v16604_v2, %v1820_v10  ;;  %v4239_v59 = vld [vmem:[#allocation2 + $0x159] sm:$0xff] }
 0x1f7   : > { %v14037_v55 = vpop.f32.mrf.mxu1  ;;  %14338 = vmatmul.mubr.msk.f32.gmra.mxu1 %vm934_vm3, %v3668_v53  ;;  %v14114_v60 = vpop.f32.mrf.mxu0  ;;  %14415 = vmatmul.mubr.msk.f32.gmra.mxu0 %vm934_vm3, %v4238_v15 }
 0x1f8   : > { %v16660_v24 = vadd.f32 %v2390_v54, %v1909_v13  ;;  %v1912_v57 = vadd.f32 %v16604_v2, %v14037_v55  ;;  %14340 = vmatprep.mubr.msk.f32.mxu1 %vm934_vm3, %v3669_v58  ;;  %14417 = vmatprep.mubr.msk.f32.mxu0 %vm934_vm3, %v4239_v59  ;;  %v4240_v54 = vld [vmem:[#allocation2 + $0x161] sm:$0xff] }
 0x1f9   : > { %v1830_v63 = vpop.f32.mrf.mxu1  ;;  %v2400_v53 = vpop.f32.mrf.mxu0  ;;  %v3671_v13 = vld [vmem:[#allocation2 + $0x168] sm:$0xff] }
 0x1fa   : > { %v16666_v61 = vadd.f32 %v14114_v60, %v1912_v57  ;;  %v1911_v10 = vadd.f32 %v16604_v2, %v1830_v63  ;;  %v4241_v57 = vld [vmem:[#allocation2 + $0x169] sm:$0xff] }
 0x1fb   : > { %v14040_v51 = vpop.f32.mrf.mxu1  ;;  %14341 = vmatmul.mubr.msk.f32.gmra.mxu1 %vm934_vm3, %v3670_v52  ;;  %v14117_v58 = vpop.f32.mrf.mxu0  ;;  %14418 = vmatmul.mubr.msk.f32.gmra.mxu0 %vm934_vm3, %v4240_v54 }
 0x1fc   : > { %v16670_v55 = vadd.f32 %v2400_v53, %v1911_v10  ;;  %v1914_v15 = vadd.f32 %v16604_v2, %v14040_v51  ;;  %14343 = vmatprep.mubr.msk.f32.mxu1 %vm934_vm3, %v3671_v13  ;;  %14420 = vmatprep.mubr.msk.f32.mxu0 %vm934_vm3, %v4241_v57  ;;  %v4242_v10 = vld [vmem:[#allocation2 + $0x171] sm:$0xff] }
 0x1fd   : > { %v1840_v60 = vpop.f32.mrf.mxu1  ;;  %v2410_v52 = vpop.f32.mrf.mxu0  ;;  %v3673_v51 = vld [vmem:[#allocation2 + $0x178] sm:$0xff] }
 0x1fe   : > { %v16676_v59 = vadd.f32 %v14117_v58, %v1914_v15  ;;  %v1913_v63 = vadd.f32 %v16604_v2, %v1840_v60  ;;  %v4243_v15 = vld [vmem:[#allocation2 + $0x179] sm:$0xff] }
 0x1ff   : > { %v14043_v46 = vpop.f32.mrf.mxu1  ;;  %14344 = vmatmul.mubr.msk.f32.gmra.mxu1 %vm934_vm3, %v3672_v50  ;;  %v14120_v13 = vpop.f32.mrf.mxu0  ;;  %14421 = vmatmul.mubr.msk.f32.gmra.mxu0 %vm934_vm3, %v4242_v10 }
 0x200   : > { %v16680_v53 = vadd.f32 %v2410_v52, %v1913_v63  ;;  %v1916_v54 = vadd.f32 %v16604_v2, %v14043_v46  ;;  %14346 = vmatprep.mubr.msk.f32.mxu1 %vm934_vm3, %v3673_v51  ;;  %14423 = vmatprep.mubr.msk.f32.mxu0 %vm934_vm3, %v4243_v15  ;;  %v4244_v63 = vld [vmem:[#allocation2 + $0x181] sm:$0xff]  ;;  %v1869_v52 = vadd.f32 %v16604_v2, %v16438_v41 }
 0x201   : > { %v1850_v58 = vpop.f32.mrf.mxu1  ;;  %v2420_v50 = vpop.f32.mrf.mxu0  ;;  %v3675_v46 = vld [vmem:[#allocation2 + $0x188] sm:$0xff] }
 0x202   : > { %v16686_v57 = vadd.f32 %v14120_v13, %v1916_v54  ;;  %v1915_v60 = vadd.f32 %v16604_v2, %v1850_v58  ;;  %v4245_v54 = vld [vmem:[#allocation2 + $0x189] sm:$0xff] }
 0x203   : > { %v14046_v47 = vpop.f32.mrf.mxu1  ;;  %14347 = vmatmul.mubr.msk.f32.gmra.mxu1 %vm934_vm3, %v3674_v48  ;;  %v14123_v15 = vpop.f32.mrf.mxu0  ;;  %14424 = vmatmul.mubr.msk.f32.gmra.mxu0 %vm934_vm3, %v4244_v63 }
 0x204   : > { %19196 = vst [vmem:[#allocation54_spill] sm:$0xff] %v16686_v57  ;;  %v16692_v10 = vadd.f32 %v2420_v50, %v1915_v60  ;;  %v1918_v51 = vadd.f32 %v16604_v2, %v14046_v47  ;;  %14349 = vmatprep.mubr.msk.f32.mxu1 %vm934_vm3, %v3675_v46  ;;  %14426 = vmatprep.mubr.msk.f32.mxu0 %vm934_vm3, %v4245_v54  ;;  %v3676_v57 = vld [vmem:[#allocation2 + $0x190] sm:$0xff]  ;;  %v3677_v47 = vld [vmem:[#allocation2 + $0x198] sm:$0xff] }
 0x205   : > { %v1860_v13 = vpop.f32.mrf.mxu1  ;;  %v2430_v49 = vpop.f32.mrf.mxu0  ;;  %v4246_v60 = vld [vmem:[#allocation2 + $0x191] sm:$0xff]  ;;  %v2439_v50 = vadd.f32 %v16435_v35, %v1869_v52 }
 0x206   : > { %19197 = vst [vmem:[#allocation55_spill] sm:$0xff] %v16692_v10  ;;  %v16698_v58 = vadd.f32 %v14123_v15, %v1918_v51  ;;  %v1917_v48 = vadd.f32 %v16604_v2, %v1860_v13  ;;  %v4247_v51 = vld [vmem:[#allocation2 + $0x199] sm:$0xff]  ;;  %v4769_v35 = vld [vmem:[#allocation2 + $0x2b] sm:$0xff] }
 0x207   : > { %v14128_v41 = vpop.f32.mrf.mxu1  ;;  %14350 = vmatmul.mubr.msk.f32.gmra.mxu1 %vm934_vm3, %v3676_v57  ;;  %v14205_v10 = vpop.f32.mrf.mxu0  ;;  %14427 = vmatmul.mubr.msk.f32.gmra.mxu0 %vm934_vm3, %v4246_v60  ;;  %v3678_v13 = vld [vmem:[#allocation2 + $0x1a0] sm:$0xff] }
 0x208   : > { %19198 = vst [vmem:[#allocation56_spill] sm:$0xff] %v16698_v58  ;;  %v16703_v63 = vadd.f32 %v2430_v49, %v1917_v48  ;;  %v3010_v46 = vadd.f32 %v14128_v41, %v16284_v38  ;;  %14352 = vmatprep.mubr.msk.f32.mxu1 %vm934_vm3, %v3677_v47  ;;  %14429 = vmatprep.mubr.msk.f32.mxu0 %vm934_vm3, %v4247_v51  ;;  %v4248_v49 = vld [vmem:[#allocation2 + $0x1a1] sm:$0xff]  ;;  %v5339_v41 = vld [vmem:[#allocation2 + $0x2c] sm:$0xff] }
 0x209   : > { %v2760_v2 = vpop.f32.mrf.mxu1  ;;  %v3330_v54 = vpop.f32.mrf.mxu0 }
 0x20a   : > { %v16709_v15 = vadd.f32 %v14205_v10, %v3010_v46  ;;  %v3009_v57 = vadd.f32 %v2760_v2, %v2439_v50  ;;  %v4770_v46 = vld [vmem:[#allocation2 + $0x33] sm:$0xff] }
 0x20b   : > { %v14131_v58 = vpop.f32.mrf.mxu1  ;;  %14353 = vmatmul.mubr.msk.f32.gmra.mxu1 %vm934_vm3, %v3678_v13  ;;  %v14208_v48 = vpop.f32.mrf.mxu0  ;;  %14430 = vmatmul.mubr.msk.f32.gmra.mxu0 %vm934_vm3, %v4248_v49  ;;  %v5340_v2 = vld [vmem:[#allocation2 + $0x34] sm:$0xff]  ;;  %v5341_v13 = vld [vmem:[#allocation2 + $0x3c] sm:$0xff] }
 0x20c   : > { %v16712_v38 = vadd.f32 %v3330_v54, %v3009_v57  ;;  %v3012_v52 = vadd.f32 %v14131_v58, %v16447_v45  ;;  %14434 = vmatprep.mubr.msk.f32.mxu1 %vm934_vm3, %v4769_v35  ;;  %14511 = vmatprep.mubr.msk.f32.mxu0 %vm934_vm3, %v5339_v41  ;;  %v4771_v54 = vld [vmem:[#allocation2 + $0x3b] sm:$0xff]  ;;  %v5342_v41 = vld [vmem:[#allocation2 + $0x44] sm:$0xff] }
 0x20d   : > { %v2770_v10 = vpop.f32.mrf.mxu1  ;;  %v3340_v50 = vpop.f32.mrf.mxu0 }
 0x20e   : > { %v16718_v60 = vadd.f32 %v14208_v48, %v3012_v52  ;;  %v3011_v47 = vadd.f32 %v2770_v10, %v16451_v25  ;;  %v4772_v48 = vld [vmem:[#allocation2 + $0x43] sm:$0xff]  ;;  %v4773_v10 = vld [vmem:[#allocation2 + $0x4b] sm:$0xff] }
 0x20f   : > { %v14134_v51 = vpop.f32.mrf.mxu1  ;;  %14435 = vmatmul.mubr.msk.f32.vlgmr.msra.gmra.mxu1 %vm934_vm3, %v4770_v46  ;;  %v14211_v57 = vpop.f32.mrf.mxu0  ;;  %14512 = vmatmul.mubr.msk.f32.vlgmr.msra.gmra.mxu0 %vm934_vm3, %v5340_v2  ;;  %v5343_v46 = vld [vmem:[#allocation2 + $0x4c] sm:$0xff] }
 0x210   : > { %v16722_v45 = vadd.f32 %v3340_v50, %v3011_v47  ;;  %v3014_v58 = vadd.f32 %v14134_v51, %v16463_v11  ;;  %14587 = vmatpush3.msk.msra.mxu1 %vm1550_vm2, %v16458_v29  ;;  %14437 = vmatprep.mubr.msk.f32.mxu1 %vm934_vm3, %v4771_v54 }
 0x211   : > { %14514 = vmatprep.mubr.msk.f32.mxu0 %vm934_vm3, %v5341_v13  ;;  %v2780_v25 = vpop.f32.mrf.mxu1  ;;  %v3350_v52 = vpop.f32.mrf.mxu0  ;;  %v5344_v13 = vld [vmem:[#allocation2 + $0x54] sm:$0xff] }
 0x212   : > { %v16730_v49 = vadd.f32 %v14211_v57, %v3014_v58  ;;  %v3013_v35 = vadd.f32 %v2780_v25, %v16472_v27  ;;  %v4774_v57 = vld [vmem:[#allocation2 + $0x53] sm:$0xff] }
 0x213   : > { %v14137_v11 = vpop.f32.mrf.mxu1  ;;  %14438 = vmatmul.mubr.msk.f32.gmra.mxu1 %vm934_vm3, %v4772_v48  ;;  %v14214_v50 = vpop.f32.mrf.mxu0  ;;  %14515 = vmatmul.mubr.msk.f32.gmra.mxu0 %vm934_vm3, %v5342_v41  ;;  %v5345_v48 = vld [vmem:[#allocation2 + $0x5c] sm:$0xff] }
 0x214   : > { %v16734_v47 = vadd.f32 %v3350_v52, %v3013_v35  ;;  %v3016_v29 = vadd.f32 %v14137_v11, %v16479_v42  ;;  %14440 = vmatprep.mubr.msk.f32.mxu1 %vm934_vm3, %v4773_v10  ;;  %14517 = vmatprep.mubr.msk.f32.mxu0 %vm934_vm3, %v5343_v46  ;;  %v4775_v42 = vld [vmem:[#allocation2 + $0x5b] sm:$0xff]  ;;  %v5346_v46 = vld [vmem:[#allocation2 + $0x64] sm:$0xff] }
 0x215   : > { %v2790_v27 = vpop.f32.mrf.mxu1  ;;  %v3360_v58 = vpop.f32.mrf.mxu0 }
 0x216   : > { %v16740_v51 = vadd.f32 %v14214_v50, %v3016_v29  ;;  %v3015_v2 = vadd.f32 %v2790_v27, %v16483_v22  ;;  %v4776_v29 = vld [vmem:[#allocation2 + $0x63] sm:$0xff] }
 0x217   : > { %v14140_v54 = vpop.f32.mrf.mxu1  ;;  %14441 = vmatmul.mubr.msk.f32.gmra.mxu1 %vm934_vm3, %v4774_v57  ;;  %v14217_v52 = vpop.f32.mrf.mxu0  ;;  %14518 = vmatmul.mubr.msk.f32.gmra.mxu0 %vm934_vm3, %v5344_v13  ;;  %v5347_v57 = vld [vmem:[#allocation2 + $0x6c] sm:$0xff] }
 0x218   : > { %v16744_v25 = vadd.f32 %v3360_v58, %v3015_v2  ;;  %v3018_v35 = vadd.f32 %v14140_v54, %v16489_v33  ;;  %14443 = vmatprep.mubr.msk.f32.mxu1 %vm934_vm3, %v4775_v42  ;;  %14520 = vmatprep.mubr.msk.f32.mxu0 %vm934_vm3, %v5345_v48  ;;  %v4777_v33 = vld [vmem:[#allocation2 + $0x6b] sm:$0xff]  ;;  %v5348_v48 = vld [vmem:[#allocation2 + $0x74] sm:$0xff] }
 0x219   : > { %v2800_v22 = vpop.f32.mrf.mxu1  ;;  %v3370_v10 = vpop.f32.mrf.mxu0 }
 0x21a   : > { %v16750_v11 = vadd.f32 %v14217_v52, %v3018_v35  ;;  %v3017_v41 = vadd.f32 %v2800_v22, %v16493_v43  ;;  %v4778_v35 = vld [vmem:[#allocation2 + $0x73] sm:$0xff] }
 0x21b   : > { %v14143_v50 = vpop.f32.mrf.mxu1  ;;  %14444 = vmatmul.mubr.msk.f32.gmra.mxu1 %vm934_vm3, %v4776_v29  ;;  %v14220_v58 = vpop.f32.mrf.mxu0  ;;  %14521 = vmatmul.mubr.msk.f32.gmra.mxu0 %vm934_vm3, %v5346_v46  ;;  %v5349_v29 = vld [vmem:[#allocation2 + $0x7c] sm:$0xff] }
 0x21c   : > { %v16754_v27 = vadd.f32 %v3370_v10, %v3017_v41  ;;  %v3020_v2 = vadd.f32 %v14143_v50, %v16499_v26  ;;  %14446 = vmatprep.mubr.msk.f32.mxu1 %vm934_vm3, %v4777_v33  ;;  %14523 = vmatprep.mubr.msk.f32.mxu0 %vm934_vm3, %v5347_v57  ;;  %v4779_v26 = vld [vmem:[#allocation2 + $0x7b] sm:$0xff]  ;;  %v5350_v57 = vld [vmem:[#allocation2 + $0x84] sm:$0xff] }
 0x21d   : > { %v2810_v43 = vpop.f32.mrf.mxu1  ;;  %v3380_v42 = vpop.f32.mrf.mxu0 }
 0x21e   : > { %v16760_v54 = vadd.f32 %v14220_v58, %v3020_v2  ;;  %v3019_v13 = vadd.f32 %v2810_v43, %v16503_v36  ;;  %v4780_v2 = vld [vmem:[#allocation2 + $0x83] sm:$0xff] }
 0x21f   : > { %v14146_v52 = vpop.f32.mrf.mxu1  ;;  %14447 = vmatmul.mubr.msk.f32.gmra.mxu1 %vm934_vm3, %v4778_v35  ;;  %v14223_v10 = vpop.f32.mrf.mxu0  ;;  %14524 = vmatmul.mubr.msk.f32.gmra.mxu0 %vm934_vm3, %v5348_v48  ;;  %v5351_v35 = vld [vmem:[#allocation2 + $0x8c] sm:$0xff] }
 0x220   : > { %v16764_v22 = vadd.f32 %v3380_v42, %v3019_v13  ;;  %v3022_v41 = vadd.f32 %v14146_v52, %v16509_v23  ;;  %14449 = vmatprep.mubr.msk.f32.mxu1 %vm934_vm3, %v4779_v26  ;;  %14526 = vmatprep.mubr.msk.f32.mxu0 %vm934_vm3, %v5349_v29  ;;  %v4781_v23 = vld [vmem:[#allocation2 + $0x8b] sm:$0xff]  ;;  %v5352_v29 = vld [vmem:[#allocation2 + $0x94] sm:$0xff] }
 0x221   : > { %v2820_v36 = vpop.f32.mrf.mxu1  ;;  %v3390_v33 = vpop.f32.mrf.mxu0 }
 0x222   : > { %v16770_v50 = vadd.f32 %v14223_v10, %v3022_v41  ;;  %v3021_v46 = vadd.f32 %v2820_v36, %v16513_v34  ;;  %v4782_v41 = vld [vmem:[#allocation2 + $0x93] sm:$0xff] }
 0x223   : > { %v14149_v58 = vpop.f32.mrf.mxu1  ;;  %14450 = vmatmul.mubr.msk.f32.gmra.mxu1 %vm934_vm3, %v4780_v2  ;;  %v14226_v42 = vpop.f32.mrf.mxu0  ;;  %14527 = vmatmul.mubr.msk.f32.gmra.mxu0 %vm934_vm3, %v5350_v57  ;;  %v5353_v2 = vld [vmem:[#allocation2 + $0x9c] sm:$0xff] }
 0x224   : > { %v16774_v43 = vadd.f32 %v3390_v33, %v3021_v46  ;;  %v3024_v13 = vadd.f32 %v14149_v58, %v16519_v40  ;;  %14452 = vmatprep.mubr.msk.f32.mxu1 %vm934_vm3, %v4781_v23  ;;  %14529 = vmatprep.mubr.msk.f32.mxu0 %vm934_vm3, %v5351_v35  ;;  %v4783_v40 = vld [vmem:[#allocation2 + $0x9b] sm:$0xff]  ;;  %v5354_v35 = vld [vmem:[#allocation2 + $0xa4] sm:$0xff] }
 0x225   : > { %v2830_v34 = vpop.f32.mrf.mxu1  ;;  %v3400_v26 = vpop.f32.mrf.mxu0 }
 0x226   : > { %v16780_v52 = vadd.f32 %v14226_v42, %v3024_v13  ;;  %v3023_v48 = vadd.f32 %v2830_v34, %v16523_v9  ;;  %v4784_v13 = vld [vmem:[#allocation2 + $0xa3] sm:$0xff] }
 0x227   : > { %v14152_v10 = vpop.f32.mrf.mxu1  ;;  %14453 = vmatmul.mubr.msk.f32.gmra.mxu1 %vm934_vm3, %v4782_v41  ;;  %v14229_v33 = vpop.f32.mrf.mxu0  ;;  %14530 = vmatmul.mubr.msk.f32.gmra.mxu0 %vm934_vm3, %v5352_v29  ;;  %v5355_v41 = vld [vmem:[#allocation2 + $0xac] sm:$0xff] }
 0x228   : > { %v16784_v36 = vadd.f32 %v3400_v26, %v3023_v48  ;;  %v3026_v46 = vadd.f32 %v14152_v10, %v16529_v16  ;;  %14455 = vmatprep.mubr.msk.f32.mxu1 %vm934_vm3, %v4783_v40  ;;  %14532 = vmatprep.mubr.msk.f32.mxu0 %vm934_vm3, %v5353_v2  ;;  %v4785_v16 = vld [vmem:[#allocation2 + $0xab] sm:$0xff]  ;;  %v5356_v2 = vld [vmem:[#allocation2 + $0xb4] sm:$0xff] }
 0x229   : > { %v2840_v9 = vpop.f32.mrf.mxu1  ;;  %v3410_v23 = vpop.f32.mrf.mxu0 }
 0x22a   : > { %v16790_v58 = vadd.f32 %v14229_v33, %v3026_v46  ;;  %v3025_v57 = vadd.f32 %v2840_v9, %v16533_v31  ;;  %v4786_v46 = vld [vmem:[#allocation2 + $0xb3] sm:$0xff] }
 0x22b   : > { %v14155_v42 = vpop.f32.mrf.mxu1  ;;  %14456 = vmatmul.mubr.msk.f32.gmra.mxu1 %vm934_vm3, %v4784_v13  ;;  %v14232_v26 = vpop.f32.mrf.mxu0  ;;  %14533 = vmatmul.mubr.msk.f32.gmra.mxu0 %vm934_vm3, %v5354_v35  ;;  %v5357_v13 = vld [vmem:[#allocation2 + $0xbc] sm:$0xff] }
 0x22c   : > { %v16794_v34 = vadd.f32 %v3410_v23, %v3025_v57  ;;  %v3028_v48 = vadd.f32 %v14155_v42, %v16539_v30  ;;  %14458 = vmatprep.mubr.msk.f32.mxu1 %vm934_vm3, %v4785_v16  ;;  %14535 = vmatprep.mubr.msk.f32.mxu0 %vm934_vm3, %v5355_v41  ;;  %v4787_v30 = vld [vmem:[#allocation2 + $0xbb] sm:$0xff]  ;;  %v5358_v41 = vld [vmem:[#allocation2 + $0xc4] sm:$0xff] }
 0x22d   : > { %v2850_v31 = vpop.f32.mrf.mxu1  ;;  %v3420_v40 = vpop.f32.mrf.mxu0 }
 0x22e   : > { %v16800_v10 = vadd.f32 %v14232_v26, %v3028_v48  ;;  %v3027_v29 = vadd.f32 %v2850_v31, %v16543_v32  ;;  %v4788_v48 = vld [vmem:[#allocation2 + $0xc3] sm:$0xff] }
 0x22f   : > { %v14158_v33 = vpop.f32.mrf.mxu1  ;;  %14459 = vmatmul.mubr.msk.f32.gmra.mxu1 %vm934_vm3, %v4786_v46  ;;  %v14235_v23 = vpop.f32.mrf.mxu0  ;;  %14536 = vmatmul.mubr.msk.f32.gmra.mxu0 %vm934_vm3, %v5356_v2  ;;  %v5359_v46 = vld [vmem:[#allocation2 + $0xcc] sm:$0xff] }
 0x230   : > { %v16804_v9 = vadd.f32 %v3420_v40, %v3027_v29  ;;  %v3030_v57 = vadd.f32 %v14158_v33, %v16549_v21  ;;  %14461 = vmatprep.mubr.msk.f32.mxu1 %vm934_vm3, %v4787_v30  ;;  %14538 = vmatprep.mubr.msk.f32.mxu0 %vm934_vm3, %v5357_v13  ;;  %v4789_v21 = vld [vmem:[#allocation2 + $0xcb] sm:$0xff]  ;;  %v5360_v13 = vld [vmem:[#allocation2 + $0xd4] sm:$0xff] }
 0x231   : > { %v2860_v32 = vpop.f32.mrf.mxu1  ;;  %v3430_v16 = vpop.f32.mrf.mxu0 }
 0x232   : > { %v16810_v42 = vadd.f32 %v14235_v23, %v3030_v57  ;;  %v3029_v35 = vadd.f32 %v2860_v32, %v16553_v17  ;;  %v4790_v57 = vld [vmem:[#allocation2 + $0xd3] sm:$0xff] }
 0x233   : > { %v14161_v26 = vpop.f32.mrf.mxu1  ;;  %14462 = vmatmul.mubr.msk.f32.gmra.mxu1 %vm934_vm3, %v4788_v48  ;;  %v14238_v40 = vpop.f32.mrf.mxu0  ;;  %14539 = vmatmul.mubr.msk.f32.gmra.mxu0 %vm934_vm3, %v5358_v41  ;;  %v5361_v48 = vld [vmem:[#allocation2 + $0xdc] sm:$0xff] }
 0x234   : > { %v16814_v31 = vadd.f32 %v3430_v16, %v3029_v35  ;;  %v3032_v29 = vadd.f32 %v14161_v26, %v16559_v28  ;;  %14464 = vmatprep.mubr.msk.f32.mxu1 %vm934_vm3, %v4789_v21  ;;  %14541 = vmatprep.mubr.msk.f32.mxu0 %vm934_vm3, %v5359_v46  ;;  %v4791_v28 = vld [vmem:[#allocation2 + $0xdb] sm:$0xff]  ;;  %v5362_v46 = vld [vmem:[#allocation2 + $0xe4] sm:$0xff] }
 0x235   : > { %v2870_v17 = vpop.f32.mrf.mxu1  ;;  %v3440_v30 = vpop.f32.mrf.mxu0 }
 0x236   : > { %v16820_v33 = vadd.f32 %v14238_v40, %v3032_v29  ;;  %v3031_v2 = vadd.f32 %v2870_v17, %v16563_v14  ;;  %v4792_v29 = vld [vmem:[#allocation2 + $0xe3] sm:$0xff] }
 0x237   : > { %v14164_v23 = vpop.f32.mrf.mxu1  ;;  %14465 = vmatmul.mubr.msk.f32.gmra.mxu1 %vm934_vm3, %v4790_v57  ;;  %v14241_v16 = vpop.f32.mrf.mxu0  ;;  %14542 = vmatmul.mubr.msk.f32.gmra.mxu0 %vm934_vm3, %v5360_v13  ;;  %v5363_v57 = vld [vmem:[#allocation2 + $0xec] sm:$0xff] }
 0x238   : > { %v16824_v32 = vadd.f32 %v3440_v30, %v3031_v2  ;;  %v3034_v35 = vadd.f32 %v14164_v23, %v16569_v44  ;;  %14467 = vmatprep.mubr.msk.f32.mxu1 %vm934_vm3, %v4791_v28  ;;  %14544 = vmatprep.mubr.msk.f32.mxu0 %vm934_vm3, %v5361_v48  ;;  %v4793_v44 = vld [vmem:[#allocation2 + $0xeb] sm:$0xff]  ;;  %v5364_v48 = vld [vmem:[#allocation2 + $0xf4] sm:$0xff] }
 0x239   : > { %v2880_v14 = vpop.f32.mrf.mxu1  ;;  %v3450_v21 = vpop.f32.mrf.mxu0 }
 0x23a   : > { %v16830_v26 = vadd.f32 %v14241_v16, %v3034_v35  ;;  %v3033_v41 = vadd.f32 %v2880_v14, %v16573_v12  ;;  %v4794_v35 = vld [vmem:[#allocation2 + $0xf3] sm:$0xff] }
 0x23b   : > { %v14167_v40 = vpop.f32.mrf.mxu1  ;;  %14468 = vmatmul.mubr.msk.f32.gmra.mxu1 %vm934_vm3, %v4792_v29  ;;  %v14244_v30 = vpop.f32.mrf.mxu0  ;;  %14545 = vmatmul.mubr.msk.f32.gmra.mxu0 %vm934_vm3, %v5362_v46  ;;  %v5365_v29 = vld [vmem:[#allocation2 + $0xfc] sm:$0xff] }
 0x23c   : > { %v16834_v17 = vadd.f32 %v3450_v21, %v3033_v41  ;;  %v3036_v2 = vadd.f32 %v14167_v40, %v16579_v39  ;;  %14470 = vmatprep.mubr.msk.f32.mxu1 %vm934_vm3, %v4793_v44  ;;  %14547 = vmatprep.mubr.msk.f32.mxu0 %vm934_vm3, %v5363_v57  ;;  %v4795_v39 = vld [vmem:[#allocation2 + $0xfb] sm:$0xff]  ;;  %v5366_v57 = vld [vmem:[#allocation2 + $0x104] sm:$0xff] }
 0x23d   : > { %v2890_v12 = vpop.f32.mrf.mxu1  ;;  %v3460_v28 = vpop.f32.mrf.mxu0 }
 0x23e   : > { %v16840_v23 = vadd.f32 %v14244_v30, %v3036_v2  ;;  %v3035_v13 = vadd.f32 %v2890_v12, %v16583_v8  ;;  %v4796_v2 = vld [vmem:[#allocation2 + $0x103] sm:$0xff] }
 0x23f   : > { %v14170_v16 = vpop.f32.mrf.mxu1  ;;  %14471 = vmatmul.mubr.msk.f32.gmra.mxu1 %vm934_vm3, %v4794_v35  ;;  %v14247_v21 = vpop.f32.mrf.mxu0  ;;  %14548 = vmatmul.mubr.msk.f32.gmra.mxu0 %vm934_vm3, %v5364_v48  ;;  %v5367_v35 = vld [vmem:[#allocation2 + $0x10c] sm:$0xff] }
 0x240   : > { %v16844_v14 = vadd.f32 %v3460_v28, %v3035_v13  ;;  %v3038_v41 = vadd.f32 %v14170_v16, %v16589_v19  ;;  %14473 = vmatprep.mubr.msk.f32.mxu1 %vm934_vm3, %v4795_v39  ;;  %14550 = vmatprep.mubr.msk.f32.mxu0 %vm934_vm3, %v5365_v29  ;;  %v4797_v19 = vld [vmem:[#allocation2 + $0x10b] sm:$0xff]  ;;  %v5368_v29 = vld [vmem:[#allocation2 + $0x114] sm:$0xff] }
 0x241   : > { %v2900_v8 = vpop.f32.mrf.mxu1  ;;  %v3470_v44 = vpop.f32.mrf.mxu0 }
 0x242   : > { %v16850_v40 = vadd.f32 %v14247_v21, %v3038_v41  ;;  %v3037_v46 = vadd.f32 %v2900_v8, %v16593_v6  ;;  %v4798_v41 = vld [vmem:[#allocation2 + $0x113] sm:$0xff] }
 0x243   : > { %v14173_v30 = vpop.f32.mrf.mxu1  ;;  %14474 = vmatmul.mubr.msk.f32.gmra.mxu1 %vm934_vm3, %v4796_v2  ;;  %v14250_v28 = vpop.f32.mrf.mxu0  ;;  %14551 = vmatmul.mubr.msk.f32.gmra.mxu0 %vm934_vm3, %v5366_v57  ;;  %v5369_v2 = vld [vmem:[#allocation2 + $0x11c] sm:$0xff] }
 0x244   : > { %v16854_v12 = vadd.f32 %v3470_v44, %v3037_v46  ;;  %v3040_v13 = vadd.f32 %v14173_v30, %v16599_v37  ;;  %14476 = vmatprep.mubr.msk.f32.mxu1 %vm934_vm3, %v4797_v19  ;;  %14553 = vmatprep.mubr.msk.f32.mxu0 %vm934_vm3, %v5367_v35  ;;  %v4799_v37 = vld [vmem:[#allocation2 + $0x11b] sm:$0xff]  ;;  %v5370_v35 = vld [vmem:[#allocation2 + $0x124] sm:$0xff] }
 0x245   : > { %v2910_v6 = vpop.f32.mrf.mxu1  ;;  %v3480_v39 = vpop.f32.mrf.mxu0 }
 0x246   : > { %v16860_v16 = vadd.f32 %v14250_v28, %v3040_v13  ;;  %v3039_v48 = vadd.f32 %v2910_v6, %v16608_v3  ;;  %v4800_v13 = vld [vmem:[#allocation2 + $0x123] sm:$0xff] }
 0x247   : > { %v14176_v21 = vpop.f32.mrf.mxu1  ;;  %14477 = vmatmul.mubr.msk.f32.gmra.mxu1 %vm934_vm3, %v4798_v41  ;;  %v14253_v44 = vpop.f32.mrf.mxu0  ;;  %14554 = vmatmul.mubr.msk.f32.gmra.mxu0 %vm934_vm3, %v5368_v29  ;;  %v5371_v41 = vld [vmem:[#allocation2 + $0x12c] sm:$0xff] }
 0x248   : > { %v16864_v8 = vadd.f32 %v3480_v39, %v3039_v48  ;;  %v3042_v46 = vadd.f32 %v14176_v21, %v16614_v0  ;;  %14479 = vmatprep.mubr.msk.f32.mxu1 %vm934_vm3, %v4799_v37  ;;  %14556 = vmatprep.mubr.msk.f32.mxu0 %vm934_vm3, %v5369_v2  ;;  %v4801_v0 = vld [vmem:[#allocation2 + $0x12b] sm:$0xff]  ;;  %v5372_v2 = vld [vmem:[#allocation2 + $0x134] sm:$0xff] }
 0x249   : > { %v2920_v3 = vpop.f32.mrf.mxu1  ;;  %v3490_v19 = vpop.f32.mrf.mxu0 }
 0x24a   : > { %v16870_v30 = vadd.f32 %v14253_v44, %v3042_v46  ;;  %v3041_v57 = vadd.f32 %v2920_v3, %v16618_v18  ;;  %v4802_v46 = vld [vmem:[#allocation2 + $0x133] sm:$0xff] }
 0x24b   : > { %v14179_v28 = vpop.f32.mrf.mxu1  ;;  %14480 = vmatmul.mubr.msk.f32.gmra.mxu1 %vm934_vm3, %v4800_v13  ;;  %v14256_v39 = vpop.f32.mrf.mxu0  ;;  %14557 = vmatmul.mubr.msk.f32.gmra.mxu0 %vm934_vm3, %v5370_v35  ;;  %v5373_v13 = vld [vmem:[#allocation2 + $0x13c] sm:$0xff] }
 0x24c   : > { %v16874_v6 = vadd.f32 %v3490_v19, %v3041_v57  ;;  %v3044_v48 = vadd.f32 %v14179_v28, %v16624_v5  ;;  %14482 = vmatprep.mubr.msk.f32.mxu1 %vm934_vm3, %v4801_v0  ;;  %14559 = vmatprep.mubr.msk.f32.mxu0 %vm934_vm3, %v5371_v41  ;;  %v4803_v5 = vld [vmem:[#allocation2 + $0x13b] sm:$0xff]  ;;  %v5374_v41 = vld [vmem:[#allocation2 + $0x144] sm:$0xff] }
 0x24d   : > { %v2930_v18 = vpop.f32.mrf.mxu1  ;;  %v3500_v37 = vpop.f32.mrf.mxu0 }
 0x24e   : > { %v16880_v21 = vadd.f32 %v14256_v39, %v3044_v48  ;;  %v3043_v29 = vadd.f32 %v2930_v18, %v16628_v1  ;;  %v4804_v48 = vld [vmem:[#allocation2 + $0x143] sm:$0xff] }
 0x24f   : > { %v14182_v44 = vpop.f32.mrf.mxu1  ;;  %14483 = vmatmul.mubr.msk.f32.gmra.mxu1 %vm934_vm3, %v4802_v46  ;;  %v14259_v19 = vpop.f32.mrf.mxu0  ;;  %14560 = vmatmul.mubr.msk.f32.gmra.mxu0 %vm934_vm3, %v5372_v2  ;;  %v5375_v46 = vld [vmem:[#allocation2 + $0x14c] sm:$0xff] }
 0x250   : > { %v16884_v3 = vadd.f32 %v3500_v37, %v3043_v29  ;;  %v3046_v57 = vadd.f32 %v14182_v44, %v16634_v20  ;;  %14485 = vmatprep.mubr.msk.f32.mxu1 %vm934_vm3, %v4803_v5  ;;  %14562 = vmatprep.mubr.msk.f32.mxu0 %vm934_vm3, %v5373_v13  ;;  %v4805_v20 = vld [vmem:[#allocation2 + $0x14b] sm:$0xff]  ;;  %v4807_v13 = vld [vmem:[#allocation2 + $0x15b] sm:$0xff] }
 0x251   : > { %v2940_v1 = vpop.f32.mrf.mxu1  ;;  %v3510_v0 = vpop.f32.mrf.mxu0 }
 0x252   : > { %v16890_v28 = vadd.f32 %v14259_v19, %v3046_v57  ;;  %v3045_v35 = vadd.f32 %v2940_v1, %v16638_v62  ;;  %v4806_v57 = vld [vmem:[#allocation2 + $0x153] sm:$0xff] }
 0x253   : > { %v14185_v39 = vpop.f32.mrf.mxu1  ;;  %14486 = vmatmul.mubr.msk.f32.gmra.mxu1 %vm934_vm3, %v4804_v48  ;;  %v14262_v37 = vpop.f32.mrf.mxu0  ;;  %14563 = vmatmul.mubr.msk.f32.gmra.mxu0 %vm934_vm3, %v5374_v41 }
 0x254   : > { %v16894_v18 = vadd.f32 %v3510_v0, %v3045_v35  ;;  %v3048_v29 = vadd.f32 %v14185_v39, %v16644_v4  ;;  %14488 = vmatprep.mubr.msk.f32.mxu1 %vm934_vm3, %v4805_v20  ;;  %14565 = vmatprep.mubr.msk.f32.mxu0 %vm934_vm3, %v5375_v46  ;;  %v5376_v4 = vld [vmem:[#allocation2 + $0x154] sm:$0xff]  ;;  %v5377_v0 = vld [vmem:[#allocation2 + $0x15c] sm:$0xff] }
 0x255   : > { %v2950_v62 = vpop.f32.mrf.mxu1  ;;  %v16905_v5 = vpop.f32.mrf.mxu0  ;;  %v4808_v20 = vld [vmem:[#allocation2 + $0x163] sm:$0xff] }
 0x256   : > { %v16900_v44 = vadd.f32 %v14262_v37, %v3048_v29  ;;  %v16903_v2 = vadd.f32 %v2950_v62, %v16650_v7  ;;  %v4809_v37 = vld [vmem:[#allocation2 + $0x16b] sm:$0xff] }
 0x257   : > { %v14188_v19 = vpop.f32.mrf.mxu1  ;;  %14489 = vmatmul.mubr.msk.f32.gmra.mxu1 %vm934_vm3, %v4806_v57  ;;  %v14265_v35 = vpop.f32.mrf.mxu0  ;;  %14566 = vmatmul.mubr.msk.f32.gmra.mxu0 %vm934_vm3, %v5376_v4  ;;  %v5379_v57 = vld [vmem:[#allocation2 + $0x16c] sm:$0xff] }
 0x258   : > { %v3050_v1 = vadd.f32 %v14188_v19, %v16656_v56  ;;  %14491 = vmatprep.mubr.msk.f32.mxu1 %vm934_vm3, %v4807_v13  ;;  %14568 = vmatprep.mubr.msk.f32.mxu0 %vm934_vm3, %v5377_v0  ;;  %v5378_v56 = vld [vmem:[#allocation2 + $0x164] sm:$0xff]  ;;  %v5380_v0 = vld [vmem:[#allocation2 + $0x174] sm:$0xff] }
 0x259   : > { %v2960_v7 = vpop.f32.mrf.mxu1  ;;  %v16917_v41 = vpop.f32.mrf.mxu0 }
 0x25a   : > { %v16912_v48 = vadd.f32 %v14265_v35, %v3050_v1  ;;  %v16915_v39 = vadd.f32 %v2960_v7, %v16660_v24  ;;  %19200 = vst [vmem:[#allocation58_spill] sm:$0xff] %v16917_v41  ;;  %v4810_v1 = vld [vmem:[#allocation2 + $0x173] sm:$0xff]  ;;  %v4811_v7 = vld [vmem:[#allocation2 + $0x17b] sm:$0xff] }
 0x25b   : > { %v14191_v29 = vpop.f32.mrf.mxu1  ;;  %14492 = vmatmul.mubr.msk.f32.gmra.mxu1 %vm934_vm3, %v4808_v20  ;;  %v14268_v62 = vpop.f32.mrf.mxu0  ;;  %14569 = vmatmul.mubr.msk.f32.gmra.mxu0 %vm934_vm3, %v5378_v56 }
 0x25c   : > { %19199 = vst [vmem:[#allocation57_spill] sm:$0xff] %v16915_v39  ;;  %v3052_v46 = vadd.f32 %v14191_v29, %v16666_v61  ;;  %14494 = vmatprep.mubr.msk.f32.mxu1 %vm934_vm3, %v4809_v37  ;;  %14571 = vmatprep.mubr.msk.f32.mxu0 %vm934_vm3, %v5379_v57  ;;  %v6742_v61 = vld [vmem:[%s19089_s5] sm:$0x3]  ;;  %v4812_v57 = vld [vmem:[#allocation2 + $0x183] sm:$0xff] }
 0x25d   : > { %v2970_v24 = vpop.f32.mrf.mxu1  ;;  %v16929_v13 = vpop.f32.mrf.mxu0  ;;  %14663 = vmatprep.subr.msk.mxu0 %vm1550_vm2, %v6742_v61 }
 0x25e   : > { %v16924_v19 = vadd.f32 %v14268_v62, %v3052_v46  ;;  %v16927_v4 = vadd.f32 %v2970_v24, %v16670_v55  ;;  %19202 = vst [vmem:[#allocation60_spill] sm:$0xff] %v16929_v13  ;;  %v5381_v55 = vld [vmem:[#allocation2 + $0x17c] sm:$0xff]  ;;  %14664 = vmatpush3.msk.msra.mxu0 %vm1550_vm2, %v6742_v61  ;;  %v5382_v24 = vld [vmem:[#allocation2 + $0x184] sm:$0xff]  ;;  %v5383_v61 = vld [vmem:[#allocation2 + $0x18c] sm:$0xff] }
 0x25f   : > { %v14194_v35 = vpop.f32.mrf.mxu1  ;;  %14495 = vmatmul.mubr.msk.f32.gmra.mxu1 %vm934_vm3, %v4810_v1  ;;  %v14271_v29 = vpop.f32.mrf.mxu0  ;;  %14572 = vmatmul.mubr.msk.f32.gmra.mxu0 %vm934_vm3, %v5380_v0  ;;  %v4813_v1 = vld [vmem:[#allocation2 + $0x18b] sm:$0xff] }
 0x260   : > { %19201 = vst [vmem:[#allocation59_spill] sm:$0xff] %v16927_v4  ;;  %v3054_v20 = vadd.f32 %v14194_v35, %v16676_v59  ;;  %14497 = vmatprep.mubr.msk.f32.mxu1 %vm934_vm3, %v4811_v7  ;;  %14574 = vmatprep.mubr.msk.f32.mxu0 %vm934_vm3, %v5381_v55  ;;  %v19205_v35 = vld [vmem:[#allocation54_spill] sm:$0xff] }
 0x261   : > { %v2980_v56 = vpop.f32.mrf.mxu1  ;;  %v16946_v62 = vpop.f32.mrf.mxu0 }
 0x262   : > { %v16941_v37 = vadd.f32 %v14271_v29, %v3054_v20  ;;  %v16944_v46 = vadd.f32 %v2980_v56, %v16680_v53  ;;  %19204 = vst [vmem:[#allocation62_spill] sm:$0xff] %v16946_v62  ;;  %v19206_v29 = vld [vmem:[#allocation55_spill] sm:$0xff] }
 0x263   : > { %v14197_v59 = vpop.f32.mrf.mxu1  ;;  %14498 = vmatmul.mubr.msk.f32.gmra.mxu1 %vm934_vm3, %v4812_v57  ;;  %v14274_v7 = vpop.f32.mrf.mxu0  ;;  %14575 = vmatmul.mubr.msk.f32.gmra.mxu0 %vm934_vm3, %v5382_v24  ;;  %v4814_v57 = vld [vmem:[#allocation2 + $0x193] sm:$0xff]  ;;  %v19209_v24 = vld [vmem:[#allocation56_spill] sm:$0xff] }
 0x264   : > { %19203 = vst [vmem:[#allocation61_spill] sm:$0xff] %v16944_v46  ;;  %v3056_v0 = vadd.f32 %v14197_v59, %v19205_v35  ;;  %14500 = vmatprep.mubr.msk.f32.mxu1 %vm934_vm3, %v4813_v1  ;;  %14577 = vmatprep.mubr.msk.f32.mxu0 %vm934_vm3, %v5383_v61  ;;  %v5384_v59 = vld [vmem:[#allocation2 + $0x194] sm:$0xff]  ;;  %v4817_v61 = vld [vmem:[#allocation2 + $0x1ab] sm:$0xff] }
 0x265   : > { %v2990_v53 = vpop.f32.mrf.mxu1  ;;  %v16958_v56 = vpop.f32.mrf.mxu0  ;;  %v4815_v35 = vld [vmem:[#allocation2 + $0x19b] sm:$0xff] }
 0x266   : > { %v16953_v20 = vadd.f32 %v14274_v7, %v3056_v0  ;;  %v16956_v55 = vadd.f32 %v2990_v53, %v19206_v29  ;;  %19208 = vst [vmem:[#allocation55_spill] sm:$0xff] %v16958_v56  ;;  %v5385_v0 = vld [vmem:[#allocation2 + $0x19c] sm:$0xff] }
 0x267   : > { %v14200_v62 = vpop.f32.mrf.mxu1  ;;  %14501 = vmatmul.mubr.msk.f32.gmra.mxu1 %vm934_vm3, %v4814_v57  ;;  %v14277_v1 = vpop.f32.mrf.mxu0  ;;  %14578 = vmatmul.mubr.msk.f32.gmra.mxu0 %vm934_vm3, %v5384_v59  ;;  %v4816_v56 = vld [vmem:[#allocation2 + $0x1a3] sm:$0xff] }
 0x268   : > { %19207 = vst [vmem:[#allocation54_spill] sm:$0xff] %v16956_v55  ;;  %v3058_v46 = vadd.f32 %v14200_v62, %v19209_v24  ;;  %14503 = vmatprep.mubr.msk.f32.mxu1 %vm934_vm3, %v4815_v35  ;;  %14580 = vmatprep.mubr.msk.f32.mxu0 %vm934_vm3, %v5385_v0  ;;  %v5387_v55 = vld [vmem:[#allocation2 + $0x1ac] sm:$0xff]  ;;  %v5386_v59 = vld [vmem:[#allocation2 + $0x1a4] sm:$0xff] }
 0x269   : > { %v3000_v7 = vpop.f32.mrf.mxu1  ;;  %v16970_v57 = vpop.f32.mrf.mxu0 }
 0x26a   : > { %v16965_v53 = vadd.f32 %v14277_v1, %v3058_v46  ;;  %v16968_v29 = vadd.f32 %v3000_v7, %v16703_v63  ;;  %19211 = vst [vmem:[#allocation63_spill] sm:$0xff] %v16970_v57  ;;  %v4818_v46 = vld [vmem:[#allocation2 + $0x1b3] sm:$0xff] }
 0x26b   : > { %v14282_v62 = vpop.f32.mrf.mxu1  ;;  %14504 = vmatmul.mubr.msk.f32.gmra.mxu1 %vm934_vm3, %v4816_v56  ;;  %v14359_v24 = vpop.f32.mrf.mxu0  ;;  %14581 = vmatmul.mubr.msk.f32.gmra.mxu0 %vm934_vm3, %v5386_v59  ;;  %v5388_v63 = vld [vmem:[#allocation2 + $0x1b4] sm:$0xff] }
 0x26c   : > { %19210 = vst [vmem:[#allocation56_spill] sm:$0xff] %v16968_v29  ;;  %v4150_v35 = vadd.f32 %v14282_v62, %v16709_v15  ;;  %14506 = vmatprep.mubr.msk.f32.mxu1 %vm934_vm3, %v4817_v61  ;;  %14583 = vmatprep.mubr.msk.f32.mxu0 %vm934_vm3, %v5387_v55  ;;  %v5909_v15 = vld [vmem:[#allocation2 + $0x2d] sm:$0xff] }
 0x26d   : > { %v3900_v1 = vpop.f32.mrf.mxu1  ;;  %v16982_v57 = vpop.f32.mrf.mxu0  ;;  %v5913_v29 = vld [vmem:[#allocation2 + $0x4d] sm:$0xff] }
 0x26e   : > { %v16977_v0 = vadd.f32 %v14359_v24, %v4150_v35  ;;  %v16980_v7 = vadd.f32 %v3900_v1, %v16712_v38  ;;  %v5910_v24 = vld [vmem:[#allocation2 + $0x35] sm:$0xff] }
 0x26f   : > { %v14285_v56 = vpop.f32.mrf.mxu1  ;;  %14507 = vmatmul.mubr.msk.f32.gmra.mxu1 %vm934_vm3, %v4818_v46  ;;  %v14362_v59 = vpop.f32.mrf.mxu0  ;;  %14584 = vmatmul.mubr.msk.f32.gmra.mxu0 %vm934_vm3, %v5388_v63  ;;  %v5911_v46 = vld [vmem:[#allocation2 + $0x3d] sm:$0xff] }
 0x270   : > { %v4152_v62 = vadd.f32 %v14285_v56, %v16718_v60  ;;  %14588 = vmatprep.mubr.msk.f32.mxu1 %vm934_vm3, %v5909_v15 }
 0x271   : > { %v3910_v55 = vpop.f32.mrf.mxu1  ;;  %v16993_v38 = vpop.f32.mrf.mxu0 }
 0x272   : > { %v16988_v61 = vadd.f32 %v14362_v59, %v4152_v62  ;;  %v16991_v35 = vadd.f32 %v3910_v55, %v16722_v45  ;;  %v5912_v59 = vld [vmem:[#allocation2 + $0x45] sm:$0xff] }
 0x273   : > { %v14288_v1 = vpop.f32.mrf.mxu1  ;;  %14589 = vmatmul.mubr.msk.f32.vlgmr.msra.gmra.mxu1 %vm934_vm3, %v5910_v24  ;;  %v14365_v56 = vpop.f32.mrf.mxu0 }
 0x274   : > { %v4154_v60 = vadd.f32 %v14288_v1, %v16730_v49  ;;  %14591 = vmatprep.mubr.msk.f32.mxu1 %vm934_vm3, %v5911_v46 }
 0x275   : > { %v3920_v15 = vpop.f32.mrf.mxu1  ;;  %v17003_v45 = vpop.f32.mrf.mxu0 }
 0x276   : > { %v16998_v63 = vadd.f32 %v14365_v56, %v4154_v60  ;;  %v17001_v62 = vadd.f32 %v3920_v15, %v16734_v47  ;;  %v5914_v60 = vld [vmem:[#allocation2 + $0x55] sm:$0xff]  ;;  %v5915_v15 = vld [vmem:[#allocation2 + $0x5d] sm:$0xff] }
 0x277   : > { %v14291_v55 = vpop.f32.mrf.mxu1  ;;  %14592 = vmatmul.mubr.msk.f32.gmra.mxu1 %vm934_vm3, %v5912_v59  ;;  %v14368_v13 = vpop.f32.mrf.mxu0 }
 0x278   : > { %v4156_v24 = vadd.f32 %v14291_v55, %v16740_v51  ;;  %14594 = vmatprep.mubr.msk.f32.mxu1 %vm934_vm3, %v5913_v29  ;;  %v5916_v55 = vld [vmem:[#allocation2 + $0x65] sm:$0xff] }
 0x279   : > { %v3930_v49 = vpop.f32.mrf.mxu1  ;;  %v17013_v47 = vpop.f32.mrf.mxu0 }
 0x27a   : > { %v17008_v1 = vadd.f32 %v14368_v13, %v4156_v24  ;;  %v17011_v46 = vadd.f32 %v3930_v49, %v16744_v25  ;;  %v5917_v49 = vld [vmem:[#allocation2 + $0x6d] sm:$0xff] }
 0x27b   : > { %v14294_v56 = vpop.f32.mrf.mxu1  ;;  %14595 = vmatmul.mubr.msk.f32.gmra.mxu1 %vm934_vm3, %v5914_v60  ;;  %v14371_v4 = vpop.f32.mrf.mxu0 }
 0x27c   : > { %v4158_v59 = vadd.f32 %v14294_v56, %v16750_v11  ;;  %14597 = vmatprep.mubr.msk.f32.mxu1 %vm934_vm3, %v5915_v15  ;;  %v5918_v15 = vld [vmem:[#allocation2 + $0x75] sm:$0xff] }
 0x27d   : > { %v3940_v51 = vpop.f32.mrf.mxu1  ;;  %v17023_v25 = vpop.f32.mrf.mxu0 }
 0x27e   : > { %v17018_v29 = vadd.f32 %v14371_v4, %v4158_v59  ;;  %v17021_v13 = vadd.f32 %v3940_v51, %v16754_v27  ;;  %v5919_v51 = vld [vmem:[#allocation2 + $0x7d] sm:$0xff] }
 0x27f   : > { %v14297_v24 = vpop.f32.mrf.mxu1  ;;  %14598 = vmatmul.mubr.msk.f32.gmra.mxu1 %vm934_vm3, %v5916_v55  ;;  %v14374_v41 = vpop.f32.mrf.mxu0 }
 0x280   : > { %v4160_v60 = vadd.f32 %v14297_v24, %v16760_v54  ;;  %14600 = vmatprep.mubr.msk.f32.mxu1 %vm934_vm3, %v5917_v49  ;;  %v5920_v49 = vld [vmem:[#allocation2 + $0x85] sm:$0xff] }
 0x281   : > { %v3950_v11 = vpop.f32.mrf.mxu1  ;;  %v17033_v27 = vpop.f32.mrf.mxu0 }
 0x282   : > { %v17028_v56 = vadd.f32 %v14374_v41, %v4160_v60  ;;  %v17031_v4 = vadd.f32 %v3950_v11, %v16764_v22  ;;  %19212 = vst [vmem:[#allocation64_spill] sm:$0xff] %v17033_v27  ;;  %v5921_v11 = vld [vmem:[#allocation2 + $0x8d] sm:$0xff] }
 0x283   : > { %v14300_v59 = vpop.f32.mrf.mxu1  ;;  %14601 = vmatmul.mubr.msk.f32.gmra.mxu1 %vm934_vm3, %v5918_v15  ;;  %v14377_v39 = vpop.f32.mrf.mxu0 }
 0x284   : > { %v4162_v55 = vadd.f32 %v14300_v59, %v16770_v50  ;;  %14603 = vmatprep.mubr.msk.f32.mxu1 %vm934_vm3, %v5919_v51  ;;  %v5922_v51 = vld [vmem:[#allocation2 + $0x95] sm:$0xff] }
 0x285   : > { %v3960_v54 = vpop.f32.mrf.mxu1  ;;  %v17043_v22 = vpop.f32.mrf.mxu0 }
 0x286   : > { %v17038_v24 = vadd.f32 %v14377_v39, %v4162_v55  ;;  %v17041_v41 = vadd.f32 %v3960_v54, %v16774_v43  ;;  %19213 = vst [vmem:[#allocation65_spill] sm:$0xff] %v17043_v22  ;;  %v5923_v54 = vld [vmem:[#allocation2 + $0x9d] sm:$0xff] }
 0x287   : > { %v14303_v60 = vpop.f32.mrf.mxu1  ;;  %14604 = vmatmul.mubr.msk.f32.gmra.mxu1 %vm934_vm3, %v5920_v49  ;;  %v14380_v27 = vpop.f32.mrf.mxu0 }
 0x288   : > { %v4164_v15 = vadd.f32 %v14303_v60, %v16780_v52  ;;  %14606 = vmatprep.mubr.msk.f32.mxu1 %vm934_vm3, %v5921_v11  ;;  %v5924_v11 = vld [vmem:[#allocation2 + $0xa5] sm:$0xff] }
 0x289   : > { %v3970_v50 = vpop.f32.mrf.mxu1  ;;  %v17053_v43 = vpop.f32.mrf.mxu0 }
 0x28a   : > { %v17048_v59 = vadd.f32 %v14380_v27, %v4164_v15  ;;  %v17051_v39 = vadd.f32 %v3970_v50, %v16784_v36  ;;  %19214 = vst [vmem:[#allocation66_spill] sm:$0xff] %v17053_v43  ;;  %v5925_v50 = vld [vmem:[#allocation2 + $0xad] sm:$0xff] }
 0x28b   : > { %v14306_v55 = vpop.f32.mrf.mxu1  ;;  %14607 = vmatmul.mubr.msk.f32.gmra.mxu1 %vm934_vm3, %v5922_v51  ;;  %v14383_v22 = vpop.f32.mrf.mxu0 }
 0x28c   : > { %v4166_v49 = vadd.f32 %v14306_v55, %v16790_v58  ;;  %14609 = vmatprep.mubr.msk.f32.mxu1 %vm934_vm3, %v5923_v54  ;;  %v5926_v54 = vld [vmem:[#allocation2 + $0xb5] sm:$0xff] }
 0x28d   : > { %v3980_v52 = vpop.f32.mrf.mxu1  ;;  %v17063_v36 = vpop.f32.mrf.mxu0 }
 0x28e   : > { %v17058_v60 = vadd.f32 %v14383_v22, %v4166_v49  ;;  %v17061_v27 = vadd.f32 %v3980_v52, %v16794_v34  ;;  %19216 = vst [vmem:[#allocation68_spill] sm:$0xff] %v17063_v36  ;;  %v5927_v52 = vld [vmem:[#allocation2 + $0xbd] sm:$0xff] }
 0x28f   : > { %v14309_v15 = vpop.f32.mrf.mxu1  ;;  %14610 = vmatmul.mubr.msk.f32.gmra.mxu1 %vm934_vm3, %v5924_v11  ;;  %v14386_v43 = vpop.f32.mrf.mxu0 }
 0x290   : > { %19215 = vst [vmem:[#allocation67_spill] sm:$0xff] %v17061_v27  ;;  %v4168_v51 = vadd.f32 %v14309_v15, %v16800_v10  ;;  %14612 = vmatprep.mubr.msk.f32.mxu1 %vm934_vm3, %v5925_v50  ;;  %v5928_v50 = vld [vmem:[#allocation2 + $0xc5] sm:$0xff] }
 0x291   : > { %v3990_v58 = vpop.f32.mrf.mxu1  ;;  %v17073_v34 = vpop.f32.mrf.mxu0 }
 0x292   : > { %v17068_v55 = vadd.f32 %v14386_v43, %v4168_v51  ;;  %v17071_v22 = vadd.f32 %v3990_v58, %v16804_v9  ;;  %19218 = vst [vmem:[#allocation70_spill] sm:$0xff] %v17073_v34  ;;  %v5929_v58 = vld [vmem:[#allocation2 + $0xcd] sm:$0xff] }
 0x293   : > { %v14312_v49 = vpop.f32.mrf.mxu1  ;;  %14613 = vmatmul.mubr.msk.f32.gmra.mxu1 %vm934_vm3, %v5926_v54  ;;  %v14389_v36 = vpop.f32.mrf.mxu0 }
 0x294   : > { %19217 = vst [vmem:[#allocation69_spill] sm:$0xff] %v17071_v22  ;;  %v4170_v11 = vadd.f32 %v14312_v49, %v16810_v42  ;;  %14615 = vmatprep.mubr.msk.f32.mxu1 %vm934_vm3, %v5927_v52  ;;  %v5930_v52 = vld [vmem:[#allocation2 + $0xd5] sm:$0xff] }
 0x295   : > { %v4000_v10 = vpop.f32.mrf.mxu1  ;;  %v17083_v9 = vpop.f32.mrf.mxu0 }
 0x296   : > { %v17078_v15 = vadd.f32 %v14389_v36, %v4170_v11  ;;  %v17081_v43 = vadd.f32 %v4000_v10, %v16814_v31  ;;  %19220 = vst [vmem:[#allocation72_spill] sm:$0xff] %v17083_v9  ;;  %v5931_v10 = vld [vmem:[#allocation2 + $0xdd] sm:$0xff] }
 0x297   : > { %v14315_v51 = vpop.f32.mrf.mxu1  ;;  %14616 = vmatmul.mubr.msk.f32.gmra.mxu1 %vm934_vm3, %v5928_v50  ;;  %v14392_v34 = vpop.f32.mrf.mxu0 }
 0x298   : > { %19219 = vst [vmem:[#allocation71_spill] sm:$0xff] %v17081_v43  ;;  %v4172_v54 = vadd.f32 %v14315_v51, %v16820_v33  ;;  %14618 = vmatprep.mubr.msk.f32.mxu1 %vm934_vm3, %v5929_v58  ;;  %v5932_v58 = vld [vmem:[#allocation2 + $0xe5] sm:$0xff] }
 0x299   : > { %v4010_v42 = vpop.f32.mrf.mxu1  ;;  %v17093_v31 = vpop.f32.mrf.mxu0 }
 0x29a   : > { %v17088_v49 = vadd.f32 %v14392_v34, %v4172_v54  ;;  %v17091_v36 = vadd.f32 %v4010_v42, %v16824_v32  ;;  %19222 = vst [vmem:[#allocation74_spill] sm:$0xff] %v17093_v31  ;;  %v5933_v42 = vld [vmem:[#allocation2 + $0xed] sm:$0xff] }
 0x29b   : > { %v14318_v11 = vpop.f32.mrf.mxu1  ;;  %14619 = vmatmul.mubr.msk.f32.gmra.mxu1 %vm934_vm3, %v5930_v52  ;;  %v14395_v9 = vpop.f32.mrf.mxu0 }
 0x29c   : > { %19221 = vst [vmem:[#allocation73_spill] sm:$0xff] %v17091_v36  ;;  %v4174_v50 = vadd.f32 %v14318_v11, %v16830_v26  ;;  %14621 = vmatprep.mubr.msk.f32.mxu1 %vm934_vm3, %v5931_v10  ;;  %v5934_v10 = vld [vmem:[#allocation2 + $0xf5] sm:$0xff] }
 0x29d   : > { %v4020_v33 = vpop.f32.mrf.mxu1  ;;  %v17103_v32 = vpop.f32.mrf.mxu0 }
 0x29e   : > { %v17098_v51 = vadd.f32 %v14395_v9, %v4174_v50  ;;  %v17101_v34 = vadd.f32 %v4020_v33, %v16834_v17  ;;  %19224 = vst [vmem:[#allocation76_spill] sm:$0xff] %v17103_v32  ;;  %v5935_v33 = vld [vmem:[#allocation2 + $0xfd] sm:$0xff] }
 0x29f   : > { %v14321_v54 = vpop.f32.mrf.mxu1  ;;  %14622 = vmatmul.mubr.msk.f32.gmra.mxu1 %vm934_vm3, %v5932_v58  ;;  %v14398_v31 = vpop.f32.mrf.mxu0 }
 0x2a0   : > { %19223 = vst [vmem:[#allocation75_spill] sm:$0xff] %v17101_v34  ;;  %v4176_v52 = vadd.f32 %v14321_v54, %v16840_v23  ;;  %14624 = vmatprep.mubr.msk.f32.mxu1 %vm934_vm3, %v5933_v42  ;;  %v5936_v42 = vld [vmem:[#allocation2 + $0x105] sm:$0xff] }
 0x2a1   : > { %v4030_v26 = vpop.f32.mrf.mxu1  ;;  %v17113_v17 = vpop.f32.mrf.mxu0 }
 0x2a2   : > { %v17108_v11 = vadd.f32 %v14398_v31, %v4176_v52  ;;  %v17111_v9 = vadd.f32 %v4030_v26, %v16844_v14  ;;  %19226 = vst [vmem:[#allocation78_spill] sm:$0xff] %v17113_v17  ;;  %v5937_v26 = vld [vmem:[#allocation2 + $0x10d] sm:$0xff] }
 0x2a3   : > { %v14324_v50 = vpop.f32.mrf.mxu1  ;;  %14625 = vmatmul.mubr.msk.f32.gmra.mxu1 %vm934_vm3, %v5934_v10  ;;  %v14401_v32 = vpop.f32.mrf.mxu0 }
 0x2a4   : > { %19225 = vst [vmem:[#allocation77_spill] sm:$0xff] %v17111_v9  ;;  %v4178_v58 = vadd.f32 %v14324_v50, %v16850_v40  ;;  %14627 = vmatprep.mubr.msk.f32.mxu1 %vm934_vm3, %v5935_v33  ;;  %v5938_v33 = vld [vmem:[#allocation2 + $0x115] sm:$0xff] }
 0x2a5   : > { %v4040_v23 = vpop.f32.mrf.mxu1  ;;  %v17123_v14 = vpop.f32.mrf.mxu0 }
 0x2a6   : > { %v17118_v54 = vadd.f32 %v14401_v32, %v4178_v58  ;;  %v17121_v31 = vadd.f32 %v4040_v23, %v16854_v12  ;;  %19228 = vst [vmem:[#allocation80_spill] sm:$0xff] %v17123_v14  ;;  %v5939_v23 = vld [vmem:[#allocation2 + $0x11d] sm:$0xff] }
 0x2a7   : > { %v14327_v52 = vpop.f32.mrf.mxu1  ;;  %14628 = vmatmul.mubr.msk.f32.gmra.mxu1 %vm934_vm3, %v5936_v42  ;;  %v14404_v17 = vpop.f32.mrf.mxu0 }
 0x2a8   : > { %19227 = vst [vmem:[#allocation79_spill] sm:$0xff] %v17121_v31  ;;  %v4180_v10 = vadd.f32 %v14327_v52, %v16860_v16  ;;  %14630 = vmatprep.mubr.msk.f32.mxu1 %vm934_vm3, %v5937_v26  ;;  %v5940_v26 = vld [vmem:[#allocation2 + $0x125] sm:$0xff] }
 0x2a9   : > { %v4050_v40 = vpop.f32.mrf.mxu1  ;;  %v17133_v12 = vpop.f32.mrf.mxu0 }
 0x2aa   : > { %v17128_v50 = vadd.f32 %v14404_v17, %v4180_v10  ;;  %v17131_v32 = vadd.f32 %v4050_v40, %v16864_v8  ;;  %19230 = vst [vmem:[#allocation82_spill] sm:$0xff] %v17133_v12  ;;  %v5941_v40 = vld [vmem:[#allocation2 + $0x12d] sm:$0xff] }
 0x2ab   : > { %v14330_v58 = vpop.f32.mrf.mxu1  ;;  %14631 = vmatmul.mubr.msk.f32.gmra.mxu1 %vm934_vm3, %v5938_v33  ;;  %v14407_v14 = vpop.f32.mrf.mxu0 }
 0x2ac   : > { %19229 = vst [vmem:[#allocation81_spill] sm:$0xff] %v17131_v32  ;;  %v4182_v42 = vadd.f32 %v14330_v58, %v16870_v30  ;;  %14633 = vmatprep.mubr.msk.f32.mxu1 %vm934_vm3, %v5939_v23  ;;  %v5942_v23 = vld [vmem:[#allocation2 + $0x135] sm:$0xff] }
 0x2ad   : > { %v4060_v16 = vpop.f32.mrf.mxu1  ;;  %v17143_v8 = vpop.f32.mrf.mxu0 }
 0x2ae   : > { %v17138_v52 = vadd.f32 %v14407_v14, %v4182_v42  ;;  %v17141_v17 = vadd.f32 %v4060_v16, %v16874_v6  ;;  %19232 = vst [vmem:[#allocation84_spill] sm:$0xff] %v17143_v8  ;;  %v5943_v16 = vld [vmem:[#allocation2 + $0x13d] sm:$0xff] }
 0x2af   : > { %v14333_v10 = vpop.f32.mrf.mxu1  ;;  %14634 = vmatmul.mubr.msk.f32.gmra.mxu1 %vm934_vm3, %v5940_v26  ;;  %v14410_v12 = vpop.f32.mrf.mxu0 }
 0x2b0   : > { %19231 = vst [vmem:[#allocation83_spill] sm:$0xff] %v17141_v17  ;;  %v4184_v33 = vadd.f32 %v14333_v10, %v16880_v21  ;;  %14636 = vmatprep.mubr.msk.f32.mxu1 %vm934_vm3, %v5941_v40  ;;  %v5944_v40 = vld [vmem:[#allocation2 + $0x145] sm:$0xff] }
 0x2b1   : > { %v4070_v30 = vpop.f32.mrf.mxu1  ;;  %v17153_v6 = vpop.f32.mrf.mxu0 }
 0x2b2   : > { %v17148_v58 = vadd.f32 %v14410_v12, %v4184_v33  ;;  %v17151_v14 = vadd.f32 %v4070_v30, %v16884_v3  ;;  %19234 = vst [vmem:[#allocation86_spill] sm:$0xff] %v17153_v6  ;;  %v5945_v30 = vld [vmem:[#allocation2 + $0x14d] sm:$0xff] }
 0x2b3   : > { %v14336_v42 = vpop.f32.mrf.mxu1  ;;  %14637 = vmatmul.mubr.msk.f32.gmra.mxu1 %vm934_vm3, %v5942_v23  ;;  %v14413_v8 = vpop.f32.mrf.mxu0  ;;  %v3617_v23 = vadd.f32 %v16905_v5, %v16903_v2 }
 0x2b4   : > { %19233 = vst [vmem:[#allocation85_spill] sm:$0xff] %v17151_v14  ;;  %v4186_v26 = vadd.f32 %v14336_v42, %v16890_v28  ;;  %14639 = vmatprep.mubr.msk.f32.mxu1 %vm934_vm3, %v5943_v16 }
 0x2b5   : > { %v4080_v21 = vpop.f32.mrf.mxu1  ;;  %v17163_v3 = vpop.f32.mrf.mxu0 }
 0x2b6   : > { %v17158_v10 = vadd.f32 %v14413_v8, %v4186_v26  ;;  %v17161_v12 = vadd.f32 %v4080_v21, %v16894_v18  ;;  %19236 = vst [vmem:[#allocation88_spill] sm:$0xff] %v17163_v3  ;;  %v5946_v21 = vld [vmem:[#allocation2 + $0x155] sm:$0xff] }
 0x2b7   : > { %v14339_v33 = vpop.f32.mrf.mxu1  ;;  %14640 = vmatmul.mubr.msk.f32.gmra.mxu1 %vm934_vm3, %v5944_v40  ;;  %v14416_v42 = vpop.f32.mrf.mxu0  ;;  %v5947_v40 = vld [vmem:[#allocation2 + $0x15d] sm:$0xff] }
 0x2b8   : > { %19235 = vst [vmem:[#allocation87_spill] sm:$0xff] %v17161_v12  ;;  %v4188_v28 = vadd.f32 %v14339_v33, %v16900_v44  ;;  %14642 = vmatprep.mubr.msk.f32.mxu1 %vm934_vm3, %v5945_v30  ;;  %v5948_v30 = vld [vmem:[#allocation2 + $0x165] sm:$0xff] }
 0x2b9   : > { %v4090_v8 = vpop.f32.mrf.mxu1  ;;  %v17174_v26 = vpop.f32.mrf.mxu0 }
 0x2ba   : > { %v17170_v16 = vadd.f32 %v14416_v42, %v4188_v28  ;;  %v17172_v18 = vadd.f32 %v4090_v8, %v3617_v23  ;;  %19238 = vst [vmem:[#allocation90_spill] sm:$0xff] %v17174_v26  ;;  %v5949_v28 = vld [vmem:[#allocation2 + $0x16d] sm:$0xff] }
 0x2bb   : > { %v14342_v3 = vpop.f32.mrf.mxu1  ;;  %14643 = vmatmul.mubr.msk.f32.gmra.mxu1 %vm934_vm3, %v5946_v21  ;;  %v14419_v2 = vpop.f32.mrf.mxu0 }
 0x2bc   : > { %19237 = vst [vmem:[#allocation89_spill] sm:$0xff] %v17172_v18  ;;  %v4190_v12 = vadd.f32 %v14342_v3, %v16912_v48  ;;  %14645 = vmatprep.mubr.msk.f32.mxu1 %vm934_vm3, %v5947_v40 }
 0x2bd   : > { %v17179_v44 = vpop.f32.mrf.mxu1  ;;  %v17183_v33 = vpop.f32.mrf.mxu0 }
 0x2be   : > { %19239 = vst [vmem:[#allocation91_spill] sm:$0xff] %v17179_v44  ;;  %v17181_v5 = vadd.f32 %v14419_v2, %v4190_v12  ;;  %19240 = vst [vmem:[#allocation92_spill] sm:$0xff] %v17183_v33  ;;  %v5950_v12 = vld [vmem:[#allocation2 + $0x175] sm:$0xff]  ;;  %v5951_v2 = vld [vmem:[#allocation2 + $0x17d] sm:$0xff] }
 0x2bf   : > { %v14345_v23 = vpop.f32.mrf.mxu1  ;;  %14646 = vmatmul.mubr.msk.f32.gmra.mxu1 %vm934_vm3, %v5948_v30  ;;  %v14422_v8 = vpop.f32.mrf.mxu0 }
 0x2c0   : > { %v4192_v42 = vadd.f32 %v14345_v23, %v16924_v19  ;;  %14648 = vmatprep.mubr.msk.f32.mxu1 %vm934_vm3, %v5949_v28  ;;  %v6692_v19 = vld [vmem:[#allocation3 + $0x3] sm:$0xff] }
 0x2c1   : > { %v17188_v48 = vpop.f32.mrf.mxu1  ;;  %v17192_v21 = vpop.f32.mrf.mxu0  ;;  %v12506_v23 = vld [vmem:[%s19089_s5 + $0x2] sm:$0x3]  ;;  %14665 = vmatprep.mubr.msk.f32.mxu0 %vm934_vm3, %v6692_v19 }
 0x2c2   : > { %19241 = vst [vmem:[#allocation93_spill] sm:$0xff] %v17188_v48  ;;  %v17190_v3 = vadd.f32 %v14422_v8, %v4192_v42  ;;  %19242 = vst [vmem:[#allocation94_spill] sm:$0xff] %v17192_v21  ;;  %14740 = vmatprep.subr.msk.mxu1 %vm1550_vm2, %v12506_v23  ;;  %v5954_v21 = vld [vmem:[#allocation2 + $0x195] sm:$0xff]  ;;  %v5957_v48 = vld [vmem:[#allocation2 + $0x1ad] sm:$0xff] }
 0x2c3   : > { %v14348_v40 = vpop.f32.mrf.mxu1  ;;  %14649 = vmatmul.mubr.msk.f32.gmra.mxu1 %vm934_vm3, %v5950_v12  ;;  %v14425_v30 = vpop.f32.mrf.mxu0  ;;  %v5952_v12 = vld [vmem:[#allocation2 + $0x185] sm:$0xff] }
 0x2c4   : > { %v4194_v33 = vadd.f32 %v14348_v40, %v16941_v37  ;;  %14651 = vmatprep.mubr.msk.f32.mxu1 %vm934_vm3, %v5951_v2  ;;  %v6693_v37 = vld [vmem:[#allocation3 + $0xb] sm:$0xff]  ;;  %14741 = vmatpush3.msk.msra.mxu1 %vm1550_vm2, %v12506_v23  ;;  %v12558_v40 = vld [vmem:[%s19089_s5 + $0x4] sm:$0x3] }
 0x2c5   : > { %v17200_v28 = vpop.f32.mrf.mxu1  ;;  %v17206_v8 = vpop.f32.mrf.mxu0  ;;  %14666 = vmatmul.mubr.msk.f32.vlgmr.msra.gmra.mxu0 %vm934_vm3, %v6693_v37  ;;  %14817 = vmatprep.subr.msk.mxu0 %vm1550_vm2, %v12558_v40  ;;  %v5955_v37 = vld [vmem:[#allocation2 + $0x19d] sm:$0xff] }
 0x2c6   : > { %19243 = vst [vmem:[#allocation95_spill] sm:$0xff] %v17200_v28  ;;  %v17204_v42 = vadd.f32 %v14425_v30, %v4194_v33  ;;  %19244 = vst [vmem:[#allocation96_spill] sm:$0xff] %v17206_v8  ;;  %v5953_v28 = vld [vmem:[#allocation2 + $0x18d] sm:$0xff]  ;;  %14818 = vmatpush3.msk.msra.mxu0 %vm1550_vm2, %v12558_v40 }
 0x2c7   : > { %v14351_v2 = vpop.f32.mrf.mxu1  ;;  %14652 = vmatmul.mubr.msk.f32.gmra.mxu1 %vm934_vm3, %v5952_v12  ;;  %v14428_v33 = vpop.f32.mrf.mxu0 }
 0x2c8   : > { %v4196_v19 = vadd.f32 %v14351_v2, %v16953_v20  ;;  %14654 = vmatprep.mubr.msk.f32.mxu1 %vm934_vm3, %v5953_v28 }
 0x2c9   : > { %v17217_v30 = vpop.f32.mrf.mxu1  ;;  %v17222_v8 = vpop.f32.mrf.mxu0 }
 0x2ca   : > { %19245 = vst [vmem:[#allocation97_spill] sm:$0xff] %v17217_v30  ;;  %v17220_v23 = vadd.f32 %v14428_v33, %v4196_v19  ;;  %19246 = vst [vmem:[#allocation98_spill] sm:$0xff] %v17222_v8  ;;  %v5956_v19 = vld [vmem:[#allocation2 + $0x1a5] sm:$0xff] }
 0x2cb   : > { %v14354_v12 = vpop.f32.mrf.mxu1  ;;  %14655 = vmatmul.mubr.msk.f32.gmra.mxu1 %vm934_vm3, %v5954_v21  ;;  %v14431_v2 = vpop.f32.mrf.mxu0 }
 0x2cc   : > { %v4198_v20 = vadd.f32 %v14354_v12, %v16965_v53  ;;  %14657 = vmatprep.mubr.msk.f32.mxu1 %vm934_vm3, %v5955_v37  ;;  %v5958_v53 = vld [vmem:[#allocation2 + $0x1b5] sm:$0xff]  ;;  %v7261_v37 = vld [vmem:[#allocation3 + $0x4] sm:$0xff] }
 0x2cd   : > { %v17227_v28 = vpop.f32.mrf.mxu1  ;;  %v17231_v40 = vpop.f32.mrf.mxu0 }
 0x2ce   : > { %19247 = vst [vmem:[#allocation99_spill] sm:$0xff] %v17227_v28  ;;  %v17229_v30 = vadd.f32 %v14431_v2, %v4198_v20  ;;  %19248 = vst [vmem:[#allocation100_spill] sm:$0xff] %v17231_v40 }
 0x2cf   : > { %v14436_v33 = vpop.f32.mrf.mxu1  ;;  %14658 = vmatmul.mubr.msk.f32.gmra.mxu1 %vm934_vm3, %v5956_v19  ;;  %v17237_v21 = vpop.f32.mrf.mxu0 }
 0x2d0   : > { %v17235_v8 = vadd.f32 %v14436_v33, %v16977_v0  ;;  %14660 = vmatprep.mubr.msk.f32.mxu1 %vm934_vm3, %v5957_v48  ;;  %v7262_v0 = vld [vmem:[#allocation3 + $0xc] sm:$0xff] }
 0x2d1   : > { %v17240_v12 = vpop.f32.mrf.mxu1  ;;  %v17242_v28 = vpop.f32.mrf.mxu0 }
 0x2d3   : > { %v14439_v20 = vpop.f32.mrf.mxu1  ;;  %14661 = vmatmul.mubr.msk.f32.gmra.mxu1 %vm934_vm3, %v5958_v53  ;;  %v17251_v33 = vpop.f32.mrf.mxu0 }
 0x2d4   : > { %v17246_v2 = vadd.f32 %v14439_v20, %v16988_v61  ;;  %14742 = vmatprep.mubr.msk.f32.mxu1 %vm934_vm3, %v7261_v37 }
 0x2d5   : > { %v17249_v19 = vpop.f32.mrf.mxu1  ;;  %v17259_v26 = vpop.f32.mrf.mxu0 }
 0x2d7   : > { %v14442_v48 = vpop.f32.mrf.mxu1  ;;  %14743 = vmatmul.mubr.msk.f32.vlgmr.msra.gmra.mxu1 %vm934_vm3, %v7262_v0  ;;  %v17266_v20 = vpop.f32.mrf.mxu0 }
 0x2d8   : > { %v17255_v40 = vadd.f32 %v14442_v48, %v16998_v63 }
 0x2d9   : > { %v17257_v44 = vpop.f32.mrf.mxu1  ;;  %v17273_v63 = vpop.f32.mrf.mxu0 }
 0x2db   : > { %v14445_v53 = vpop.f32.mrf.mxu1 }
 0x2dc   : > { %v17262_v61 = vadd.f32 %v14445_v53, %v17008_v1  ;;  %v17280_v1 = vpop.f32.mrf.mxu0 }
 0x2dd   : > { %v17264_v37 = vpop.f32.mrf.mxu1 }
 0x2df   : > { %v14448_v18 = vpop.f32.mrf.mxu1 }
 0x2e0   : > { %v17269_v6 = vadd.f32 %v14448_v18, %v17018_v29  ;;  %v17287_v29 = vpop.f32.mrf.mxu0 }
 0x2e1   : > { %v17271_v0 = vpop.f32.mrf.mxu1 }
 0x2e3   : > { %v14451_v48 = vpop.f32.mrf.mxu1 }
 0x2e4   : > { %v17276_v14 = vadd.f32 %v14451_v48, %v17028_v56  ;;  %v17294_v56 = vpop.f32.mrf.mxu0 }
 0x2e5   : > { %v17278_v17 = vpop.f32.mrf.mxu1 }
 0x2e7   : > { %v14454_v53 = vpop.f32.mrf.mxu1 }
 0x2e8   : > { %v17283_v32 = vadd.f32 %v14454_v53, %v17038_v24  ;;  %v17301_v24 = vpop.f32.mrf.mxu0 }
 0x2e9   : > { %v17285_v31 = vpop.f32.mrf.mxu1 }
 0x2eb   : > { %v14457_v18 = vpop.f32.mrf.mxu1 }
 0x2ec   : > { %v17290_v9 = vadd.f32 %v14457_v18, %v17048_v59  ;;  %v17308_v59 = vpop.f32.mrf.mxu0 }
 0x2ed   : > { %v17292_v34 = vpop.f32.mrf.mxu1 }
 0x2ee   : > { %19249 = vst [vmem:[#allocation101_spill] sm:$0xff] %v17290_v9  ;;  %19250 = vst [vmem:[#allocation102_spill] sm:$0xff] %v17292_v34 }
 0x2ef   : > { %v14460_v48 = vpop.f32.mrf.mxu1 }
 0x2f0   : > { %v17297_v36 = vadd.f32 %v14460_v48, %v17058_v60  ;;  %v17315_v60 = vpop.f32.mrf.mxu0 }
 0x2f1   : > { %v17299_v43 = vpop.f32.mrf.mxu1 }
 0x2f2   : > { %19251 = vst [vmem:[#allocation103_spill] sm:$0xff] %v17297_v36  ;;  %19252 = vst [vmem:[#allocation104_spill] sm:$0xff] %v17299_v43 }
 0x2f3   : > { %v14463_v53 = vpop.f32.mrf.mxu1 }
 0x2f4   : > { %v17304_v22 = vadd.f32 %v14463_v53, %v17068_v55  ;;  %v17322_v55 = vpop.f32.mrf.mxu0 }
 0x2f5   : > { %v17306_v27 = vpop.f32.mrf.mxu1 }
 0x2f6   : > { %19253 = vst [vmem:[#allocation105_spill] sm:$0xff] %v17304_v22  ;;  %19254 = vst [vmem:[#allocation106_spill] sm:$0xff] %v17306_v27 }
 0x2f7   : > { %v14466_v18 = vpop.f32.mrf.mxu1 }
 0x2f8   : > { %v17311_v9 = vadd.f32 %v14466_v18, %v17078_v15  ;;  %v17329_v15 = vpop.f32.mrf.mxu0 }
 0x2f9   : > { %v17313_v34 = vpop.f32.mrf.mxu1 }
 0x2fa   : > { %19255 = vst [vmem:[#allocation107_spill] sm:$0xff] %v17311_v9  ;;  %19256 = vst [vmem:[#allocation108_spill] sm:$0xff] %v17313_v34 }
 0x2fb   : > { %v14469_v48 = vpop.f32.mrf.mxu1 }
 0x2fc   : > { %v17318_v36 = vadd.f32 %v14469_v48, %v17088_v49  ;;  %v17336_v49 = vpop.f32.mrf.mxu0 }
 0x2fd   : > { %v17320_v43 = vpop.f32.mrf.mxu1 }
 0x2fe   : > { %19257 = vst [vmem:[#allocation109_spill] sm:$0xff] %v17318_v36  ;;  %19258 = vst [vmem:[#allocation110_spill] sm:$0xff] %v17320_v43 }
 0x2ff   : > { %v14472_v53 = vpop.f32.mrf.mxu1 }
 0x300   : > { %v17325_v22 = vadd.f32 %v14472_v53, %v17098_v51  ;;  %v17343_v51 = vpop.f32.mrf.mxu0 }
 0x301   : > { %v17327_v27 = vpop.f32.mrf.mxu1 }
 0x302   : > { %19259 = vst [vmem:[#allocation111_spill] sm:$0xff] %v17325_v22  ;;  %19260 = vst [vmem:[#allocation112_spill] sm:$0xff] %v17327_v27 }
 0x303   : > { %v14475_v18 = vpop.f32.mrf.mxu1 }
 0x304   : > { %v17332_v9 = vadd.f32 %v14475_v18, %v17108_v11  ;;  %v17350_v11 = vpop.f32.mrf.mxu0 }
 0x305   : > { %v17334_v34 = vpop.f32.mrf.mxu1 }
 0x306   : > { %19261 = vst [vmem:[#allocation113_spill] sm:$0xff] %v17332_v9  ;;  %19262 = vst [vmem:[#allocation114_spill] sm:$0xff] %v17334_v34 }
 0x307   : > { %v14478_v48 = vpop.f32.mrf.mxu1 }
 0x308   : > { %v17339_v36 = vadd.f32 %v14478_v48, %v17118_v54  ;;  %v17357_v54 = vpop.f32.mrf.mxu0 }
 0x309   : > { %v17341_v43 = vpop.f32.mrf.mxu1 }
 0x30a   : > { %19263 = vst [vmem:[#allocation115_spill] sm:$0xff] %v17339_v36  ;;  %19264 = vst [vmem:[#allocation116_spill] sm:$0xff] %v17341_v43 }
 0x30b   : > { %v14481_v53 = vpop.f32.mrf.mxu1 }
 0x30c   : > { %v17346_v22 = vadd.f32 %v14481_v53, %v17128_v50  ;;  %v17364_v50 = vpop.f32.mrf.mxu0 }
 0x30d   : > { %v17348_v27 = vpop.f32.mrf.mxu1 }
 0x30e   : > { %19265 = vst [vmem:[#allocation117_spill] sm:$0xff] %v17346_v22  ;;  %19266 = vst [vmem:[#allocation118_spill] sm:$0xff] %v17348_v27 }
 0x30f   : > { %v14484_v18 = vpop.f32.mrf.mxu1 }
 0x310   : > { %v17353_v9 = vadd.f32 %v14484_v18, %v17138_v52  ;;  %v17371_v52 = vpop.f32.mrf.mxu0 }
 0x311   : > { %v17355_v34 = vpop.f32.mrf.mxu1 }
 0x312   : > { %19267 = vst [vmem:[#allocation119_spill] sm:$0xff] %v17353_v9  ;;  %19268 = vst [vmem:[#allocation120_spill] sm:$0xff] %v17355_v34 }
 0x313   : > { %v14487_v48 = vpop.f32.mrf.mxu1 }
 0x314   : > { %v17360_v36 = vadd.f32 %v14487_v48, %v17148_v58  ;;  %v17378_v58 = vpop.f32.mrf.mxu0 }
 0x315   : > { %v17362_v43 = vpop.f32.mrf.mxu1 }
 0x316   : > { %19269 = vst [vmem:[#allocation121_spill] sm:$0xff] %v17360_v36  ;;  %19270 = vst [vmem:[#allocation122_spill] sm:$0xff] %v17362_v43 }
 0x317   : > { %v14490_v53 = vpop.f32.mrf.mxu1 }
 0x318   : > { %v17367_v22 = vadd.f32 %v14490_v53, %v17158_v10  ;;  %v12610_v10 = vld [vmem:[%s19089_s5 + $0x6] sm:$0x3]  ;;  %v17388_v53 = vpop.f32.mrf.mxu0 }
 0x319   : > { %v17369_v27 = vpop.f32.mrf.mxu1  ;;  %14894 = vmatprep.subr.msk.mxu1 %vm1550_vm2, %v12610_v10 }
 0x31a   : > { %19271 = vst [vmem:[#allocation123_spill] sm:$0xff] %v17367_v22  ;;  %19272 = vst [vmem:[#allocation124_spill] sm:$0xff] %v17369_v27  ;;  %14895 = vmatpush3.msk.msra.mxu1 %vm1550_vm2, %v12610_v10 }
 0x31b   : > { %v14493_v18 = vpop.f32.mrf.mxu1 }
 0x31c   : > { %v17374_v9 = vadd.f32 %v14493_v18, %v17170_v16  ;;  %v12662_v16 = vld [vmem:[%s19089_s5 + $0x8] sm:$0x3] }
 0x31d   : > { %v17376_v34 = vpop.f32.mrf.mxu1  ;;  %14971 = vmatprep.subr.msk.mxu0 %vm1550_vm2, %v12662_v16 }
 0x31e   : > { %19273 = vst [vmem:[#allocation125_spill] sm:$0xff] %v17374_v9  ;;  %19274 = vst [vmem:[#allocation126_spill] sm:$0xff] %v17376_v34 }
 0x31f   : > { %v14496_v48 = vpop.f32.mrf.mxu1 }
 0x320   : > { %v17381_v36 = vadd.f32 %v14496_v48, %v17181_v5 }
 0x321   : > { %v17383_v43 = vpop.f32.mrf.mxu1 }
 0x322   : > { %19275 = vst [vmem:[#allocation127_spill] sm:$0xff] %v17381_v36  ;;  %19276 = vst [vmem:[#allocation128_spill] sm:$0xff] %v17383_v43  ;;  %v17401_v36 = vpop.f32.mrf.mxu0 }
 0x323   : > { %v14499_v18 = vpop.f32.mrf.mxu1 }
 0x324   : > { %v17397_v5 = vadd.f32 %v14499_v18, %v17190_v3  ;;  %v17408_v22 = vpop.f32.mrf.mxu0  ;;  %v4719_v3 = vadd.f32 %v16982_v57, %v16980_v7 }
 0x325   : > { %v17399_v48 = vpop.f32.mrf.mxu1 }
 0x326   : > { %19277 = vst [vmem:[#allocation129_spill] sm:$0xff] %v17397_v5  ;;  %19278 = vst [vmem:[#allocation130_spill] sm:$0xff] %v17399_v48  ;;  %v17417_v18 = vpop.f32.mrf.mxu0  ;;  %v5289_v48 = vadd.f32 %v17240_v12, %v4719_v3 }
 0x327   : > { %v14502_v43 = vpop.f32.mrf.mxu1 }
 0x328   : > { %v17404_v9 = vadd.f32 %v14502_v43, %v17204_v42  ;;  %v5859_v57 = vadd.f32 %v17242_v28, %v5289_v48  ;;  %v19283_v28 = vld [vmem:[#allocation7_spill] sm:$0xff] }
 0x329   : > { %v17406_v34 = vpop.f32.mrf.mxu1 }
 0x32a   : > { %19279 = vst [vmem:[#allocation131_spill] sm:$0xff] %v17404_v9  ;;  %v4721_v9 = vadd.f32 %v16993_v38, %v16991_v35 }
 0x32b   : > { %v14505_v27 = vpop.f32.mrf.mxu1 }
 0x32c   : > { %v17411_v10 = vadd.f32 %v14505_v27, %v17220_v23  ;;  %v5860_v27 = vadd.f32 %v17237_v21, %v17235_v8  ;;  %v17429_v23 = vpop.f32.mrf.mxu0  ;;  %v5291_v7 = vadd.f32 %v17249_v19, %v4721_v9 }
 0x32d   : > { %v17413_v16 = vpop.f32.mrf.mxu1 }
 0x32e   : > { %19280 = vst [vmem:[#allocation132_spill] sm:$0xff] %v17411_v10  ;;  %19281 = vst [vmem:[#allocation133_spill] sm:$0xff] %v17413_v16  ;;  %v17437_v3 = vpop.f32.mrf.mxu0 }
 0x32f   : > { %v14508_v5 = vpop.f32.mrf.mxu1 }
 0x330   : > { %v17421_v43 = vadd.f32 %v14508_v5, %v17229_v30  ;;  %v4723_v30 = vadd.f32 %v17003_v45, %v17001_v62  ;;  %v5862_v5 = vadd.f32 %v17251_v33, %v17246_v2  ;;  %v4725_v62 = vadd.f32 %v17013_v47, %v17011_v46  ;;  %v17446_v33 = vpop.f32.mrf.mxu0  ;;  %v19285_v46 = vld [vmem:[#allocation6_spill] sm:$0xff] }
 0x331   : > { %v17423_v42 = vpop.f32.mrf.mxu1  ;;  %v5864_v2 = vadd.f32 %v17266_v20, %v17255_v40  ;;  %v4727_v40 = vadd.f32 %v17023_v25, %v17021_v13  ;;  %v19287_v13 = vld [vmem:[#allocation8_spill] sm:$0xff] }
 0x332   : > { %19282 = vst [vmem:[#allocation134_spill] sm:$0xff] %v17421_v43  ;;  %v5293_v8 = vadd.f32 %v17257_v44, %v4723_v30  ;;  %v5861_v43 = vadd.f32 %v17259_v26, %v5291_v7  ;;  %v5295_v7 = vadd.f32 %v17264_v37, %v4725_v62  ;;  %v5868_v62 = vadd.f32 %v17294_v56, %v17269_v6 }
 0x333   : > { %v14590_v10 = vpop.f32.mrf.mxu1 }
 0x334   : > { %v6430_v16 = vadd.f32 %v14590_v10, %v5860_v27  ;;  %v19284_v10 = vld [vmem:[#allocation5_spill] sm:$0xff]  ;;  %v5863_v26 = vadd.f32 %v17273_v63, %v5293_v8  ;;  %v19286_v63 = vld [vmem:[#allocation4_spill] sm:$0xff]  ;;  %v5297_v8 = vadd.f32 %v17271_v0, %v4727_v40 }
 0x335   : > { %v6180_v12 = vpop.f32.mrf.mxu1  ;;  %v19289_v0 = vld [vmem:[#allocation9_spill] sm:$0xff] }
 0x336   : > { %v6480_v35 = vmax.f32 %v6430_v16, 0.0  ;;  %v6429_v38 = vadd.f32 %v6180_v12, %v5859_v57 }
 0x337   : > { %v14593_v21 = vpop.f32.mrf.mxu1 }
 0x338   : > { %v6586_v48 = vmul.f32 %v6480_v35, %v19283_v28  ;;  %v6479_v9 = vmax.f32 %v6429_v38, 0.0  ;;  %v6432_v19 = vadd.f32 %v14593_v21, %v5862_v5  ;;  %v5866_v5 = vadd.f32 %v17280_v1, %v17262_v61  ;;  %v17458_v35 = vpop.f32.mrf.mxu0  ;;  %v19288_v61 = vld [vmem:[#allocation64_spill] sm:$0xff] }
 0x339   : > { %v6190_v45 = vpop.f32.mrf.mxu1  ;;  %v5865_v28 = vadd.f32 %v17287_v29, %v5295_v7  ;;  %v4729_v1 = vadd.f32 %v19288_v61, %v17031_v4  ;;  %v19290_v7 = vld [vmem:[#allocation10_spill] sm:$0xff] }
 0x33a   : > { %6636 = vst.msk [vmem:[#allocation3 + $0x20] sm:$0xff] %vm934_vm3, %v6586_v48  ;;  %v6585_v44 = vmul.f32 %v6479_v9, %v19284_v10  ;;  %v6482_v16 = vmax.f32 %v6432_v19, 0.0  ;;  %v6431_v27 = vadd.f32 %v6190_v45, %v5861_v43  ;;  %v17470_v45 = vpop.f32.mrf.mxu0 }
 0x33b   : > { %v14596_v57 = vpop.f32.mrf.mxu1  ;;  %v5299_v4 = vadd.f32 %v17278_v17, %v4729_v1  ;;  %v5870_v17 = vadd.f32 %v17308_v59, %v17276_v14 }
 0x33c   : > { %6635 = vst.msk [vmem:[#allocation3 + $0x18] sm:$0xff] %vm934_vm3, %v6585_v44  ;;  %v6588_v47 = vmul.f32 %v6482_v16, %v19285_v46  ;;  %v6481_v30 = vmax.f32 %v6431_v27, 0.0  ;;  %v6434_v12 = vadd.f32 %v14596_v57, %v5864_v2  ;;  %v5867_v44 = vadd.f32 %v17301_v24, %v5297_v8  ;;  %v17486_v40 = vpop.f32.mrf.mxu0 }
 0x33d   : > { %v6200_v20 = vpop.f32.mrf.mxu1 }
 0x33e   : > { %6638 = vst.msk [vmem:[#allocation3 + $0x30] sm:$0xff] %vm934_vm3, %v6588_v47  ;;  %v6587_v43 = vmul.f32 %v6481_v30, %v19286_v63  ;;  %v6484_v37 = vmax.f32 %v6434_v12, 0.0  ;;  %v6433_v38 = vadd.f32 %v6200_v20, %v5863_v26  ;;  %v19291_v30 = vld [vmem:[#allocation65_spill] sm:$0xff]  ;;  %v19292_v20 = vld [vmem:[#allocation11_spill] sm:$0xff]  ;;  %v17502_v1 = vpop.f32.mrf.mxu0 }
 0x33f   : > { %v14599_v21 = vpop.f32.mrf.mxu1  ;;  %v4731_v24 = vadd.f32 %v19291_v30, %v17041_v41 }
 0x340   : > { %6637 = vst.msk [vmem:[#allocation3 + $0x28] sm:$0xff] %vm934_vm3, %v6587_v43  ;;  %v6590_v25 = vmul.f32 %v6484_v37, %v19287_v13  ;;  %v6483_v48 = vmax.f32 %v6433_v38, 0.0  ;;  %v6436_v9 = vadd.f32 %v14599_v21, %v5866_v5  ;;  %v19293_v13 = vld [vmem:[#allocation12_spill] sm:$0xff] }
 0x341   : > { %v6210_v19 = vpop.f32.mrf.mxu1  ;;  %v5301_v37 = vadd.f32 %v17285_v31, %v4731_v24  ;;  %v17518_v24 = vpop.f32.mrf.mxu0 }
 0x342   : > { %6640 = vst.msk [vmem:[#allocation3 + $0x40] sm:$0xff] %vm934_vm3, %v6590_v25  ;;  %v6589_v2 = vmul.f32 %v6483_v48, %v19289_v0  ;;  %v6486_v29 = vmax.f32 %v6436_v9, 0.0  ;;  %v6435_v10 = vadd.f32 %v6210_v19, %v5865_v28  ;;  %v5869_v28 = vadd.f32 %v17315_v60, %v5299_v4  ;;  %v19294_v9 = vld [vmem:[#allocation66_spill] sm:$0xff]  ;;  %v19295_v19 = vld [vmem:[#allocation13_spill] sm:$0xff] }
 0x343   : > { %v14602_v16 = vpop.f32.mrf.mxu1  ;;  %v6694_v27 = vld [vmem:[#allocation3 + $0x13] sm:$0xff]  ;;  %v6695_v57 = vld [vmem:[#allocation3 + $0x1b] sm:$0xff]  ;;  %v4733_v31 = vadd.f32 %v19294_v9, %v17051_v39  ;;  %v5872_v60 = vadd.f32 %v17322_v55, %v17283_v32 }
 0x344   : > { %v7263_v26 = vld [vmem:[#allocation3 + $0x14] sm:$0xff]  ;;  %6639 = vst.msk [vmem:[#allocation3 + $0x38] sm:$0xff] %vm934_vm3, %v6589_v2  ;;  %v6592_v6 = vmul.f32 %v6486_v29, %v19290_v7  ;;  %v6485_v56 = vmax.f32 %v6435_v10, 0.0  ;;  %v6438_v46 = vadd.f32 %v14602_v16, %v5868_v62  ;;  %14668 = vmatprep.mubr.msk.f32.mxu0 %vm934_vm3, %v6694_v27  ;;  %v7264_v47 = vld [vmem:[#allocation3 + $0x1c] sm:$0xff]  ;;  %v5871_v29 = vadd.f32 %v17329_v15, %v5301_v37 }
 0x345   : > { %14745 = vmatprep.mubr.msk.f32.mxu1 %vm934_vm3, %v7263_v26  ;;  %v6220_v12 = vpop.f32.mrf.mxu1  ;;  %14669 = vmatmul.mubr.msk.f32.gmra.mxu0 %vm934_vm3, %v6695_v57  ;;  %v19296_v27 = vld [vmem:[#allocation102_spill] sm:$0xff] }
 0x346   : > { %14746 = vmatmul.mubr.msk.f32.gmra.mxu1 %vm934_vm3, %v7264_v47  ;;  %6642 = vst.msk [vmem:[#allocation3 + $0x50] sm:$0xff] %vm934_vm3, %v6592_v6  ;;  %v6591_v5 = vmul.f32 %v6485_v56, %v19292_v20  ;;  %v6488_v63 = vmax.f32 %v6438_v46, 0.0  ;;  %v6437_v43 = vadd.f32 %v6220_v12, %v5867_v44  ;;  %v5303_v26 = vadd.f32 %v19296_v27, %v4733_v31  ;;  %v19297_v57 = vld [vmem:[#allocation14_spill] sm:$0xff]  ;;  %v19298_v6 = vld [vmem:[#allocation67_spill] sm:$0xff]  ;;  %v19299_v56 = vld [vmem:[#allocation68_spill] sm:$0xff] }
 0x347   : > { %v14605_v38 = vpop.f32.mrf.mxu1  ;;  %v6696_v41 = vld [vmem:[#allocation3 + $0x23] sm:$0xff]  ;;  %v6697_v21 = vld [vmem:[#allocation3 + $0x2b] sm:$0xff]  ;;  %v4735_v15 = vadd.f32 %v19299_v56, %v19298_v6  ;;  %v19301_v12 = vld [vmem:[#allocation15_spill] sm:$0xff] }
 0x348   : > { %v7265_v8 = vld [vmem:[#allocation3 + $0x24] sm:$0xff]  ;;  %6641 = vst.msk [vmem:[#allocation3 + $0x48] sm:$0xff] %vm934_vm3, %v6591_v5  ;;  %v6594_v14 = vmul.f32 %v6488_v63, %v19293_v13  ;;  %v6487_v59 = vmax.f32 %v6437_v43, 0.0  ;;  %v6440_v25 = vadd.f32 %v14605_v38, %v5870_v17  ;;  %14671 = vmatprep.mubr.msk.f32.mxu0 %vm934_vm3, %v6696_v41  ;;  %v7266_v48 = vld [vmem:[#allocation3 + $0x2c] sm:$0xff] }
 0x349   : > { %14748 = vmatprep.mubr.msk.f32.mxu1 %vm934_vm3, %v7265_v8  ;;  %v6230_v61 = vpop.f32.mrf.mxu1  ;;  %14672 = vmatmul.mubr.msk.f32.gmra.mxu0 %vm934_vm3, %v6697_v21  ;;  %v19300_v47 = vld [vmem:[#allocation101_spill] sm:$0xff]  ;;  %v19302_v63 = vld [vmem:[#allocation104_spill] sm:$0xff]  ;;  %v5873_v21 = vadd.f32 %v17343_v51, %v5303_v26  ;;  %v19306_v51 = vld [vmem:[#allocation103_spill] sm:$0xff] }
 0x34a   : > { %14749 = vmatmul.mubr.msk.f32.gmra.mxu1 %vm934_vm3, %v7266_v48  ;;  %6644 = vst.msk [vmem:[#allocation3 + $0x60] sm:$0xff] %vm934_vm3, %v6594_v14  ;;  %v6593_v62 = vmul.f32 %v6487_v59, %v19295_v19  ;;  %v6490_v0 = vmax.f32 %v6440_v25, 0.0  ;;  %v6439_v2 = vadd.f32 %v6230_v61, %v5869_v28  ;;  %v5874_v30 = vadd.f32 %v17336_v49, %v19300_v47  ;;  %v19303_v28 = vld [vmem:[#allocation16_spill] sm:$0xff]  ;;  %v19304_v25 = vld [vmem:[#allocation69_spill] sm:$0xff]  ;;  %v19305_v48 = vld [vmem:[#allocation70_spill] sm:$0xff] }
 0x34b   : > { %v14608_v10 = vpop.f32.mrf.mxu1  ;;  %v6698_v39 = vld [vmem:[#allocation3 + $0x33] sm:$0xff]  ;;  %v6699_v16 = vld [vmem:[#allocation3 + $0x3b] sm:$0xff]  ;;  %v5305_v43 = vadd.f32 %v19302_v63, %v4735_v15  ;;  %v4737_v9 = vadd.f32 %v19305_v48, %v19304_v25  ;;  %v5876_v61 = vadd.f32 %v17350_v11, %v19306_v51  ;;  %v19307_v19 = vld [vmem:[#allocation17_spill] sm:$0xff] }
 0x34c   : > { %v7267_v44 = vld [vmem:[#allocation3 + $0x34] sm:$0xff]  ;;  %6643 = vst.msk [vmem:[#allocation3 + $0x58] sm:$0xff] %vm934_vm3, %v6593_v62  ;;  %v6596_v32 = vmul.f32 %v6490_v0, %v19297_v57  ;;  %v6489_v55 = vmax.f32 %v6439_v2, 0.0  ;;  %v6442_v4 = vadd.f32 %v14608_v10, %v5872_v60  ;;  %14674 = vmatprep.mubr.msk.f32.mxu0 %vm934_vm3, %v6698_v39  ;;  %v7268_v7 = vld [vmem:[#allocation3 + $0x3c] sm:$0xff]  ;;  %v17534_v60 = vpop.f32.mrf.mxu0  ;;  %v19312_v15 = vld [vmem:[#allocation105_spill] sm:$0xff] }
 0x34d   : > { %14751 = vmatprep.mubr.msk.f32.mxu1 %vm934_vm3, %v7267_v44  ;;  %v6240_v46 = vpop.f32.mrf.mxu1  ;;  %14675 = vmatmul.mubr.msk.f32.gmra.mxu0 %vm934_vm3, %v6699_v16  ;;  %v19308_v27 = vld [vmem:[#allocation106_spill] sm:$0xff]  ;;  %v19311_v6 = vld [vmem:[#allocation72_spill] sm:$0xff]  ;;  %v19319_v51 = vld [vmem:[#allocation21_spill] sm:$0xff] }
 0x34e   : > { %14752 = vmatmul.mubr.msk.f32.gmra.mxu1 %vm934_vm3, %v7268_v7  ;;  %6646 = vst.msk [vmem:[#allocation3 + $0x70] sm:$0xff] %vm934_vm3, %v6596_v32  ;;  %v6595_v17 = vmul.f32 %v6489_v55, %v19301_v12  ;;  %v6492_v20 = vmax.f32 %v6442_v4, 0.0  ;;  %v6441_v5 = vadd.f32 %v6240_v46, %v5871_v29  ;;  %v5875_v29 = vadd.f32 %v17357_v54, %v5305_v43  ;;  %v19309_v57 = vld [vmem:[#allocation18_spill] sm:$0xff]  ;;  %v19310_v7 = vld [vmem:[#allocation71_spill] sm:$0xff]  ;;  %v17550_v47 = vpop.f32.mrf.mxu0 }
 0x34f   : > { %v14611_v37 = vpop.f32.mrf.mxu1  ;;  %v6700_v38 = vld [vmem:[#allocation3 + $0x43] sm:$0xff]  ;;  %v6701_v8 = vld [vmem:[#allocation3 + $0x4b] sm:$0xff]  ;;  %v5307_v26 = vadd.f32 %v19308_v27, %v4737_v9  ;;  %v4739_v54 = vadd.f32 %v19311_v6, %v19310_v7  ;;  %v5878_v46 = vadd.f32 %v17364_v50, %v19312_v15 }
 0x350   : > { %v7269_v41 = vld [vmem:[#allocation3 + $0x44] sm:$0xff]  ;;  %6645 = vst.msk [vmem:[#allocation3 + $0x68] sm:$0xff] %vm934_vm3, %v6595_v17  ;;  %v6598_v49 = vmul.f32 %v6492_v20, %v19303_v28  ;;  %v6491_v13 = vmax.f32 %v6441_v5, 0.0  ;;  %v6444_v14 = vadd.f32 %v14611_v37, %v5874_v30  ;;  %14677 = vmatprep.mubr.msk.f32.mxu0 %vm934_vm3, %v6700_v38  ;;  %v7270_v59 = vld [vmem:[#allocation3 + $0x4c] sm:$0xff]  ;;  %v19313_v30 = vld [vmem:[#allocation19_spill] sm:$0xff] }
 0x351   : > { %14754 = vmatprep.mubr.msk.f32.mxu1 %vm934_vm3, %v7269_v41  ;;  %v6250_v31 = vpop.f32.mrf.mxu1  ;;  %14678 = vmatmul.mubr.msk.f32.gmra.mxu0 %vm934_vm3, %v6701_v8  ;;  %v19314_v5 = vld [vmem:[#allocation108_spill] sm:$0xff]  ;;  %v5877_v8 = vadd.f32 %v17371_v52, %v5307_v26  ;;  %v19318_v52 = vld [vmem:[#allocation107_spill] sm:$0xff]  ;;  %v19321_v27 = vld [vmem:[#allocation22_spill] sm:$0xff] }
 0x352   : > { %14755 = vmatmul.mubr.msk.f32.gmra.mxu1 %vm934_vm3, %v7270_v59  ;;  %6648 = vst.msk [vmem:[#allocation3 + $0x80] sm:$0xff] %vm934_vm3, %v6598_v49  ;;  %v6597_v62 = vmul.f32 %v6491_v13, %v19307_v19  ;;  %v6494_v0 = vmax.f32 %v6444_v14, 0.0  ;;  %v6443_v2 = vadd.f32 %v6250_v31, %v5873_v21  ;;  %v5309_v63 = vadd.f32 %v19314_v5, %v4739_v54  ;;  %v19315_v21 = vld [vmem:[#allocation20_spill] sm:$0xff]  ;;  %v19316_v14 = vld [vmem:[#allocation73_spill] sm:$0xff]  ;;  %v19317_v59 = vld [vmem:[#allocation74_spill] sm:$0xff]  ;;  %v17566_v31 = vpop.f32.mrf.mxu0 }
 0x353   : > { %v14614_v10 = vpop.f32.mrf.mxu1  ;;  %v6702_v39 = vld [vmem:[#allocation3 + $0x53] sm:$0xff]  ;;  %v6703_v16 = vld [vmem:[#allocation3 + $0x5b] sm:$0xff]  ;;  %v4741_v25 = vadd.f32 %v19317_v59, %v19316_v14  ;;  %v5880_v9 = vadd.f32 %v17378_v58, %v19318_v52  ;;  %v19324_v7 = vld [vmem:[#allocation109_spill] sm:$0xff] }
 0x354   : > { %v7271_v44 = vld [vmem:[#allocation3 + $0x54] sm:$0xff]  ;;  %6647 = vst.msk [vmem:[#allocation3 + $0x78] sm:$0xff] %vm934_vm3, %v6597_v62  ;;  %v6600_v11 = vmul.f32 %v6494_v0, %v19309_v57  ;;  %v6493_v32 = vmax.f32 %v6443_v2, 0.0  ;;  %v6446_v55 = vadd.f32 %v14614_v10, %v5876_v61  ;;  %14680 = vmatprep.mubr.msk.f32.mxu0 %vm934_vm3, %v6702_v39  ;;  %v7272_v4 = vld [vmem:[#allocation3 + $0x5c] sm:$0xff]  ;;  %v5879_v0 = vadd.f32 %v17388_v53, %v5309_v63  ;;  %v17582_v54 = vpop.f32.mrf.mxu0 }
 0x355   : > { %14757 = vmatprep.mubr.msk.f32.mxu1 %vm934_vm3, %v7271_v44  ;;  %v6260_v56 = vpop.f32.mrf.mxu1  ;;  %14681 = vmatmul.mubr.msk.f32.gmra.mxu0 %vm934_vm3, %v6703_v16  ;;  %v19320_v44 = vld [vmem:[#allocation110_spill] sm:$0xff]  ;;  %v5882_v6 = vadd.f32 %v17401_v36, %v19324_v7 }
 0x356   : > { %14758 = vmatmul.mubr.msk.f32.gmra.mxu1 %vm934_vm3, %v7272_v4  ;;  %6650 = vst.msk [vmem:[#allocation3 + $0x90] sm:$0xff] %vm934_vm3, %v6600_v11  ;;  %v6599_v12 = vmul.f32 %v6493_v32, %v19313_v30  ;;  %v6496_v17 = vmax.f32 %v6446_v55, 0.0  ;;  %v6445_v20 = vadd.f32 %v6260_v56, %v5875_v29  ;;  %v5311_v16 = vadd.f32 %v19320_v44, %v4741_v25  ;;  %v19322_v32 = vld [vmem:[#allocation75_spill] sm:$0xff]  ;;  %v19323_v55 = vld [vmem:[#allocation76_spill] sm:$0xff]  ;;  %v17598_v59 = vpop.f32.mrf.mxu0  ;;  %v19331_v25 = vld [vmem:[#allocation25_spill] sm:$0xff] }
 0x357   : > { %v14617_v43 = vpop.f32.mrf.mxu1  ;;  %v6704_v37 = vld [vmem:[#allocation3 + $0x63] sm:$0xff]  ;;  %v6705_v41 = vld [vmem:[#allocation3 + $0x6b] sm:$0xff]  ;;  %v4743_v53 = vadd.f32 %v19323_v55, %v19322_v32  ;;  %v19325_v56 = vld [vmem:[#allocation23_spill] sm:$0xff] }
 0x358   : > { %v7273_v38 = vld [vmem:[#allocation3 + $0x64] sm:$0xff]  ;;  %6649 = vst.msk [vmem:[#allocation3 + $0x88] sm:$0xff] %vm934_vm3, %v6599_v12  ;;  %v6602_v50 = vmul.f32 %v6496_v17, %v19315_v21  ;;  %v6495_v28 = vmax.f32 %v6445_v20, 0.0  ;;  %v6448_v49 = vadd.f32 %v14617_v43, %v5878_v46  ;;  %14683 = vmatprep.mubr.msk.f32.mxu0 %vm934_vm3, %v6704_v37  ;;  %v7274_v13 = vld [vmem:[#allocation3 + $0x6c] sm:$0xff]  ;;  %v5881_v37 = vadd.f32 %v17408_v22, %v5311_v16  ;;  %v19330_v22 = vld [vmem:[#allocation111_spill] sm:$0xff]  ;;  %v17614_v32 = vpop.f32.mrf.mxu0 }
 0x359   : > { %14760 = vmatprep.mubr.msk.f32.mxu1 %vm934_vm3, %v7273_v38  ;;  %v6270_v48 = vpop.f32.mrf.mxu1  ;;  %14684 = vmatmul.mubr.msk.f32.gmra.mxu0 %vm934_vm3, %v6705_v41  ;;  %v19326_v12 = vld [vmem:[#allocation112_spill] sm:$0xff]  ;;  %v5884_v14 = vadd.f32 %v17417_v18, %v19330_v22  ;;  %v19337_v55 = vld [vmem:[#allocation27_spill] sm:$0xff] }
 0x35a   : > { %14761 = vmatmul.mubr.msk.f32.gmra.mxu1 %vm934_vm3, %v7274_v13  ;;  %6652 = vst.msk [vmem:[#allocation3 + $0xa0] sm:$0xff] %vm934_vm3, %v6602_v50  ;;  %v6601_v61 = vmul.f32 %v6495_v28, %v19319_v51  ;;  %v6498_v19 = vmax.f32 %v6448_v49, 0.0  ;;  %v6447_v62 = vadd.f32 %v6270_v48, %v5877_v8  ;;  %v5313_v17 = vadd.f32 %v19326_v12, %v4743_v53  ;;  %v19327_v38 = vld [vmem:[#allocation24_spill] sm:$0xff]  ;;  %v19328_v50 = vld [vmem:[#allocation77_spill] sm:$0xff]  ;;  %v19329_v28 = vld [vmem:[#allocation78_spill] sm:$0xff] }
 0x35b   : > { %v14620_v2 = vpop.f32.mrf.mxu1  ;;  %v6706_v29 = vld [vmem:[#allocation3 + $0x73] sm:$0xff]  ;;  %v6707_v39 = vld [vmem:[#allocation3 + $0x7b] sm:$0xff]  ;;  %v4745_v49 = vadd.f32 %v19329_v28, %v19328_v50  ;;  %v19343_v50 = vld [vmem:[#allocation29_spill] sm:$0xff] }
 0x35c   : > { %v7275_v10 = vld [vmem:[#allocation3 + $0x74] sm:$0xff]  ;;  %6651 = vst.msk [vmem:[#allocation3 + $0x98] sm:$0xff] %vm934_vm3, %v6601_v61  ;;  %v6604_v58 = vmul.f32 %v6498_v19, %v19321_v27  ;;  %v6497_v26 = vmax.f32 %v6447_v62, 0.0  ;;  %v6450_v57 = vadd.f32 %v14620_v2, %v5880_v9  ;;  %14686 = vmatprep.mubr.msk.f32.mxu0 %vm934_vm3, %v6706_v29  ;;  %v7276_v11 = vld [vmem:[#allocation3 + $0x7c] sm:$0xff]  ;;  %v5883_v51 = vadd.f32 %v17429_v23, %v5313_v17 }
 0x35d   : > { %14763 = vmatprep.mubr.msk.f32.mxu1 %vm934_vm3, %v7275_v10  ;;  %v6280_v4 = vpop.f32.mrf.mxu1  ;;  %14687 = vmatmul.mubr.msk.f32.gmra.mxu0 %vm934_vm3, %v6707_v39  ;;  %v19332_v2 = vld [vmem:[#allocation114_spill] sm:$0xff]  ;;  %v19334_v27 = vld [vmem:[#allocation79_spill] sm:$0xff] }
 0x35e   : > { %14764 = vmatmul.mubr.msk.f32.gmra.mxu1 %vm934_vm3, %v7276_v11  ;;  %6654 = vst.msk [vmem:[#allocation3 + $0xb0] sm:$0xff] %vm934_vm3, %v6604_v58  ;;  %v6603_v15 = vmul.f32 %v6497_v26, %v19325_v56  ;;  %v6500_v46 = vmax.f32 %v6450_v57, 0.0  ;;  %v6449_v30 = vadd.f32 %v6280_v4, %v5879_v0  ;;  %v5315_v29 = vadd.f32 %v19332_v2, %v4745_v49  ;;  %v19333_v10 = vld [vmem:[#allocation26_spill] sm:$0xff]  ;;  %v19335_v58 = vld [vmem:[#allocation80_spill] sm:$0xff]  ;;  %v19336_v57 = vld [vmem:[#allocation113_spill] sm:$0xff] }
 0x35f   : > { %v14623_v20 = vpop.f32.mrf.mxu1  ;;  %v6708_v5 = vld [vmem:[#allocation3 + $0x83] sm:$0xff]  ;;  %v6709_v43 = vld [vmem:[#allocation3 + $0x8b] sm:$0xff]  ;;  %v4747_v23 = vadd.f32 %v19335_v58, %v19334_v27  ;;  %v5886_v11 = vadd.f32 %v17437_v3, %v19336_v57  ;;  %v19346_v2 = vld [vmem:[#allocation83_spill] sm:$0xff] }
 0x360   : > { %v7277_v63 = vld [vmem:[#allocation3 + $0x84] sm:$0xff]  ;;  %6653 = vst.msk [vmem:[#allocation3 + $0xa8] sm:$0xff] %vm934_vm3, %v6603_v15  ;;  %v6606_v36 = vmul.f32 %v6500_v46, %v19327_v38  ;;  %v6499_v41 = vmax.f32 %v6449_v30, 0.0  ;;  %v6452_v8 = vadd.f32 %v14623_v20, %v5882_v6  ;;  %14689 = vmatprep.mubr.msk.f32.mxu0 %vm934_vm3, %v6708_v5  ;;  %v7278_v21 = vld [vmem:[#allocation3 + $0x8c] sm:$0xff]  ;;  %v5885_v17 = vadd.f32 %v17446_v33, %v5315_v29  ;;  %v19342_v33 = vld [vmem:[#allocation115_spill] sm:$0xff] }
 0x361   : > { %14766 = vmatprep.mubr.msk.f32.mxu1 %vm934_vm3, %v7277_v63  ;;  %v6290_v13 = vpop.f32.mrf.mxu1  ;;  %14690 = vmatmul.mubr.msk.f32.gmra.mxu0 %vm934_vm3, %v6709_v43  ;;  %v19338_v6 = vld [vmem:[#allocation116_spill] sm:$0xff]  ;;  %v19341_v38 = vld [vmem:[#allocation82_spill] sm:$0xff] }
 0x362   : > { %14767 = vmatmul.mubr.msk.f32.gmra.mxu1 %vm934_vm3, %v7278_v21  ;;  %6656 = vst.msk [vmem:[#allocation3 + $0xc0] sm:$0xff] %vm934_vm3, %v6606_v36  ;;  %v6605_v48 = vmul.f32 %v6499_v41, %v19331_v25  ;;  %v6502_v52 = vmax.f32 %v6452_v8, 0.0  ;;  %v6451_v9 = vadd.f32 %v6290_v13, %v5881_v37  ;;  %v5317_v56 = vadd.f32 %v19338_v6, %v4747_v23  ;;  %v19339_v20 = vld [vmem:[#allocation28_spill] sm:$0xff]  ;;  %v19340_v37 = vld [vmem:[#allocation81_spill] sm:$0xff]  ;;  %v17630_v21 = vpop.f32.mrf.mxu0 }
 0x363   : > { %v14626_v61 = vpop.f32.mrf.mxu1  ;;  %v6710_v19 = vld [vmem:[#allocation3 + $0x93] sm:$0xff]  ;;  %v6711_v0 = vld [vmem:[#allocation3 + $0x9b] sm:$0xff]  ;;  %v4749_v36 = vadd.f32 %v19341_v38, %v19340_v37  ;;  %v5888_v8 = vadd.f32 %v17458_v35, %v19342_v33 }
 0x364   : > { %v7279_v62 = vld [vmem:[#allocation3 + $0x94] sm:$0xff]  ;;  %6655 = vst.msk [vmem:[#allocation3 + $0xb8] sm:$0xff] %vm934_vm3, %v6605_v48  ;;  %v6608_v18 = vmul.f32 %v6502_v52, %v19333_v10  ;;  %v6501_v39 = vmax.f32 %v6451_v9, 0.0  ;;  %v6454_v44 = vadd.f32 %v14626_v61, %v5884_v14  ;;  %14692 = vmatprep.mubr.msk.f32.mxu0 %vm934_vm3, %v6710_v19  ;;  %v7280_v16 = vld [vmem:[#allocation3 + $0x9c] sm:$0xff]  ;;  %v5887_v22 = vadd.f32 %v17470_v45, %v5317_v56 }
 0x365   : > { %14769 = vmatprep.mubr.msk.f32.mxu1 %vm934_vm3, %v7279_v62  ;;  %v6300_v26 = vpop.f32.mrf.mxu1  ;;  %14693 = vmatmul.mubr.msk.f32.gmra.mxu0 %vm934_vm3, %v6711_v0  ;;  %v19344_v9 = vld [vmem:[#allocation118_spill] sm:$0xff]  ;;  %v19347_v29 = vld [vmem:[#allocation84_spill] sm:$0xff] }
 0x366   : > { %14770 = vmatmul.mubr.msk.f32.gmra.mxu1 %vm934_vm3, %v7280_v16  ;;  %6658 = vst.msk [vmem:[#allocation3 + $0xd0] sm:$0xff] %vm934_vm3, %v6608_v18  ;;  %v6607_v53 = vmul.f32 %v6501_v39, %v19337_v55  ;;  %v6504_v4 = vmax.f32 %v6454_v44, 0.0  ;;  %v6453_v7 = vadd.f32 %v6300_v26, %v5883_v51  ;;  %v5319_v51 = vadd.f32 %v19344_v9, %v4749_v36  ;;  %v19345_v61 = vld [vmem:[#allocation30_spill] sm:$0xff]  ;;  %v19348_v18 = vld [vmem:[#allocation117_spill] sm:$0xff]  ;;  %v17646_v44 = vpop.f32.mrf.mxu0  ;;  %v19349_v16 = vld [vmem:[#allocation31_spill] sm:$0xff] }
 0x367   : > { %v14629_v15 = vpop.f32.mrf.mxu1  ;;  %v6712_v46 = vld [vmem:[#allocation3 + $0xa3] sm:$0xff]  ;;  %v6713_v12 = vld [vmem:[#allocation3 + $0xab] sm:$0xff]  ;;  %v4751_v45 = vadd.f32 %v19347_v29, %v19346_v2  ;;  %v5890_v39 = vadd.f32 %v17486_v40, %v19348_v18 }
 0x368   : > { %v7281_v30 = vld [vmem:[#allocation3 + $0xa4] sm:$0xff]  ;;  %6657 = vst.msk [vmem:[#allocation3 + $0xc8] sm:$0xff] %vm934_vm3, %v6607_v53  ;;  %v6610_v3 = vmul.f32 %v6504_v4, %v19339_v20  ;;  %v6503_v5 = vmax.f32 %v6453_v7, 0.0  ;;  %v6456_v63 = vadd.f32 %v14629_v15, %v5886_v11  ;;  %14695 = vmatprep.mubr.msk.f32.mxu0 %vm934_vm3, %v6712_v46  ;;  %v7282_v43 = vld [vmem:[#allocation3 + $0xac] sm:$0xff]  ;;  %v5889_v7 = vadd.f32 %v17502_v1, %v5319_v51  ;;  %v19354_v1 = vld [vmem:[#allocation119_spill] sm:$0xff] }
 0x369   : > { %14772 = vmatprep.mubr.msk.f32.mxu1 %vm934_vm3, %v7281_v30  ;;  %v6310_v41 = vpop.f32.mrf.mxu1  ;;  %14696 = vmatmul.mubr.msk.f32.gmra.mxu0 %vm934_vm3, %v6713_v12  ;;  %v19350_v26 = vld [vmem:[#allocation120_spill] sm:$0xff]  ;;  %v19352_v30 = vld [vmem:[#allocation85_spill] sm:$0xff]  ;;  %v19353_v12 = vld [vmem:[#allocation86_spill] sm:$0xff] }
 0x36a   : > { %14773 = vmatmul.mubr.msk.f32.gmra.mxu1 %vm934_vm3, %v7282_v43  ;;  %6660 = vst.msk [vmem:[#allocation3 + $0xe0] sm:$0xff] %vm934_vm3, %v6610_v3  ;;  %v6609_v28 = vmul.f32 %v6503_v5, %v19343_v50  ;;  %v6506_v49 = vmax.f32 %v6456_v63, 0.0  ;;  %v6455_v13 = vadd.f32 %v6310_v41, %v5885_v17  ;;  %v5321_v57 = vadd.f32 %v19350_v26, %v4751_v45  ;;  %v19351_v6 = vld [vmem:[#allocation32_spill] sm:$0xff]  ;;  %v17662_v5 = vpop.f32.mrf.mxu0  ;;  %v19355_v63 = vld [vmem:[#allocation33_spill] sm:$0xff]  ;;  %v19363_v45 = vld [vmem:[#allocation58_spill] sm:$0xff] }
 0x36b   : > { %v14632_v14 = vpop.f32.mrf.mxu1  ;;  %v6714_v25 = vld [vmem:[#allocation3 + $0xb3] sm:$0xff]  ;;  %v6715_v52 = vld [vmem:[#allocation3 + $0xbb] sm:$0xff]  ;;  %v4753_v17 = vadd.f32 %v19353_v12, %v19352_v30  ;;  %v5892_v3 = vadd.f32 %v17518_v24, %v19354_v1  ;;  %v19360_v51 = vld [vmem:[#allocation121_spill] sm:$0xff] }
 0x36c   : > { %v7283_v48 = vld [vmem:[#allocation3 + $0xb4] sm:$0xff]  ;;  %6659 = vst.msk [vmem:[#allocation3 + $0xd8] sm:$0xff] %vm934_vm3, %v6609_v28  ;;  %v6612_v35 = vmul.f32 %v6506_v49, %v19345_v61  ;;  %v6505_v19 = vmax.f32 %v6455_v13, 0.0  ;;  %v6458_v62 = vadd.f32 %v14632_v14, %v5888_v8  ;;  %14698 = vmatprep.mubr.msk.f32.mxu0 %vm934_vm3, %v6714_v25  ;;  %v7284_v0 = vld [vmem:[#allocation3 + $0xbc] sm:$0xff]  ;;  %v5891_v36 = vadd.f32 %v17534_v60, %v5321_v57  ;;  %v19362_v29 = vld [vmem:[#allocation57_spill] sm:$0xff] }
 0x36d   : > { %14775 = vmatprep.mubr.msk.f32.mxu1 %vm934_vm3, %v7283_v48  ;;  %v6320_v10 = vpop.f32.mrf.mxu1  ;;  %14699 = vmatmul.mubr.msk.f32.gmra.mxu0 %vm934_vm3, %v6715_v52  ;;  %v19356_v28 = vld [vmem:[#allocation122_spill] sm:$0xff]  ;;  %v19358_v48 = vld [vmem:[#allocation87_spill] sm:$0xff]  ;;  %v19359_v52 = vld [vmem:[#allocation88_spill] sm:$0xff]  ;;  %v5894_v61 = vadd.f32 %v17550_v47, %v19360_v51 }
 0x36e   : > { %14776 = vmatmul.mubr.msk.f32.gmra.mxu1 %vm934_vm3, %v7284_v0  ;;  %6662 = vst.msk [vmem:[#allocation3 + $0xf0] sm:$0xff] %vm934_vm3, %v6612_v35  ;;  %v6611_v27 = vmul.f32 %v6505_v19, %v19349_v16  ;;  %v6508_v58 = vmax.f32 %v6458_v62, 0.0  ;;  %v6457_v23 = vadd.f32 %v6320_v10, %v5887_v22  ;;  %v5323_v49 = vadd.f32 %v19356_v28, %v4753_v17  ;;  %v19357_v13 = vld [vmem:[#allocation34_spill] sm:$0xff]  ;;  %v17678_v35 = vpop.f32.mrf.mxu0  ;;  %v19361_v19 = vld [vmem:[#allocation35_spill] sm:$0xff]  ;;  %v19364_v18 = vld [vmem:[#allocation124_spill] sm:$0xff] }
 0x36f   : > { %v14635_v11 = vpop.f32.mrf.mxu1  ;;  %v6716_v55 = vld [vmem:[#allocation3 + $0xc3] sm:$0xff]  ;;  %v6717_v4 = vld [vmem:[#allocation3 + $0xcb] sm:$0xff]  ;;  %v4755_v60 = vadd.f32 %v19359_v52, %v19358_v48  ;;  %v3619_v10 = vadd.f32 %v19363_v45, %v19362_v29  ;;  %v19378_v51 = vld [vmem:[#allocation39_spill] sm:$0xff] }
 0x370   : > { %v7285_v53 = vld [vmem:[#allocation3 + $0xc4] sm:$0xff]  ;;  %6661 = vst.msk [vmem:[#allocation3 + $0xe8] sm:$0xff] %vm934_vm3, %v6611_v27  ;;  %v6614_v40 = vmul.f32 %v6508_v58, %v19351_v6  ;;  %v6507_v56 = vmax.f32 %v6457_v23, 0.0  ;;  %v6460_v15 = vadd.f32 %v14635_v11, %v5890_v39  ;;  %14701 = vmatprep.mubr.msk.f32.mxu0 %vm934_vm3, %v6716_v55  ;;  %v7286_v46 = vld [vmem:[#allocation3 + $0xcc] sm:$0xff]  ;;  %v5893_v26 = vadd.f32 %v17566_v31, %v5323_v49  ;;  %v19369_v31 = vld [vmem:[#allocation123_spill] sm:$0xff]  ;;  %v17697_v30 = vpop.f32.mrf.mxu0 }
 0x371   : > { %14778 = vmatprep.mubr.msk.f32.mxu1 %vm934_vm3, %v7285_v53  ;;  %v6330_v20 = vpop.f32.mrf.mxu1  ;;  %14702 = vmatmul.mubr.msk.f32.gmra.mxu0 %vm934_vm3, %v6717_v4  ;;  %v5325_v39 = vadd.f32 %v19364_v18, %v4755_v60  ;;  %v19365_v47 = vld [vmem:[#allocation36_spill] sm:$0xff]  ;;  %v19366_v4 = vld [vmem:[#allocation89_spill] sm:$0xff] }
 0x372   : > { %14779 = vmatmul.mubr.msk.f32.gmra.mxu1 %vm934_vm3, %v7286_v46  ;;  %6664 = vst.msk [vmem:[#allocation3 + $0x100] sm:$0xff] %vm934_vm3, %v6614_v40  ;;  %v6613_v43 = vmul.f32 %v6507_v56, %v19355_v63  ;;  %v6510_v37 = vmax.f32 %v6460_v15, 0.0  ;;  %v6459_v38 = vadd.f32 %v6330_v20, %v5889_v7  ;;  %v19367_v7 = vld [vmem:[#allocation90_spill] sm:$0xff]  ;;  %v19368_v40 = vld [vmem:[#allocation91_spill] sm:$0xff]  ;;  %v5896_v46 = vadd.f32 %v17582_v54, %v19369_v31  ;;  %v19370_v12 = vld [vmem:[#allocation37_spill] sm:$0xff] }
 0x373   : > { %v14638_v41 = vpop.f32.mrf.mxu1  ;;  %v6718_v33 = vld [vmem:[#allocation3 + $0xd3] sm:$0xff]  ;;  %v6719_v50 = vld [vmem:[#allocation3 + $0xdb] sm:$0xff]  ;;  %v4757_v6 = vadd.f32 %v19367_v7, %v19366_v4  ;;  %v4189_v56 = vadd.f32 %v19368_v40, %v3619_v10  ;;  %v19377_v52 = vld [vmem:[#allocation125_spill] sm:$0xff] }
 0x374   : > { %v7287_v8 = vld [vmem:[#allocation3 + $0xd4] sm:$0xff]  ;;  %6663 = vst.msk [vmem:[#allocation3 + $0xf8] sm:$0xff] %vm934_vm3, %v6613_v43  ;;  %v6616_v24 = vmul.f32 %v6510_v37, %v19357_v13  ;;  %v6509_v22 = vmax.f32 %v6459_v38, 0.0  ;;  %v6462_v14 = vadd.f32 %v14638_v41, %v5892_v3  ;;  %14704 = vmatprep.mubr.msk.f32.mxu0 %vm934_vm3, %v6718_v33  ;;  %v7288_v25 = vld [vmem:[#allocation3 + $0xdc] sm:$0xff]  ;;  %v5895_v37 = vadd.f32 %v17598_v59, %v5325_v39  ;;  %v19376_v59 = vld [vmem:[#allocation93_spill] sm:$0xff] }
 0x375   : > { %14781 = vmatprep.mubr.msk.f32.mxu1 %vm934_vm3, %v7287_v8  ;;  %v6340_v9 = vpop.f32.mrf.mxu1  ;;  %14705 = vmatmul.mubr.msk.f32.gmra.mxu0 %vm934_vm3, %v6719_v50  ;;  %v19371_v3 = vld [vmem:[#allocation59_spill] sm:$0xff]  ;;  %v19372_v63 = vld [vmem:[#allocation60_spill] sm:$0xff]  ;;  %v19373_v8 = vld [vmem:[#allocation126_spill] sm:$0xff]  ;;  %v5898_v60 = vadd.f32 %v17614_v32, %v19377_v52 }
 0x376   : > { %14782 = vmatmul.mubr.msk.f32.gmra.mxu1 %vm934_vm3, %v7288_v25  ;;  %6666 = vst.msk [vmem:[#allocation3 + $0x110] sm:$0xff] %vm934_vm3, %v6616_v24  ;;  %v6615_v62 = vmul.f32 %v6509_v22, %v19361_v19  ;;  %v6512_v0 = vmax.f32 %v6462_v14, 0.0  ;;  %v6461_v2 = vadd.f32 %v6340_v9, %v5891_v36  ;;  %v3621_v43 = vadd.f32 %v19372_v63, %v19371_v3  ;;  %v19374_v54 = vld [vmem:[#allocation38_spill] sm:$0xff]  ;;  %v19375_v22 = vld [vmem:[#allocation92_spill] sm:$0xff]  ;;  %v17715_v9 = vpop.f32.mrf.mxu0 }
 0x377   : > { %v14641_v16 = vpop.f32.mrf.mxu1  ;;  %v6720_v27 = vld [vmem:[#allocation3 + $0xe3] sm:$0xff]  ;;  %v6721_v23 = vld [vmem:[#allocation3 + $0xeb] sm:$0xff]  ;;  %v5327_v50 = vadd.f32 %v19373_v8, %v4757_v6  ;;  %v4759_v14 = vadd.f32 %v19375_v22, %v4189_v56 }
 0x378   : > { %v7289_v58 = vld [vmem:[#allocation3 + $0xe4] sm:$0xff]  ;;  %6665 = vst.msk [vmem:[#allocation3 + $0x108] sm:$0xff] %vm934_vm3, %v6615_v62  ;;  %v6618_v57 = vmul.f32 %v6512_v0, %v19365_v47  ;;  %v6511_v11 = vmax.f32 %v6461_v2, 0.0  ;;  %v6464_v55 = vadd.f32 %v14641_v16, %v5894_v61  ;;  %14707 = vmatprep.mubr.msk.f32.mxu0 %vm934_vm3, %v6720_v27  ;;  %v7290_v53 = vld [vmem:[#allocation3 + $0xec] sm:$0xff]  ;;  %v4191_v25 = vadd.f32 %v19376_v59, %v3621_v43  ;;  %v5830_v40 = vpop.f32.mrf.mxu0  ;;  %v19394_v59 = vld [vmem:[#allocation43_spill] sm:$0xff] }
 0x379   : > { %14784 = vmatprep.mubr.msk.f32.mxu1 %vm934_vm3, %v7289_v58  ;;  %v6350_v15 = vpop.f32.mrf.mxu1  ;;  %14708 = vmatmul.mubr.msk.f32.gmra.mxu0 %vm934_vm3, %v6721_v23  ;;  %v19379_v0 = vld [vmem:[#allocation61_spill] sm:$0xff]  ;;  %v19380_v2 = vld [vmem:[#allocation62_spill] sm:$0xff]  ;;  %v19381_v45 = vld [vmem:[#allocation128_spill] sm:$0xff]  ;;  %v5897_v58 = vadd.f32 %v17630_v21, %v5327_v50 }
 0x37a   : > { %14785 = vmatmul.mubr.msk.f32.gmra.mxu1 %vm934_vm3, %v7290_v53  ;;  %6668 = vst.msk [vmem:[#allocation3 + $0x120] sm:$0xff] %vm934_vm3, %v6618_v57  ;;  %v6617_v17 = vmul.f32 %v6511_v11, %v19370_v12  ;;  %v6514_v20 = vmax.f32 %v6464_v55, 0.0  ;;  %v6463_v1 = vadd.f32 %v6350_v15, %v5893_v26  ;;  %v3623_v29 = vadd.f32 %v19380_v2, %v19379_v0  ;;  %v19382_v32 = vld [vmem:[#allocation40_spill] sm:$0xff]  ;;  %v19383_v11 = vld [vmem:[#allocation94_spill] sm:$0xff]  ;;  %v19384_v53 = vld [vmem:[#allocation95_spill] sm:$0xff] }
 0x37b   : > { %v14644_v38 = vpop.f32.mrf.mxu1  ;;  %v6722_v36 = vld [vmem:[#allocation3 + $0xf3] sm:$0xff]  ;;  %v6723_v33 = vld [vmem:[#allocation3 + $0xfb] sm:$0xff]  ;;  %v5329_v10 = vadd.f32 %v19381_v45, %v4759_v14  ;;  %v4761_v55 = vadd.f32 %v19383_v11, %v4191_v25  ;;  %v19386_v56 = vld [vmem:[#allocation41_spill] sm:$0xff]  ;;  %v14582_v14 = vpop.f32.mrf.mxu0 }
 0x37c   : > { %v7291_v41 = vld [vmem:[#allocation3 + $0xf4] sm:$0xff]  ;;  %6667 = vst.msk [vmem:[#allocation3 + $0x118] sm:$0xff] %vm934_vm3, %v6617_v17  ;;  %v6620_v28 = vmul.f32 %v6514_v20, %v19374_v54  ;;  %v6513_v49 = vmax.f32 %v6463_v1, 0.0  ;;  %v6466_v13 = vadd.f32 %v14644_v38, %v5896_v46  ;;  %14710 = vmatprep.mubr.msk.f32.mxu0 %vm934_vm3, %v6722_v36  ;;  %v7292_v24 = vld [vmem:[#allocation3 + $0xfc] sm:$0xff]  ;;  %v4193_v4 = vadd.f32 %v19384_v53, %v3623_v29  ;;  %v19401_v11 = vld [vmem:[#allocation45_spill] sm:$0xff] }
 0x37d   : > { %14787 = vmatprep.mubr.msk.f32.mxu1 %vm934_vm3, %v7291_v41  ;;  %v6360_v48 = vpop.f32.mrf.mxu1  ;;  %14711 = vmatmul.mubr.msk.f32.gmra.mxu0 %vm934_vm3, %v6723_v33  ;;  %v19385_v21 = vld [vmem:[#allocation127_spill] sm:$0xff]  ;;  %v19387_v12 = vld [vmem:[#allocation54_spill] sm:$0xff]  ;;  %v5899_v1 = vadd.f32 %v17662_v5, %v5329_v10  ;;  %v19391_v54 = vld [vmem:[#allocation96_spill] sm:$0xff] }
 0x37e   : > { %14788 = vmatmul.mubr.msk.f32.gmra.mxu1 %vm934_vm3, %v7292_v24  ;;  %6670 = vst.msk [vmem:[#allocation3 + $0x130] sm:$0xff] %vm934_vm3, %v6620_v28  ;;  %v6619_v61 = vmul.f32 %v6513_v49, %v19378_v51  ;;  %v6516_v19 = vmax.f32 %v6466_v13, 0.0  ;;  %v6465_v62 = vadd.f32 %v6360_v48, %v5895_v37  ;;  %v5900_v6 = vadd.f32 %v17646_v44, %v19385_v21  ;;  %v19388_v17 = vld [vmem:[#allocation55_spill] sm:$0xff]  ;;  %v19389_v38 = vld [vmem:[#allocation130_spill] sm:$0xff]  ;;  %v19392_v5 = vld [vmem:[#allocation97_spill] sm:$0xff] }
 0x37f   : > { %v14647_v18 = vpop.f32.mrf.mxu1  ;;  %v6724_v39 = vld [vmem:[#allocation3 + $0x103] sm:$0xff]  ;;  %v6725_v27 = vld [vmem:[#allocation3 + $0x10b] sm:$0xff]  ;;  %v3625_v20 = vadd.f32 %v19388_v17, %v19387_v12  ;;  %v5331_v36 = vadd.f32 %v19389_v38, %v4761_v55  ;;  %v4763_v28 = vadd.f32 %v19391_v54, %v4193_v4  ;;  %v19396_v51 = vld [vmem:[#allocation63_spill] sm:$0xff] }
 0x380   : > { %v7293_v16 = vld [vmem:[#allocation3 + $0x104] sm:$0xff]  ;;  %6669 = vst.msk [vmem:[#allocation3 + $0x128] sm:$0xff] %vm934_vm3, %v6619_v61  ;;  %v6622_v23 = vmul.f32 %v6516_v19, %v19382_v32  ;;  %v6515_v26 = vmax.f32 %v6465_v62, 0.0  ;;  %v6468_v47 = vadd.f32 %v14647_v18, %v5898_v60  ;;  %14713 = vmatprep.mubr.msk.f32.mxu0 %vm934_vm3, %v6724_v39  ;;  %v7294_v57 = vld [vmem:[#allocation3 + $0x10c] sm:$0xff] }
 0x381   : > { %14790 = vmatprep.mubr.msk.f32.mxu1 %vm934_vm3, %v7293_v16  ;;  %v6370_v7 = vpop.f32.mrf.mxu1  ;;  %14714 = vmatmul.mubr.msk.f32.gmra.mxu0 %vm934_vm3, %v6725_v27  ;;  %v19390_v44 = vld [vmem:[#allocation42_spill] sm:$0xff]  ;;  %v4195_v49 = vadd.f32 %v19392_v5, %v3625_v20  ;;  %v19393_v24 = vld [vmem:[#allocation129_spill] sm:$0xff]  ;;  %v19395_v60 = vld [vmem:[#allocation56_spill] sm:$0xff]  ;;  %v5333_v19 = vadd.f32 %v17406_v34, %v4763_v28  ;;  %v5901_v45 = vadd.f32 %v17697_v30, %v5331_v36 }
 0x382   : > { %14791 = vmatmul.mubr.msk.f32.gmra.mxu1 %vm934_vm3, %v7294_v57  ;;  %6672 = vst.msk [vmem:[#allocation3 + $0x140] sm:$0xff] %vm934_vm3, %v6622_v23  ;;  %v6621_v15 = vmul.f32 %v6515_v26, %v19386_v56  ;;  %v6518_v31 = vmax.f32 %v6468_v47, 0.0  ;;  %v6467_v46 = vadd.f32 %v6370_v7, %v5897_v58  ;;  %v5902_v22 = vadd.f32 %v17678_v35, %v19393_v24  ;;  %v19397_v35 = vld [vmem:[#allocation44_spill] sm:$0xff]  ;;  %v19398_v27 = vld [vmem:[#allocation98_spill] sm:$0xff]  ;;  %v19399_v34 = vld [vmem:[#allocation99_spill] sm:$0xff]  ;;  %v5840_v57 = vpop.f32.mrf.mxu0 }
 0x383   : > { %v14650_v3 = vpop.f32.mrf.mxu1  ;;  %v6726_v63 = vld [vmem:[#allocation3 + $0x113] sm:$0xff]  ;;  %v6727_v37 = vld [vmem:[#allocation3 + $0x11b] sm:$0xff]  ;;  %v3627_v61 = vadd.f32 %v19396_v51, %v19395_v60  ;;  %v4765_v58 = vadd.f32 %v19398_v27, %v4195_v49  ;;  %v17766_v30 = vld [vmem:[%s19089_s5 + $0xa] sm:$0x3]  ;;  %v5903_v7 = vadd.f32 %v5830_v40, %v5333_v19 }
 0x384   : > { %v7295_v43 = vld [vmem:[#allocation3 + $0x114] sm:$0xff]  ;;  %6671 = vst.msk [vmem:[#allocation3 + $0x138] sm:$0xff] %vm934_vm3, %v6621_v15  ;;  %v6624_v41 = vmul.f32 %v6518_v31, %v19390_v44  ;;  %v6517_v33 = vmax.f32 %v6467_v46, 0.0  ;;  %v6470_v8 = vadd.f32 %v14650_v3, %v5900_v6  ;;  %14716 = vmatprep.mubr.msk.f32.mxu0 %vm934_vm3, %v6726_v63  ;;  %v7296_v50 = vld [vmem:[#allocation3 + $0x11c] sm:$0xff]  ;;  %15048 = vmatprep.subr.msk.mxu1 %vm1550_vm2, %v17766_v30  ;;  %v19402_v31 = vld [vmem:[#allocation133_spill] sm:$0xff]  ;;  %v14585_v12 = vpop.f32.mrf.mxu0 }
 0x385   : > { %14793 = vmatprep.mubr.msk.f32.mxu1 %vm934_vm3, %v7295_v43  ;;  %v6380_v13 = vpop.f32.mrf.mxu1  ;;  %14717 = vmatmul.mubr.msk.f32.gmra.mxu0 %vm934_vm3, %v6727_v37  ;;  %v4197_v32 = vadd.f32 %v19399_v34, %v3627_v61  ;;  %v19400_v26 = vld [vmem:[#allocation131_spill] sm:$0xff]  ;;  %v5335_v46 = vadd.f32 %v19402_v31, %v4765_v58  ;;  %v19404_v63 = vld [vmem:[#allocation100_spill] sm:$0xff]  ;;  %v19409_v51 = vld [vmem:[#allocation49_spill] sm:$0xff] }
 0x386   : > { %14794 = vmatmul.mubr.msk.f32.gmra.mxu1 %vm934_vm3, %v7296_v50  ;;  %6674 = vst.msk [vmem:[#allocation3 + $0x150] sm:$0xff] %vm934_vm3, %v6624_v41  ;;  %v6623_v25 = vmul.f32 %v6517_v33, %v19394_v59  ;;  %v6520_v48 = vmax.f32 %v6470_v8, 0.0  ;;  %v6469_v52 = vadd.f32 %v6380_v13, %v5899_v1  ;;  %v5904_v47 = vadd.f32 %v17715_v9, %v19400_v26  ;;  %v19403_v9 = vld [vmem:[#allocation46_spill] sm:$0xff]  ;;  %v19405_v37 = vld [vmem:[#allocation132_spill] sm:$0xff]  ;;  %v19406_v36 = vld [vmem:[#allocation47_spill] sm:$0xff]  ;;  %v5850_v13 = vpop.f32.mrf.mxu0 }
 0x387   : > { %v14653_v62 = vpop.f32.mrf.mxu1  ;;  %v6728_v0 = vld [vmem:[#allocation3 + $0x123] sm:$0xff]  ;;  %v6729_v29 = vld [vmem:[#allocation3 + $0x12b] sm:$0xff]  ;;  %v4767_v40 = vadd.f32 %v19404_v63, %v4197_v32  ;;  %v5906_v38 = vadd.f32 %v14582_v14, %v19405_v37  ;;  %v5905_v49 = vadd.f32 %v5840_v57, %v5335_v46  ;;  %v8401_v37 = vld [vmem:[#allocation3 + $0x17] sm:$0xff] }
 0x388   : > { %v7297_v2 = vld [vmem:[#allocation3 + $0x124] sm:$0xff]  ;;  %6673 = vst.msk [vmem:[#allocation3 + $0x148] sm:$0xff] %vm934_vm3, %v6623_v25  ;;  %v6626_v10 = vmul.f32 %v6520_v48, %v19397_v35  ;;  %v6519_v18 = vmax.f32 %v6469_v52, 0.0  ;;  %v6472_v39 = vadd.f32 %v14653_v62, %v5902_v22  ;;  %14719 = vmatprep.mubr.msk.f32.mxu0 %vm934_vm3, %v6728_v0  ;;  %v7298_v16 = vld [vmem:[#allocation3 + $0x12c] sm:$0xff] }
 0x389   : > { %14796 = vmatprep.mubr.msk.f32.mxu1 %vm934_vm3, %v7297_v2  ;;  %v6390_v23 = vpop.f32.mrf.mxu1  ;;  %14720 = vmatmul.mubr.msk.f32.gmra.mxu0 %vm934_vm3, %v6729_v29  ;;  %v5337_v8 = vadd.f32 %v17423_v42, %v4767_v40  ;;  %v19407_v24 = vld [vmem:[#allocation48_spill] sm:$0xff]  ;;  %v19408_v52 = vld [vmem:[#allocation134_spill] sm:$0xff]  ;;  %v19413_v31 = vld [vmem:[#allocation53_spill] sm:$0xff] }
 0x38a   : > { %14797 = vmatmul.mubr.msk.f32.gmra.mxu1 %vm934_vm3, %v7298_v16  ;;  %6676 = vst.msk [vmem:[#allocation3 + $0x160] sm:$0xff] %vm934_vm3, %v6626_v10  ;;  %v6625_v55 = vmul.f32 %v6519_v18, %v19401_v11  ;;  %v6522_v53 = vmax.f32 %v6472_v39, 0.0  ;;  %v6471_v4 = vadd.f32 %v6390_v23, %v5901_v45  ;;  %v17795_v42 = vld [vmem:[%s19090_s6] ss:$0 sm:$0xff]  ;;  %v5908_v60 = vadd.f32 %v14585_v12, %v19408_v52  ;;  %v14667_v10 = vpop.f32.mrf.mxu0  ;;  %v19410_v18 = vld [vmem:[#allocation50_spill] sm:$0xff]  ;;  %v19411_v23 = vld [vmem:[#allocation51_spill] sm:$0xff] }
 0x38b   : > { %v14656_v21 = vpop.f32.mrf.mxu1  ;;  %v6730_v6 = vld [vmem:[#allocation3 + $0x133] sm:$0xff]  ;;  %v6731_v15 = vld [vmem:[#allocation3 + $0x13b] sm:$0xff]  ;;  %v5907_v0 = vadd.f32 %v5850_v13, %v5337_v8  ;;  %v7212_v34 = vadd.f32 %v14667_v10, %v17795_v42  ;;  %v8403_v8 = vld [vmem:[#allocation3 + $0x27] sm:$0xff] }
 0x38c   : > { %v7299_v56 = vld [vmem:[#allocation3 + $0x134] sm:$0xff]  ;;  %6675 = vst.msk [vmem:[#allocation3 + $0x158] sm:$0xff] %vm934_vm3, %v6625_v55  ;;  %v6628_v17 = vmul.f32 %v6522_v53, %v19403_v9  ;;  %v6521_v20 = vmax.f32 %v6471_v4, 0.0  ;;  %v6474_v1 = vadd.f32 %v14656_v21, %v5904_v47  ;;  %14722 = vmatprep.mubr.msk.f32.mxu0 %vm934_vm3, %v6730_v6  ;;  %v7300_v3 = vld [vmem:[#allocation3 + $0x13c] sm:$0xff] }
 0x38d   : > { %14799 = vmatprep.mubr.msk.f32.mxu1 %vm934_vm3, %v7299_v56  ;;  %v6400_v43 = vpop.f32.mrf.mxu1  ;;  %14723 = vmatmul.mubr.msk.f32.gmra.mxu0 %vm934_vm3, %v6731_v15  ;;  %v8406_v13 = vld [vmem:[#allocation3 + $0x3f] sm:$0xff] }
 0x38e   : > { %14800 = vmatmul.mubr.msk.f32.gmra.mxu1 %vm934_vm3, %v7300_v3  ;;  %6678 = vst.msk [vmem:[#allocation3 + $0x170] sm:$0xff] %vm934_vm3, %v6628_v17  ;;  %v6627_v44 = vmul.f32 %v6521_v20, %v19406_v36  ;;  %v6524_v41 = vmax.f32 %v6474_v1, 0.0  ;;  %v6473_v33 = vadd.f32 %v6400_v43, %v5903_v7  ;;  %v19412_v7 = vld [vmem:[#allocation52_spill] sm:$0xff] }
 0x38f   : > { %v14659_v50 = vpop.f32.mrf.mxu1  ;;  %v6732_v54 = vld [vmem:[#allocation3 + $0x143] sm:$0xff]  ;;  %v6733_v5 = vld [vmem:[#allocation3 + $0x14b] sm:$0xff] }
 0x390   : > { %v7301_v28 = vld [vmem:[#allocation3 + $0x144] sm:$0xff]  ;;  %6677 = vst.msk [vmem:[#allocation3 + $0x168] sm:$0xff] %vm934_vm3, %v6627_v44  ;;  %v6630_v22 = vmul.f32 %v6524_v41, %v19407_v24  ;;  %v6523_v59 = vmax.f32 %v6473_v33, 0.0  ;;  %v6476_v14 = vadd.f32 %v14659_v50, %v5906_v38  ;;  %14725 = vmatprep.mubr.msk.f32.mxu0 %vm934_vm3, %v6732_v54  ;;  %v7302_v25 = vld [vmem:[#allocation3 + $0x14c] sm:$0xff]  ;;  %v7833_v44 = vld [vmem:[#allocation3 + $0x15] sm:$0xff] }
 0x391   : > { %14802 = vmatprep.mubr.msk.f32.mxu1 %vm934_vm3, %v7301_v28  ;;  %v6410_v48 = vpop.f32.mrf.mxu1  ;;  %14726 = vmatmul.mubr.msk.f32.gmra.mxu0 %vm934_vm3, %v6733_v5  ;;  %v7831_v1 = vld [vmem:[#allocation3 + $0x5] sm:$0xff]  ;;  %v7832_v38 = vld [vmem:[#allocation3 + $0xd] sm:$0xff]  ;;  %v7834_v50 = vld [vmem:[#allocation3 + $0x1d] sm:$0xff] }
 0x392   : > { %14803 = vmatmul.mubr.msk.f32.gmra.mxu1 %vm934_vm3, %v7302_v25  ;;  %6680 = vst.msk [vmem:[#allocation3 + $0x180] sm:$0xff] %vm934_vm3, %v6630_v22  ;;  %v6629_v61 = vmul.f32 %v6523_v59, %v19409_v51  ;;  %v6526_v19 = vmax.f32 %v6476_v14, 0.0  ;;  %v6475_v62 = vadd.f32 %v6410_v48, %v5905_v49  ;;  %v8402_v36 = vld [vmem:[#allocation3 + $0x1f] sm:$0xff]  ;;  %v17835_v41 = vld [vmem:[%s19089_s5 + $0xc] sm:$0x3]  ;;  %v8404_v54 = vld [vmem:[#allocation3 + $0x2f] sm:$0xff] }
 0x393   : > { %v14662_v2 = vpop.f32.mrf.mxu1  ;;  %v6734_v29 = vld [vmem:[#allocation3 + $0x153] sm:$0xff]  ;;  %v6735_v35 = vld [vmem:[#allocation3 + $0x15b] sm:$0xff]  ;;  %v15372_v33 = vld [vmem:[%s19089_s5 + $0x8] sm:$0x3] }
 0x394   : > { %v7303_v45 = vld [vmem:[#allocation3 + $0x154] sm:$0xff]  ;;  %6679 = vst.msk [vmem:[#allocation3 + $0x178] sm:$0xff] %vm934_vm3, %v6629_v61  ;;  %v6632_v39 = vmul.f32 %v6526_v19, %v19410_v18  ;;  %v6525_v16 = vmax.f32 %v6475_v62, 0.0  ;;  %v6478_v27 = vadd.f32 %v14662_v2, %v5908_v60  ;;  %14728 = vmatprep.mubr.msk.f32.mxu0 %vm934_vm3, %v6734_v29  ;;  %v7304_v58 = vld [vmem:[#allocation3 + $0x15c] sm:$0xff]  ;;  %v7835_v28 = vld [vmem:[#allocation3 + $0x25] sm:$0xff] }
 0x395   : > { %14805 = vmatprep.mubr.msk.f32.mxu1 %vm934_vm3, %v7303_v45  ;;  %v6420_v32 = vpop.f32.mrf.mxu1  ;;  %14729 = vmatmul.mubr.msk.f32.gmra.mxu0 %vm934_vm3, %v6735_v35  ;;  %v8405_v5 = vld [vmem:[#allocation3 + $0x37] sm:$0xff]  ;;  %v7836_v49 = vld [vmem:[#allocation3 + $0x2d] sm:$0xff]  ;;  %v7839_v14 = vld [vmem:[#allocation3 + $0x45] sm:$0xff] }
 0x396   : > { %14806 = vmatmul.mubr.msk.f32.gmra.mxu1 %vm934_vm3, %v7304_v58  ;;  %6682 = vst.msk [vmem:[#allocation3 + $0x190] sm:$0xff] %vm934_vm3, %v6632_v39  ;;  %v6631_v26 = vmul.f32 %v6525_v16, %v19411_v23  ;;  %v6528_v47 = vmax.f32 %v6478_v27, 0.0  ;;  %v6477_v57 = vadd.f32 %v6420_v32, %v5907_v0  ;;  %v8407_v24 = vld [vmem:[#allocation3 + $0x47] sm:$0xff]  ;;  %v7838_v22 = vld [vmem:[#allocation3 + $0x3d] sm:$0xff]  ;;  %v8408_v59 = vld [vmem:[#allocation3 + $0x4f] sm:$0xff] }
 0x397   : > { %v6736_v11 = vld [vmem:[#allocation3 + $0x163] sm:$0xff]  ;;  %v6737_v53 = vld [vmem:[#allocation3 + $0x16b] sm:$0xff]  ;;  %v14744_v4 = vpop.f32.mrf.mxu1  ;;  %v8409_v25 = vld [vmem:[#allocation3 + $0x57] sm:$0xff] }
 0x398   : > { %v7305_v55 = vld [vmem:[#allocation3 + $0x164] sm:$0xff]  ;;  %6681 = vst.msk [vmem:[#allocation3 + $0x188] sm:$0xff] %vm934_vm3, %v6631_v26  ;;  %v6634_v21 = vmul.f32 %v6528_v47, %v19412_v7  ;;  %v6527_v6 = vmax.f32 %v6477_v57, 0.0  ;;  %14731 = vmatprep.mubr.msk.f32.mxu0 %vm934_vm3, %v6736_v11  ;;  %v7306_v56 = vld [vmem:[#allocation3 + $0x16c] sm:$0xff]  ;;  %v17813_v15 = vadd.f32 %v14744_v4, %v7212_v34  ;;  %v7841_v60 = vld [vmem:[#allocation3 + $0x55] sm:$0xff] }
 0x399   : > { %14808 = vmatprep.mubr.msk.f32.mxu1 %vm934_vm3, %v7305_v55  ;;  %14732 = vmatmul.mubr.msk.f32.gmra.mxu0 %vm934_vm3, %v6737_v53  ;;  %v7840_v48 = vld [vmem:[#allocation3 + $0x4d] sm:$0xff]  ;;  %v8410_v52 = vld [vmem:[#allocation3 + $0x5f] sm:$0xff]  ;;  %v8413_v0 = vld [vmem:[#allocation3 + $0x77] sm:$0xff] }
 0x39a   : > { %14809 = vmatmul.mubr.msk.f32.gmra.mxu1 %vm934_vm3, %v7306_v56  ;;  %6684 = vst.msk [vmem:[#allocation3 + $0x1a0] sm:$0xff] %vm934_vm3, %v6634_v21  ;;  %v6633_v46 = vmul.f32 %v6527_v6, %v19413_v31  ;;  %v8411_v51 = vld [vmem:[#allocation3 + $0x67] sm:$0xff]  ;;  %v7842_v61 = vld [vmem:[#allocation3 + $0x5d] sm:$0xff]  ;;  %v8412_v19 = vld [vmem:[#allocation3 + $0x6f] sm:$0xff] }
 0x39b   : > { %v6738_v12 = vld [vmem:[#allocation3 + $0x173] sm:$0xff]  ;;  %v6739_v17 = vld [vmem:[#allocation3 + $0x17b] sm:$0xff]  ;;  %v7843_v62 = vld [vmem:[#allocation3 + $0x65] sm:$0xff] }
 0x39c   : > { %v7307_v9 = vld [vmem:[#allocation3 + $0x174] sm:$0xff]  ;;  %6683 = vst.msk [vmem:[#allocation3 + $0x198] sm:$0xff] %vm934_vm3, %v6633_v46  ;;  %14734 = vmatprep.mubr.msk.f32.mxu0 %vm934_vm3, %v6738_v12  ;;  %v7308_v20 = vld [vmem:[#allocation3 + $0x17c] sm:$0xff]  ;;  %v8415_v35 = vld [vmem:[#allocation3 + $0x87] sm:$0xff] }
 0x39d   : > { %14811 = vmatprep.mubr.msk.f32.mxu1 %vm934_vm3, %v7307_v9  ;;  %14735 = vmatmul.mubr.msk.f32.gmra.mxu0 %vm934_vm3, %v6739_v17  ;;  %v7844_v2 = vld [vmem:[#allocation3 + $0x6d] sm:$0xff]  ;;  %v8414_v29 = vld [vmem:[#allocation3 + $0x7f] sm:$0xff]  ;;  %v7845_v45 = vld [vmem:[#allocation3 + $0x75] sm:$0xff] }
 0x39e   : > { %14812 = vmatmul.mubr.msk.f32.gmra.mxu1 %vm934_vm3, %v7308_v20  ;;  %v7846_v10 = vld [vmem:[#allocation3 + $0x7d] sm:$0xff]  ;;  %v8416_v18 = vld [vmem:[#allocation3 + $0x8f] sm:$0xff]  ;;  %v7847_v39 = vld [vmem:[#allocation3 + $0x85] sm:$0xff] }
 0x39f   : > { %v6740_v3 = vld [vmem:[#allocation3 + $0x183] sm:$0xff]  ;;  %v6741_v40 = vld [vmem:[#allocation3 + $0x18b] sm:$0xff]  ;;  %v8417_v16 = vld [vmem:[#allocation3 + $0x97] sm:$0xff] }
 0x3a0   : > { %v7309_v63 = vld [vmem:[#allocation3 + $0x184] sm:$0xff]  ;;  %14737 = vmatprep.mubr.msk.f32.mxu0 %vm934_vm3, %v6740_v3  ;;  %v7310_v43 = vld [vmem:[#allocation3 + $0x18c] sm:$0xff]  ;;  %v7849_v34 = vld [vmem:[#allocation3 + $0x95] sm:$0xff] }
 0x3a1   : > { %14814 = vmatprep.mubr.msk.f32.mxu1 %vm934_vm3, %v7309_v63  ;;  %14738 = vmatmul.mubr.msk.f32.gmra.mxu0 %vm934_vm3, %v6741_v40  ;;  %v7848_v27 = vld [vmem:[#allocation3 + $0x8d] sm:$0xff]  ;;  %v8418_v58 = vld [vmem:[#allocation3 + $0x9f] sm:$0xff]  ;;  %v8421_v57 = vld [vmem:[#allocation3 + $0xb7] sm:$0xff] }
 0x3a2   : > { %14815 = vmatmul.mubr.msk.f32.gmra.mxu1 %vm934_vm3, %v7310_v43  ;;  %14819 = vmatprep.mubr.msk.f32.mxu0 %vm934_vm3, %v7831_v1  ;;  %v8419_v32 = vld [vmem:[#allocation3 + $0xa7] sm:$0xff]  ;;  %v7850_v23 = vld [vmem:[#allocation3 + $0x9d] sm:$0xff]  ;;  %v8420_v26 = vld [vmem:[#allocation3 + $0xaf] sm:$0xff] }
 0x3a3   : > { %14896 = vmatprep.mubr.msk.f32.mxu1 %vm934_vm3, %v8401_v37  ;;  %v7851_v47 = vld [vmem:[#allocation3 + $0xa5] sm:$0xff]  ;;  %v7852_v11 = vld [vmem:[#allocation3 + $0xad] sm:$0xff]  ;;  %v7853_v53 = vld [vmem:[#allocation3 + $0xb5] sm:$0xff] }
 0x3a4   : > { %v8422_v55 = vld [vmem:[#allocation3 + $0xbf] sm:$0xff]  ;;  %v8423_v4 = vld [vmem:[#allocation3 + $0xc7] sm:$0xff]  ;;  %v8424_v21 = vld [vmem:[#allocation3 + $0xcf] sm:$0xff] }
 0x3a5   : > { %14820 = vmatmul.mubr.msk.f32.vlgmr.msra.gmra.mxu0 %vm934_vm3, %v7832_v38  ;;  %v7854_v7 = vld [vmem:[#allocation3 + $0xbd] sm:$0xff]  ;;  %v7855_v6 = vld [vmem:[#allocation3 + $0xc5] sm:$0xff]  ;;  %v7856_v31 = vld [vmem:[#allocation3 + $0xcd] sm:$0xff] }
 0x3a6   : > { %14897 = vmatmul.mubr.msk.f32.vlgmr.msra.gmra.mxu1 %vm934_vm3, %v8402_v36  ;;  %14972 = vmatpush3.msk.msra.mxu0 %vm1550_vm2, %v15372_v33  ;;  %v8425_v56 = vld [vmem:[#allocation3 + $0xd7] sm:$0xff]  ;;  %v8426_v46 = vld [vmem:[#allocation3 + $0xdf] sm:$0xff]  ;;  %v8427_v9 = vld [vmem:[#allocation3 + $0xe7] sm:$0xff] }
 0x3a7   : > { %14822 = vmatprep.mubr.msk.f32.mxu0 %vm934_vm3, %v7833_v44  ;;  %14899 = vmatprep.mubr.msk.f32.mxu1 %vm934_vm3, %v8403_v8  ;;  %v7857_v12 = vld [vmem:[#allocation3 + $0xd5] sm:$0xff]  ;;  %v7858_v17 = vld [vmem:[#allocation3 + $0xdd] sm:$0xff]  ;;  %v7859_v1 = vld [vmem:[#allocation3 + $0xe5] sm:$0xff] }
 0x3a8   : > { %15049 = vmatpush3.msk.msra.mxu1 %vm1550_vm2, %v17766_v30  ;;  %15125 = vmatprep.subr.msk.mxu0 %vm1550_vm2, %v17835_v41  ;;  %v7837_v30 = vld [vmem:[#allocation3 + $0x35] sm:$0xff]  ;;  %v7860_v63 = vld [vmem:[#allocation3 + $0xed] sm:$0xff]  ;;  %v8430_v40 = vld [vmem:[#allocation3 + $0xff] sm:$0xff] }
 0x3a9   : > { %14823 = vmatmul.mubr.msk.f32.gmra.mxu0 %vm934_vm3, %v7834_v50  ;;  %v8428_v20 = vld [vmem:[#allocation3 + $0xef] sm:$0xff]  ;;  %v8429_v3 = vld [vmem:[#allocation3 + $0xf7] sm:$0xff]  ;;  %v8431_v37 = vld [vmem:[#allocation3 + $0x107] sm:$0xff] }
 0x3aa   : > { %14900 = vmatmul.mubr.msk.f32.gmra.mxu1 %vm934_vm3, %v8404_v54  ;;  %14825 = vmatprep.mubr.msk.f32.mxu0 %vm934_vm3, %v7835_v28  ;;  %v7861_v43 = vld [vmem:[#allocation3 + $0xf5] sm:$0xff]  ;;  %v7862_v38 = vld [vmem:[#allocation3 + $0xfd] sm:$0xff]  ;;  %v7863_v44 = vld [vmem:[#allocation3 + $0x105] sm:$0xff] }
 0x3ab   : > { %14902 = vmatprep.mubr.msk.f32.mxu1 %vm934_vm3, %v8405_v5  ;;  %v8432_v36 = vld [vmem:[#allocation3 + $0x10f] sm:$0xff]  ;;  %v8433_v33 = vld [vmem:[#allocation3 + $0x117] sm:$0xff]  ;;  %v8434_v50 = vld [vmem:[#allocation3 + $0x11f] sm:$0xff] }
 0x3ac   : > { %v7864_v8 = vld [vmem:[#allocation3 + $0x10d] sm:$0xff]  ;;  %v7865_v54 = vld [vmem:[#allocation3 + $0x115] sm:$0xff]  ;;  %v7866_v5 = vld [vmem:[#allocation3 + $0x11d] sm:$0xff] }
 0x3ad   : > { %14826 = vmatmul.mubr.msk.f32.gmra.mxu0 %vm934_vm3, %v7836_v49  ;;  %v8435_v28 = vld [vmem:[#allocation3 + $0x127] sm:$0xff]  ;;  %v8436_v49 = vld [vmem:[#allocation3 + $0x12f] sm:$0xff] }
 0x3ae   : > { %14903 = vmatmul.mubr.msk.f32.gmra.mxu1 %vm934_vm3, %v8406_v13  ;;  %14828 = vmatprep.mubr.msk.f32.mxu0 %vm934_vm3, %v7837_v30  ;;  %v7867_v13 = vld [vmem:[#allocation3 + $0x125] sm:$0xff]  ;;  %v8437_v30 = vld [vmem:[#allocation3 + $0x137] sm:$0xff] }
 0x3af   : > { %14905 = vmatprep.mubr.msk.f32.mxu1 %vm934_vm3, %v8407_v24  ;;  %v7868_v24 = vld [vmem:[#allocation3 + $0x12d] sm:$0xff] }
 0x3b1   : > { %14829 = vmatmul.mubr.msk.f32.gmra.mxu0 %vm934_vm3, %v7838_v22  ;;  %v8438_v22 = vld [vmem:[#allocation3 + $0x13f] sm:$0xff] }
 0x3b2   : > { %14906 = vmatmul.mubr.msk.f32.gmra.mxu1 %vm934_vm3, %v8408_v59  ;;  %14831 = vmatprep.mubr.msk.f32.mxu0 %vm934_vm3, %v7839_v14  ;;  %v17918_v59 = vld [vmem:[%s19089_s5 + $0xe] sm:$0x3]  ;;  %v7869_v14 = vld [vmem:[#allocation3 + $0x135] sm:$0xff] }
 0x3b3   : > { %14908 = vmatprep.mubr.msk.f32.mxu1 %vm934_vm3, %v8409_v25  ;;  %v8439_v25 = vld [vmem:[#allocation3 + $0x147] sm:$0xff]  ;;  %15202 = vmatprep.subr.msk.mxu1 %vm1550_vm2, %v17918_v59 }
 0x3b5   : > { %14832 = vmatmul.mubr.msk.f32.gmra.mxu0 %vm934_vm3, %v7840_v48  ;;  %v7870_v48 = vld [vmem:[#allocation3 + $0x13d] sm:$0xff] }
 0x3b6   : > { %14909 = vmatmul.mubr.msk.f32.gmra.mxu1 %vm934_vm3, %v8410_v52  ;;  %14834 = vmatprep.mubr.msk.f32.mxu0 %vm934_vm3, %v7841_v60  ;;  %v8440_v52 = vld [vmem:[#allocation3 + $0x14f] sm:$0xff]  ;;  %v7871_v60 = vld [vmem:[#allocation3 + $0x145] sm:$0xff] }
 0x3b7   : > { %14911 = vmatprep.mubr.msk.f32.mxu1 %vm934_vm3, %v8411_v51  ;;  %v8441_v51 = vld [vmem:[#allocation3 + $0x157] sm:$0xff] }
 0x3b9   : > { %14835 = vmatmul.mubr.msk.f32.gmra.mxu0 %vm934_vm3, %v7842_v61  ;;  %v7872_v61 = vld [vmem:[#allocation3 + $0x14d] sm:$0xff] }
 0x3ba   : > { %14912 = vmatmul.mubr.msk.f32.gmra.mxu1 %vm934_vm3, %v8412_v19  ;;  %14837 = vmatprep.mubr.msk.f32.mxu0 %vm934_vm3, %v7843_v62  ;;  %v8442_v19 = vld [vmem:[#allocation3 + $0x15f] sm:$0xff]  ;;  %v7873_v62 = vld [vmem:[#allocation3 + $0x155] sm:$0xff] }
 0x3bb   : > { %14914 = vmatprep.mubr.msk.f32.mxu1 %vm934_vm3, %v8413_v0  ;;  %v8443_v0 = vld [vmem:[#allocation3 + $0x167] sm:$0xff] }
 0x3bd   : > { %14838 = vmatmul.mubr.msk.f32.gmra.mxu0 %vm934_vm3, %v7844_v2  ;;  %v7874_v2 = vld [vmem:[#allocation3 + $0x15d] sm:$0xff] }
 0x3be   : > { %14915 = vmatmul.mubr.msk.f32.gmra.mxu1 %vm934_vm3, %v8414_v29  ;;  %14840 = vmatprep.mubr.msk.f32.mxu0 %vm934_vm3, %v7845_v45  ;;  %v8444_v29 = vld [vmem:[#allocation3 + $0x16f] sm:$0xff]  ;;  %v7875_v45 = vld [vmem:[#allocation3 + $0x165] sm:$0xff] }
 0x3bf   : > { %14917 = vmatprep.mubr.msk.f32.mxu1 %vm934_vm3, %v8415_v35  ;;  %v8445_v35 = vld [vmem:[#allocation3 + $0x177] sm:$0xff] }
 0x3c1   : > { %14841 = vmatmul.mubr.msk.f32.gmra.mxu0 %vm934_vm3, %v7846_v10  ;;  %v7876_v10 = vld [vmem:[#allocation3 + $0x16d] sm:$0xff] }
 0x3c2   : > { %14918 = vmatmul.mubr.msk.f32.gmra.mxu1 %vm934_vm3, %v8416_v18  ;;  %14843 = vmatprep.mubr.msk.f32.mxu0 %vm934_vm3, %v7847_v39  ;;  %v8446_v18 = vld [vmem:[#allocation3 + $0x17f] sm:$0xff]  ;;  %v7877_v39 = vld [vmem:[#allocation3 + $0x175] sm:$0xff] }
 0x3c3   : > { %14920 = vmatprep.mubr.msk.f32.mxu1 %vm934_vm3, %v8417_v16  ;;  %v8447_v16 = vld [vmem:[#allocation3 + $0x187] sm:$0xff] }
 0x3c5   : > { %14844 = vmatmul.mubr.msk.f32.gmra.mxu0 %vm934_vm3, %v7848_v27  ;;  %v7878_v27 = vld [vmem:[#allocation3 + $0x17d] sm:$0xff] }
 0x3c6   : > { %14921 = vmatmul.mubr.msk.f32.gmra.mxu1 %vm934_vm3, %v8418_v58  ;;  %14846 = vmatprep.mubr.msk.f32.mxu0 %vm934_vm3, %v7849_v34  ;;  %v8448_v58 = vld [vmem:[#allocation3 + $0x18f] sm:$0xff]  ;;  %v7879_v34 = vld [vmem:[#allocation3 + $0x185] sm:$0xff] }
 0x3c7   : > { %14923 = vmatprep.mubr.msk.f32.mxu1 %vm934_vm3, %v8419_v32  ;;  %v8449_v32 = vld [vmem:[#allocation3 + $0x197] sm:$0xff] }
 0x3c9   : > { %14847 = vmatmul.mubr.msk.f32.gmra.mxu0 %vm934_vm3, %v7850_v23  ;;  %v17944_v23 = vpop.f32.mrf.mxu1 }
 0x3ca   : > { %14924 = vmatmul.mubr.msk.f32.gmra.mxu1 %vm934_vm3, %v8420_v26  ;;  %14849 = vmatprep.mubr.msk.f32.mxu0 %vm934_vm3, %v7851_v47  ;;  %v17948_v26 = vpop.f32.mrf.mxu0  ;;  %v7880_v47 = vld [vmem:[#allocation3 + $0x18d] sm:$0xff] }
 0x3cb   : > { %14926 = vmatprep.mubr.msk.f32.mxu1 %vm934_vm3, %v8421_v57  ;;  %v8450_v57 = vld [vmem:[#allocation3 + $0x19f] sm:$0xff] }
 0x3cd   : > { %14850 = vmatmul.mubr.msk.f32.gmra.mxu0 %vm934_vm3, %v7852_v11 }
 0x3ce   : > { %14927 = vmatmul.mubr.msk.f32.gmra.mxu1 %vm934_vm3, %v8422_v55  ;;  %14852 = vmatprep.mubr.msk.f32.mxu0 %vm934_vm3, %v7853_v53  ;;  %v8971_v53 = vld [vmem:[#allocation3 + $0x18] sm:$0xff] }
 0x3cf   : > { %14929 = vmatprep.mubr.msk.f32.mxu1 %vm934_vm3, %v8423_v4  ;;  %v9541_v4 = vld [vmem:[#allocation3 + $0x19] sm:$0xff] }
 0x3d1   : > { %14853 = vmatmul.mubr.msk.f32.gmra.mxu0 %vm934_vm3, %v7854_v7 }
 0x3d2   : > { %14930 = vmatmul.mubr.msk.f32.gmra.mxu1 %vm934_vm3, %v8424_v21  ;;  %14855 = vmatprep.mubr.msk.f32.mxu0 %vm934_vm3, %v7855_v6 }
 0x3d3   : > { %14932 = vmatprep.mubr.msk.f32.mxu1 %vm934_vm3, %v8425_v56 }
 0x3d5   : > { %14856 = vmatmul.mubr.msk.f32.gmra.mxu0 %vm934_vm3, %v7856_v31 }
 0x3d6   : > { %14933 = vmatmul.mubr.msk.f32.gmra.mxu1 %vm934_vm3, %v8426_v46  ;;  %14858 = vmatprep.mubr.msk.f32.mxu0 %vm934_vm3, %v7857_v12  ;;  %v8972_v46 = vld [vmem:[#allocation3 + $0x20] sm:$0xff] }
 0x3d7   : > { %14935 = vmatprep.mubr.msk.f32.mxu1 %vm934_vm3, %v8427_v9  ;;  %v9542_v12 = vld [vmem:[#allocation3 + $0x21] sm:$0xff] }
 0x3d9   : > { %14859 = vmatmul.mubr.msk.f32.gmra.mxu0 %vm934_vm3, %v7858_v17 }
 0x3da   : > { %14936 = vmatmul.mubr.msk.f32.gmra.mxu1 %vm934_vm3, %v8428_v20  ;;  %14861 = vmatprep.mubr.msk.f32.mxu0 %vm934_vm3, %v7859_v1  ;;  %v8973_v20 = vld [vmem:[#allocation3 + $0x28] sm:$0xff]  ;;  %v17963_v1 = vld [vmem:[%s19089_s5 + $0x10] sm:$0x3] }
 0x3db   : > { %14938 = vmatprep.mubr.msk.f32.mxu1 %vm934_vm3, %v8429_v3 }
 0x3dd   : > { %14862 = vmatmul.mubr.msk.f32.gmra.mxu0 %vm934_vm3, %v7860_v63 }
 0x3de   : > { %14939 = vmatmul.mubr.msk.f32.gmra.mxu1 %vm934_vm3, %v8430_v40  ;;  %14864 = vmatprep.mubr.msk.f32.mxu0 %vm934_vm3, %v7861_v43  ;;  %v9543_v40 = vld [vmem:[#allocation3 + $0x29] sm:$0xff] }
 0x3df   : > { %14941 = vmatprep.mubr.msk.f32.mxu1 %vm934_vm3, %v8431_v37 }
 0x3e1   : > { %14865 = vmatmul.mubr.msk.f32.gmra.mxu0 %vm934_vm3, %v7862_v38 }
 0x3e2   : > { %14942 = vmatmul.mubr.msk.f32.gmra.mxu1 %vm934_vm3, %v8432_v36  ;;  %14867 = vmatprep.mubr.msk.f32.mxu0 %vm934_vm3, %v7863_v44  ;;  %v8974_v44 = vld [vmem:[#allocation3 + $0x30] sm:$0xff] }
 0x3e3   : > { %14944 = vmatprep.mubr.msk.f32.mxu1 %vm934_vm3, %v8433_v33  ;;  %v9544_v33 = vld [vmem:[#allocation3 + $0x31] sm:$0xff] }
 0x3e5   : > { %14868 = vmatmul.mubr.msk.f32.gmra.mxu0 %vm934_vm3, %v7864_v8 }
 0x3e6   : > { %14945 = vmatmul.mubr.msk.f32.gmra.mxu1 %vm934_vm3, %v8434_v50  ;;  %14870 = vmatprep.mubr.msk.f32.mxu0 %vm934_vm3, %v7865_v54  ;;  %v8975_v50 = vld [vmem:[#allocation3 + $0x38] sm:$0xff] }
 0x3e7   : > { %14947 = vmatprep.mubr.msk.f32.mxu1 %vm934_vm3, %v8435_v28  ;;  %v9545_v54 = vld [vmem:[#allocation3 + $0x39] sm:$0xff] }
 0x3e9   : > { %14871 = vmatmul.mubr.msk.f32.gmra.mxu0 %vm934_vm3, %v7866_v5 }
 0x3ea   : > { %14948 = vmatmul.mubr.msk.f32.gmra.mxu1 %vm934_vm3, %v8436_v49  ;;  %14873 = vmatprep.mubr.msk.f32.mxu0 %vm934_vm3, %v7867_v13 }
 0x3eb   : > { %14950 = vmatprep.mubr.msk.f32.mxu1 %vm934_vm3, %v8437_v30 }
 0x3ed   : > { %14874 = vmatmul.mubr.msk.f32.gmra.mxu0 %vm934_vm3, %v7868_v24 }
 0x3ee   : > { %14951 = vmatmul.mubr.msk.f32.gmra.mxu1 %vm934_vm3, %v8438_v22  ;;  %14876 = vmatprep.mubr.msk.f32.mxu0 %vm934_vm3, %v7869_v14  ;;  %v8976_v22 = vld [vmem:[#allocation3 + $0x40] sm:$0xff] }
 0x3ef   : > { %14953 = vmatprep.mubr.msk.f32.mxu1 %vm934_vm3, %v8439_v25 }
 0x3f1   : > { %14877 = vmatmul.mubr.msk.f32.gmra.mxu0 %vm934_vm3, %v7870_v48  ;;  %v8977_v48 = vld [vmem:[#allocation3 + $0x48] sm:$0xff] }
 0x3f2   : > { %14954 = vmatmul.mubr.msk.f32.gmra.mxu1 %vm934_vm3, %v8440_v52  ;;  %14879 = vmatprep.mubr.msk.f32.mxu0 %vm934_vm3, %v7871_v60  ;;  %v9547_v52 = vld [vmem:[#allocation3 + $0x49] sm:$0xff] }
 0x3f3   : > { %14956 = vmatprep.mubr.msk.f32.mxu1 %vm934_vm3, %v8441_v51 }
 0x3f5   : > { %14880 = vmatmul.mubr.msk.f32.gmra.mxu0 %vm934_vm3, %v7872_v61 }
 0x3f6   : > { %14957 = vmatmul.mubr.msk.f32.gmra.mxu1 %vm934_vm3, %v8442_v19  ;;  %14882 = vmatprep.mubr.msk.f32.mxu0 %vm934_vm3, %v7873_v62 }
 0x3f7   : > { %14959 = vmatprep.mubr.msk.f32.mxu1 %vm934_vm3, %v8443_v0 }
 0x3f9   : > { %14883 = vmatmul.mubr.msk.f32.gmra.mxu0 %vm934_vm3, %v7874_v2  ;;  %v8978_v2 = vld [vmem:[#allocation3 + $0x50] sm:$0xff] }
 0x3fa   : > { %14960 = vmatmul.mubr.msk.f32.gmra.mxu1 %vm934_vm3, %v8444_v29  ;;  %14885 = vmatprep.mubr.msk.f32.mxu0 %vm934_vm3, %v7875_v45  ;;  %v9548_v29 = vld [vmem:[#allocation3 + $0x51] sm:$0xff] }
 0x3fb   : > { %14962 = vmatprep.mubr.msk.f32.mxu1 %vm934_vm3, %v8445_v35 }
 0x3fd   : > { %14886 = vmatmul.mubr.msk.f32.gmra.mxu0 %vm934_vm3, %v7876_v10  ;;  %v8979_v10 = vld [vmem:[#allocation3 + $0x58] sm:$0xff] }
 0x3fe   : > { %14963 = vmatmul.mubr.msk.f32.gmra.mxu1 %vm934_vm3, %v8446_v18  ;;  %14888 = vmatprep.mubr.msk.f32.mxu0 %vm934_vm3, %v7877_v39  ;;  %v9549_v18 = vld [vmem:[#allocation3 + $0x59] sm:$0xff] }
 0x3ff   : > { %14965 = vmatprep.mubr.msk.f32.mxu1 %vm934_vm3, %v8447_v16 }
 0x401   : > { %14889 = vmatmul.mubr.msk.f32.gmra.mxu0 %vm934_vm3, %v7878_v27 }
 0x402   : > { %14966 = vmatmul.mubr.msk.f32.gmra.mxu1 %vm934_vm3, %v8448_v58  ;;  %14891 = vmatprep.mubr.msk.f32.mxu0 %vm934_vm3, %v7879_v34 }
 0x403   : > { %14968 = vmatprep.mubr.msk.f32.mxu1 %vm934_vm3, %v8449_v32 }
 0x405   : > { %v14670_v11 = vpop.f32.mrf.mxu0  ;;  %14892 = vmatmul.mubr.msk.f32.gmra.mxu0 %vm934_vm3, %v7880_v47  ;;  %v8980_v47 = vld [vmem:[#allocation3 + $0x60] sm:$0xff] }
 0x406   : > { %v14747_v55 = vpop.f32.mrf.mxu1  ;;  %14969 = vmatmul.mubr.msk.f32.gmra.mxu1 %vm934_vm3, %v8450_v57  ;;  %v7214_v7 = vadd.f32 %v14670_v11, %v17795_v42  ;;  %14973 = vmatprep.mubr.msk.f32.mxu0 %vm934_vm3, %v8971_v53  ;;  %v9550_v57 = vld [vmem:[#allocation3 + $0x61] sm:$0xff] }
 0x407   : > { %15050 = vmatprep.mubr.msk.f32.mxu1 %vm934_vm3, %v9541_v4  ;;  %v6972_v21 = vpop.f32.mrf.mxu0  ;;  %v8981_v53 = vld [vmem:[#allocation3 + $0x68] sm:$0xff] }
 0x408   : > { %v7542_v6 = vpop.f32.mrf.mxu1  ;;  %v17955_v56 = vadd.f32 %v14747_v55, %v7214_v7  ;;  %v7213_v31 = vadd.f32 %v17795_v42, %v6972_v21  ;;  %v9551_v4 = vld [vmem:[#allocation3 + $0x69] sm:$0xff] }
 0x409   : > { %v14673_v9 = vpop.f32.mrf.mxu0  ;;  %14974 = vmatmul.mubr.msk.f32.vlgmr.msra.gmra.mxu0 %vm934_vm3, %v8972_v46 }
 0x40a   : > { %v14750_v17 = vpop.f32.mrf.mxu1  ;;  %15051 = vmatmul.mubr.msk.f32.vlgmr.msra.gmra.mxu1 %vm934_vm3, %v9542_v12  ;;  %v17965_v3 = vadd.f32 %v7542_v6, %v7213_v31  ;;  %v7216_v63 = vadd.f32 %v14673_v9, %v17795_v42  ;;  %15126 = vmatpush3.msk.msra.mxu0 %vm1550_vm2, %v17835_v41  ;;  %v8982_v9 = vld [vmem:[#allocation3 + $0x70] sm:$0xff] }
 0x40b   : > { %14976 = vmatprep.mubr.msk.f32.mxu0 %vm934_vm3, %v8973_v20  ;;  %15053 = vmatprep.mubr.msk.f32.mxu1 %vm934_vm3, %v9543_v40  ;;  %v6982_v43 = vpop.f32.mrf.mxu0  ;;  %v8983_v40 = vld [vmem:[#allocation3 + $0x78] sm:$0xff] }
 0x40c   : > { %v7552_v37 = vpop.f32.mrf.mxu1  ;;  %15203 = vmatpush3.msk.msra.mxu1 %vm1550_vm2, %v17918_v59  ;;  %v17974_v38 = vadd.f32 %v14750_v17, %v7216_v63  ;;  %v7215_v36 = vadd.f32 %v17795_v42, %v6982_v43  ;;  %15279 = vmatprep.subr.msk.mxu0 %vm1550_vm2, %v17963_v1  ;;  %v9546_v59 = vld [vmem:[#allocation3 + $0x41] sm:$0xff]  ;;  %v9552_v17 = vld [vmem:[#allocation3 + $0x71] sm:$0xff]  ;;  %v9553_v43 = vld [vmem:[#allocation3 + $0x79] sm:$0xff] }
 0x40d   : > { %v14676_v41 = vpop.f32.mrf.mxu0  ;;  %14977 = vmatmul.mubr.msk.f32.gmra.mxu0 %vm934_vm3, %v8974_v44 }
 0x40e   : > { %v14753_v8 = vpop.f32.mrf.mxu1  ;;  %15054 = vmatmul.mubr.msk.f32.gmra.mxu1 %vm934_vm3, %v9544_v33  ;;  %v17981_v28 = vadd.f32 %v7552_v37, %v7215_v36  ;;  %v7218_v5 = vadd.f32 %v14676_v41, %v17795_v42  ;;  %14979 = vmatprep.mubr.msk.f32.mxu0 %vm934_vm3, %v8975_v50  ;;  %v8984_v50 = vld [vmem:[#allocation3 + $0x80] sm:$0xff] }
 0x40f   : > { %15056 = vmatprep.mubr.msk.f32.mxu1 %vm934_vm3, %v9545_v54  ;;  %v6992_v49 = vpop.f32.mrf.mxu0  ;;  %v9554_v54 = vld [vmem:[#allocation3 + $0x81] sm:$0xff] }
 0x410   : > { %v7562_v13 = vpop.f32.mrf.mxu1  ;;  %v17986_v30 = vadd.f32 %v14753_v8, %v7218_v5  ;;  %v7217_v24 = vadd.f32 %v17795_v42, %v6992_v49 }
 0x411   : > { %v14679_v14 = vpop.f32.mrf.mxu0  ;;  %14980 = vmatmul.mubr.msk.f32.gmra.mxu0 %vm934_vm3, %v8976_v22 }
 0x412   : > { %v14756_v25 = vpop.f32.mrf.mxu1  ;;  %15057 = vmatmul.mubr.msk.f32.gmra.mxu1 %vm934_vm3, %v9546_v59  ;;  %v17991_v60 = vadd.f32 %v7562_v13, %v7217_v24  ;;  %v7220_v51 = vadd.f32 %v14679_v14, %v17795_v42  ;;  %14982 = vmatprep.mubr.msk.f32.mxu0 %vm934_vm3, %v8977_v48  ;;  %v8985_v13 = vld [vmem:[#allocation3 + $0x88] sm:$0xff] }
 0x413   : > { %15059 = vmatprep.mubr.msk.f32.mxu1 %vm934_vm3, %v9547_v52  ;;  %v7002_v61 = vpop.f32.mrf.mxu0  ;;  %v9555_v24 = vld [vmem:[#allocation3 + $0x89] sm:$0xff] }
 0x414   : > { %v7572_v19 = vpop.f32.mrf.mxu1  ;;  %v17996_v62 = vadd.f32 %v14756_v25, %v7220_v51  ;;  %v7219_v0 = vadd.f32 %v17795_v42, %v7002_v61  ;;  %v8986_v51 = vld [vmem:[#allocation3 + $0x90] sm:$0xff] }
 0x415   : > { %v14682_v45 = vpop.f32.mrf.mxu0  ;;  %14983 = vmatmul.mubr.msk.f32.gmra.mxu0 %vm934_vm3, %v8978_v2  ;;  %v9556_v61 = vld [vmem:[#allocation3 + $0x91] sm:$0xff] }
 0x416   : > { %v14759_v35 = vpop.f32.mrf.mxu1  ;;  %15060 = vmatmul.mubr.msk.f32.gmra.mxu1 %vm934_vm3, %v9548_v29  ;;  %v18001_v39 = vadd.f32 %v7572_v19, %v7219_v0  ;;  %v7222_v16 = vadd.f32 %v14682_v45, %v17795_v42  ;;  %14985 = vmatprep.mubr.msk.f32.mxu0 %vm934_vm3, %v8979_v10  ;;  %v8987_v2 = vld [vmem:[#allocation3 + $0x98] sm:$0xff] }
 0x417   : > { %15062 = vmatprep.mubr.msk.f32.mxu1 %vm934_vm3, %v9549_v18  ;;  %v7012_v27 = vpop.f32.mrf.mxu0  ;;  %v9557_v29 = vld [vmem:[#allocation3 + $0x99] sm:$0xff] }
 0x418   : > { %v7582_v58 = vpop.f32.mrf.mxu1  ;;  %v18006_v34 = vadd.f32 %v14759_v35, %v7222_v16  ;;  %v7221_v32 = vadd.f32 %v17795_v42, %v7012_v27 }
 0x419   : > { %v14685_v11 = vpop.f32.mrf.mxu0  ;;  %14986 = vmatmul.mubr.msk.f32.gmra.mxu0 %vm934_vm3, %v8980_v47 }
 0x41a   : > { %v14762_v55 = vpop.f32.mrf.mxu1  ;;  %15063 = vmatmul.mubr.msk.f32.gmra.mxu1 %vm934_vm3, %v9550_v57  ;;  %v18011_v7 = vadd.f32 %v7582_v58, %v7221_v32  ;;  %v7224_v21 = vadd.f32 %v14685_v11, %v17795_v42  ;;  %14988 = vmatprep.mubr.msk.f32.mxu0 %vm934_vm3, %v8981_v53  ;;  %v8988_v58 = vld [vmem:[#allocation3 + $0xa0] sm:$0xff]  ;;  %v8989_v11 = vld [vmem:[#allocation3 + $0xa8] sm:$0xff] }
 0x41b   : > { %15065 = vmatprep.mubr.msk.f32.mxu1 %vm934_vm3, %v9551_v4  ;;  %v7022_v6 = vpop.f32.mrf.mxu0  ;;  %v9558_v32 = vld [vmem:[#allocation3 + $0xa1] sm:$0xff] }
 0x41c   : > { %v7592_v31 = vpop.f32.mrf.mxu1  ;;  %v18016_v46 = vadd.f32 %v14762_v55, %v7224_v21  ;;  %v7223_v12 = vadd.f32 %v17795_v42, %v7022_v6  ;;  %v9559_v55 = vld [vmem:[#allocation3 + $0xa9] sm:$0xff] }
 0x41d   : > { %v14688_v20 = vpop.f32.mrf.mxu0  ;;  %14989 = vmatmul.mubr.msk.f32.gmra.mxu0 %vm934_vm3, %v8982_v9  ;;  %v8990_v9 = vld [vmem:[#allocation3 + $0xb0] sm:$0xff] }
 0x41e   : > { %v14765_v63 = vpop.f32.mrf.mxu1  ;;  %15066 = vmatmul.mubr.msk.f32.gmra.mxu1 %vm934_vm3, %v9552_v17  ;;  %v18021_v37 = vadd.f32 %v7592_v31, %v7223_v12  ;;  %v7226_v36 = vadd.f32 %v14688_v20, %v17795_v42  ;;  %14991 = vmatprep.mubr.msk.f32.mxu0 %vm934_vm3, %v8983_v40  ;;  %v9560_v17 = vld [vmem:[#allocation3 + $0xb1] sm:$0xff] }
 0x41f   : > { %15068 = vmatprep.mubr.msk.f32.mxu1 %vm934_vm3, %v9553_v43  ;;  %v7032_v44 = vpop.f32.mrf.mxu0  ;;  %v8991_v40 = vld [vmem:[#allocation3 + $0xb8] sm:$0xff] }
 0x420   : > { %v7602_v33 = vpop.f32.mrf.mxu1  ;;  %v18026_v41 = vadd.f32 %v14765_v63, %v7226_v36  ;;  %v7225_v8 = vadd.f32 %v17795_v42, %v7032_v44  ;;  %v9561_v43 = vld [vmem:[#allocation3 + $0xb9] sm:$0xff] }
 0x421   : > { %v14691_v5 = vpop.f32.mrf.mxu0  ;;  %14992 = vmatmul.mubr.msk.f32.gmra.mxu0 %vm934_vm3, %v8984_v50 }
 0x422   : > { %v14768_v49 = vpop.f32.mrf.mxu1  ;;  %15069 = vmatmul.mubr.msk.f32.gmra.mxu1 %vm934_vm3, %v9554_v54  ;;  %v18031_v22 = vadd.f32 %v7602_v33, %v7225_v8  ;;  %v7228_v59 = vadd.f32 %v14691_v5, %v17795_v42  ;;  %14994 = vmatprep.mubr.msk.f32.mxu0 %vm934_vm3, %v8985_v13  ;;  %v8992_v5 = vld [vmem:[#allocation3 + $0xc0] sm:$0xff] }
 0x423   : > { %15071 = vmatprep.mubr.msk.f32.mxu1 %vm934_vm3, %v9555_v24  ;;  %v7042_v14 = vpop.f32.mrf.mxu0 }
 0x424   : > { %v7612_v25 = vpop.f32.mrf.mxu1  ;;  %v18036_v48 = vadd.f32 %v14768_v49, %v7228_v59  ;;  %v7227_v52 = vadd.f32 %v17795_v42, %v7042_v14  ;;  %v9562_v49 = vld [vmem:[#allocation3 + $0xc1] sm:$0xff]  ;;  %v9563_v14 = vld [vmem:[#allocation3 + $0xc9] sm:$0xff] }
 0x425   : > { %v14694_v19 = vpop.f32.mrf.mxu0  ;;  %14995 = vmatmul.mubr.msk.f32.gmra.mxu0 %vm934_vm3, %v8986_v51  ;;  %v8993_v59 = vld [vmem:[#allocation3 + $0xc8] sm:$0xff] }
 0x426   : > { %v14771_v0 = vpop.f32.mrf.mxu1  ;;  %15072 = vmatmul.mubr.msk.f32.gmra.mxu1 %vm934_vm3, %v9556_v61  ;;  %v18041_v45 = vadd.f32 %v7612_v25, %v7227_v52  ;;  %v7230_v35 = vadd.f32 %v14694_v19, %v17795_v42  ;;  %14997 = vmatprep.mubr.msk.f32.mxu0 %vm934_vm3, %v8987_v2  ;;  %v8994_v2 = vld [vmem:[#allocation3 + $0xd0] sm:$0xff] }
 0x427   : > { %15074 = vmatprep.mubr.msk.f32.mxu1 %vm934_vm3, %v9557_v29  ;;  %v7052_v10 = vpop.f32.mrf.mxu0  ;;  %v9564_v29 = vld [vmem:[#allocation3 + $0xd1] sm:$0xff] }
 0x428   : > { %v7622_v18 = vpop.f32.mrf.mxu1  ;;  %v18046_v16 = vadd.f32 %v14771_v0, %v7230_v35  ;;  %v7229_v27 = vadd.f32 %v17795_v42, %v7052_v10 }
 0x429   : > { %v14697_v47 = vpop.f32.mrf.mxu0  ;;  %14998 = vmatmul.mubr.msk.f32.gmra.mxu0 %vm934_vm3, %v8988_v58 }
 0x42a   : > { %v14774_v57 = vpop.f32.mrf.mxu1  ;;  %15075 = vmatmul.mubr.msk.f32.gmra.mxu1 %vm934_vm3, %v9558_v32  ;;  %v18051_v53 = vadd.f32 %v7622_v18, %v7229_v27  ;;  %v7232_v4 = vadd.f32 %v14697_v47, %v17795_v42  ;;  %15000 = vmatprep.mubr.msk.f32.mxu0 %vm934_vm3, %v8989_v11  ;;  %v8995_v18 = vld [vmem:[#allocation3 + $0xd8] sm:$0xff] }
 0x42b   : > { %15077 = vmatprep.mubr.msk.f32.mxu1 %vm934_vm3, %v9559_v55  ;;  %v7062_v21 = vpop.f32.mrf.mxu0  ;;  %v9565_v27 = vld [vmem:[#allocation3 + $0xd9] sm:$0xff] }
 0x42c   : > { %v7632_v6 = vpop.f32.mrf.mxu1  ;;  %v18056_v31 = vadd.f32 %v14774_v57, %v7232_v4  ;;  %v7231_v12 = vadd.f32 %v17795_v42, %v7062_v21  ;;  %v8996_v4 = vld [vmem:[#allocation3 + $0xe0] sm:$0xff] }
 0x42d   : > { %v14700_v20 = vpop.f32.mrf.mxu0  ;;  %15001 = vmatmul.mubr.msk.f32.gmra.mxu0 %vm934_vm3, %v8990_v9  ;;  %v9566_v21 = vld [vmem:[#allocation3 + $0xe1] sm:$0xff] }
 0x42e   : > { %v14777_v63 = vpop.f32.mrf.mxu1  ;;  %15078 = vmatmul.mubr.msk.f32.gmra.mxu1 %vm934_vm3, %v9560_v17  ;;  %v18061_v36 = vadd.f32 %v7632_v6, %v7231_v12  ;;  %v7234_v44 = vadd.f32 %v14700_v20, %v17795_v42  ;;  %15003 = vmatprep.mubr.msk.f32.mxu0 %vm934_vm3, %v8991_v40  ;;  %v8997_v9 = vld [vmem:[#allocation3 + $0xe8] sm:$0xff] }
 0x42f   : > { %15080 = vmatprep.mubr.msk.f32.mxu1 %vm934_vm3, %v9561_v43  ;;  %v7072_v33 = vpop.f32.mrf.mxu0  ;;  %v9567_v17 = vld [vmem:[#allocation3 + $0xe9] sm:$0xff] }
 0x430   : > { %v7642_v8 = vpop.f32.mrf.mxu1  ;;  %v18066_v50 = vadd.f32 %v14777_v63, %v7234_v44  ;;  %v7233_v54 = vadd.f32 %v17795_v42, %v7072_v33 }
 0x431   : > { %v14703_v13 = vpop.f32.mrf.mxu0  ;;  %15004 = vmatmul.mubr.msk.f32.gmra.mxu0 %vm934_vm3, %v8992_v5 }
 0x432   : > { %v14780_v24 = vpop.f32.mrf.mxu1  ;;  %15081 = vmatmul.mubr.msk.f32.gmra.mxu1 %vm934_vm3, %v9562_v49  ;;  %v18071_v25 = vadd.f32 %v7642_v8, %v7233_v54  ;;  %v7236_v52 = vadd.f32 %v14703_v13, %v17795_v42  ;;  %15006 = vmatprep.mubr.msk.f32.mxu0 %vm934_vm3, %v8993_v59  ;;  %v8998_v8 = vld [vmem:[#allocation3 + $0xf0] sm:$0xff]  ;;  %v8999_v13 = vld [vmem:[#allocation3 + $0xf8] sm:$0xff] }
 0x433   : > { %15083 = vmatprep.mubr.msk.f32.mxu1 %vm934_vm3, %v9563_v14  ;;  %v7082_v51 = vpop.f32.mrf.mxu0  ;;  %v9568_v54 = vld [vmem:[#allocation3 + $0xf1] sm:$0xff] }
 0x434   : > { %v7652_v61 = vpop.f32.mrf.mxu1  ;;  %v18076_v19 = vadd.f32 %v14780_v24, %v7236_v52  ;;  %v7235_v0 = vadd.f32 %v17795_v42, %v7082_v51  ;;  %v9569_v24 = vld [vmem:[#allocation3 + $0xf9] sm:$0xff] }
 0x435   : > { %v14706_v35 = vpop.f32.mrf.mxu0  ;;  %15007 = vmatmul.mubr.msk.f32.gmra.mxu0 %vm934_vm3, %v8994_v2  ;;  %v9000_v2 = vld [vmem:[#allocation3 + $0x100] sm:$0xff] }
 0x436   : > { %v14783_v10 = vpop.f32.mrf.mxu1  ;;  %15084 = vmatmul.mubr.msk.f32.gmra.mxu1 %vm934_vm3, %v9564_v29  ;;  %v18081_v58 = vadd.f32 %v7652_v61, %v7235_v0  ;;  %v7238_v32 = vadd.f32 %v14706_v35, %v17795_v42  ;;  %15009 = vmatprep.mubr.msk.f32.mxu0 %vm934_vm3, %v8995_v18  ;;  %v9570_v29 = vld [vmem:[#allocation3 + $0x101] sm:$0xff] }
 0x437   : > { %15086 = vmatprep.mubr.msk.f32.mxu1 %vm934_vm3, %v9565_v27  ;;  %v7092_v47 = vpop.f32.mrf.mxu0  ;;  %v9001_v18 = vld [vmem:[#allocation3 + $0x108] sm:$0xff] }
 0x438   : > { %v7662_v57 = vpop.f32.mrf.mxu1  ;;  %v18086_v11 = vadd.f32 %v14783_v10, %v7238_v32  ;;  %v7237_v55 = vadd.f32 %v17795_v42, %v7092_v47  ;;  %v9571_v27 = vld [vmem:[#allocation3 + $0x109] sm:$0xff]  ;;  %v18116_v47 = vld [vmem:[%s19090_s6] ss:$0 sm:$0xff] }
 0x439   : > { %v14709_v6 = vpop.f32.mrf.mxu0  ;;  %15010 = vmatmul.mubr.msk.f32.gmra.mxu0 %vm934_vm3, %v8996_v4 }
 0x43a   : > { %v14786_v12 = vpop.f32.mrf.mxu1  ;;  %15087 = vmatmul.mubr.msk.f32.gmra.mxu1 %vm934_vm3, %v9566_v21  ;;  %v18091_v20 = vadd.f32 %v7662_v57, %v7237_v55  ;;  %v7240_v63 = vadd.f32 %v14709_v6, %v17795_v42  ;;  %15012 = vmatprep.mubr.msk.f32.mxu0 %vm934_vm3, %v8997_v9  ;;  %v9002_v6 = vld [vmem:[#allocation3 + $0x110] sm:$0xff] }
 0x43b   : > { %15089 = vmatprep.mubr.msk.f32.mxu1 %vm934_vm3, %v9567_v17  ;;  %v7102_v40 = vpop.f32.mrf.mxu0 }
 0x43c   : > { %v7672_v43 = vpop.f32.mrf.mxu1  ;;  %v18096_v44 = vadd.f32 %v14786_v12, %v7240_v63  ;;  %v7239_v33 = vadd.f32 %v17795_v42, %v7102_v40  ;;  %v9572_v12 = vld [vmem:[#allocation3 + $0x111] sm:$0xff]  ;;  %v9573_v40 = vld [vmem:[#allocation3 + $0x119] sm:$0xff] }
 0x43d   : > { %v14712_v5 = vpop.f32.mrf.mxu0  ;;  %15013 = vmatmul.mubr.msk.f32.gmra.mxu0 %vm934_vm3, %v8998_v8  ;;  %v9003_v63 = vld [vmem:[#allocation3 + $0x118] sm:$0xff] }
 0x43e   : > { %v14789_v49 = vpop.f32.mrf.mxu1  ;;  %15090 = vmatmul.mubr.msk.f32.gmra.mxu1 %vm934_vm3, %v9568_v54  ;;  %v18101_v59 = vadd.f32 %v7672_v43, %v7239_v33  ;;  %v7242_v14 = vadd.f32 %v14712_v5, %v17795_v42  ;;  %15015 = vmatprep.mubr.msk.f32.mxu0 %vm934_vm3, %v8999_v13  ;;  %v9004_v13 = vld [vmem:[#allocation3 + $0x120] sm:$0xff] }
 0x43f   : > { %15092 = vmatprep.mubr.msk.f32.mxu1 %vm934_vm3, %v9569_v24  ;;  %v7112_v52 = vpop.f32.mrf.mxu0  ;;  %v9574_v24 = vld [vmem:[#allocation3 + $0x121] sm:$0xff] }
 0x440   : > { %v7682_v51 = vpop.f32.mrf.mxu1  ;;  %v18106_v61 = vadd.f32 %v14789_v49, %v7242_v14  ;;  %v7241_v0 = vadd.f32 %v17795_v42, %v7112_v52 }
 0x441   : > { %v14715_v35 = vpop.f32.mrf.mxu0  ;;  %15016 = vmatmul.mubr.msk.f32.gmra.mxu0 %vm934_vm3, %v9000_v2 }
 0x442   : > { %v14792_v10 = vpop.f32.mrf.mxu1  ;;  %15093 = vmatmul.mubr.msk.f32.gmra.mxu1 %vm934_vm3, %v9570_v29  ;;  %v18111_v32 = vadd.f32 %v7682_v51, %v7241_v0  ;;  %v7244_v57 = vadd.f32 %v18116_v47, %v14715_v35  ;;  %15018 = vmatprep.mubr.msk.f32.mxu0 %vm934_vm3, %v9001_v18  ;;  %v9005_v51 = vld [vmem:[#allocation3 + $0x128] sm:$0xff] }
 0x443   : > { %15095 = vmatprep.mubr.msk.f32.mxu1 %vm934_vm3, %v9571_v27  ;;  %v7122_v42 = vpop.f32.mrf.mxu0  ;;  %v9575_v0 = vld [vmem:[#allocation3 + $0x129] sm:$0xff] }
 0x444   : > { %v7692_v55 = vpop.f32.mrf.mxu1  ;;  %v18121_v4 = vadd.f32 %v14792_v10, %v7244_v57  ;;  %v7243_v21 = vadd.f32 %v18116_v47, %v7122_v42  ;;  %v9006_v57 = vld [vmem:[#allocation3 + $0x130] sm:$0xff] }
 0x445   : > { %v14718_v9 = vpop.f32.mrf.mxu0  ;;  %15019 = vmatmul.mubr.msk.f32.gmra.mxu0 %vm934_vm3, %v9002_v6  ;;  %v9576_v42 = vld [vmem:[#allocation3 + $0x131] sm:$0xff] }
 0x446   : > { %v14795_v17 = vpop.f32.mrf.mxu1  ;;  %15096 = vmatmul.mubr.msk.f32.gmra.mxu1 %vm934_vm3, %v9572_v12  ;;  %v18126_v43 = vadd.f32 %v7692_v55, %v7243_v21  ;;  %v7246_v33 = vadd.f32 %v18116_v47, %v14718_v9  ;;  %15021 = vmatprep.mubr.msk.f32.mxu0 %vm934_vm3, %v9003_v63  ;;  %v9007_v6 = vld [vmem:[#allocation3 + $0x138] sm:$0xff] }
 0x447   : > { %15098 = vmatprep.mubr.msk.f32.mxu1 %vm934_vm3, %v9573_v40  ;;  %v7132_v8 = vpop.f32.mrf.mxu0  ;;  %v9577_v12 = vld [vmem:[#allocation3 + $0x139] sm:$0xff] }
 0x448   : > { %v7702_v54 = vpop.f32.mrf.mxu1  ;;  %v18131_v5 = vadd.f32 %v14795_v17, %v7246_v33  ;;  %v7245_v49 = vadd.f32 %v18116_v47, %v7132_v8 }
 0x449   : > { %v14721_v14 = vpop.f32.mrf.mxu0  ;;  %15022 = vmatmul.mubr.msk.f32.gmra.mxu0 %vm934_vm3, %v9004_v13 }
 0x44a   : > { %v14798_v52 = vpop.f32.mrf.mxu1  ;;  %15099 = vmatmul.mubr.msk.f32.gmra.mxu1 %vm934_vm3, %v9574_v24  ;;  %v18136_v2 = vadd.f32 %v7702_v54, %v7245_v49  ;;  %v7248_v29 = vadd.f32 %v18116_v47, %v14721_v14  ;;  %15024 = vmatprep.mubr.msk.f32.mxu0 %vm934_vm3, %v9005_v51  ;;  %v9008_v54 = vld [vmem:[#allocation3 + $0x140] sm:$0xff]  ;;  %v9009_v14 = vld [vmem:[#allocation3 + $0x148] sm:$0xff] }
 0x44b   : > { %15101 = vmatprep.mubr.msk.f32.mxu1 %vm934_vm3, %v9575_v0  ;;  %v7142_v35 = vpop.f32.mrf.mxu0  ;;  %v9578_v49 = vld [vmem:[#allocation3 + $0x141] sm:$0xff] }
 0x44c   : > { %v7712_v10 = vpop.f32.mrf.mxu1  ;;  %v18141_v18 = vadd.f32 %v14798_v52, %v7248_v29  ;;  %v7247_v27 = vadd.f32 %v18116_v47, %v7142_v35  ;;  %v9579_v52 = vld [vmem:[#allocation3 + $0x149] sm:$0xff] }
 0x44d   : > { %v14724_v55 = vpop.f32.mrf.mxu0  ;;  %15025 = vmatmul.mubr.msk.f32.gmra.mxu0 %vm934_vm3, %v9006_v57  ;;  %v9010_v57 = vld [vmem:[#allocation3 + $0x150] sm:$0xff] }
 0x44e   : > { %v14801_v21 = vpop.f32.mrf.mxu1  ;;  %15102 = vmatmul.mubr.msk.f32.gmra.mxu1 %vm934_vm3, %v9576_v42  ;;  %v18146_v9 = vadd.f32 %v7712_v10, %v7247_v27  ;;  %v7250_v17 = vadd.f32 %v18116_v47, %v14724_v55  ;;  %15027 = vmatprep.mubr.msk.f32.mxu0 %vm934_vm3, %v9007_v6  ;;  %v9580_v42 = vld [vmem:[#allocation3 + $0x151] sm:$0xff] }
 0x44f   : > { %15104 = vmatprep.mubr.msk.f32.mxu1 %vm934_vm3, %v9577_v12  ;;  %v7152_v63 = vpop.f32.mrf.mxu0  ;;  %v9011_v6 = vld [vmem:[#allocation3 + $0x158] sm:$0xff] }
 0x450   : > { %v7722_v40 = vpop.f32.mrf.mxu1  ;;  %v18151_v33 = vadd.f32 %v14801_v21, %v7250_v17  ;;  %v7249_v8 = vadd.f32 %v18116_v47, %v7152_v63  ;;  %v9581_v12 = vld [vmem:[#allocation3 + $0x159] sm:$0xff] }
 0x451   : > { %v14727_v13 = vpop.f32.mrf.mxu0  ;;  %15028 = vmatmul.mubr.msk.f32.gmra.mxu0 %vm934_vm3, %v9008_v54 }
 0x452   : > { %v14804_v24 = vpop.f32.mrf.mxu1  ;;  %15105 = vmatmul.mubr.msk.f32.gmra.mxu1 %vm934_vm3, %v9578_v49  ;;  %v18156_v51 = vadd.f32 %v7722_v40, %v7249_v8  ;;  %v7252_v0 = vadd.f32 %v18116_v47, %v14727_v13  ;;  %15030 = vmatprep.mubr.msk.f32.mxu0 %vm934_vm3, %v9009_v14  ;;  %v9012_v13 = vld [vmem:[#allocation3 + $0x160] sm:$0xff] }
 0x453   : > { %15107 = vmatprep.mubr.msk.f32.mxu1 %vm934_vm3, %v9579_v52  ;;  %v7162_v29 = vpop.f32.mrf.mxu0 }
 0x454   : > { %v7732_v35 = vpop.f32.mrf.mxu1  ;;  %v18161_v10 = vadd.f32 %v14804_v24, %v7252_v0  ;;  %v7251_v27 = vadd.f32 %v18116_v47, %v7162_v29  ;;  %v9582_v24 = vld [vmem:[#allocation3 + $0x161] sm:$0xff]  ;;  %v9583_v29 = vld [vmem:[#allocation3 + $0x169] sm:$0xff] }
 0x455   : > { %v14730_v55 = vpop.f32.mrf.mxu0  ;;  %15031 = vmatmul.mubr.msk.f32.gmra.mxu0 %vm934_vm3, %v9010_v57  ;;  %v9013_v0 = vld [vmem:[#allocation3 + $0x168] sm:$0xff] }
 0x456   : > { %v14807_v21 = vpop.f32.mrf.mxu1  ;;  %15108 = vmatmul.mubr.msk.f32.gmra.mxu1 %vm934_vm3, %v9580_v42  ;;  %v18166_v17 = vadd.f32 %v7732_v35, %v7251_v27  ;;  %v7254_v63 = vadd.f32 %v18116_v47, %v14730_v55  ;;  %15033 = vmatprep.mubr.msk.f32.mxu0 %vm934_vm3, %v9011_v6  ;;  %v9014_v6 = vld [vmem:[#allocation3 + $0x170] sm:$0xff] }
 0x457   : > { %15110 = vmatprep.mubr.msk.f32.mxu1 %vm934_vm3, %v9581_v12  ;;  %v7172_v40 = vpop.f32.mrf.mxu0  ;;  %v9584_v12 = vld [vmem:[#allocation3 + $0x171] sm:$0xff] }
 0x458   : > { %v7742_v8 = vpop.f32.mrf.mxu1  ;;  %v18171_v54 = vadd.f32 %v14807_v21, %v7254_v63  ;;  %v7253_v49 = vadd.f32 %v18116_v47, %v7172_v40 }
 0x459   : > { %v14733_v14 = vpop.f32.mrf.mxu0  ;;  %15034 = vmatmul.mubr.msk.f32.gmra.mxu0 %vm934_vm3, %v9012_v13 }
 0x45a   : > { %v14810_v52 = vpop.f32.mrf.mxu1  ;;  %15111 = vmatmul.mubr.msk.f32.gmra.mxu1 %vm934_vm3, %v9582_v24  ;;  %v18176_v35 = vadd.f32 %v7742_v8, %v7253_v49  ;;  %v7256_v27 = vadd.f32 %v18116_v47, %v14733_v14  ;;  %15036 = vmatprep.mubr.msk.f32.mxu0 %vm934_vm3, %v9013_v0  ;;  %v9015_v8 = vld [vmem:[#allocation3 + $0x178] sm:$0xff] }
 0x45b   : > { %15113 = vmatprep.mubr.msk.f32.mxu1 %vm934_vm3, %v9583_v29  ;;  %v7182_v57 = vpop.f32.mrf.mxu0  ;;  %v9585_v49 = vld [vmem:[#allocation3 + $0x179] sm:$0xff] }
 0x45c   : > { %v7752_v42 = vpop.f32.mrf.mxu1  ;;  %v18181_v55 = vadd.f32 %v14810_v52, %v7256_v27  ;;  %v7255_v21 = vadd.f32 %v18116_v47, %v7182_v57  ;;  %v9016_v27 = vld [vmem:[#allocation3 + $0x180] sm:$0xff] }
 0x45d   : > { %v14736_v63 = vpop.f32.mrf.mxu0  ;;  %15037 = vmatmul.mubr.msk.f32.gmra.mxu0 %vm934_vm3, %v9014_v6  ;;  %v9586_v57 = vld [vmem:[#allocation3 + $0x181] sm:$0xff] }
 0x45e   : > { %19414 = vst [vmem:[#allocation7_spill] sm:$0xff] %v18181_v55  ;;  %v14813_v40 = vpop.f32.mrf.mxu1  ;;  %15114 = vmatmul.mubr.msk.f32.gmra.mxu1 %vm934_vm3, %v9584_v12  ;;  %v18186_v13 = vadd.f32 %v7752_v42, %v7255_v21  ;;  %v7258_v24 = vadd.f32 %v18116_v47, %v14736_v63  ;;  %15039 = vmatprep.mubr.msk.f32.mxu0 %vm934_vm3, %v9015_v8  ;;  %v9017_v42 = vld [vmem:[#allocation3 + $0x188] sm:$0xff] }
 0x45f   : > { %15116 = vmatprep.mubr.msk.f32.mxu1 %vm934_vm3, %v9585_v49  ;;  %v7192_v14 = vpop.f32.mrf.mxu0  ;;  %v9587_v21 = vld [vmem:[#allocation3 + $0x189] sm:$0xff]  ;;  %v7211_v63 = vadd.f32 %v18116_v47, %v17948_v26  ;;  %v9019_v26 = vld [vmem:[#allocation3 + $0x198] sm:$0xff] }
 0x460   : > { %19415 = vst [vmem:[#allocation5_spill] sm:$0xff] %v18186_v13  ;;  %v7762_v52 = vpop.f32.mrf.mxu1  ;;  %v18191_v0 = vadd.f32 %v14813_v40, %v7258_v24  ;;  %v7257_v29 = vadd.f32 %v18116_v47, %v7192_v14 }
 0x461   : > { %v14739_v6 = vpop.f32.mrf.mxu0  ;;  %15040 = vmatmul.mubr.msk.f32.gmra.mxu0 %vm934_vm3, %v9016_v27 }
 0x462   : > { %19416 = vst [vmem:[#allocation6_spill] sm:$0xff] %v18191_v0  ;;  %v14816_v12 = vpop.f32.mrf.mxu1  ;;  %15117 = vmatmul.mubr.msk.f32.gmra.mxu1 %vm934_vm3, %v9586_v57  ;;  %v18198_v8 = vadd.f32 %v7762_v52, %v7257_v29  ;;  %v7260_v40 = vadd.f32 %v18116_v47, %v14739_v6  ;;  %15042 = vmatprep.mubr.msk.f32.mxu0 %vm934_vm3, %v9017_v42  ;;  %v9018_v57 = vld [vmem:[#allocation3 + $0x190] sm:$0xff]  ;;  %v9589_v52 = vld [vmem:[#allocation3 + $0x199] sm:$0xff] }
 0x463   : > { %15119 = vmatprep.mubr.msk.f32.mxu1 %vm934_vm3, %v9587_v21  ;;  %v7202_v49 = vpop.f32.mrf.mxu0  ;;  %v9588_v0 = vld [vmem:[#allocation3 + $0x191] sm:$0xff]  ;;  %v7781_v29 = vadd.f32 %v17944_v23, %v7211_v63 }
 0x464   : > { %v7772_v24 = vpop.f32.mrf.mxu1  ;;  %v18203_v14 = vadd.f32 %v14816_v12, %v7260_v40  ;;  %v7259_v27 = vadd.f32 %v18116_v47, %v7202_v49  ;;  %v9020_v49 = vld [vmem:[#allocation3 + $0x1a0] sm:$0xff]  ;;  %v10111_v23 = vld [vmem:[#allocation3 + $0x2b] sm:$0xff] }
 0x465   : > { %v14821_v13 = vpop.f32.mrf.mxu0  ;;  %15043 = vmatmul.mubr.msk.f32.gmra.mxu0 %vm934_vm3, %v9018_v57  ;;  %v9590_v57 = vld [vmem:[#allocation3 + $0x1a1] sm:$0xff]  ;;  %v10681_v63 = vld [vmem:[#allocation3 + $0x2c] sm:$0xff] }
 0x466   : > { %19417 = vst [vmem:[#allocation4_spill] sm:$0xff] %v18203_v14  ;;  %v14898_v55 = vpop.f32.mrf.mxu1  ;;  %15120 = vmatmul.mubr.msk.f32.gmra.mxu1 %vm934_vm3, %v9588_v0  ;;  %v18209_v6 = vadd.f32 %v7772_v24, %v7259_v27  ;;  %v8352_v42 = vadd.f32 %v14821_v13, %v17813_v15  ;;  %15045 = vmatprep.mubr.msk.f32.mxu0 %vm934_vm3, %v9019_v26 }
 0x467   : > { %15122 = vmatprep.mubr.msk.f32.mxu1 %vm934_vm3, %v9589_v52  ;;  %v8102_v47 = vpop.f32.mrf.mxu0  ;;  %v10112_v52 = vld [vmem:[#allocation3 + $0x33] sm:$0xff] }
 0x468   : > { %v8672_v12 = vpop.f32.mrf.mxu1  ;;  %v18214_v21 = vadd.f32 %v14898_v55, %v8352_v42  ;;  %v8351_v40 = vadd.f32 %v8102_v47, %v7781_v29  ;;  %v10682_v29 = vld [vmem:[#allocation3 + $0x34] sm:$0xff] }
 0x469   : > { %v14824_v0 = vpop.f32.mrf.mxu0  ;;  %15046 = vmatmul.mubr.msk.f32.gmra.mxu0 %vm934_vm3, %v9020_v49 }
 0x46a   : > { %v14901_v14 = vpop.f32.mrf.mxu1  ;;  %15123 = vmatmul.mubr.msk.f32.gmra.mxu1 %vm934_vm3, %v9590_v57  ;;  %v18218_v15 = vadd.f32 %v8672_v12, %v8351_v40  ;;  %v8354_v13 = vadd.f32 %v14824_v0, %v17955_v56  ;;  %15127 = vmatprep.mubr.msk.f32.mxu0 %vm934_vm3, %v10111_v23  ;;  %v10113_v12 = vld [vmem:[#allocation3 + $0x3b] sm:$0xff]  ;;  %v10114_v23 = vld [vmem:[#allocation3 + $0x43] sm:$0xff] }
 0x46b   : > { %15204 = vmatprep.mubr.msk.f32.mxu1 %vm934_vm3, %v10681_v63  ;;  %v8112_v55 = vpop.f32.mrf.mxu0  ;;  %v10684_v63 = vld [vmem:[#allocation3 + $0x44] sm:$0xff] }
 0x46c   : > { %v8682_v24 = vpop.f32.mrf.mxu1  ;;  %v18223_v27 = vadd.f32 %v14901_v14, %v8354_v13  ;;  %v8353_v26 = vadd.f32 %v8112_v55, %v17965_v3  ;;  %v10683_v14 = vld [vmem:[#allocation3 + $0x3c] sm:$0xff] }
 0x46d   : > { %v14827_v42 = vpop.f32.mrf.mxu0  ;;  %15128 = vmatmul.mubr.msk.f32.vlgmr.msra.gmra.mxu0 %vm934_vm3, %v10112_v52 }
 0x46e   : > { %v14904_v47 = vpop.f32.mrf.mxu1  ;;  %15205 = vmatmul.mubr.msk.f32.vlgmr.msra.gmra.mxu1 %vm934_vm3, %v10682_v29  ;;  %v18228_v56 = vadd.f32 %v8682_v24, %v8353_v26  ;;  %v8356_v40 = vadd.f32 %v14827_v42, %v17974_v38  ;;  %15280 = vmatpush3.msk.msra.mxu0 %vm1550_vm2, %v17963_v1  ;;  %v10115_v1 = vld [vmem:[#allocation3 + $0x4b] sm:$0xff] }
 0x46f   : > { %15130 = vmatprep.mubr.msk.f32.mxu0 %vm934_vm3, %v10113_v12  ;;  %15207 = vmatprep.mubr.msk.f32.mxu1 %vm934_vm3, %v10683_v14  ;;  %v8122_v3 = vpop.f32.mrf.mxu0  ;;  %v10685_v38 = vld [vmem:[#allocation3 + $0x4c] sm:$0xff]  ;;  %v10686_v12 = vld [vmem:[#allocation3 + $0x54] sm:$0xff] }
 0x470   : > { %v8692_v49 = vpop.f32.mrf.mxu1  ;;  %v18235_v57 = vadd.f32 %v14904_v47, %v8356_v40  ;;  %v8355_v0 = vadd.f32 %v8122_v3, %v17981_v28  ;;  %v10116_v47 = vld [vmem:[#allocation3 + $0x53] sm:$0xff]  ;;  %v10117_v3 = vld [vmem:[#allocation3 + $0x5b] sm:$0xff] }
 0x471   : > { %v14830_v13 = vpop.f32.mrf.mxu0  ;;  %15131 = vmatmul.mubr.msk.f32.gmra.mxu0 %vm934_vm3, %v10114_v23 }
 0x472   : > { %v14907_v55 = vpop.f32.mrf.mxu1  ;;  %15208 = vmatmul.mubr.msk.f32.gmra.mxu1 %vm934_vm3, %v10684_v63  ;;  %v18240_v24 = vadd.f32 %v8692_v49, %v8355_v0  ;;  %v8358_v26 = vadd.f32 %v14830_v13, %v17986_v30  ;;  %15133 = vmatprep.mubr.msk.f32.mxu0 %vm934_vm3, %v10115_v1  ;;  %v10687_v30 = vld [vmem:[#allocation3 + $0x5c] sm:$0xff]  ;;  %v10688_v1 = vld [vmem:[#allocation3 + $0x64] sm:$0xff] }
 0x473   : > { %15210 = vmatprep.mubr.msk.f32.mxu1 %vm934_vm3, %v10685_v38  ;;  %v8132_v52 = vpop.f32.mrf.mxu0 }
 0x474   : > { %v8702_v28 = vpop.f32.mrf.mxu1  ;;  %v18245_v29 = vadd.f32 %v14907_v55, %v8358_v26  ;;  %v8357_v42 = vadd.f32 %v8132_v52, %v17991_v60  ;;  %v10118_v55 = vld [vmem:[#allocation3 + $0x63] sm:$0xff]  ;;  %v10119_v52 = vld [vmem:[#allocation3 + $0x6b] sm:$0xff] }
 0x475   : > { %v14833_v40 = vpop.f32.mrf.mxu0  ;;  %15134 = vmatmul.mubr.msk.f32.gmra.mxu0 %vm934_vm3, %v10116_v47 }
 0x476   : > { %v14910_v14 = vpop.f32.mrf.mxu1  ;;  %15211 = vmatmul.mubr.msk.f32.gmra.mxu1 %vm934_vm3, %v10686_v12  ;;  %v18250_v49 = vadd.f32 %v8702_v28, %v8357_v42  ;;  %v8360_v0 = vadd.f32 %v14833_v40, %v17996_v62  ;;  %15136 = vmatprep.mubr.msk.f32.mxu0 %vm934_vm3, %v10117_v3  ;;  %v10689_v62 = vld [vmem:[#allocation3 + $0x6c] sm:$0xff]  ;;  %v10690_v3 = vld [vmem:[#allocation3 + $0x74] sm:$0xff] }
 0x477   : > { %15213 = vmatprep.mubr.msk.f32.mxu1 %vm934_vm3, %v10687_v30  ;;  %v8142_v23 = vpop.f32.mrf.mxu0 }
 0x478   : > { %v8712_v60 = vpop.f32.mrf.mxu1  ;;  %v18255_v63 = vadd.f32 %v14910_v14, %v8360_v0  ;;  %v8359_v13 = vadd.f32 %v8142_v23, %v18001_v39  ;;  %v10120_v14 = vld [vmem:[#allocation3 + $0x73] sm:$0xff]  ;;  %v10121_v23 = vld [vmem:[#allocation3 + $0x7b] sm:$0xff] }
 0x479   : > { %v14836_v38 = vpop.f32.mrf.mxu0  ;;  %15137 = vmatmul.mubr.msk.f32.gmra.mxu0 %vm934_vm3, %v10118_v55 }
 0x47a   : > { %v14913_v26 = vpop.f32.mrf.mxu1  ;;  %15214 = vmatmul.mubr.msk.f32.gmra.mxu1 %vm934_vm3, %v10688_v1  ;;  %v18260_v28 = vadd.f32 %v8712_v60, %v8359_v13  ;;  %v8362_v42 = vadd.f32 %v14836_v38, %v18006_v34  ;;  %15139 = vmatprep.mubr.msk.f32.mxu0 %vm934_vm3, %v10119_v52  ;;  %v10691_v34 = vld [vmem:[#allocation3 + $0x7c] sm:$0xff]  ;;  %v10692_v52 = vld [vmem:[#allocation3 + $0x84] sm:$0xff] }
 0x47b   : > { %15216 = vmatprep.mubr.msk.f32.mxu1 %vm934_vm3, %v10689_v62  ;;  %v8152_v47 = vpop.f32.mrf.mxu0 }
 0x47c   : > { %v8722_v39 = vpop.f32.mrf.mxu1  ;;  %v18265_v12 = vadd.f32 %v14913_v26, %v8362_v42  ;;  %v8361_v40 = vadd.f32 %v8152_v47, %v18011_v7  ;;  %v10122_v26 = vld [vmem:[#allocation3 + $0x83] sm:$0xff]  ;;  %v10123_v47 = vld [vmem:[#allocation3 + $0x8b] sm:$0xff] }
 0x47d   : > { %v14839_v30 = vpop.f32.mrf.mxu0  ;;  %15140 = vmatmul.mubr.msk.f32.gmra.mxu0 %vm934_vm3, %v10120_v14 }
 0x47e   : > { %v14916_v0 = vpop.f32.mrf.mxu1  ;;  %15217 = vmatmul.mubr.msk.f32.gmra.mxu1 %vm934_vm3, %v10690_v3  ;;  %v18270_v60 = vadd.f32 %v8722_v39, %v8361_v40  ;;  %v8364_v13 = vadd.f32 %v14839_v30, %v18016_v46  ;;  %15142 = vmatprep.mubr.msk.f32.mxu0 %vm934_vm3, %v10121_v23  ;;  %v10693_v46 = vld [vmem:[#allocation3 + $0x8c] sm:$0xff]  ;;  %v10694_v23 = vld [vmem:[#allocation3 + $0x94] sm:$0xff] }
 0x47f   : > { %15219 = vmatprep.mubr.msk.f32.mxu1 %vm934_vm3, %v10691_v34  ;;  %v8162_v55 = vpop.f32.mrf.mxu0 }
 0x480   : > { %v8732_v7 = vpop.f32.mrf.mxu1  ;;  %v18275_v1 = vadd.f32 %v14916_v0, %v8364_v13  ;;  %v8363_v38 = vadd.f32 %v8162_v55, %v18021_v37  ;;  %v10124_v0 = vld [vmem:[#allocation3 + $0x93] sm:$0xff]  ;;  %v10125_v55 = vld [vmem:[#allocation3 + $0x9b] sm:$0xff] }
 0x481   : > { %v14842_v62 = vpop.f32.mrf.mxu0  ;;  %15143 = vmatmul.mubr.msk.f32.gmra.mxu0 %vm934_vm3, %v10122_v26 }
 0x482   : > { %v14919_v42 = vpop.f32.mrf.mxu1  ;;  %15220 = vmatmul.mubr.msk.f32.gmra.mxu1 %vm934_vm3, %v10692_v52  ;;  %v18280_v39 = vadd.f32 %v8732_v7, %v8363_v38  ;;  %v8366_v40 = vadd.f32 %v14842_v62, %v18026_v41  ;;  %15145 = vmatprep.mubr.msk.f32.mxu0 %vm934_vm3, %v10123_v47  ;;  %v10695_v41 = vld [vmem:[#allocation3 + $0x9c] sm:$0xff]  ;;  %v10696_v47 = vld [vmem:[#allocation3 + $0xa4] sm:$0xff] }
 0x483   : > { %15222 = vmatprep.mubr.msk.f32.mxu1 %vm934_vm3, %v10693_v46  ;;  %v8172_v14 = vpop.f32.mrf.mxu0 }
 0x484   : > { %v8742_v37 = vpop.f32.mrf.mxu1  ;;  %v18285_v3 = vadd.f32 %v14919_v42, %v8366_v40  ;;  %v8365_v30 = vadd.f32 %v8172_v14, %v18031_v22  ;;  %v10126_v42 = vld [vmem:[#allocation3 + $0xa3] sm:$0xff]  ;;  %v10127_v14 = vld [vmem:[#allocation3 + $0xab] sm:$0xff] }
 0x485   : > { %v14845_v34 = vpop.f32.mrf.mxu0  ;;  %15146 = vmatmul.mubr.msk.f32.gmra.mxu0 %vm934_vm3, %v10124_v0 }
 0x486   : > { %v14922_v13 = vpop.f32.mrf.mxu1  ;;  %15223 = vmatmul.mubr.msk.f32.gmra.mxu1 %vm934_vm3, %v10694_v23  ;;  %v18290_v7 = vadd.f32 %v8742_v37, %v8365_v30  ;;  %v8368_v38 = vadd.f32 %v14845_v34, %v18036_v48  ;;  %15148 = vmatprep.mubr.msk.f32.mxu0 %vm934_vm3, %v10125_v55  ;;  %v10697_v48 = vld [vmem:[#allocation3 + $0xac] sm:$0xff]  ;;  %v10698_v55 = vld [vmem:[#allocation3 + $0xb4] sm:$0xff] }
 0x487   : > { %15225 = vmatprep.mubr.msk.f32.mxu1 %vm934_vm3, %v10695_v41  ;;  %v8182_v26 = vpop.f32.mrf.mxu0 }
 0x488   : > { %v8752_v22 = vpop.f32.mrf.mxu1  ;;  %v18295_v52 = vadd.f32 %v14922_v13, %v8368_v38  ;;  %v8367_v62 = vadd.f32 %v8182_v26, %v18041_v45  ;;  %v10128_v13 = vld [vmem:[#allocation3 + $0xb3] sm:$0xff]  ;;  %v10129_v26 = vld [vmem:[#allocation3 + $0xbb] sm:$0xff] }
 0x489   : > { %v14848_v46 = vpop.f32.mrf.mxu0  ;;  %15149 = vmatmul.mubr.msk.f32.gmra.mxu0 %vm934_vm3, %v10126_v42 }
 0x48a   : > { %v14925_v40 = vpop.f32.mrf.mxu1  ;;  %15226 = vmatmul.mubr.msk.f32.gmra.mxu1 %vm934_vm3, %v10696_v47  ;;  %v18300_v37 = vadd.f32 %v8752_v22, %v8367_v62  ;;  %v8370_v30 = vadd.f32 %v14848_v46, %v18046_v16  ;;  %15151 = vmatprep.mubr.msk.f32.mxu0 %vm934_vm3, %v10127_v14  ;;  %v10699_v16 = vld [vmem:[#allocation3 + $0xbc] sm:$0xff]  ;;  %v10700_v14 = vld [vmem:[#allocation3 + $0xc4] sm:$0xff] }
 0x48b   : > { %15228 = vmatprep.mubr.msk.f32.mxu1 %vm934_vm3, %v10697_v48  ;;  %v8192_v0 = vpop.f32.mrf.mxu0 }
 0x48c   : > { %v8762_v45 = vpop.f32.mrf.mxu1  ;;  %v18305_v23 = vadd.f32 %v14925_v40, %v8370_v30  ;;  %v8369_v34 = vadd.f32 %v8192_v0, %v18051_v53  ;;  %v10130_v40 = vld [vmem:[#allocation3 + $0xc3] sm:$0xff]  ;;  %v10131_v0 = vld [vmem:[#allocation3 + $0xcb] sm:$0xff] }
 0x48d   : > { %v14851_v41 = vpop.f32.mrf.mxu0  ;;  %15152 = vmatmul.mubr.msk.f32.gmra.mxu0 %vm934_vm3, %v10128_v13 }
 0x48e   : > { %v14928_v38 = vpop.f32.mrf.mxu1  ;;  %15229 = vmatmul.mubr.msk.f32.gmra.mxu1 %vm934_vm3, %v10698_v55  ;;  %v18310_v22 = vadd.f32 %v8762_v45, %v8369_v34  ;;  %v8372_v62 = vadd.f32 %v14851_v41, %v18056_v31  ;;  %15154 = vmatprep.mubr.msk.f32.mxu0 %vm934_vm3, %v10129_v26  ;;  %v10701_v31 = vld [vmem:[#allocation3 + $0xcc] sm:$0xff]  ;;  %v10702_v26 = vld [vmem:[#allocation3 + $0xd4] sm:$0xff] }
 0x48f   : > { %15231 = vmatprep.mubr.msk.f32.mxu1 %vm934_vm3, %v10699_v16  ;;  %v8202_v42 = vpop.f32.mrf.mxu0 }
 0x490   : > { %v8772_v53 = vpop.f32.mrf.mxu1  ;;  %v18315_v47 = vadd.f32 %v14928_v38, %v8372_v62  ;;  %v8371_v46 = vadd.f32 %v8202_v42, %v18061_v36  ;;  %v10132_v38 = vld [vmem:[#allocation3 + $0xd3] sm:$0xff]  ;;  %v10133_v42 = vld [vmem:[#allocation3 + $0xdb] sm:$0xff] }
 0x491   : > { %v14854_v48 = vpop.f32.mrf.mxu0  ;;  %15155 = vmatmul.mubr.msk.f32.gmra.mxu0 %vm934_vm3, %v10130_v40 }
 0x492   : > { %v14931_v30 = vpop.f32.mrf.mxu1  ;;  %15232 = vmatmul.mubr.msk.f32.gmra.mxu1 %vm934_vm3, %v10700_v14  ;;  %v18320_v45 = vadd.f32 %v8772_v53, %v8371_v46  ;;  %v8374_v34 = vadd.f32 %v14854_v48, %v18066_v50  ;;  %15157 = vmatprep.mubr.msk.f32.mxu0 %vm934_vm3, %v10131_v0  ;;  %v10703_v50 = vld [vmem:[#allocation3 + $0xdc] sm:$0xff]  ;;  %v10704_v0 = vld [vmem:[#allocation3 + $0xe4] sm:$0xff] }
 0x493   : > { %15234 = vmatprep.mubr.msk.f32.mxu1 %vm934_vm3, %v10701_v31  ;;  %v8212_v13 = vpop.f32.mrf.mxu0 }
 0x494   : > { %v8782_v36 = vpop.f32.mrf.mxu1  ;;  %v18325_v55 = vadd.f32 %v14931_v30, %v8374_v34  ;;  %v8373_v41 = vadd.f32 %v8212_v13, %v18071_v25  ;;  %v10134_v30 = vld [vmem:[#allocation3 + $0xe3] sm:$0xff]  ;;  %v10135_v13 = vld [vmem:[#allocation3 + $0xeb] sm:$0xff] }
 0x495   : > { %v14857_v16 = vpop.f32.mrf.mxu0  ;;  %15158 = vmatmul.mubr.msk.f32.gmra.mxu0 %vm934_vm3, %v10132_v38 }
 0x496   : > { %v14934_v62 = vpop.f32.mrf.mxu1  ;;  %15235 = vmatmul.mubr.msk.f32.gmra.mxu1 %vm934_vm3, %v10702_v26  ;;  %v18330_v53 = vadd.f32 %v8782_v36, %v8373_v41  ;;  %v8376_v46 = vadd.f32 %v14857_v16, %v18076_v19  ;;  %15160 = vmatprep.mubr.msk.f32.mxu0 %vm934_vm3, %v10133_v42  ;;  %v10705_v19 = vld [vmem:[#allocation3 + $0xec] sm:$0xff]  ;;  %v10706_v42 = vld [vmem:[#allocation3 + $0xf4] sm:$0xff] }
 0x497   : > { %15237 = vmatprep.mubr.msk.f32.mxu1 %vm934_vm3, %v10703_v50  ;;  %v8222_v40 = vpop.f32.mrf.mxu0 }
 0x498   : > { %v8792_v25 = vpop.f32.mrf.mxu1  ;;  %v18335_v14 = vadd.f32 %v14934_v62, %v8376_v46  ;;  %v8375_v48 = vadd.f32 %v8222_v40, %v18081_v58  ;;  %v10136_v62 = vld [vmem:[#allocation3 + $0xf3] sm:$0xff]  ;;  %v10137_v40 = vld [vmem:[#allocation3 + $0xfb] sm:$0xff] }
 0x499   : > { %v14860_v31 = vpop.f32.mrf.mxu0  ;;  %15161 = vmatmul.mubr.msk.f32.gmra.mxu0 %vm934_vm3, %v10134_v30 }
 0x49a   : > { %v14937_v34 = vpop.f32.mrf.mxu1  ;;  %15238 = vmatmul.mubr.msk.f32.gmra.mxu1 %vm934_vm3, %v10704_v0  ;;  %v18340_v36 = vadd.f32 %v8792_v25, %v8375_v48  ;;  %v8378_v41 = vadd.f32 %v14860_v31, %v18086_v11  ;;  %15163 = vmatprep.mubr.msk.f32.mxu0 %vm934_vm3, %v10135_v13  ;;  %v10707_v11 = vld [vmem:[#allocation3 + $0xfc] sm:$0xff]  ;;  %v10708_v13 = vld [vmem:[#allocation3 + $0x104] sm:$0xff] }
 0x49b   : > { %15240 = vmatprep.mubr.msk.f32.mxu1 %vm934_vm3, %v10705_v19  ;;  %v8232_v38 = vpop.f32.mrf.mxu0 }
 0x49c   : > { %v8802_v58 = vpop.f32.mrf.mxu1  ;;  %v18345_v26 = vadd.f32 %v14937_v34, %v8378_v41  ;;  %v8377_v16 = vadd.f32 %v8232_v38, %v18091_v20  ;;  %v10138_v34 = vld [vmem:[#allocation3 + $0x103] sm:$0xff]  ;;  %v10139_v38 = vld [vmem:[#allocation3 + $0x10b] sm:$0xff] }
 0x49d   : > { %v14863_v50 = vpop.f32.mrf.mxu0  ;;  %15164 = vmatmul.mubr.msk.f32.gmra.mxu0 %vm934_vm3, %v10136_v62 }
 0x49e   : > { %v14940_v46 = vpop.f32.mrf.mxu1  ;;  %15241 = vmatmul.mubr.msk.f32.gmra.mxu1 %vm934_vm3, %v10706_v42  ;;  %v18350_v25 = vadd.f32 %v8802_v58, %v8377_v16  ;;  %v8380_v48 = vadd.f32 %v14863_v50, %v18096_v44  ;;  %15166 = vmatprep.mubr.msk.f32.mxu0 %vm934_vm3, %v10137_v40  ;;  %v10709_v44 = vld [vmem:[#allocation3 + $0x10c] sm:$0xff]  ;;  %v10710_v40 = vld [vmem:[#allocation3 + $0x114] sm:$0xff] }
 0x49f   : > { %15243 = vmatprep.mubr.msk.f32.mxu1 %vm934_vm3, %v10707_v11  ;;  %v8242_v30 = vpop.f32.mrf.mxu0 }
 0x4a0   : > { %v8812_v20 = vpop.f32.mrf.mxu1  ;;  %v18355_v0 = vadd.f32 %v14940_v46, %v8380_v48  ;;  %v8379_v31 = vadd.f32 %v8242_v30, %v18101_v59  ;;  %v10140_v46 = vld [vmem:[#allocation3 + $0x113] sm:$0xff]  ;;  %v10141_v30 = vld [vmem:[#allocation3 + $0x11b] sm:$0xff] }
 0x4a1   : > { %v14866_v19 = vpop.f32.mrf.mxu0  ;;  %15167 = vmatmul.mubr.msk.f32.gmra.mxu0 %vm934_vm3, %v10138_v34 }
 0x4a2   : > { %v14943_v41 = vpop.f32.mrf.mxu1  ;;  %15244 = vmatmul.mubr.msk.f32.gmra.mxu1 %vm934_vm3, %v10708_v13  ;;  %v18360_v58 = vadd.f32 %v8812_v20, %v8379_v31  ;;  %v8382_v16 = vadd.f32 %v14866_v19, %v18106_v61  ;;  %15169 = vmatprep.mubr.msk.f32.mxu0 %vm934_vm3, %v10139_v38  ;;  %v10711_v61 = vld [vmem:[#allocation3 + $0x11c] sm:$0xff]  ;;  %v10712_v38 = vld [vmem:[#allocation3 + $0x124] sm:$0xff] }
 0x4a3   : > { %15246 = vmatprep.mubr.msk.f32.mxu1 %vm934_vm3, %v10709_v44  ;;  %v8252_v62 = vpop.f32.mrf.mxu0 }
 0x4a4   : > { %v8822_v59 = vpop.f32.mrf.mxu1  ;;  %v18365_v42 = vadd.f32 %v14943_v41, %v8382_v16  ;;  %v8381_v50 = vadd.f32 %v8252_v62, %v18111_v32  ;;  %v10142_v41 = vld [vmem:[#allocation3 + $0x123] sm:$0xff]  ;;  %v10143_v62 = vld [vmem:[#allocation3 + $0x12b] sm:$0xff] }
 0x4a5   : > { %v14869_v11 = vpop.f32.mrf.mxu0  ;;  %15170 = vmatmul.mubr.msk.f32.gmra.mxu0 %vm934_vm3, %v10140_v46 }
 0x4a6   : > { %v14946_v48 = vpop.f32.mrf.mxu1  ;;  %15247 = vmatmul.mubr.msk.f32.gmra.mxu1 %vm934_vm3, %v10710_v40  ;;  %v18370_v20 = vadd.f32 %v8822_v59, %v8381_v50  ;;  %v8384_v31 = vadd.f32 %v14869_v11, %v18121_v4  ;;  %15172 = vmatprep.mubr.msk.f32.mxu0 %vm934_vm3, %v10141_v30  ;;  %v10713_v4 = vld [vmem:[#allocation3 + $0x12c] sm:$0xff]  ;;  %v10714_v30 = vld [vmem:[#allocation3 + $0x134] sm:$0xff] }
 0x4a7   : > { %15249 = vmatprep.mubr.msk.f32.mxu1 %vm934_vm3, %v10711_v61  ;;  %v8262_v34 = vpop.f32.mrf.mxu0 }
 0x4a8   : > { %v8832_v32 = vpop.f32.mrf.mxu1  ;;  %v18375_v13 = vadd.f32 %v14946_v48, %v8384_v31  ;;  %v8383_v19 = vadd.f32 %v8262_v34, %v18126_v43  ;;  %v10144_v48 = vld [vmem:[#allocation3 + $0x133] sm:$0xff]  ;;  %v10145_v34 = vld [vmem:[#allocation3 + $0x13b] sm:$0xff] }
 0x4a9   : > { %v14872_v44 = vpop.f32.mrf.mxu0  ;;  %15173 = vmatmul.mubr.msk.f32.gmra.mxu0 %vm934_vm3, %v10142_v41 }
 0x4aa   : > { %v14949_v16 = vpop.f32.mrf.mxu1  ;;  %15250 = vmatmul.mubr.msk.f32.gmra.mxu1 %vm934_vm3, %v10712_v38  ;;  %v18380_v59 = vadd.f32 %v8832_v32, %v8383_v19  ;;  %v8386_v50 = vadd.f32 %v14872_v44, %v18131_v5  ;;  %15175 = vmatprep.mubr.msk.f32.mxu0 %vm934_vm3, %v10143_v62  ;;  %v10715_v5 = vld [vmem:[#allocation3 + $0x13c] sm:$0xff]  ;;  %v10716_v62 = vld [vmem:[#allocation3 + $0x144] sm:$0xff] }
 0x4ab   : > { %15252 = vmatprep.mubr.msk.f32.mxu1 %vm934_vm3, %v10713_v4  ;;  %v8272_v46 = vpop.f32.mrf.mxu0 }
 0x4ac   : > { %v8842_v43 = vpop.f32.mrf.mxu1  ;;  %v18385_v40 = vadd.f32 %v14949_v16, %v8386_v50  ;;  %v8385_v11 = vadd.f32 %v8272_v46, %v18136_v2  ;;  %v10146_v16 = vld [vmem:[#allocation3 + $0x143] sm:$0xff]  ;;  %v10147_v46 = vld [vmem:[#allocation3 + $0x14b] sm:$0xff] }
 0x4ad   : > { %v14875_v61 = vpop.f32.mrf.mxu0  ;;  %15176 = vmatmul.mubr.msk.f32.gmra.mxu0 %vm934_vm3, %v10144_v48 }
 0x4ae   : > { %v14952_v31 = vpop.f32.mrf.mxu1  ;;  %15253 = vmatmul.mubr.msk.f32.gmra.mxu1 %vm934_vm3, %v10714_v30  ;;  %v18390_v32 = vadd.f32 %v8842_v43, %v8385_v11  ;;  %v8388_v19 = vadd.f32 %v14875_v61, %v18141_v18  ;;  %15178 = vmatprep.mubr.msk.f32.mxu0 %vm934_vm3, %v10145_v34  ;;  %v10717_v18 = vld [vmem:[#allocation3 + $0x14c] sm:$0xff]  ;;  %v10718_v34 = vld [vmem:[#allocation3 + $0x154] sm:$0xff] }
 0x4af   : > { %15255 = vmatprep.mubr.msk.f32.mxu1 %vm934_vm3, %v10715_v5  ;;  %v8282_v41 = vpop.f32.mrf.mxu0 }
 0x4b0   : > { %v8852_v2 = vpop.f32.mrf.mxu1  ;;  %v18395_v38 = vadd.f32 %v14952_v31, %v8388_v19  ;;  %v8387_v44 = vadd.f32 %v8282_v41, %v18146_v9  ;;  %v10148_v31 = vld [vmem:[#allocation3 + $0x153] sm:$0xff]  ;;  %v10149_v41 = vld [vmem:[#allocation3 + $0x15b] sm:$0xff] }
 0x4b1   : > { %v14878_v4 = vpop.f32.mrf.mxu0  ;;  %15179 = vmatmul.mubr.msk.f32.gmra.mxu0 %vm934_vm3, %v10146_v16 }
 0x4b2   : > { %v14955_v50 = vpop.f32.mrf.mxu1  ;;  %15256 = vmatmul.mubr.msk.f32.gmra.mxu1 %vm934_vm3, %v10716_v62  ;;  %v18400_v43 = vadd.f32 %v8852_v2, %v8387_v44  ;;  %v8390_v11 = vadd.f32 %v14878_v4, %v18151_v33  ;;  %15181 = vmatprep.mubr.msk.f32.mxu0 %vm934_vm3, %v10147_v46  ;;  %v10719_v33 = vld [vmem:[#allocation3 + $0x15c] sm:$0xff]  ;;  %v10720_v46 = vld [vmem:[#allocation3 + $0x164] sm:$0xff] }
 0x4b3   : > { %15258 = vmatprep.mubr.msk.f32.mxu1 %vm934_vm3, %v10717_v18  ;;  %v8292_v48 = vpop.f32.mrf.mxu0 }
 0x4b4   : > { %v8862_v9 = vpop.f32.mrf.mxu1  ;;  %v18405_v30 = vadd.f32 %v14955_v50, %v8390_v11  ;;  %v8389_v61 = vadd.f32 %v8292_v48, %v18156_v51  ;;  %v10150_v50 = vld [vmem:[#allocation3 + $0x163] sm:$0xff]  ;;  %v10151_v48 = vld [vmem:[#allocation3 + $0x16b] sm:$0xff] }
 0x4b5   : > { %v14881_v5 = vpop.f32.mrf.mxu0  ;;  %15182 = vmatmul.mubr.msk.f32.gmra.mxu0 %vm934_vm3, %v10148_v31 }
 0x4b6   : > { %v14958_v19 = vpop.f32.mrf.mxu1  ;;  %15259 = vmatmul.mubr.msk.f32.gmra.mxu1 %vm934_vm3, %v10718_v34  ;;  %v18410_v2 = vadd.f32 %v8862_v9, %v8389_v61  ;;  %v8392_v44 = vadd.f32 %v14881_v5, %v18161_v10  ;;  %15184 = vmatprep.mubr.msk.f32.mxu0 %vm934_vm3, %v10149_v41  ;;  %v10721_v10 = vld [vmem:[#allocation3 + $0x16c] sm:$0xff]  ;;  %v10722_v41 = vld [vmem:[#allocation3 + $0x174] sm:$0xff] }
 0x4b7   : > { %15261 = vmatprep.mubr.msk.f32.mxu1 %vm934_vm3, %v10719_v33  ;;  %v8302_v16 = vpop.f32.mrf.mxu0 }
 0x4b8   : > { %v8872_v51 = vpop.f32.mrf.mxu1  ;;  %v18415_v62 = vadd.f32 %v14958_v19, %v8392_v44  ;;  %v8391_v4 = vadd.f32 %v8302_v16, %v18166_v17  ;;  %v10152_v19 = vld [vmem:[#allocation3 + $0x173] sm:$0xff]  ;;  %v10153_v16 = vld [vmem:[#allocation3 + $0x17b] sm:$0xff] }
 0x4b9   : > { %v14884_v18 = vpop.f32.mrf.mxu0  ;;  %15185 = vmatmul.mubr.msk.f32.gmra.mxu0 %vm934_vm3, %v10150_v50 }
 0x4ba   : > { %v14961_v11 = vpop.f32.mrf.mxu1  ;;  %15262 = vmatmul.mubr.msk.f32.gmra.mxu1 %vm934_vm3, %v10720_v46  ;;  %v18420_v9 = vadd.f32 %v8872_v51, %v8391_v4  ;;  %v8394_v61 = vadd.f32 %v14884_v18, %v18171_v54  ;;  %15187 = vmatprep.mubr.msk.f32.mxu0 %vm934_vm3, %v10151_v48  ;;  %v10723_v54 = vld [vmem:[#allocation3 + $0x17c] sm:$0xff] }
 0x4bb   : > { %15264 = vmatprep.mubr.msk.f32.mxu1 %vm934_vm3, %v10721_v10  ;;  %v8312_v31 = vpop.f32.mrf.mxu0  ;;  %v19418_v4 = vld [vmem:[#allocation7_spill] sm:$0xff]  ;;  %v10154_v10 = vld [vmem:[#allocation3 + $0x183] sm:$0xff] }
 0x4bc   : > { %v8882_v17 = vpop.f32.mrf.mxu1  ;;  %v18425_v34 = vadd.f32 %v14961_v11, %v8394_v61  ;;  %v8393_v5 = vadd.f32 %v8312_v31, %v18176_v35  ;;  %v19420_v11 = vld [vmem:[#allocation5_spill] sm:$0xff] }
 0x4bd   : > { %v14887_v33 = vpop.f32.mrf.mxu0  ;;  %15188 = vmatmul.mubr.msk.f32.gmra.mxu0 %vm934_vm3, %v10152_v19  ;;  %v10724_v61 = vld [vmem:[#allocation3 + $0x184] sm:$0xff] }
 0x4be   : > { %v14964_v44 = vpop.f32.mrf.mxu1  ;;  %15265 = vmatmul.mubr.msk.f32.gmra.mxu1 %vm934_vm3, %v10722_v41  ;;  %v18430_v51 = vadd.f32 %v8882_v17, %v8393_v5  ;;  %v8396_v50 = vadd.f32 %v14887_v33, %v19418_v4  ;;  %15190 = vmatprep.mubr.msk.f32.mxu0 %vm934_vm3, %v10153_v16  ;;  %v10155_v17 = vld [vmem:[#allocation3 + $0x18b] sm:$0xff] }
 0x4bf   : > { %15267 = vmatprep.mubr.msk.f32.mxu1 %vm934_vm3, %v10723_v54  ;;  %v8322_v46 = vpop.f32.mrf.mxu0  ;;  %v10725_v5 = vld [vmem:[#allocation3 + $0x18c] sm:$0xff] }
 0x4c0   : > { %v8892_v35 = vpop.f32.mrf.mxu1  ;;  %v18435_v18 = vadd.f32 %v14964_v44, %v8396_v50  ;;  %v8395_v48 = vadd.f32 %v8322_v46, %v19420_v11  ;;  %v19422_v33 = vld [vmem:[#allocation6_spill] sm:$0xff] }
 0x4c1   : > { %v14890_v31 = vpop.f32.mrf.mxu0  ;;  %15191 = vmatmul.mubr.msk.f32.gmra.mxu0 %vm934_vm3, %v10154_v10  ;;  %v10156_v46 = vld [vmem:[#allocation3 + $0x193] sm:$0xff] }
 0x4c2   : > { %19419 = vst [vmem:[#allocation8_spill] sm:$0xff] %v18435_v18  ;;  %v14967_v19 = vpop.f32.mrf.mxu1  ;;  %15268 = vmatmul.mubr.msk.f32.gmra.mxu1 %vm934_vm3, %v10724_v61  ;;  %v18440_v41 = vadd.f32 %v8892_v35, %v8395_v48  ;;  %v8398_v16 = vadd.f32 %v14890_v31, %v19422_v33  ;;  %15193 = vmatprep.mubr.msk.f32.mxu0 %vm934_vm3, %v10155_v17  ;;  %v10726_v11 = vld [vmem:[#allocation3 + $0x194] sm:$0xff]  ;;  %v10727_v48 = vld [vmem:[#allocation3 + $0x19c] sm:$0xff]  ;;  %v10159_v33 = vld [vmem:[#allocation3 + $0x1ab] sm:$0xff] }
 0x4c3   : > { %15270 = vmatprep.mubr.msk.f32.mxu1 %vm934_vm3, %v10725_v5  ;;  %v8332_v44 = vpop.f32.mrf.mxu0  ;;  %v10157_v35 = vld [vmem:[#allocation3 + $0x19b] sm:$0xff] }
 0x4c4   : > { %19421 = vst [vmem:[#allocation64_spill] sm:$0xff] %v18440_v41  ;;  %v8902_v54 = vpop.f32.mrf.mxu1  ;;  %v18445_v4 = vadd.f32 %v14967_v19, %v8398_v16  ;;  %v8397_v50 = vadd.f32 %v8332_v44, %v18198_v8  ;;  %v19424_v17 = vld [vmem:[#allocation4_spill] sm:$0xff]  ;;  %v10729_v16 = vld [vmem:[#allocation3 + $0x1ac] sm:$0xff] }
 0x4c5   : > { %v14893_v10 = vpop.f32.mrf.mxu0  ;;  %15194 = vmatmul.mubr.msk.f32.gmra.mxu0 %vm934_vm3, %v10156_v46 }
 0x4c6   : > { %19423 = vst [vmem:[#allocation9_spill] sm:$0xff] %v18445_v4  ;;  %v14970_v61 = vpop.f32.mrf.mxu1  ;;  %15271 = vmatmul.mubr.msk.f32.gmra.mxu1 %vm934_vm3, %v10726_v11  ;;  %v18450_v31 = vadd.f32 %v8902_v54, %v8397_v50  ;;  %v8400_v5 = vadd.f32 %v14893_v10, %v19424_v17  ;;  %15196 = vmatprep.mubr.msk.f32.mxu0 %vm934_vm3, %v10157_v35  ;;  %v10158_v4 = vld [vmem:[#allocation3 + $0x1a3] sm:$0xff]  ;;  %v10160_v10 = vld [vmem:[#allocation3 + $0x1b3] sm:$0xff] }
 0x4c7   : > { %15273 = vmatprep.mubr.msk.f32.mxu1 %vm934_vm3, %v10727_v48  ;;  %v8342_v19 = vpop.f32.mrf.mxu0  ;;  %v10728_v11 = vld [vmem:[#allocation3 + $0x1a4] sm:$0xff] }
 0x4c8   : > { %v8912_v8 = vpop.f32.mrf.mxu1  ;;  %v18455_v44 = vadd.f32 %v14970_v61, %v8400_v5  ;;  %v8399_v46 = vadd.f32 %v8342_v19, %v18209_v6  ;;  %v10730_v61 = vld [vmem:[#allocation3 + $0x1b4] sm:$0xff] }
 0x4c9   : > { %v14975_v41 = vpop.f32.mrf.mxu0  ;;  %15197 = vmatmul.mubr.msk.f32.gmra.mxu0 %vm934_vm3, %v10158_v4  ;;  %v11251_v19 = vld [vmem:[#allocation3 + $0x2d] sm:$0xff] }
 0x4ca   : > { %v15052_v18 = vpop.f32.mrf.mxu1  ;;  %15274 = vmatmul.mubr.msk.f32.gmra.mxu1 %vm934_vm3, %v10728_v11  ;;  %v18460_v54 = vadd.f32 %v8912_v8, %v8399_v46  ;;  %v9492_v50 = vadd.f32 %v14975_v41, %v18214_v21  ;;  %15199 = vmatprep.mubr.msk.f32.mxu0 %vm934_vm3, %v10159_v33 }
 0x4cb   : > { %15276 = vmatprep.mubr.msk.f32.mxu1 %vm934_vm3, %v10729_v16  ;;  %v9242_v35 = vpop.f32.mrf.mxu0 }
 0x4cc   : > { %v9812_v6 = vpop.f32.mrf.mxu1  ;;  %v18465_v48 = vadd.f32 %v15052_v18, %v9492_v50  ;;  %v9491_v17 = vadd.f32 %v9242_v35, %v18218_v15  ;;  %v11252_v15 = vld [vmem:[#allocation3 + $0x35] sm:$0xff]  ;;  %v11253_v50 = vld [vmem:[#allocation3 + $0x3d] sm:$0xff] }
 0x4cd   : > { %v14978_v5 = vpop.f32.mrf.mxu0  ;;  %15200 = vmatmul.mubr.msk.f32.gmra.mxu0 %vm934_vm3, %v10160_v10 }
 0x4ce   : > { %v15055_v4 = vpop.f32.mrf.mxu1  ;;  %15277 = vmatmul.mubr.msk.f32.gmra.mxu1 %vm934_vm3, %v10730_v61  ;;  %v18470_v21 = vadd.f32 %v9812_v6, %v9491_v17  ;;  %v9494_v41 = vadd.f32 %v14978_v5, %v18223_v27  ;;  %15281 = vmatprep.mubr.msk.f32.mxu0 %vm934_vm3, %v11251_v19  ;;  %v11254_v5 = vld [vmem:[#allocation3 + $0x45] sm:$0xff]  ;;  %v11255_v19 = vld [vmem:[#allocation3 + $0x4d] sm:$0xff] }
 0x4cf   : > { %v9252_v8 = vpop.f32.mrf.mxu0 }
 0x4d0   : > { %v9822_v33 = vpop.f32.mrf.mxu1  ;;  %v18474_v16 = vadd.f32 %v15055_v4, %v9494_v41  ;;  %v9493_v18 = vadd.f32 %v9252_v8, %v18228_v56 }
 0x4d1   : > { %v14981_v46 = vpop.f32.mrf.mxu0  ;;  %15282 = vmatmul.mubr.msk.f32.vlgmr.msra.gmra.mxu0 %vm934_vm3, %v11252_v15 }
 0x4d2   : > { %v15058_v11 = vpop.f32.mrf.mxu1  ;;  %v18478_v10 = vadd.f32 %v9822_v33, %v9493_v18  ;;  %v9496_v61 = vadd.f32 %v14981_v46, %v18235_v57  ;;  %15284 = vmatprep.mubr.msk.f32.mxu0 %vm934_vm3, %v11253_v50  ;;  %v11256_v46 = vld [vmem:[#allocation3 + $0x55] sm:$0xff]  ;;  %v11257_v50 = vld [vmem:[#allocation3 + $0x5d] sm:$0xff] }
 0x4d3   : > { %v9262_v27 = vpop.f32.mrf.mxu0 }
 0x4d4   : > { %v9832_v35 = vpop.f32.mrf.mxu1  ;;  %v18482_v6 = vadd.f32 %v15058_v11, %v9496_v61  ;;  %v9495_v17 = vadd.f32 %v9262_v27, %v18240_v24 }
 0x4d5   : > { %v14984_v56 = vpop.f32.mrf.mxu0  ;;  %15285 = vmatmul.mubr.msk.f32.gmra.mxu0 %vm934_vm3, %v11254_v5 }
 0x4d6   : > { %v15061_v4 = vpop.f32.mrf.mxu1  ;;  %v18486_v41 = vadd.f32 %v9832_v35, %v9495_v17  ;;  %v9498_v8 = vadd.f32 %v14984_v56, %v18245_v29  ;;  %15287 = vmatprep.mubr.msk.f32.mxu0 %vm934_vm3, %v11255_v19  ;;  %v11258_v56 = vld [vmem:[#allocation3 + $0x65] sm:$0xff]  ;;  %v11259_v19 = vld [vmem:[#allocation3 + $0x6d] sm:$0xff] }
 0x4d7   : > { %v9272_v57 = vpop.f32.mrf.mxu0 }
 0x4d8   : > { %v9842_v33 = vpop.f32.mrf.mxu1  ;;  %v18490_v18 = vadd.f32 %v15061_v4, %v9498_v8  ;;  %v9497_v15 = vadd.f32 %v9272_v57, %v18250_v49 }
 0x4d9   : > { %v14987_v24 = vpop.f32.mrf.mxu0  ;;  %15288 = vmatmul.mubr.msk.f32.gmra.mxu0 %vm934_vm3, %v11256_v46 }
 0x4da   : > { %v15064_v11 = vpop.f32.mrf.mxu1  ;;  %v18494_v61 = vadd.f32 %v9842_v33, %v9497_v15  ;;  %v9500_v27 = vadd.f32 %v14987_v24, %v18255_v63  ;;  %15290 = vmatprep.mubr.msk.f32.mxu0 %vm934_vm3, %v11257_v50  ;;  %v11260_v24 = vld [vmem:[#allocation3 + $0x75] sm:$0xff]  ;;  %v11261_v50 = vld [vmem:[#allocation3 + $0x7d] sm:$0xff] }
 0x4db   : > { %v9282_v29 = vpop.f32.mrf.mxu0 }
 0x4dc   : > { %v9852_v35 = vpop.f32.mrf.mxu1  ;;  %v18498_v17 = vadd.f32 %v15064_v11, %v9500_v27  ;;  %v9499_v5 = vadd.f32 %v9282_v29, %v18260_v28 }
 0x4dd   : > { %v14990_v49 = vpop.f32.mrf.mxu0  ;;  %15291 = vmatmul.mubr.msk.f32.gmra.mxu0 %vm934_vm3, %v11258_v56 }
 0x4de   : > { %v15067_v4 = vpop.f32.mrf.mxu1  ;;  %v18502_v8 = vadd.f32 %v9852_v35, %v9499_v5  ;;  %v9502_v57 = vadd.f32 %v14990_v49, %v18265_v12  ;;  %15293 = vmatprep.mubr.msk.f32.mxu0 %vm934_vm3, %v11259_v19  ;;  %v11262_v49 = vld [vmem:[#allocation3 + $0x85] sm:$0xff]  ;;  %v11263_v19 = vld [vmem:[#allocation3 + $0x8d] sm:$0xff] }
 0x4df   : > { %v9292_v63 = vpop.f32.mrf.mxu0 }
 0x4e0   : > { %v9862_v33 = vpop.f32.mrf.mxu1  ;;  %v18506_v15 = vadd.f32 %v15067_v4, %v9502_v57  ;;  %v9501_v46 = vadd.f32 %v9292_v63, %v18270_v60 }
 0x4e1   : > { %v14993_v28 = vpop.f32.mrf.mxu0  ;;  %15294 = vmatmul.mubr.msk.f32.gmra.mxu0 %vm934_vm3, %v11260_v24 }
 0x4e2   : > { %v15070_v11 = vpop.f32.mrf.mxu1  ;;  %v18510_v27 = vadd.f32 %v9862_v33, %v9501_v46  ;;  %v9504_v29 = vadd.f32 %v14993_v28, %v18275_v1  ;;  %15296 = vmatprep.mubr.msk.f32.mxu0 %vm934_vm3, %v11261_v50  ;;  %v11264_v28 = vld [vmem:[#allocation3 + $0x95] sm:$0xff]  ;;  %v11265_v50 = vld [vmem:[#allocation3 + $0x9d] sm:$0xff] }
 0x4e3   : > { %v9302_v12 = vpop.f32.mrf.mxu0 }
 0x4e4   : > { %v9872_v35 = vpop.f32.mrf.mxu1  ;;  %v18514_v5 = vadd.f32 %v15070_v11, %v9504_v29  ;;  %v9503_v56 = vadd.f32 %v9302_v12, %v18280_v39 }
 0x4e5   : > { %v14996_v60 = vpop.f32.mrf.mxu0  ;;  %15297 = vmatmul.mubr.msk.f32.gmra.mxu0 %vm934_vm3, %v11262_v49 }
 0x4e6   : > { %v15073_v4 = vpop.f32.mrf.mxu1  ;;  %v18518_v57 = vadd.f32 %v9872_v35, %v9503_v56  ;;  %v9506_v63 = vadd.f32 %v14996_v60, %v18285_v3  ;;  %15299 = vmatprep.mubr.msk.f32.mxu0 %vm934_vm3, %v11263_v19  ;;  %v11266_v60 = vld [vmem:[#allocation3 + $0xa5] sm:$0xff]  ;;  %v11267_v19 = vld [vmem:[#allocation3 + $0xad] sm:$0xff] }
 0x4e7   : > { %v9312_v1 = vpop.f32.mrf.mxu0 }
 0x4e8   : > { %v9882_v33 = vpop.f32.mrf.mxu1  ;;  %v18522_v46 = vadd.f32 %v15073_v4, %v9506_v63  ;;  %v9505_v24 = vadd.f32 %v9312_v1, %v18290_v7 }
 0x4e9   : > { %v14999_v39 = vpop.f32.mrf.mxu0  ;;  %15300 = vmatmul.mubr.msk.f32.gmra.mxu0 %vm934_vm3, %v11264_v28 }
 0x4ea   : > { %v15076_v11 = vpop.f32.mrf.mxu1  ;;  %v18526_v29 = vadd.f32 %v9882_v33, %v9505_v24  ;;  %v9508_v12 = vadd.f32 %v14999_v39, %v18295_v52  ;;  %15302 = vmatprep.mubr.msk.f32.mxu0 %vm934_vm3, %v11265_v50  ;;  %v11268_v39 = vld [vmem:[#allocation3 + $0xb5] sm:$0xff]  ;;  %v11269_v50 = vld [vmem:[#allocation3 + $0xbd] sm:$0xff] }
 0x4eb   : > { %v9322_v3 = vpop.f32.mrf.mxu0 }
 0x4ec   : > { %v9892_v35 = vpop.f32.mrf.mxu1  ;;  %v18530_v56 = vadd.f32 %v15076_v11, %v9508_v12  ;;  %v9507_v49 = vadd.f32 %v9322_v3, %v18300_v37 }
 0x4ed   : > { %v15002_v7 = vpop.f32.mrf.mxu0  ;;  %15303 = vmatmul.mubr.msk.f32.gmra.mxu0 %vm934_vm3, %v11266_v60 }
 0x4ee   : > { %v15079_v4 = vpop.f32.mrf.mxu1  ;;  %v18534_v63 = vadd.f32 %v9892_v35, %v9507_v49  ;;  %v9510_v1 = vadd.f32 %v15002_v7, %v18305_v23  ;;  %15305 = vmatprep.mubr.msk.f32.mxu0 %vm934_vm3, %v11267_v19  ;;  %v11270_v7 = vld [vmem:[#allocation3 + $0xc5] sm:$0xff]  ;;  %v11271_v19 = vld [vmem:[#allocation3 + $0xcd] sm:$0xff] }
 0x4ef   : > { %v9332_v52 = vpop.f32.mrf.mxu0 }
 0x4f0   : > { %v9902_v33 = vpop.f32.mrf.mxu1  ;;  %v18538_v24 = vadd.f32 %v15079_v4, %v9510_v1  ;;  %v9509_v28 = vadd.f32 %v9332_v52, %v18310_v22 }
 0x4f1   : > { %v15005_v37 = vpop.f32.mrf.mxu0  ;;  %15306 = vmatmul.mubr.msk.f32.gmra.mxu0 %vm934_vm3, %v11268_v39 }
 0x4f2   : > { %v15082_v11 = vpop.f32.mrf.mxu1  ;;  %v18542_v12 = vadd.f32 %v9902_v33, %v9509_v28  ;;  %v9512_v3 = vadd.f32 %v15005_v37, %v18315_v47  ;;  %15308 = vmatprep.mubr.msk.f32.mxu0 %vm934_vm3, %v11269_v50  ;;  %v11272_v37 = vld [vmem:[#allocation3 + $0xd5] sm:$0xff]  ;;  %v11273_v50 = vld [vmem:[#allocation3 + $0xdd] sm:$0xff] }
 0x4f3   : > { %v9342_v23 = vpop.f32.mrf.mxu0 }
 0x4f4   : > { %v9912_v35 = vpop.f32.mrf.mxu1  ;;  %v18546_v49 = vadd.f32 %v15082_v11, %v9512_v3  ;;  %v9511_v60 = vadd.f32 %v9342_v23, %v18320_v45 }
 0x4f5   : > { %v15008_v22 = vpop.f32.mrf.mxu0  ;;  %15309 = vmatmul.mubr.msk.f32.gmra.mxu0 %vm934_vm3, %v11270_v7 }
 0x4f6   : > { %v15085_v4 = vpop.f32.mrf.mxu1  ;;  %v18550_v1 = vadd.f32 %v9912_v35, %v9511_v60  ;;  %v9514_v52 = vadd.f32 %v15008_v22, %v18325_v55  ;;  %15311 = vmatprep.mubr.msk.f32.mxu0 %vm934_vm3, %v11271_v19  ;;  %v11274_v22 = vld [vmem:[#allocation3 + $0xe5] sm:$0xff]  ;;  %v11275_v19 = vld [vmem:[#allocation3 + $0xed] sm:$0xff] }
 0x4f7   : > { %v9352_v47 = vpop.f32.mrf.mxu0 }
 0x4f8   : > { %v9922_v33 = vpop.f32.mrf.mxu1  ;;  %v18554_v28 = vadd.f32 %v15085_v4, %v9514_v52  ;;  %v9513_v39 = vadd.f32 %v9352_v47, %v18330_v53 }
 0x4f9   : > { %v15011_v45 = vpop.f32.mrf.mxu0  ;;  %15312 = vmatmul.mubr.msk.f32.gmra.mxu0 %vm934_vm3, %v11272_v37 }
 0x4fa   : > { %v15088_v11 = vpop.f32.mrf.mxu1  ;;  %v18558_v3 = vadd.f32 %v9922_v33, %v9513_v39  ;;  %v9516_v23 = vadd.f32 %v15011_v45, %v18335_v14  ;;  %15314 = vmatprep.mubr.msk.f32.mxu0 %vm934_vm3, %v11273_v50  ;;  %v11276_v45 = vld [vmem:[#allocation3 + $0xf5] sm:$0xff]  ;;  %v11277_v50 = vld [vmem:[#allocation3 + $0xfd] sm:$0xff] }
 0x4fb   : > { %v9362_v55 = vpop.f32.mrf.mxu0 }
 0x4fc   : > { %v9932_v35 = vpop.f32.mrf.mxu1  ;;  %v18562_v60 = vadd.f32 %v15088_v11, %v9516_v23  ;;  %v9515_v7 = vadd.f32 %v9362_v55, %v18340_v36 }
 0x4fd   : > { %v15014_v53 = vpop.f32.mrf.mxu0  ;;  %15315 = vmatmul.mubr.msk.f32.gmra.mxu0 %vm934_vm3, %v11274_v22 }
 0x4fe   : > { %v15091_v4 = vpop.f32.mrf.mxu1  ;;  %v18566_v52 = vadd.f32 %v9932_v35, %v9515_v7  ;;  %v9518_v47 = vadd.f32 %v15014_v53, %v18345_v26  ;;  %15317 = vmatprep.mubr.msk.f32.mxu0 %vm934_vm3, %v11275_v19  ;;  %v11278_v53 = vld [vmem:[#allocation3 + $0x105] sm:$0xff]  ;;  %v11279_v19 = vld [vmem:[#allocation3 + $0x10d] sm:$0xff] }
 0x4ff   : > { %v9372_v14 = vpop.f32.mrf.mxu0 }
 0x500   : > { %v9942_v33 = vpop.f32.mrf.mxu1  ;;  %v18570_v39 = vadd.f32 %v15091_v4, %v9518_v47  ;;  %v9517_v37 = vadd.f32 %v9372_v14, %v18350_v25 }
 0x501   : > { %v15017_v36 = vpop.f32.mrf.mxu0  ;;  %15318 = vmatmul.mubr.msk.f32.gmra.mxu0 %vm934_vm3, %v11276_v45 }
 0x502   : > { %v15094_v11 = vpop.f32.mrf.mxu1  ;;  %v18574_v23 = vadd.f32 %v9942_v33, %v9517_v37  ;;  %v9520_v55 = vadd.f32 %v15017_v36, %v18355_v0  ;;  %15320 = vmatprep.mubr.msk.f32.mxu0 %vm934_vm3, %v11277_v50  ;;  %v11280_v36 = vld [vmem:[#allocation3 + $0x115] sm:$0xff]  ;;  %v11281_v50 = vld [vmem:[#allocation3 + $0x11d] sm:$0xff] }
 0x503   : > { %v9382_v26 = vpop.f32.mrf.mxu0 }
 0x504   : > { %v9952_v35 = vpop.f32.mrf.mxu1  ;;  %v18578_v7 = vadd.f32 %v15094_v11, %v9520_v55  ;;  %v9519_v22 = vadd.f32 %v9382_v26, %v18360_v58 }
 0x505   : > { %v15020_v25 = vpop.f32.mrf.mxu0  ;;  %15321 = vmatmul.mubr.msk.f32.gmra.mxu0 %vm934_vm3, %v11278_v53 }
 0x506   : > { %v15097_v4 = vpop.f32.mrf.mxu1  ;;  %v18582_v47 = vadd.f32 %v9952_v35, %v9519_v22  ;;  %v9522_v14 = vadd.f32 %v15020_v25, %v18365_v42  ;;  %15323 = vmatprep.mubr.msk.f32.mxu0 %vm934_vm3, %v11279_v19  ;;  %v11282_v25 = vld [vmem:[#allocation3 + $0x125] sm:$0xff]  ;;  %v11283_v19 = vld [vmem:[#allocation3 + $0x12d] sm:$0xff] }
 0x507   : > { %v9392_v0 = vpop.f32.mrf.mxu0 }
 0x508   : > { %v9962_v33 = vpop.f32.mrf.mxu1  ;;  %v18586_v37 = vadd.f32 %v15097_v4, %v9522_v14  ;;  %v9521_v45 = vadd.f32 %v9392_v0, %v18370_v20 }
 0x509   : > { %v15023_v58 = vpop.f32.mrf.mxu0  ;;  %15324 = vmatmul.mubr.msk.f32.gmra.mxu0 %vm934_vm3, %v11280_v36 }
 0x50a   : > { %v15100_v11 = vpop.f32.mrf.mxu1  ;;  %v18590_v55 = vadd.f32 %v9962_v33, %v9521_v45  ;;  %v9524_v26 = vadd.f32 %v15023_v58, %v18375_v13  ;;  %15326 = vmatprep.mubr.msk.f32.mxu0 %vm934_vm3, %v11281_v50  ;;  %v11284_v58 = vld [vmem:[#allocation3 + $0x135] sm:$0xff]  ;;  %v11285_v50 = vld [vmem:[#allocation3 + $0x13d] sm:$0xff] }
 0x50b   : > { %v9402_v42 = vpop.f32.mrf.mxu0 }
 0x50c   : > { %v9972_v35 = vpop.f32.mrf.mxu1  ;;  %v18594_v22 = vadd.f32 %v15100_v11, %v9524_v26  ;;  %v9523_v53 = vadd.f32 %v9402_v42, %v18380_v59 }
 0x50d   : > { %v15026_v20 = vpop.f32.mrf.mxu0  ;;  %15327 = vmatmul.mubr.msk.f32.gmra.mxu0 %vm934_vm3, %v11282_v25 }
 0x50e   : > { %v15103_v4 = vpop.f32.mrf.mxu1  ;;  %v18598_v14 = vadd.f32 %v9972_v35, %v9523_v53  ;;  %v9526_v0 = vadd.f32 %v15026_v20, %v18385_v40  ;;  %15329 = vmatprep.mubr.msk.f32.mxu0 %vm934_vm3, %v11283_v19  ;;  %v11286_v20 = vld [vmem:[#allocation3 + $0x145] sm:$0xff]  ;;  %v11287_v19 = vld [vmem:[#allocation3 + $0x14d] sm:$0xff] }
 0x50f   : > { %v9412_v13 = vpop.f32.mrf.mxu0 }
 0x510   : > { %v9982_v33 = vpop.f32.mrf.mxu1  ;;  %v18602_v45 = vadd.f32 %v15103_v4, %v9526_v0  ;;  %v9525_v36 = vadd.f32 %v9412_v13, %v18390_v32 }
 0x511   : > { %v15029_v59 = vpop.f32.mrf.mxu0  ;;  %15330 = vmatmul.mubr.msk.f32.gmra.mxu0 %vm934_vm3, %v11284_v58 }
 0x512   : > { %v15106_v11 = vpop.f32.mrf.mxu1  ;;  %v18606_v26 = vadd.f32 %v9982_v33, %v9525_v36  ;;  %v9528_v42 = vadd.f32 %v15029_v59, %v18395_v38  ;;  %15332 = vmatprep.mubr.msk.f32.mxu0 %vm934_vm3, %v11285_v50  ;;  %v11288_v59 = vld [vmem:[#allocation3 + $0x155] sm:$0xff]  ;;  %v11289_v50 = vld [vmem:[#allocation3 + $0x15d] sm:$0xff] }
 0x513   : > { %v9422_v40 = vpop.f32.mrf.mxu0 }
 0x514   : > { %v9992_v35 = vpop.f32.mrf.mxu1  ;;  %v18610_v53 = vadd.f32 %v15106_v11, %v9528_v42  ;;  %v9527_v25 = vadd.f32 %v9422_v40, %v18400_v43 }
 0x515   : > { %v15032_v32 = vpop.f32.mrf.mxu0  ;;  %15333 = vmatmul.mubr.msk.f32.gmra.mxu0 %vm934_vm3, %v11286_v20 }
 0x516   : > { %v15109_v4 = vpop.f32.mrf.mxu1  ;;  %v18614_v0 = vadd.f32 %v9992_v35, %v9527_v25  ;;  %v9530_v13 = vadd.f32 %v15032_v32, %v18405_v30  ;;  %15335 = vmatprep.mubr.msk.f32.mxu0 %vm934_vm3, %v11287_v19  ;;  %v11290_v32 = vld [vmem:[#allocation3 + $0x165] sm:$0xff]  ;;  %v11291_v19 = vld [vmem:[#allocation3 + $0x16d] sm:$0xff] }
 0x517   : > { %v9432_v38 = vpop.f32.mrf.mxu0 }
 0x518   : > { %v10002_v33 = vpop.f32.mrf.mxu1  ;;  %v18618_v36 = vadd.f32 %v15109_v4, %v9530_v13  ;;  %v9529_v58 = vadd.f32 %v9432_v38, %v18410_v2 }
 0x519   : > { %v15035_v43 = vpop.f32.mrf.mxu0  ;;  %15336 = vmatmul.mubr.msk.f32.gmra.mxu0 %vm934_vm3, %v11288_v59 }
 0x51a   : > { %v15112_v11 = vpop.f32.mrf.mxu1  ;;  %v18622_v42 = vadd.f32 %v10002_v33, %v9529_v58  ;;  %v9532_v40 = vadd.f32 %v15035_v43, %v18415_v62  ;;  %15338 = vmatprep.mubr.msk.f32.mxu0 %vm934_vm3, %v11289_v50  ;;  %v11292_v43 = vld [vmem:[#allocation3 + $0x175] sm:$0xff]  ;;  %v11293_v50 = vld [vmem:[#allocation3 + $0x17d] sm:$0xff] }
 0x51b   : > { %v9442_v30 = vpop.f32.mrf.mxu0 }
 0x51c   : > { %v10012_v35 = vpop.f32.mrf.mxu1  ;;  %v18626_v25 = vadd.f32 %v15112_v11, %v9532_v40  ;;  %v9531_v20 = vadd.f32 %v9442_v30, %v18420_v9  ;;  %v19425_v30 = vld [vmem:[#allocation8_spill] sm:$0xff] }
 0x51d   : > { %v15038_v2 = vpop.f32.mrf.mxu0  ;;  %15339 = vmatmul.mubr.msk.f32.gmra.mxu0 %vm934_vm3, %v11290_v32 }
 0x51e   : > { %v15115_v4 = vpop.f32.mrf.mxu1  ;;  %v18630_v13 = vadd.f32 %v10012_v35, %v9531_v20  ;;  %v9534_v38 = vadd.f32 %v15038_v2, %v18425_v34  ;;  %15341 = vmatprep.mubr.msk.f32.mxu0 %vm934_vm3, %v11291_v19  ;;  %v19427_v2 = vld [vmem:[#allocation64_spill] sm:$0xff] }
 0x51f   : > { %v9452_v62 = vpop.f32.mrf.mxu0  ;;  %v11294_v19 = vld [vmem:[#allocation3 + $0x185] sm:$0xff] }
 0x520   : > { %v10022_v33 = vpop.f32.mrf.mxu1  ;;  %v18634_v58 = vadd.f32 %v15115_v4, %v9534_v38  ;;  %v9533_v59 = vadd.f32 %v9452_v62, %v18430_v51  ;;  %v11295_v62 = vld [vmem:[#allocation3 + $0x18d] sm:$0xff] }
 0x521   : > { %v15041_v9 = vpop.f32.mrf.mxu0  ;;  %15342 = vmatmul.mubr.msk.f32.gmra.mxu0 %vm934_vm3, %v11292_v43 }
 0x522   : > { %v15118_v11 = vpop.f32.mrf.mxu1  ;;  %v18638_v40 = vadd.f32 %v10022_v33, %v9533_v59  ;;  %v9536_v35 = vadd.f32 %v15041_v9, %v19425_v30  ;;  %15344 = vmatprep.mubr.msk.f32.mxu0 %vm934_vm3, %v11293_v50  ;;  %v19428_v33 = vld [vmem:[#allocation9_spill] sm:$0xff] }
 0x523   : > { %v9462_v34 = vpop.f32.mrf.mxu0 }
 0x524   : > { %v10032_v20 = vpop.f32.mrf.mxu1  ;;  %v18642_v32 = vadd.f32 %v15118_v11, %v9536_v35  ;;  %v9535_v4 = vadd.f32 %v9462_v34, %v19427_v2  ;;  %v11296_v35 = vld [vmem:[#allocation3 + $0x195] sm:$0xff] }
 0x525   : > { %v15044_v51 = vpop.f32.mrf.mxu0  ;;  %15345 = vmatmul.mubr.msk.f32.gmra.mxu0 %vm934_vm3, %v11294_v19 }
 0x526   : > { %19426 = vst [vmem:[#allocation10_spill] sm:$0xff] %v18642_v32  ;;  %v15121_v38 = vpop.f32.mrf.mxu1  ;;  %v18646_v43 = vadd.f32 %v10032_v20, %v9535_v4  ;;  %v9538_v59 = vadd.f32 %v15044_v51, %v19428_v33  ;;  %15347 = vmatprep.mubr.msk.f32.mxu0 %vm934_vm3, %v11295_v62  ;;  %v11297_v32 = vld [vmem:[#allocation3 + $0x19d] sm:$0xff]  ;;  %v11299_v62 = vld [vmem:[#allocation3 + $0x1ad] sm:$0xff] }
 0x527   : > { %v9472_v9 = vpop.f32.mrf.mxu0 }
 0x528   : > { %v10042_v50 = vpop.f32.mrf.mxu1  ;;  %v18650_v30 = vadd.f32 %v15121_v38, %v9538_v59  ;;  %v9537_v11 = vadd.f32 %v9472_v9, %v18450_v31  ;;  %v11298_v31 = vld [vmem:[#allocation3 + $0x1a5] sm:$0xff] }
 0x529   : > { %v15047_v34 = vpop.f32.mrf.mxu0  ;;  %15348 = vmatmul.mubr.msk.f32.gmra.mxu0 %vm934_vm3, %v11296_v35 }
 0x52a   : > { %v15124_v2 = vpop.f32.mrf.mxu1  ;;  %v18654_v19 = vadd.f32 %v10042_v50, %v9537_v11  ;;  %v9540_v20 = vadd.f32 %v15047_v34, %v18455_v44  ;;  %15350 = vmatprep.mubr.msk.f32.mxu0 %vm934_vm3, %v11297_v32  ;;  %v11300_v44 = vld [vmem:[#allocation3 + $0x1b5] sm:$0xff] }
 0x52b   : > { %v9482_v4 = vpop.f32.mrf.mxu0 }
 0x52c   : > { %v10052_v51 = vpop.f32.mrf.mxu1  ;;  %v18658_v33 = vadd.f32 %v15124_v2, %v9540_v20  ;;  %v9539_v38 = vadd.f32 %v9482_v4, %v18460_v54 }
 0x52d   : > { %v15129_v59 = vpop.f32.mrf.mxu0  ;;  %15351 = vmatmul.mubr.msk.f32.gmra.mxu0 %vm934_vm3, %v11298_v31 }
 0x52e   : > { %v18661_v9 = vpop.f32.mrf.mxu1  ;;  %v18664_v35 = vadd.f32 %v10052_v51, %v9539_v38  ;;  %v18667_v50 = vadd.f32 %v15129_v59, %v18465_v48  ;;  %15353 = vmatprep.mubr.msk.f32.mxu0 %vm934_vm3, %v11299_v62 }
 0x52f   : > { %v10382_v32 = vpop.f32.mrf.mxu0 }
 0x530   : > { %v18671_v11 = vadd.f32 %v10382_v32, %v18470_v21  ;;  %v18673_v34 = vpop.f32.mrf.mxu1 }
 0x531   : > { %v15132_v54 = vpop.f32.mrf.mxu0  ;;  %15354 = vmatmul.mubr.msk.f32.gmra.mxu0 %vm934_vm3, %v11300_v44 }
 0x532   : > { %v18677_v2 = vadd.f32 %v15132_v54, %v18474_v16  ;;  %v18682_v48 = vpop.f32.mrf.mxu1 }
 0x533   : > { %v10392_v20 = vpop.f32.mrf.mxu0 }
 0x534   : > { %v18680_v4 = vadd.f32 %v10392_v20, %v18478_v10  ;;  %v18690_v31 = vpop.f32.mrf.mxu1 }
 0x535   : > { %v15135_v51 = vpop.f32.mrf.mxu0 }
 0x536   : > { %v18685_v62 = vadd.f32 %v15135_v51, %v18482_v6  ;;  %v18698_v32 = vpop.f32.mrf.mxu1 }
 0x537   : > { %v10402_v21 = vpop.f32.mrf.mxu0 }
 0x538   : > { %v18688_v38 = vadd.f32 %v10402_v21, %v18486_v41  ;;  %v18706_v51 = vpop.f32.mrf.mxu1 }
 0x539   : > { %v15138_v59 = vpop.f32.mrf.mxu0 }
 0x53a   : > { %v18693_v16 = vadd.f32 %v15138_v59, %v18490_v18 }
 0x53b   : > { %v10412_v44 = vpop.f32.mrf.mxu0 }
 0x53c   : > { %v18696_v10 = vadd.f32 %v10412_v44, %v18494_v61  ;;  %v18714_v44 = vpop.f32.mrf.mxu1 }
 0x53d   : > { %v15141_v54 = vpop.f32.mrf.mxu0 }
 0x53e   : > { %19429 = vst [vmem:[#allocation65_spill] sm:$0xff] %v18696_v10  ;;  %v18701_v6 = vadd.f32 %v15141_v54, %v18498_v17 }
 0x53f   : > { %v10422_v20 = vpop.f32.mrf.mxu0 }
 0x540   : > { %v18704_v41 = vadd.f32 %v10422_v20, %v18502_v8  ;;  %v18722_v20 = vpop.f32.mrf.mxu1 }
 0x541   : > { %v15144_v21 = vpop.f32.mrf.mxu0 }
 0x542   : > { %19430 = vst [vmem:[#allocation11_spill] sm:$0xff] %v18704_v41  ;;  %v18709_v18 = vadd.f32 %v15144_v21, %v18506_v15 }
 0x543   : > { %v10432_v59 = vpop.f32.mrf.mxu0 }
 0x544   : > { %v18712_v61 = vadd.f32 %v10432_v59, %v18510_v27  ;;  %v18730_v59 = vpop.f32.mrf.mxu1 }
 0x545   : > { %v15147_v10 = vpop.f32.mrf.mxu0 }
 0x546   : > { %19431 = vst [vmem:[#allocation12_spill] sm:$0xff] %v18712_v61  ;;  %v18717_v17 = vadd.f32 %v15147_v10, %v18514_v5 }
 0x547   : > { %v10442_v54 = vpop.f32.mrf.mxu0 }
 0x548   : > { %v18720_v8 = vadd.f32 %v10442_v54, %v18518_v57  ;;  %v18738_v54 = vpop.f32.mrf.mxu1 }
 0x549   : > { %v15150_v41 = vpop.f32.mrf.mxu0 }
 0x54a   : > { %19432 = vst [vmem:[#allocation66_spill] sm:$0xff] %v18720_v8  ;;  %v18725_v15 = vadd.f32 %v15150_v41, %v18522_v46 }
 0x54b   : > { %v10452_v21 = vpop.f32.mrf.mxu0 }
 0x54c   : > { %v18728_v27 = vadd.f32 %v10452_v21, %v18526_v29  ;;  %v18746_v21 = vpop.f32.mrf.mxu1 }
 0x54d   : > { %v15153_v61 = vpop.f32.mrf.mxu0 }
 0x54e   : > { %19433 = vst [vmem:[#allocation13_spill] sm:$0xff] %v18728_v27  ;;  %v18733_v5 = vadd.f32 %v15153_v61, %v18530_v56 }
 0x54f   : > { %v10462_v10 = vpop.f32.mrf.mxu0 }
 0x550   : > { %v18736_v57 = vadd.f32 %v10462_v10, %v18534_v63  ;;  %v18754_v10 = vpop.f32.mrf.mxu1 }
 0x551   : > { %v15156_v8 = vpop.f32.mrf.mxu0 }
 0x552   : > { %19434 = vst [vmem:[#allocation102_spill] sm:$0xff] %v18736_v57  ;;  %v18741_v46 = vadd.f32 %v15156_v8, %v18538_v24 }
 0x553   : > { %v10472_v41 = vpop.f32.mrf.mxu0 }
 0x554   : > { %v18744_v29 = vadd.f32 %v10472_v41, %v18542_v12  ;;  %v18762_v41 = vpop.f32.mrf.mxu1 }
 0x555   : > { %v15159_v27 = vpop.f32.mrf.mxu0 }
 0x556   : > { %19435 = vst [vmem:[#allocation14_spill] sm:$0xff] %v18744_v29  ;;  %v18749_v56 = vadd.f32 %v15159_v27, %v18546_v49 }
 0x557   : > { %v10482_v61 = vpop.f32.mrf.mxu0 }
 0x558   : > { %v18752_v63 = vadd.f32 %v10482_v61, %v18550_v1  ;;  %v18770_v61 = vpop.f32.mrf.mxu1 }
 0x559   : > { %v15162_v57 = vpop.f32.mrf.mxu0 }
 0x55a   : > { %19436 = vst [vmem:[#allocation67_spill] sm:$0xff] %v18752_v63  ;;  %v18757_v24 = vadd.f32 %v15162_v57, %v18554_v28 }
 0x55b   : > { %v10492_v8 = vpop.f32.mrf.mxu0 }
 0x55c   : > { %v18760_v12 = vadd.f32 %v10492_v8, %v18558_v3  ;;  %v18778_v8 = vpop.f32.mrf.mxu1 }
 0x55d   : > { %v15165_v29 = vpop.f32.mrf.mxu0 }
 0x55e   : > { %19437 = vst [vmem:[#allocation68_spill] sm:$0xff] %v18760_v12  ;;  %v18765_v49 = vadd.f32 %v15165_v29, %v18562_v60 }
 0x55f   : > { %v10502_v27 = vpop.f32.mrf.mxu0 }
 0x560   : > { %v18768_v1 = vadd.f32 %v10502_v27, %v18566_v52  ;;  %v18786_v27 = vpop.f32.mrf.mxu1 }
 0x561   : > { %v15168_v63 = vpop.f32.mrf.mxu0 }
 0x562   : > { %19438 = vst [vmem:[#allocation101_spill] sm:$0xff] %v18768_v1  ;;  %v18773_v28 = vadd.f32 %v15168_v63, %v18570_v39 }
 0x563   : > { %v10512_v57 = vpop.f32.mrf.mxu0 }
 0x564   : > { %v18776_v3 = vadd.f32 %v10512_v57, %v18574_v23  ;;  %v18794_v57 = vpop.f32.mrf.mxu1 }
 0x565   : > { %v15171_v12 = vpop.f32.mrf.mxu0 }
 0x566   : > { %19439 = vst [vmem:[#allocation15_spill] sm:$0xff] %v18776_v3  ;;  %v18781_v60 = vadd.f32 %v15171_v12, %v18578_v7 }
 0x567   : > { %v10522_v29 = vpop.f32.mrf.mxu0 }
 0x568   : > { %v18784_v52 = vadd.f32 %v10522_v29, %v18582_v47  ;;  %v18802_v29 = vpop.f32.mrf.mxu1 }
 0x569   : > { %v15174_v1 = vpop.f32.mrf.mxu0 }
 0x56a   : > { %19440 = vst [vmem:[#allocation104_spill] sm:$0xff] %v18784_v52  ;;  %v18789_v39 = vadd.f32 %v15174_v1, %v18586_v37 }
 0x56b   : > { %v10532_v63 = vpop.f32.mrf.mxu0 }
 0x56c   : > { %v18792_v23 = vadd.f32 %v10532_v63, %v18590_v55  ;;  %v18810_v63 = vpop.f32.mrf.mxu1 }
 0x56d   : > { %v15177_v3 = vpop.f32.mrf.mxu0 }
 0x56e   : > { %19441 = vst [vmem:[#allocation16_spill] sm:$0xff] %v18792_v23  ;;  %v18797_v7 = vadd.f32 %v15177_v3, %v18594_v22 }
 0x56f   : > { %v10542_v12 = vpop.f32.mrf.mxu0 }
 0x570   : > { %v18800_v47 = vadd.f32 %v10542_v12, %v18598_v14  ;;  %v18818_v12 = vpop.f32.mrf.mxu1 }
 0x571   : > { %v15180_v52 = vpop.f32.mrf.mxu0 }
 0x572   : > { %19442 = vst [vmem:[#allocation69_spill] sm:$0xff] %v18800_v47  ;;  %v18805_v37 = vadd.f32 %v15180_v52, %v18602_v45 }
 0x573   : > { %v10552_v1 = vpop.f32.mrf.mxu0 }
 0x574   : > { %v18808_v55 = vadd.f32 %v10552_v1, %v18606_v26  ;;  %v18826_v1 = vpop.f32.mrf.mxu1 }
 0x575   : > { %v15183_v23 = vpop.f32.mrf.mxu0 }
 0x576   : > { %19443 = vst [vmem:[#allocation70_spill] sm:$0xff] %v18808_v55  ;;  %v18813_v22 = vadd.f32 %v15183_v23, %v18610_v53 }
 0x577   : > { %v10562_v3 = vpop.f32.mrf.mxu0 }
 0x578   : > { %v18816_v14 = vadd.f32 %v10562_v3, %v18614_v0  ;;  %v18834_v3 = vpop.f32.mrf.mxu1 }
 0x579   : > { %v15186_v47 = vpop.f32.mrf.mxu0 }
 0x57a   : > { %19444 = vst [vmem:[#allocation103_spill] sm:$0xff] %v18816_v14  ;;  %v18821_v45 = vadd.f32 %v15186_v47, %v18618_v36 }
 0x57b   : > { %v10572_v52 = vpop.f32.mrf.mxu0 }
 0x57c   : > { %v18824_v26 = vadd.f32 %v10572_v52, %v18622_v42  ;;  %v18842_v52 = vpop.f32.mrf.mxu1 }
 0x57d   : > { %v15189_v55 = vpop.f32.mrf.mxu0 }
 0x57e   : > { %19445 = vst [vmem:[#allocation17_spill] sm:$0xff] %v18824_v26  ;;  %v18829_v53 = vadd.f32 %v15189_v55, %v18626_v25  ;;  %v19449_v25 = vld [vmem:[#allocation10_spill] sm:$0xff] }
 0x57f   : > { %v10582_v23 = vpop.f32.mrf.mxu0 }
 0x580   : > { %19446 = vst [vmem:[#allocation106_spill] sm:$0xff] %v18829_v53  ;;  %v18832_v0 = vadd.f32 %v10582_v23, %v18630_v13  ;;  %v18850_v23 = vpop.f32.mrf.mxu1 }
 0x581   : > { %v15192_v14 = vpop.f32.mrf.mxu0 }
 0x582   : > { %19447 = vst [vmem:[#allocation18_spill] sm:$0xff] %v18832_v0  ;;  %v18837_v36 = vadd.f32 %v15192_v14, %v18634_v58 }
 0x583   : > { %v10592_v47 = vpop.f32.mrf.mxu0 }
 0x584   : > { %v18840_v42 = vadd.f32 %v10592_v47, %v18638_v40  ;;  %v18858_v47 = vpop.f32.mrf.mxu1 }
 0x585   : > { %v15195_v26 = vpop.f32.mrf.mxu0 }
 0x586   : > { %19448 = vst [vmem:[#allocation71_spill] sm:$0xff] %v18840_v42  ;;  %v18845_v55 = vadd.f32 %v15195_v26, %v19449_v25 }
 0x587   : > { %v10602_v53 = vpop.f32.mrf.mxu0 }
 0x588   : > { %v18848_v13 = vadd.f32 %v10602_v53, %v18646_v43  ;;  %v11202_v43 = vadd.f32 %v18661_v9, %v18667_v50 }
 0x589   : > { %v15198_v0 = vpop.f32.mrf.mxu0 }
 0x58a   : > { %v18853_v58 = vadd.f32 %v15198_v0, %v18650_v30  ;;  %v18875_v30 = vpop.f32.mrf.mxu1 }
 0x58b   : > { %v10612_v14 = vpop.f32.mrf.mxu0 }
 0x58c   : > { %v18856_v40 = vadd.f32 %v10612_v14, %v18654_v19 }
 0x58d   : > { %v15201_v42 = vpop.f32.mrf.mxu0 }
 0x58e   : > { %v18861_v26 = vadd.f32 %v15201_v42, %v18658_v33  ;;  %v11201_v33 = vadd.f32 %v18673_v34, %v18671_v11  ;;  %v18883_v42 = vpop.f32.mrf.mxu1  ;;  %v11206_v34 = vadd.f32 %v18698_v32, %v18685_v62 }
 0x58f   : > { %v10622_v25 = vpop.f32.mrf.mxu0 }
 0x590   : > { %v18866_v53 = vadd.f32 %v10622_v25, %v18664_v35  ;;  %v11204_v35 = vadd.f32 %v18682_v48, %v18677_v2  ;;  %v11203_v25 = vadd.f32 %v18690_v31, %v18680_v4  ;;  %v18893_v48 = vpop.f32.mrf.mxu1 }
 0x591   : > { %v15283_v19 = vpop.f32.mrf.mxu0 }
 0x592   : > { %19450 = vst [vmem:[#allocation72_spill] sm:$0xff] %v18866_v53  ;;  %v11772_v9 = vadd.f32 %v15283_v19, %v11202_v43  ;;  %v11205_v19 = vadd.f32 %v18706_v51, %v18688_v38  ;;  %v18903_v32 = vpop.f32.mrf.mxu1 }
 0x593   : > { %v11522_v50 = vpop.f32.mrf.mxu0 }
 0x594   : > { %11823 = vst.msk [vmem:[%s18873_s12 + $0x8] sm:$0xff] %vm11821_vm5, %v11772_v9  ;;  %v11771_v0 = vadd.f32 %v11522_v50, %v11201_v33  ;;  %v11208_v33 = vadd.f32 %v18714_v44, %v18693_v16  ;;  %v19451_v9 = vld [vmem:[#allocation65_spill] sm:$0xff]  ;;  %v18913_v44 = vpop.f32.mrf.mxu1 }
 0x595   : > { %v15286_v14 = vpop.f32.mrf.mxu0  ;;  %v11207_v50 = vadd.f32 %v18722_v20, %v19451_v9 }
 0x596   : > { %11822 = vst.msk [vmem:[%s18873_s12] sm:$0xff] %vm11821_vm5, %v11771_v0  ;;  %v11774_v53 = vadd.f32 %v15286_v14, %v11204_v35  ;;  %v11210_v35 = vadd.f32 %v18730_v59, %v18701_v6  ;;  %v19452_v14 = vld [vmem:[#allocation11_spill] sm:$0xff]  ;;  %v18923_v59 = vpop.f32.mrf.mxu1 }
 0x597   : > { %v11532_v11 = vpop.f32.mrf.mxu0 }
 0x598   : > { %11825 = vst.msk [vmem:[%s18873_s12 + $0x18] sm:$0xff] %vm11821_vm5, %v11774_v53  ;;  %v11773_v2 = vadd.f32 %v11532_v11, %v11203_v25  ;;  %v11209_v25 = vadd.f32 %v18738_v54, %v19452_v14 }
 0x599   : > { %v15289_v43 = vpop.f32.mrf.mxu0 }
 0x59a   : > { %11824 = vst.msk [vmem:[%s18873_s12 + $0x10] sm:$0xff] %vm11821_vm5, %v11773_v2  ;;  %v11776_v4 = vadd.f32 %v15289_v43, %v11206_v34  ;;  %v11212_v34 = vadd.f32 %v18746_v21, %v18709_v18  ;;  %v19453_v43 = vld [vmem:[#allocation12_spill] sm:$0xff]  ;;  %v18933_v21 = vpop.f32.mrf.mxu1 }
 0x59b   : > { %v11542_v31 = vpop.f32.mrf.mxu0 }
 0x59c   : > { %11827 = vst.msk [vmem:[%s18873_s12 + $0x28] sm:$0xff] %vm11821_vm5, %v11776_v4  ;;  %v11775_v62 = vadd.f32 %v11542_v31, %v11205_v19  ;;  %v11211_v19 = vadd.f32 %v18754_v10, %v19453_v43  ;;  %v11214_v31 = vadd.f32 %v18762_v41, %v18717_v17  ;;  %v18943_v41 = vpop.f32.mrf.mxu1 }
 0x59d   : > { %v15292_v53 = vpop.f32.mrf.mxu0 }
 0x59e   : > { %11826 = vst.msk [vmem:[%s18873_s12 + $0x20] sm:$0xff] %vm11821_vm5, %v11775_v62  ;;  %v11778_v38 = vadd.f32 %v15292_v53, %v11208_v33  ;;  %v19454_v62 = vld [vmem:[#allocation66_spill] sm:$0xff] }
 0x59f   : > { %v11552_v51 = vpop.f32.mrf.mxu0  ;;  %v11213_v53 = vadd.f32 %v18770_v61, %v19454_v62  ;;  %v11224_v62 = vadd.f32 %v18842_v52, %v18757_v24 }
 0x5a0   : > { %11829 = vst.msk [vmem:[%s18873_s12 + $0x38] sm:$0xff] %vm11821_vm5, %v11778_v38  ;;  %v11777_v16 = vadd.f32 %v11552_v51, %v11207_v50  ;;  %v11216_v50 = vadd.f32 %v18778_v8, %v18725_v15  ;;  %v19455_v51 = vld [vmem:[#allocation13_spill] sm:$0xff]  ;;  %v18953_v8 = vpop.f32.mrf.mxu1 }
 0x5a1   : > { %v15295_v0 = vpop.f32.mrf.mxu0 }
 0x5a2   : > { %11828 = vst.msk [vmem:[%s18873_s12 + $0x30] sm:$0xff] %vm11821_vm5, %v11777_v16  ;;  %v11780_v20 = vadd.f32 %v15295_v0, %v11210_v35  ;;  %v11215_v35 = vadd.f32 %v18786_v27, %v19455_v51  ;;  %v11218_v0 = vadd.f32 %v18794_v57, %v18733_v5  ;;  %v18963_v57 = vpop.f32.mrf.mxu1  ;;  %v19460_v51 = vld [vmem:[#allocation101_spill] sm:$0xff] }
 0x5a3   : > { %v11562_v11 = vpop.f32.mrf.mxu0 }
 0x5a4   : > { %11831 = vst.msk [vmem:[%s18873_s12 + $0x48] sm:$0xff] %vm11821_vm5, %v11780_v20  ;;  %v11779_v6 = vadd.f32 %v11562_v11, %v11209_v25  ;;  %v19456_v25 = vld [vmem:[#allocation102_spill] sm:$0xff] }
 0x5a5   : > { %v15298_v2 = vpop.f32.mrf.mxu0  ;;  %v11217_v20 = vadd.f32 %v18802_v29, %v19456_v25 }
 0x5a6   : > { %11830 = vst.msk [vmem:[%s18873_s12 + $0x40] sm:$0xff] %vm11821_vm5, %v11779_v6  ;;  %v11782_v54 = vadd.f32 %v15298_v2, %v11212_v34  ;;  %v11220_v34 = vadd.f32 %v18810_v63, %v18741_v46  ;;  %v19457_v2 = vld [vmem:[#allocation14_spill] sm:$0xff]  ;;  %v18973_v63 = vpop.f32.mrf.mxu1 }
 0x5a7   : > { %v11572_v4 = vpop.f32.mrf.mxu0  ;;  %v11219_v43 = vadd.f32 %v18818_v12, %v19457_v2 }
 0x5a8   : > { %11833 = vst.msk [vmem:[%s18873_s12 + $0x58] sm:$0xff] %vm11821_vm5, %v11782_v54  ;;  %v11781_v18 = vadd.f32 %v11572_v4, %v11211_v19  ;;  %v11222_v54 = vadd.f32 %v18826_v1, %v18749_v56  ;;  %v15260_v1 = vpop.f32.mrf.mxu1 }
 0x5a9   : > { %v15301_v33 = vpop.f32.mrf.mxu0 }
 0x5aa   : > { %11832 = vst.msk [vmem:[%s18873_s12 + $0x50] sm:$0xff] %vm11821_vm5, %v11781_v18  ;;  %v11784_v10 = vadd.f32 %v15301_v33, %v11214_v31  ;;  %v19458_v31 = vld [vmem:[#allocation67_spill] sm:$0xff]  ;;  %v11132_v52 = vpop.f32.mrf.mxu1 }
 0x5ab   : > { %v11582_v9 = vpop.f32.mrf.mxu0  ;;  %v11221_v18 = vadd.f32 %v18834_v3, %v19458_v31 }
 0x5ac   : > { %11835 = vst.msk [vmem:[%s18873_s12 + $0x68] sm:$0xff] %vm11821_vm5, %v11784_v10  ;;  %v11783_v17 = vadd.f32 %v11582_v9, %v11213_v53  ;;  %v19459_v10 = vld [vmem:[#allocation68_spill] sm:$0xff] }
 0x5ad   : > { %v15304_v38 = vpop.f32.mrf.mxu0  ;;  %v11223_v9 = vadd.f32 %v18850_v23, %v19459_v10  ;;  %v11238_v10 = vadd.f32 %v15260_v1, %v18813_v22  ;;  %v19467_v1 = vld [vmem:[#allocation17_spill] sm:$0xff] }
 0x5ae   : > { %11834 = vst.msk [vmem:[%s18873_s12 + $0x60] sm:$0xff] %vm11821_vm5, %v11783_v17  ;;  %v11786_v61 = vadd.f32 %v15304_v38, %v11216_v50  ;;  %v11226_v17 = vadd.f32 %v18858_v47, %v18765_v49  ;;  %v15263_v47 = vpop.f32.mrf.mxu1 }
 0x5af   : > { %v11592_v16 = vpop.f32.mrf.mxu0 }
 0x5b0   : > { %11837 = vst.msk [vmem:[%s18873_s12 + $0x78] sm:$0xff] %vm11821_vm5, %v11786_v61  ;;  %v11785_v15 = vadd.f32 %v11592_v16, %v11215_v35  ;;  %v11225_v35 = vadd.f32 %v18875_v30, %v19460_v51  ;;  %v11228_v16 = vadd.f32 %v18883_v42, %v18773_v28  ;;  %v11142_v42 = vpop.f32.mrf.mxu1 }
 0x5b1   : > { %v15307_v14 = vpop.f32.mrf.mxu0 }
 0x5b2   : > { %11836 = vst.msk [vmem:[%s18873_s12 + $0x70] sm:$0xff] %vm11821_vm5, %v11785_v15  ;;  %v11788_v27 = vadd.f32 %v15307_v14, %v11218_v0  ;;  %v19461_v15 = vld [vmem:[#allocation15_spill] sm:$0xff] }
 0x5b3   : > { %v11602_v11 = vpop.f32.mrf.mxu0  ;;  %v11227_v14 = vadd.f32 %v18893_v48, %v19461_v15 }
 0x5b4   : > { %11839 = vst.msk [vmem:[%s18873_s12 + $0x88] sm:$0xff] %vm11821_vm5, %v11788_v27  ;;  %v11787_v5 = vadd.f32 %v11602_v11, %v11217_v20  ;;  %v11230_v20 = vadd.f32 %v18903_v32, %v18781_v60  ;;  %v19462_v11 = vld [vmem:[#allocation104_spill] sm:$0xff]  ;;  %v15266_v32 = vpop.f32.mrf.mxu1 }
 0x5b5   : > { %v15310_v6 = vpop.f32.mrf.mxu0 }
 0x5b6   : > { %11838 = vst.msk [vmem:[%s18873_s12 + $0x80] sm:$0xff] %vm11821_vm5, %v11787_v5  ;;  %v11790_v29 = vadd.f32 %v15310_v6, %v11220_v34  ;;  %v11229_v34 = vadd.f32 %v18913_v44, %v19462_v11  ;;  %v11232_v6 = vadd.f32 %v18923_v59, %v18789_v39  ;;  %v11152_v59 = vpop.f32.mrf.mxu1 }
 0x5b7   : > { %v11612_v19 = vpop.f32.mrf.mxu0 }
 0x5b8   : > { %11841 = vst.msk [vmem:[%s18873_s12 + $0x98] sm:$0xff] %vm11821_vm5, %v11790_v29  ;;  %v11789_v46 = vadd.f32 %v11612_v19, %v11219_v43  ;;  %v19463_v43 = vld [vmem:[#allocation16_spill] sm:$0xff] }
 0x5b9   : > { %v15313_v4 = vpop.f32.mrf.mxu0  ;;  %v11231_v29 = vadd.f32 %v18933_v21, %v19463_v43 }
 0x5ba   : > { %11840 = vst.msk [vmem:[%s18873_s12 + $0x90] sm:$0xff] %vm11821_vm5, %v11789_v46  ;;  %v11792_v12 = vadd.f32 %v15313_v4, %v11222_v54  ;;  %v11234_v54 = vadd.f32 %v18943_v41, %v18797_v7  ;;  %v19464_v4 = vld [vmem:[#allocation69_spill] sm:$0xff]  ;;  %v15269_v41 = vpop.f32.mrf.mxu1 }
 0x5bb   : > { %v11622_v33 = vpop.f32.mrf.mxu0  ;;  %v11233_v31 = vadd.f32 %v18953_v8, %v19464_v4 }
 0x5bc   : > { %11843 = vst.msk [vmem:[%s18873_s12 + $0xa8] sm:$0xff] %vm11821_vm5, %v11792_v12  ;;  %v11791_v56 = vadd.f32 %v11622_v33, %v11221_v18  ;;  %v11236_v12 = vadd.f32 %v18963_v57, %v18805_v37  ;;  %v11162_v37 = vpop.f32.mrf.mxu1 }
 0x5bd   : > { %v15316_v53 = vpop.f32.mrf.mxu0 }
 0x5be   : > { %11842 = vst.msk [vmem:[%s18873_s12 + $0xa0] sm:$0xff] %vm11821_vm5, %v11791_v56  ;;  %v11794_v3 = vadd.f32 %v15316_v53, %v11224_v62  ;;  %v19465_v62 = vld [vmem:[#allocation70_spill] sm:$0xff]  ;;  %v15272_v51 = vpop.f32.mrf.mxu1 }
 0x5bf   : > { %v11632_v50 = vpop.f32.mrf.mxu0  ;;  %v11235_v56 = vadd.f32 %v18973_v63, %v19465_v62  ;;  %v11240_v63 = vadd.f32 %v15263_v47, %v18821_v45  ;;  %v19469_v47 = vld [vmem:[#allocation18_spill] sm:$0xff] }
 0x5c0   : > { %11845 = vst.msk [vmem:[%s18873_s12 + $0xb8] sm:$0xff] %vm11821_vm5, %v11794_v3  ;;  %v11793_v24 = vadd.f32 %v11632_v50, %v11223_v9  ;;  %v19466_v3 = vld [vmem:[#allocation103_spill] sm:$0xff]  ;;  %v11241_v15 = vadd.f32 %v11152_v59, %v19469_v47 }
 0x5c1   : > { %v15319_v38 = vpop.f32.mrf.mxu0  ;;  %v11237_v50 = vadd.f32 %v11132_v52, %v19466_v3  ;;  %v19468_v52 = vld [vmem:[#allocation106_spill] sm:$0xff] }
 0x5c2   : > { %11844 = vst.msk [vmem:[%s18873_s12 + $0xb0] sm:$0xff] %vm11821_vm5, %v11793_v24  ;;  %v11796_v23 = vadd.f32 %v15319_v38, %v11226_v17 }
 0x5c3   : > { %v11642_v61 = vpop.f32.mrf.mxu0 }
 0x5c4   : > { %11847 = vst.msk [vmem:[%s18873_s12 + $0xc8] sm:$0xff] %vm11821_vm5, %v11796_v23  ;;  %v11795_v49 = vadd.f32 %v11642_v61, %v11225_v35  ;;  %v11239_v35 = vadd.f32 %v11142_v42, %v19467_v1 }
 0x5c5   : > { %v15322_v0 = vpop.f32.mrf.mxu0 }
 0x5c6   : > { %11846 = vst.msk [vmem:[%s18873_s12 + $0xc0] sm:$0xff] %vm11821_vm5, %v11795_v49  ;;  %v11798_v30 = vadd.f32 %v15322_v0, %v11228_v16  ;;  %v11242_v16 = vadd.f32 %v15266_v32, %v19468_v52  ;;  %v11172_v0 = vpop.f32.mrf.mxu1 }
 0x5c7   : > { %v11652_v25 = vpop.f32.mrf.mxu0  ;;  %v11245_v32 = vadd.f32 %v11172_v0, %v18848_v13 }
 0x5c8   : > { %11849 = vst.msk [vmem:[%s18873_s12 + $0xd8] sm:$0xff] %vm11821_vm5, %v11798_v30  ;;  %v11797_v28 = vadd.f32 %v11652_v25, %v11227_v14  ;;  %v11244_v25 = vadd.f32 %v15269_v41, %v18837_v36 }
 0x5c9   : > { %v15325_v27 = vpop.f32.mrf.mxu0 }
 0x5ca   : > { %11848 = vst.msk [vmem:[%s18873_s12 + $0xd0] sm:$0xff] %vm11821_vm5, %v11797_v28  ;;  %v11800_v48 = vadd.f32 %v15325_v27, %v11230_v20  ;;  %v15275_v28 = vpop.f32.mrf.mxu1  ;;  %v19470_v27 = vld [vmem:[#allocation71_spill] sm:$0xff] }
 0x5cb   : > { %v11662_v5 = vpop.f32.mrf.mxu0  ;;  %v11243_v11 = vadd.f32 %v11162_v37, %v19470_v27 }
 0x5cc   : > { %11851 = vst.msk [vmem:[%s18873_s12 + $0xe8] sm:$0xff] %vm11821_vm5, %v11800_v48  ;;  %v11799_v60 = vadd.f32 %v11662_v5, %v11229_v34  ;;  %v11246_v5 = vadd.f32 %v15272_v51, %v18845_v55 }
 0x5cd   : > { %v15328_v2 = vpop.f32.mrf.mxu0 }
 0x5ce   : > { %11850 = vst.msk [vmem:[%s18873_s12 + $0xe0] sm:$0xff] %vm11821_vm5, %v11799_v60  ;;  %v11802_v44 = vadd.f32 %v15328_v2, %v11232_v6  ;;  %v11182_v60 = vpop.f32.mrf.mxu1 }
 0x5cf   : > { %v11672_v19 = vpop.f32.mrf.mxu0 }
 0x5d0   : > { %11853 = vst.msk [vmem:[%s18873_s12 + $0xf8] sm:$0xff] %vm11821_vm5, %v11802_v44  ;;  %v11801_v39 = vadd.f32 %v11672_v19, %v11231_v29  ;;  %v15278_v43 = vpop.f32.mrf.mxu1  ;;  %v11248_v44 = vadd.f32 %v15275_v28, %v18853_v58  ;;  %v19471_v58 = vld [vmem:[#allocation72_spill] sm:$0xff] }
 0x5d1   : > { %v15331_v46 = vpop.f32.mrf.mxu0 }
 0x5d2   : > { %11852 = vst.msk [vmem:[%s18873_s12 + $0xf0] sm:$0xff] %vm11821_vm5, %v11801_v39  ;;  %v11804_v21 = vadd.f32 %v15331_v46, %v11234_v54  ;;  %v11247_v54 = vadd.f32 %v11182_v60, %v18856_v40  ;;  %v11192_v13 = vpop.f32.mrf.mxu1  ;;  %v11250_v46 = vadd.f32 %v15278_v43, %v18861_v26 }
 0x5d3   : > { %v11682_v18 = vpop.f32.mrf.mxu0 }
 0x5d4   : > { %11855 = vst.msk [vmem:[%s18873_s12 + $0x108] sm:$0xff] %vm11821_vm5, %v11804_v21  ;;  %v11803_v7 = vadd.f32 %v11682_v18, %v11233_v31  ;;  %v11249_v21 = vadd.f32 %v11192_v13, %v19471_v58 }
 0x5d5   : > { %v15334_v33 = vpop.f32.mrf.mxu0 }
 0x5d6   : > { %11854 = vst.msk [vmem:[%s18873_s12 + $0x100] sm:$0xff] %vm11821_vm5, %v11803_v7  ;;  %v11806_v8 = vadd.f32 %v15334_v33, %v11236_v12 }
 0x5d7   : > { %v11692_v53 = vpop.f32.mrf.mxu0 }
 0x5d8   : > { %11857 = vst.msk [vmem:[%s18873_s12 + $0x118] sm:$0xff] %vm11821_vm5, %v11806_v8  ;;  %v11805_v9 = vadd.f32 %v11692_v53, %v11235_v56 }
 0x5d9   : > { %v15337_v57 = vpop.f32.mrf.mxu0 }
 0x5da   : > { %11856 = vst.msk [vmem:[%s18873_s12 + $0x110] sm:$0xff] %vm11821_vm5, %v11805_v9  ;;  %v11808_v17 = vadd.f32 %v15337_v57, %v11238_v10 }
 0x5db   : > { %v11702_v24 = vpop.f32.mrf.mxu0 }
 0x5dc   : > { %11859 = vst.msk [vmem:[%s18873_s12 + $0x128] sm:$0xff] %vm11821_vm5, %v11808_v17  ;;  %v11807_v38 = vadd.f32 %v11702_v24, %v11237_v50 }
 0x5dd   : > { %v15340_v22 = vpop.f32.mrf.mxu0 }
 0x5de   : > { %11858 = vst.msk [vmem:[%s18873_s12 + $0x120] sm:$0xff] %vm11821_vm5, %v11807_v38  ;;  %v11810_v23 = vadd.f32 %v15340_v22, %v11240_v63 }
 0x5df   : > { %v11712_v61 = vpop.f32.mrf.mxu0 }
 0x5e0   : > { %11861 = vst.msk [vmem:[%s18873_s12 + $0x138] sm:$0xff] %vm11821_vm5, %v11810_v23  ;;  %v11809_v49 = vadd.f32 %v11712_v61, %v11239_v35 }
 0x5e1   : > { %v15343_v45 = vpop.f32.mrf.mxu0 }
 0x5e2   : > { %11860 = vst.msk [vmem:[%s18873_s12 + $0x130] sm:$0xff] %vm11821_vm5, %v11809_v49  ;;  %v11812_v14 = vadd.f32 %v15343_v45, %v11242_v16 }
 0x5e3   : > { %v11722_v30 = vpop.f32.mrf.mxu0 }
 0x5e4   : > { %11863 = vst.msk [vmem:[%s18873_s12 + $0x148] sm:$0xff] %vm11821_vm5, %v11812_v14  ;;  %v11811_v20 = vadd.f32 %v11722_v30, %v11241_v15 }
 0x5e5   : > { %v15346_v42 = vpop.f32.mrf.mxu0 }
 0x5e6   : > { %11862 = vst.msk [vmem:[%s18873_s12 + $0x140] sm:$0xff] %vm11821_vm5, %v11811_v20  ;;  %v11814_v34 = vadd.f32 %v15346_v42, %v11244_v25 }
 0x5e7   : > { %v11732_v48 = vpop.f32.mrf.mxu0 }
 0x5e8   : > { %11865 = vst.msk [vmem:[%s18873_s12 + $0x158] sm:$0xff] %vm11821_vm5, %v11814_v34  ;;  %v11813_v6 = vadd.f32 %v11732_v48, %v11243_v11 }
 0x5e9   : > { %v15349_v36 = vpop.f32.mrf.mxu0 }
 0x5ea   : > { %11864 = vst.msk [vmem:[%s18873_s12 + $0x150] sm:$0xff] %vm11821_vm5, %v11813_v6  ;;  %v11816_v2 = vadd.f32 %v15349_v36, %v11246_v5 }
 0x5eb   : > { %v11742_v29 = vpop.f32.mrf.mxu0 }
 0x5ec   : > { %11867 = vst.msk [vmem:[%s18873_s12 + $0x168] sm:$0xff] %vm11821_vm5, %v11816_v2  ;;  %v11815_v55 = vadd.f32 %v11742_v29, %v11245_v32 }
 0x5ed   : > { %v15352_v19 = vpop.f32.mrf.mxu0 }
 0x5ee   : > { %11866 = vst.msk [vmem:[%s18873_s12 + $0x160] sm:$0xff] %vm11821_vm5, %v11815_v55  ;;  %v11818_v39 = vadd.f32 %v15352_v19, %v11248_v44 }
 0x5ef   : > { %v11752_v59 = vpop.f32.mrf.mxu0 }
 0x5f0   : > { %11869 = vst.msk [vmem:[%s18873_s12 + $0x178] sm:$0xff] %vm11821_vm5, %v11818_v39  ;;  %v11817_v4 = vadd.f32 %v11752_v59, %v11247_v54 }
 0x5f1   : > { %v15355_v31 = vpop.f32.mrf.mxu0 }
 0x5f2   : > { %11868 = vst.msk [vmem:[%s18873_s12 + $0x170] sm:$0xff] %vm11821_vm5, %v11817_v4  ;;  %v11820_v18 = vadd.f32 %v15355_v31, %v11250_v46 }
 0x5f3   : > { %v11762_v12 = vpop.f32.mrf.mxu0 }
 0x5f4   : > { %11871 = vst.msk [vmem:[%s18873_s12 + $0x188] sm:$0xff] %vm11821_vm5, %v11820_v18  ;;  %v11819_v40 = vadd.f32 %v11762_v12, %v11249_v21 }
 0x5f6   : > { %11870 = vst.msk [vmem:[%s18873_s12 + $0x180] sm:$0xff] %vm11821_vm5, %v11819_v40 }
 0x5f7 PF: > { %s18_s27 = sadd.s32 1, %s15380_s27  }
 0x5f8   : > { %p15_p4 = scmp.ge.s32.totalorder %s18_s27, 4  }
 0x5fa   :  { %17 = sbr.rel (!%p15_p4) target bundleno = 1 (0x1), region = 98 }

</bundles_post_ra>
